<compile_context>
chip_gen: v5e
topology: v5e:2x2
jax: 0.10.0
libtpu: 0.0.40
codegen_flags: <defaults>
</compile_context>

<pallas_src>
import math

import jax
import jax.numpy as jnp
import numpy as np
from jax.experimental import pallas as pl
from jax.experimental.pallas import tpu as pltpu


_SPECS = (                       # (kind, Cin, Cout, K), forward order
    ("conv", 32, 64, 3),         # nn.Conv2d(32, 64, 3, padding=1) + ReLU
    ("convT", 64, 32, 4),        # nn.ConvTranspose2d(64, 32, 4) -> Up2x
    ("convT", 32, 16, 4),        # nn.ConvTranspose2d(32, 16, 4) -> Up2x
    ("convT", 16, 8, 4),         # nn.ConvTranspose2d(16,  8, 4) -> Up2x
    ("convT", 8, 3, 4),          # nn.ConvTranspose2d( 8,  3, 4) -> Up2x
    ("convT", 3, 3, 4),          # nn.ConvTranspose2d( 3,  3, 4) -> Up(size=(64,64))
)
_IN_HW = 2                       # latent spatial size used in this script
_OUT_HW = 64


# ---------------------------------------------------------------------------
# Host-side constant construction.
#
# In-kernel activation layout: X[ci*Hp + r, w] = padded_input[ci, r, w], width on
# the 128 lanes (Wp <= 128 for every layer at a 2x2 latent).  For each conv:
#   taps = vertical stack over kw of "X with columns shifted left by kw"
#   Y    = A @ taps + bias,   A[co*OH+oh, kw*Cin*Hp + ci*Hp + oh+kh] = Wc[co,ci,kh,kw]
# The next layer's zero padding + 2x nearest row-upsample (a 0/1 matrix Th) is folded
# into A_{l+1} host-side (A_{l+1} @ kron(I_K, Th_l)); the column strip / col-upsample /
# pad AND the per-kw column shift become one 0/1 matrix Tw_l of shape (128, 4*128)
# applied to Y, whose four 128-wide lane-aligned blocks are restacked as the next taps.
# ConvTranspose2d == full-pad correlation with spatially flipped, channel-transposed
# weights, so all six layers share the same machinery.
# ---------------------------------------------------------------------------
def _make_th(channels, rows_in, scale, pad, hp_next):
    """Row selection: input row (c*rows_in + r) feeds rows (c*hp_next + pad + scale*r + d)."""
    th = np.zeros((channels * hp_next, channels * rows_in), np.float32)
    ch, r = np.meshgrid(np.arange(channels), np.arange(rows_in), indexing="ij")
    for d in range(scale):
        th[(ch * hp_next + pad + scale * r + d).ravel(),
           (ch * rows_in + r).ravel()] = 1.0
    return th


def _make_tw_shifted(ow, scale, pad, n_shifts):
    """Column selection + per-kw left shift: block kw maps valid output column o to
    column pad + scale*o + d - kw (garbage columns o >= ow are dropped)."""
    tw = np.zeros((128, 128 * n_shifts), np.float32)
    o = np.arange(ow)
    for kw in range(n_shifts):
        for d in range(scale):
            tw[o, kw * 128 + pad + scale * o + d - kw] = 1.0
    return tw


def _expand_weight(wc, hp):
    """Scatter (Cout,Cin,K,K) correlation weights into the conv-as-one-matmul matrix."""
    cout, cin, k, _ = wc.shape
    oh_n = hp - k + 1
    a = np.zeros((cout * oh_n, k * cin * hp), np.float32)
    co, oh, ci, kh, kw = np.meshgrid(np.arange(cout), np.arange(oh_n), np.arange(cin),
                                     np.arange(k), np.arange(k), indexing="ij")
    rows = (co * oh_n + oh).ravel()
    cols = (kw * (cin * hp) + ci * hp + oh + kh).ravel()
    a[rows, cols] = wc[co, ci, kh, kw].ravel()
    return a


def _fold_rows(a, th, k):
    """Fold the row-selection Th of the previous stage into A:  A @ kron(I_K, Th)."""
    rows_in = th.shape[0]
    assert a.shape[1] == k * rows_in
    return np.concatenate([a[:, i * rows_in:(i + 1) * rows_in] @ th for i in range(k)],
                          axis=1)


def init_decoder_params(key):
    """Weights in the PyTorch layouts: Conv2d (Cout,Cin,3,3); ConvT (Cin,Cout,4,4)."""
    params = []
    for kind, cin, cout, k in _SPECS:
        key, k_w, k_b = jax.random.split(key, 3)
        if kind == "conv":
            shape, fan_in = (cout, cin, k, k), cin * k * k
        else:
            shape, fan_in = (cin, cout, k, k), cout * k * k   # PyTorch ConvT fan-in quirk
        bound = 1.0 / math.sqrt(fan_in)
        w = jax.random.uniform(k_w, shape, jnp.float32, -bound, bound)
        b = jax.random.uniform(k_b, (cout,), jnp.float32, -bound, bound)
        params.append((w, b))
    return params


def build_decoder_consts(params, h_in=_IN_HW):
    """Precompute the fused-kernel operands: per layer (A_eff bf16, bias f32, Tw bf16),
    plus the final row-selection Shr for the 125->64 nearest resize."""
    consts = []
    cin0 = _SPECS[0][1]
    th_prev = _make_th(channels=cin0, rows_in=h_in, scale=1, pad=1, hp_next=h_in + 2)
    h_cur = h_in
    oh = cout = None
    for idx, ((w_t, b_t), (kind, cin, cout, k)) in enumerate(zip(params, _SPECS)):
        pad = 1 if kind == "conv" else k - 1
        hp = h_cur + 2 * pad
        oh = hp - k + 1
        assert hp <= 128, "row-major layout assumes padded width <= 128 lanes"
        w_np = np.asarray(w_t, dtype=np.float32)
        if kind == "conv":
            wc = w_np                                           # correlation weights
        else:                                                   # ConvT = flipped full corr
            wc = np.flip(w_np, axis=(2, 3)).transpose(1, 0, 2, 3)
        a_eff = _fold_rows(_expand_weight(wc, hp), th_prev, k)
        b_exp = np.repeat(np.asarray(b_t, dtype=np.float32), oh).reshape(-1, 1)
        if idx < len(_SPECS) - 1:
            s = 1 if idx == 0 else 2                            # nearest-upsample factor
            k_next = _SPECS[idx + 1][3]
            tw = _make_tw_shifted(ow=oh, scale=s, pad=k_next - 1, n_shifts=k_next)
            th_prev = _make_th(channels=cout, rows_in=oh, scale=s, pad=k_next - 1,
                               hp_next=s * oh + 2 * (k_next - 1))
            h_cur = s * oh
        else:                                                   # final nearest resize cols
            tw = np.zeros((128, _OUT_HW), np.float32)
            j = np.arange(_OUT_HW)
            tw[(j * oh) // _OUT_HW, j] = 1.0
        consts += [jnp.asarray(a_eff, dtype=jnp.bfloat16),
                   jnp.asarray(b_exp, dtype=jnp.float32),
                   jnp.asarray(tw, dtype=jnp.bfloat16)]
    shr = np.zeros((cout * _OUT_HW, cout * oh), np.float32)      # final resize rows
    cc, ii = np.meshgrid(np.arange(cout), np.arange(_OUT_HW), indexing="ij")
    shr[(cc * _OUT_HW + ii).ravel(), (cc * oh + (ii * oh) // _OUT_HW).ravel()] = 1.0
    consts.append(jnp.asarray(shr, dtype=jnp.bfloat16))
    return consts


# ---------------------------------------------------------------------------
# Fused whole-decoder kernel (one grid step per batch sample).
# ---------------------------------------------------------------------------
def _decoder_kernel(*refs):
    x_ref, shr_ref, o_ref = refs[0], refs[-2], refs[-1]
    layer_refs = refs[1:-2]                      # (A_eff, bias, Tw) x 6
    n_layers = len(layer_refs) // 3

    taps = x_ref[0]                              # (3*64, 128) bf16: layer-1 taps
    for l in range(n_layers):
        a_ref = layer_refs[3 * l]
        b_ref = layer_refs[3 * l + 1]
        t_ref = layer_refs[3 * l + 2]
        # Whole conv layer as one bf16 MXU matmul with f32 accumulation.
        y = jnp.dot(a_ref[...], taps, preferred_element_type=jnp.float32)
        y = y + b_ref[...]                       # (R, 1) bias broadcast over lanes
        if l == 0:
            y = jnp.maximum(y, 0.0)              # ReLU only after the Conv2d
        zz = jnp.dot(y.astype(jnp.bfloat16), t_ref[...],
                     preferred_element_type=jnp.float32).astype(jnp.bfloat16)
        n_shifts = t_ref.shape[1] // 128
        if n_shifts > 1:
            # Tw packs the kw-shifted column selections side by side; restack the
            # lane-aligned 128-wide blocks on the sublane axis -> next layer's taps.
            taps = jnp.concatenate(
                [zz[:, s * 128:(s + 1) * 128] for s in range(n_shifts)], axis=0)
        else:
            taps = zz                            # last layer: resized columns (375, 64)
    out = jnp.dot(shr_ref[...], taps, preferred_element_type=jnp.float32)   # (192, 64)
    o_ref[0] = out.astype(o_ref.dtype)


def decoder_forward(consts, x):
    """x: (B, 32, 2, 2) latent, NCHW.  Returns (B, 3, 64, 64) float32."""
    bsz, c, h, w = x.shape
    assert (c, h, w) == (_SPECS[0][1], _IN_HW, _IN_HW), (c, h, w)
    k1 = _SPECS[0][3]

    # Tiny host-side prep: row-major latent, left pad of 1 (Conv2d padding=1), and the
    # k1 column-shifted views stacked on the row axis -> layer-1 taps (B, 3*64, 128).
    z0 = x.reshape(bsz, c * h, w).astype(jnp.float32)
    z0 = jnp.pad(z0, ((0, 0), (0, 0), (1, (128 + k1 - 1) - 1 - w)))
    x_taps = jnp.concatenate([z0[:, :, kw:kw + 128] for kw in range(k1)],
                             axis=1).astype(jnp.bfloat16)

    in_specs = [pl.BlockSpec((1,) + x_taps.shape[1:], lambda i: (i, 0, 0))]
    for arr in consts:                            # resident weight / selection blocks
        in_specs.append(pl.BlockSpec(arr.shape, lambda i, n=arr.ndim: (0,) * n))

    # Advisory cost estimate (matmul MACs + resident bytes).
    macs = 0
    for l in range(len(_SPECS)):
        a, t = consts[3 * l], consts[3 * l + 2]
        macs += a.shape[0] * a.shape[1] * 128
        macs += a.shape[0] * 128 * t.shape[1]
    shr = consts[-1]
    macs += shr.shape[0] * shr.shape[1] * _OUT_HW
    const_bytes = sum(int(np.prod(c_.shape)) * c_.dtype.itemsize for c_ in consts)
    cost = pl.CostEstimate(
        flops=2 * bsz * int(macs), transcendentals=0,
        bytes_accessed=int(const_bytes) + x_taps.size * 2 + bsz * 3 * _OUT_HW * _OUT_HW * 4)

    out = pl.pallas_call(
        _decoder_kernel,
        out_shape=jax.ShapeDtypeStruct((bsz, 3 * _OUT_HW, _OUT_HW), jnp.float32),
        grid=(bsz,),
        in_specs=in_specs,
        out_specs=pl.BlockSpec((1, 3 * _OUT_HW, _OUT_HW), lambda i: (i, 0, 0)),
        compiler_params=pltpu.CompilerParams(
            dimension_semantics=("parallel",),
            vmem_limit_bytes=32 * 1024 * 1024),
        cost_estimate=cost,
    )(x_taps, *consts)
    return out.reshape(bsz, 3, _OUT_HW, _OUT_HW)


# ---------------------------------------------------------------------------
# Pure-JAX f32 reference of the PyTorch module (for the numerical self-check).
# ---------------------------------------------------------------------------
def reference_forward(params, x):
    def corr(h, wc, b, pad):
        y = jax.lax.conv_general_dilated(
            h, wc, window_strides=(1, 1), padding=((pad, pad), (pad, pad)),
            dimension_numbers=("NCHW", "OIHW", "NCHW"),
            precision=jax.lax.Precision.HIGHEST)
        return y + b.reshape(1, -1, 1, 1)

    def conv_t(h, w_torch, b):        # ConvTranspose2d(stride=1, pad=0)
        wc = jnp.transpose(jnp.flip(w_torch, (2, 3)), (1, 0, 2, 3))
        return corr(h, wc, b, pad=w_torch.shape[2] - 1)

    def up2(h):
        return jnp.repeat(jnp.repeat(h, 2, axis=2), 2, axis=3)

    (w1, b1), (w2, b2), (w3, b3), (w4, b4), (w5, b5), (w6, b6) = params
    h = jax.nn.relu(corr(x.astype(jnp.float32), w1, b1, 1))
    h = up2(conv_t(h, w2, b2))
    h = up2(conv_t(h, w3, b3))
    h = up2(conv_t(h, w4, b4))
    h = up2(conv_t(h, w5, b5))
    h = conv_t(h, w6, b6)
    hi = (jnp.arange(_OUT_HW) * h.shape[2]) // _OUT_HW     # nearest resize to 64x64
    wi = (jnp.arange(_OUT_HW) * h.shape[3]) // _OUT_HW
    return h[:, :, hi, :][:, :, :, wi]


if __name__ == "__main__":
    key = jax.random.PRNGKey(0)
    k_params, k_x = jax.random.split(key)
    params = init_decoder_params(k_params)        # torch-layout weights/biases
    consts = build_decoder_consts(params)         # fused-kernel operands

    x = jax.random.normal(k_x, (2, 32, _IN_HW, _IN_HW), dtype=jnp.float32)

    fwd = jax.jit(decoder_forward)
    out = jax.block_until_ready(fwd(consts, x))
    assert out.shape == (2, 3, 64, 64) and out.dtype == jnp.float32, (out.shape, out.dtype)

    # Self-check against the f32 reference (kernel runs bf16 internally).
    ref = reference_forward(params, x)
    err = float(jnp.max(jnp.abs(out - ref)))
    scale = float(jnp.max(jnp.abs(ref)))
    assert err <= 3e-2 + 5e-2 * scale, ("numerical mismatch", err, scale)

    print("KERNEL_OK")
</pallas_src>

<mosaic_0001>
module attributes {stable_mosaic.version = 11 : i64} {
  func.func @_decoder_kernel(%arg0: i32, %arg1: memref<1x192x128xbf16, #tpu.memory_space<vmem>>, %arg2: memref<128x192xbf16, #tpu.memory_space<vmem>>, %arg3: memref<128x1xf32, #tpu.memory_space<vmem>>, %arg4: memref<128x512xbf16, #tpu.memory_space<vmem>>, %arg5: memref<160x512xbf16, #tpu.memory_space<vmem>>, %arg6: memref<160x1xf32, #tpu.memory_space<vmem>>, %arg7: memref<128x512xbf16, #tpu.memory_space<vmem>>, %arg8: memref<208x640xbf16, #tpu.memory_space<vmem>>, %arg9: memref<208x1xf32, #tpu.memory_space<vmem>>, %arg10: memref<128x512xbf16, #tpu.memory_space<vmem>>, %arg11: memref<232x832xbf16, #tpu.memory_space<vmem>>, %arg12: memref<232x1xf32, #tpu.memory_space<vmem>>, %arg13: memref<128x512xbf16, #tpu.memory_space<vmem>>, %arg14: memref<183x928xbf16, #tpu.memory_space<vmem>>, %arg15: memref<183x1xf32, #tpu.memory_space<vmem>>, %arg16: memref<128x512xbf16, #tpu.memory_space<vmem>>, %arg17: memref<375x732xbf16, #tpu.memory_space<vmem>>, %arg18: memref<375x1xf32, #tpu.memory_space<vmem>>, %arg19: memref<128x64xbf16, #tpu.memory_space<vmem>>, %arg20: memref<192x375xbf16, #tpu.memory_space<vmem>>, %arg21: memref<1x192x64xf32, #tpu.memory_space<vmem>>) attributes {dimension_semantics = [#tpu.dimension_semantics<parallel>], iteration_bounds = array<i64: 2>, scalar_prefetch = 0 : i64, scratch_operands = 0 : i64, tpu.core_type = #tpu.core_type<tc>, window_params = [{transform_indices = @transform_0, window_bounds = array<i64: 1, 192, 128>}, {pipeline_mode = #tpu.pipeline_mode<synchronous>, transform_indices = @transform_1, window_bounds = array<i64: 128, 192>}, {pipeline_mode = #tpu.pipeline_mode<synchronous>, transform_indices = @transform_2, window_bounds = array<i64: 128, 1>}, {pipeline_mode = #tpu.pipeline_mode<synchronous>, transform_indices = @transform_3, window_bounds = array<i64: 128, 512>}, {pipeline_mode = #tpu.pipeline_mode<synchronous>, transform_indices = @transform_4, window_bounds = array<i64: 160, 512>}, {pipeline_mode = #tpu.pipeline_mode<synchronous>, transform_indices = @transform_5, window_bounds = array<i64: 160, 1>}, {pipeline_mode = #tpu.pipeline_mode<synchronous>, transform_indices = @transform_6, window_bounds = array<i64: 128, 512>}, {pipeline_mode = #tpu.pipeline_mode<synchronous>, transform_indices = @transform_7, window_bounds = array<i64: 208, 640>}, {pipeline_mode = #tpu.pipeline_mode<synchronous>, transform_indices = @transform_8, window_bounds = array<i64: 208, 1>}, {pipeline_mode = #tpu.pipeline_mode<synchronous>, transform_indices = @transform_9, window_bounds = array<i64: 128, 512>}, {pipeline_mode = #tpu.pipeline_mode<synchronous>, transform_indices = @transform_10, window_bounds = array<i64: 232, 832>}, {pipeline_mode = #tpu.pipeline_mode<synchronous>, transform_indices = @transform_11, window_bounds = array<i64: 232, 1>}, {pipeline_mode = #tpu.pipeline_mode<synchronous>, transform_indices = @transform_12, window_bounds = array<i64: 128, 512>}, {pipeline_mode = #tpu.pipeline_mode<synchronous>, transform_indices = @transform_13, window_bounds = array<i64: 183, 928>}, {pipeline_mode = #tpu.pipeline_mode<synchronous>, transform_indices = @transform_14, window_bounds = array<i64: 183, 1>}, {pipeline_mode = #tpu.pipeline_mode<synchronous>, transform_indices = @transform_15, window_bounds = array<i64: 128, 512>}, {pipeline_mode = #tpu.pipeline_mode<synchronous>, transform_indices = @transform_16, window_bounds = array<i64: 375, 732>}, {pipeline_mode = #tpu.pipeline_mode<synchronous>, transform_indices = @transform_17, window_bounds = array<i64: 375, 1>}, {pipeline_mode = #tpu.pipeline_mode<synchronous>, transform_indices = @transform_18, window_bounds = array<i64: 128, 64>}, {pipeline_mode = #tpu.pipeline_mode<synchronous>, transform_indices = @transform_19, window_bounds = array<i64: 192, 375>}, {transform_indices = @transform_20, window_bounds = array<i64: 1, 192, 64>}]} {
    %c0 = arith.constant 0 : index
    %c0_0 = arith.constant 0 : index
    %c0_1 = arith.constant 0 : index
    %0 = vector.load %arg1[%c0, %c0_0, %c0_1] : memref<1x192x128xbf16, #tpu.memory_space<vmem>>, vector<1x192x128xbf16>
    %1 = vector.shape_cast %0 : vector<1x192x128xbf16> to vector<192x128xbf16>
    %c0_2 = arith.constant 0 : index
    %c0_3 = arith.constant 0 : index
    %2 = vector.load %arg2[%c0_2, %c0_3] : memref<128x192xbf16, #tpu.memory_space<vmem>>, vector<128x192xbf16>
    %cst = arith.constant dense<0.000000e+00> : vector<128x128xf32>
    %3 = tpu.matmul %2, %1, %cst {dimension_numbers = #tpu.dot_dimension_numbers<[1], [0], [0], [1], [0, 0, 1, 1], [], []>} : vector<128x192xbf16>, vector<192x128xbf16>, vector<128x128xf32> -> vector<128x128xf32>
    %c0_4 = arith.constant 0 : index
    %c0_5 = arith.constant 0 : index
    %4 = vector.load %arg3[%c0_4, %c0_5] : memref<128x1xf32, #tpu.memory_space<vmem>>, vector<128x1xf32>
    %5 = vector.broadcast %4 : vector<128x1xf32> to vector<128x128xf32>
    %6 = arith.addf %3, %5 : vector<128x128xf32>
    %cst_6 = arith.constant 0.000000e+00 : f32
    %7 = vector.broadcast %cst_6 : f32 to vector<128x128xf32>
    %8 = arith.maximumf %6, %7 : vector<128x128xf32>
    %9 = arith.truncf %8 : vector<128x128xf32> to vector<128x128xbf16>
    %c0_7 = arith.constant 0 : index
    %c0_8 = arith.constant 0 : index
    %10 = vector.load %arg4[%c0_7, %c0_8] : memref<128x512xbf16, #tpu.memory_space<vmem>>, vector<128x512xbf16>
    %cst_9 = arith.constant dense<0.000000e+00> : vector<128x512xf32>
    %11 = tpu.matmul %9, %10, %cst_9 {dimension_numbers = #tpu.dot_dimension_numbers<[1], [0], [0], [1], [0, 0, 1, 1], [], []>} : vector<128x128xbf16>, vector<128x512xbf16>, vector<128x512xf32> -> vector<128x512xf32>
    %12 = arith.truncf %11 : vector<128x512xf32> to vector<128x512xbf16>
    %13 = vector.extract_strided_slice %12 {offsets = [0, 0], sizes = [128, 128], strides = [1, 1]} : vector<128x512xbf16> to vector<128x128xbf16>
    %14 = vector.extract_strided_slice %12 {offsets = [0, 128], sizes = [128, 128], strides = [1, 1]} : vector<128x512xbf16> to vector<128x128xbf16>
    %15 = vector.extract_strided_slice %12 {offsets = [0, 256], sizes = [128, 128], strides = [1, 1]} : vector<128x512xbf16> to vector<128x128xbf16>
    %16 = vector.extract_strided_slice %12 {offsets = [0, 384], sizes = [128, 128], strides = [1, 1]} : vector<128x512xbf16> to vector<128x128xbf16>
    %17 = tpu.concatenate %13, %14, %15, %16 in 0 : vector<128x128xbf16>, vector<128x128xbf16>, vector<128x128xbf16>, vector<128x128xbf16> -> vector<512x128xbf16>
    %c0_10 = arith.constant 0 : index
    %c0_11 = arith.constant 0 : index
    %18 = vector.load %arg5[%c0_10, %c0_11] : memref<160x512xbf16, #tpu.memory_space<vmem>>, vector<160x512xbf16>
    %cst_12 = arith.constant dense<0.000000e+00> : vector<160x128xf32>
    %19 = tpu.matmul %18, %17, %cst_12 {dimension_numbers = #tpu.dot_dimension_numbers<[1], [0], [0], [1], [0, 0, 1, 1], [], []>} : vector<160x512xbf16>, vector<512x128xbf16>, vector<160x128xf32> -> vector<160x128xf32>
    %c0_13 = arith.constant 0 : index
    %c0_14 = arith.constant 0 : index
    %20 = vector.load %arg6[%c0_13, %c0_14] : memref<160x1xf32, #tpu.memory_space<vmem>>, vector<160x1xf32>
    %21 = vector.broadcast %20 : vector<160x1xf32> to vector<160x128xf32>
    %22 = arith.addf %19, %21 : vector<160x128xf32>
    %23 = arith.truncf %22 : vector<160x128xf32> to vector<160x128xbf16>
    %c0_15 = arith.constant 0 : index
    %c0_16 = arith.constant 0 : index
    %24 = vector.load %arg7[%c0_15, %c0_16] : memref<128x512xbf16, #tpu.memory_space<vmem>>, vector<128x512xbf16>
    %cst_17 = arith.constant dense<0.000000e+00> : vector<160x512xf32>
    %25 = tpu.matmul %23, %24, %cst_17 {dimension_numbers = #tpu.dot_dimension_numbers<[1], [0], [0], [1], [0, 0, 1, 1], [], []>} : vector<160x128xbf16>, vector<128x512xbf16>, vector<160x512xf32> -> vector<160x512xf32>
    %26 = arith.truncf %25 : vector<160x512xf32> to vector<160x512xbf16>
    %27 = vector.extract_strided_slice %26 {offsets = [0, 0], sizes = [160, 128], strides = [1, 1]} : vector<160x512xbf16> to vector<160x128xbf16>
    %28 = vector.extract_strided_slice %26 {offsets = [0, 128], sizes = [160, 128], strides = [1, 1]} : vector<160x512xbf16> to vector<160x128xbf16>
    %29 = vector.extract_strided_slice %26 {offsets = [0, 256], sizes = [160, 128], strides = [1, 1]} : vector<160x512xbf16> to vector<160x128xbf16>
    %30 = vector.extract_strided_slice %26 {offsets = [0, 384], sizes = [160, 128], strides = [1, 1]} : vector<160x512xbf16> to vector<160x128xbf16>
    %31 = tpu.concatenate %27, %28, %29, %30 in 0 : vector<160x128xbf16>, vector<160x128xbf16>, vector<160x128xbf16>, vector<160x128xbf16> -> vector<640x128xbf16>
    %c0_18 = arith.constant 0 : index
    %c0_19 = arith.constant 0 : index
    %32 = vector.load %arg8[%c0_18, %c0_19] : memref<208x640xbf16, #tpu.memory_space<vmem>>, vector<208x640xbf16>
    %cst_20 = arith.constant dense<0.000000e+00> : vector<208x128xf32>
    %33 = tpu.matmul %32, %31, %cst_20 {dimension_numbers = #tpu.dot_dimension_numbers<[1], [0], [0], [1], [0, 0, 1, 1], [], []>} : vector<208x640xbf16>, vector<640x128xbf16>, vector<208x128xf32> -> vector<208x128xf32>
    %c0_21 = arith.constant 0 : index
    %c0_22 = arith.constant 0 : index
    %34 = vector.load %arg9[%c0_21, %c0_22] : memref<208x1xf32, #tpu.memory_space<vmem>>, vector<208x1xf32>
    %35 = vector.broadcast %34 : vector<208x1xf32> to vector<208x128xf32>
    %36 = arith.addf %33, %35 : vector<208x128xf32>
    %37 = arith.truncf %36 : vector<208x128xf32> to vector<208x128xbf16>
    %c0_23 = arith.constant 0 : index
    %c0_24 = arith.constant 0 : index
    %38 = vector.load %arg10[%c0_23, %c0_24] : memref<128x512xbf16, #tpu.memory_space<vmem>>, vector<128x512xbf16>
    %cst_25 = arith.constant dense<0.000000e+00> : vector<208x512xf32>
    %39 = tpu.matmul %37, %38, %cst_25 {dimension_numbers = #tpu.dot_dimension_numbers<[1], [0], [0], [1], [0, 0, 1, 1], [], []>} : vector<208x128xbf16>, vector<128x512xbf16>, vector<208x512xf32> -> vector<208x512xf32>
    %40 = arith.truncf %39 : vector<208x512xf32> to vector<208x512xbf16>
    %41 = vector.extract_strided_slice %40 {offsets = [0, 0], sizes = [208, 128], strides = [1, 1]} : vector<208x512xbf16> to vector<208x128xbf16>
    %42 = vector.extract_strided_slice %40 {offsets = [0, 128], sizes = [208, 128], strides = [1, 1]} : vector<208x512xbf16> to vector<208x128xbf16>
    %43 = vector.extract_strided_slice %40 {offsets = [0, 256], sizes = [208, 128], strides = [1, 1]} : vector<208x512xbf16> to vector<208x128xbf16>
    %44 = vector.extract_strided_slice %40 {offsets = [0, 384], sizes = [208, 128], strides = [1, 1]} : vector<208x512xbf16> to vector<208x128xbf16>
    %45 = tpu.concatenate %41, %42, %43, %44 in 0 : vector<208x128xbf16>, vector<208x128xbf16>, vector<208x128xbf16>, vector<208x128xbf16> -> vector<832x128xbf16>
    %c0_26 = arith.constant 0 : index
    %c0_27 = arith.constant 0 : index
    %46 = vector.load %arg11[%c0_26, %c0_27] : memref<232x832xbf16, #tpu.memory_space<vmem>>, vector<232x832xbf16>
    %cst_28 = arith.constant dense<0.000000e+00> : vector<232x128xf32>
    %47 = tpu.matmul %46, %45, %cst_28 {dimension_numbers = #tpu.dot_dimension_numbers<[1], [0], [0], [1], [0, 0, 1, 1], [], []>} : vector<232x832xbf16>, vector<832x128xbf16>, vector<232x128xf32> -> vector<232x128xf32>
    %c0_29 = arith.constant 0 : index
    %c0_30 = arith.constant 0 : index
    %48 = vector.load %arg12[%c0_29, %c0_30] : memref<232x1xf32, #tpu.memory_space<vmem>>, vector<232x1xf32>
    %49 = vector.broadcast %48 : vector<232x1xf32> to vector<232x128xf32>
    %50 = arith.addf %47, %49 : vector<232x128xf32>
    %51 = arith.truncf %50 : vector<232x128xf32> to vector<232x128xbf16>
    %c0_31 = arith.constant 0 : index
    %c0_32 = arith.constant 0 : index
    %52 = vector.load %arg13[%c0_31, %c0_32] : memref<128x512xbf16, #tpu.memory_space<vmem>>, vector<128x512xbf16>
    %cst_33 = arith.constant dense<0.000000e+00> : vector<232x512xf32>
    %53 = tpu.matmul %51, %52, %cst_33 {dimension_numbers = #tpu.dot_dimension_numbers<[1], [0], [0], [1], [0, 0, 1, 1], [], []>} : vector<232x128xbf16>, vector<128x512xbf16>, vector<232x512xf32> -> vector<232x512xf32>
    %54 = arith.truncf %53 : vector<232x512xf32> to vector<232x512xbf16>
    %55 = vector.extract_strided_slice %54 {offsets = [0, 0], sizes = [232, 128], strides = [1, 1]} : vector<232x512xbf16> to vector<232x128xbf16>
    %56 = vector.extract_strided_slice %54 {offsets = [0, 128], sizes = [232, 128], strides = [1, 1]} : vector<232x512xbf16> to vector<232x128xbf16>
    %57 = vector.extract_strided_slice %54 {offsets = [0, 256], sizes = [232, 128], strides = [1, 1]} : vector<232x512xbf16> to vector<232x128xbf16>
    %58 = vector.extract_strided_slice %54 {offsets = [0, 384], sizes = [232, 128], strides = [1, 1]} : vector<232x512xbf16> to vector<232x128xbf16>
    %59 = tpu.concatenate %55, %56, %57, %58 in 0 : vector<232x128xbf16>, vector<232x128xbf16>, vector<232x128xbf16>, vector<232x128xbf16> -> vector<928x128xbf16>
    %c0_34 = arith.constant 0 : index
    %c0_35 = arith.constant 0 : index
    %60 = vector.load %arg14[%c0_34, %c0_35] : memref<183x928xbf16, #tpu.memory_space<vmem>>, vector<183x928xbf16>
    %cst_36 = arith.constant dense<0.000000e+00> : vector<183x128xf32>
    %61 = tpu.matmul %60, %59, %cst_36 {dimension_numbers = #tpu.dot_dimension_numbers<[1], [0], [0], [1], [0, 0, 1, 1], [], []>} : vector<183x928xbf16>, vector<928x128xbf16>, vector<183x128xf32> -> vector<183x128xf32>
    %c0_37 = arith.constant 0 : index
    %c0_38 = arith.constant 0 : index
    %62 = vector.load %arg15[%c0_37, %c0_38] : memref<183x1xf32, #tpu.memory_space<vmem>>, vector<183x1xf32>
    %63 = vector.broadcast %62 : vector<183x1xf32> to vector<183x128xf32>
    %64 = arith.addf %61, %63 : vector<183x128xf32>
    %65 = arith.truncf %64 : vector<183x128xf32> to vector<183x128xbf16>
    %c0_39 = arith.constant 0 : index
    %c0_40 = arith.constant 0 : index
    %66 = vector.load %arg16[%c0_39, %c0_40] : memref<128x512xbf16, #tpu.memory_space<vmem>>, vector<128x512xbf16>
    %cst_41 = arith.constant dense<0.000000e+00> : vector<183x512xf32>
    %67 = tpu.matmul %65, %66, %cst_41 {dimension_numbers = #tpu.dot_dimension_numbers<[1], [0], [0], [1], [0, 0, 1, 1], [], []>} : vector<183x128xbf16>, vector<128x512xbf16>, vector<183x512xf32> -> vector<183x512xf32>
    %68 = arith.truncf %67 : vector<183x512xf32> to vector<183x512xbf16>
    %69 = vector.extract_strided_slice %68 {offsets = [0, 0], sizes = [183, 128], strides = [1, 1]} : vector<183x512xbf16> to vector<183x128xbf16>
    %70 = vector.extract_strided_slice %68 {offsets = [0, 128], sizes = [183, 128], strides = [1, 1]} : vector<183x512xbf16> to vector<183x128xbf16>
    %71 = vector.extract_strided_slice %68 {offsets = [0, 256], sizes = [183, 128], strides = [1, 1]} : vector<183x512xbf16> to vector<183x128xbf16>
    %72 = vector.extract_strided_slice %68 {offsets = [0, 384], sizes = [183, 128], strides = [1, 1]} : vector<183x512xbf16> to vector<183x128xbf16>
    %73 = tpu.concatenate %69, %70, %71, %72 in 0 : vector<183x128xbf16>, vector<183x128xbf16>, vector<183x128xbf16>, vector<183x128xbf16> -> vector<732x128xbf16>
    %c0_42 = arith.constant 0 : index
    %c0_43 = arith.constant 0 : index
    %74 = vector.load %arg17[%c0_42, %c0_43] : memref<375x732xbf16, #tpu.memory_space<vmem>>, vector<375x732xbf16>
    %cst_44 = arith.constant dense<0.000000e+00> : vector<375x128xf32>
    %75 = tpu.matmul %74, %73, %cst_44 {dimension_numbers = #tpu.dot_dimension_numbers<[1], [0], [0], [1], [0, 0, 1, 1], [], []>} : vector<375x732xbf16>, vector<732x128xbf16>, vector<375x128xf32> -> vector<375x128xf32>
    %c0_45 = arith.constant 0 : index
    %c0_46 = arith.constant 0 : index
    %76 = vector.load %arg18[%c0_45, %c0_46] : memref<375x1xf32, #tpu.memory_space<vmem>>, vector<375x1xf32>
    %77 = vector.broadcast %76 : vector<375x1xf32> to vector<375x128xf32>
    %78 = arith.addf %75, %77 : vector<375x128xf32>
    %79 = arith.truncf %78 : vector<375x128xf32> to vector<375x128xbf16>
    %c0_47 = arith.constant 0 : index
    %c0_48 = arith.constant 0 : index
    %80 = vector.load %arg19[%c0_47, %c0_48] : memref<128x64xbf16, #tpu.memory_space<vmem>>, vector<128x64xbf16>
    %cst_49 = arith.constant dense<0.000000e+00> : vector<375x64xf32>
    %81 = tpu.matmul %79, %80, %cst_49 {dimension_numbers = #tpu.dot_dimension_numbers<[1], [0], [0], [1], [0, 0, 1, 1], [], []>} : vector<375x128xbf16>, vector<128x64xbf16>, vector<375x64xf32> -> vector<375x64xf32>
    %82 = arith.truncf %81 : vector<375x64xf32> to vector<375x64xbf16>
    %c0_50 = arith.constant 0 : index
    %c0_51 = arith.constant 0 : index
    %83 = vector.load %arg20[%c0_50, %c0_51] : memref<192x375xbf16, #tpu.memory_space<vmem>>, vector<192x375xbf16>
    %cst_52 = arith.constant dense<0.000000e+00> : vector<192x64xf32>
    %84 = tpu.matmul %83, %82, %cst_52 {dimension_numbers = #tpu.dot_dimension_numbers<[1], [0], [0], [1], [0, 0, 1, 1], [], []>} : vector<192x375xbf16>, vector<375x64xbf16>, vector<192x64xf32> -> vector<192x64xf32>
    %c0_53 = arith.constant 0 : index
    %c0_54 = arith.constant 0 : index
    %c0_55 = arith.constant 0 : index
    %85 = vector.load %arg21[%c0_53, %c0_54, %c0_55] : memref<1x192x64xf32, #tpu.memory_space<vmem>>, vector<1x192x64xf32>
    %86 = vector.shape_cast %85 : vector<1x192x64xf32> to vector<192x64xf32>
    %87 = vector.shape_cast %84 : vector<192x64xf32> to vector<1x192x64xf32>
    tpu.vector_store %arg21[%c0_53, %c0_54, %c0_55], %87 {strides = array<i32>} : memref<1x192x64xf32, #tpu.memory_space<vmem>>, vector<1x192x64xf32>,
    return
  }
  func.func @transform_0(%arg0: i32) -> (i32, i32, i32) {
    %c0_i32 = arith.constant 0 : i32
    %c0_i32_0 = arith.constant 0 : i32
    %c0_i32_1 = arith.constant 0 : i32
    return %arg0, %c0_i32, %c0_i32_0 : i32, i32, i32
  }
  func.func @transform_1(%arg0: i32) -> (i32, i32) {
    %c0_i32 = arith.constant 0 : i32
    %c0_i32_0 = arith.constant 0 : i32
    %c0_i32_1 = arith.constant 0 : i32
    return %c0_i32, %c0_i32_0 : i32, i32
  }
  func.func @transform_2(%arg0: i32) -> (i32, i32) {
    %c0_i32 = arith.constant 0 : i32
    %c0_i32_0 = arith.constant 0 : i32
    %c0_i32_1 = arith.constant 0 : i32
    return %c0_i32, %c0_i32_0 : i32, i32
  }
  func.func @transform_3(%arg0: i32) -> (i32, i32) {
    %c0_i32 = arith.constant 0 : i32
    %c0_i32_0 = arith.constant 0 : i32
    %c0_i32_1 = arith.constant 0 : i32
    return %c0_i32, %c0_i32_0 : i32, i32
  }
  func.func @transform_4(%arg0: i32) -> (i32, i32) {
    %c0_i32 = arith.constant 0 : i32
    %c0_i32_0 = arith.constant 0 : i32
    %c0_i32_1 = arith.constant 0 : i32
    return %c0_i32, %c0_i32_0 : i32, i32
  }
  func.func @transform_5(%arg0: i32) -> (i32, i32) {
    %c0_i32 = arith.constant 0 : i32
    %c0_i32_0 = arith.constant 0 : i32
    %c0_i32_1 = arith.constant 0 : i32
    return %c0_i32, %c0_i32_0 : i32, i32
  }
  func.func @transform_6(%arg0: i32) -> (i32, i32) {
    %c0_i32 = arith.constant 0 : i32
    %c0_i32_0 = arith.constant 0 : i32
    %c0_i32_1 = arith.constant 0 : i32
    return %c0_i32, %c0_i32_0 : i32, i32
  }
  func.func @transform_7(%arg0: i32) -> (i32, i32) {
    %c0_i32 = arith.constant 0 : i32
    %c0_i32_0 = arith.constant 0 : i32
    %c0_i32_1 = arith.constant 0 : i32
    return %c0_i32, %c0_i32_0 : i32, i32
  }
  func.func @transform_8(%arg0: i32) -> (i32, i32) {
    %c0_i32 = arith.constant 0 : i32
    %c0_i32_0 = arith.constant 0 : i32
    %c0_i32_1 = arith.constant 0 : i32
    return %c0_i32, %c0_i32_0 : i32, i32
  }
  func.func @transform_9(%arg0: i32) -> (i32, i32) {
    %c0_i32 = arith.constant 0 : i32
    %c0_i32_0 = arith.constant 0 : i32
    %c0_i32_1 = arith.constant 0 : i32
    return %c0_i32, %c0_i32_0 : i32, i32
  }
  func.func @transform_10(%arg0: i32) -> (i32, i32) {
    %c0_i32 = arith.constant 0 : i32
    %c0_i32_0 = arith.constant 0 : i32
    %c0_i32_1 = arith.constant 0 : i32
    return %c0_i32, %c0_i32_0 : i32, i32
  }
  func.func @transform_11(%arg0: i32) -> (i32, i32) {
    %c0_i32 = arith.constant 0 : i32
    %c0_i32_0 = arith.constant 0 : i32
    %c0_i32_1 = arith.constant 0 : i32
    return %c0_i32, %c0_i32_0 : i32, i32
  }
  func.func @transform_12(%arg0: i32) -> (i32, i32) {
    %c0_i32 = arith.constant 0 : i32
    %c0_i32_0 = arith.constant 0 : i32
    %c0_i32_1 = arith.constant 0 : i32
    return %c0_i32, %c0_i32_0 : i32, i32
  }
  func.func @transform_13(%arg0: i32) -> (i32, i32) {
    %c0_i32 = arith.constant 0 : i32
    %c0_i32_0 = arith.constant 0 : i32
    %c0_i32_1 = arith.constant 0 : i32
    return %c0_i32, %c0_i32_0 : i32, i32
  }
  func.func @transform_14(%arg0: i32) -> (i32, i32) {
    %c0_i32 = arith.constant 0 : i32
    %c0_i32_0 = arith.constant 0 : i32
    %c0_i32_1 = arith.constant 0 : i32
    return %c0_i32, %c0_i32_0 : i32, i32
  }
  func.func @transform_15(%arg0: i32) -> (i32, i32) {
    %c0_i32 = arith.constant 0 : i32
    %c0_i32_0 = arith.constant 0 : i32
    %c0_i32_1 = arith.constant 0 : i32
    return %c0_i32, %c0_i32_0 : i32, i32
  }
  func.func @transform_16(%arg0: i32) -> (i32, i32) {
    %c0_i32 = arith.constant 0 : i32
    %c0_i32_0 = arith.constant 0 : i32
    %c0_i32_1 = arith.constant 0 : i32
    return %c0_i32, %c0_i32_0 : i32, i32
  }
  func.func @transform_17(%arg0: i32) -> (i32, i32) {
    %c0_i32 = arith.constant 0 : i32
    %c0_i32_0 = arith.constant 0 : i32
    %c0_i32_1 = arith.constant 0 : i32
    return %c0_i32, %c0_i32_0 : i32, i32
  }
  func.func @transform_18(%arg0: i32) -> (i32, i32) {
    %c0_i32 = arith.constant 0 : i32
    %c0_i32_0 = arith.constant 0 : i32
    %c0_i32_1 = arith.constant 0 : i32
    return %c0_i32, %c0_i32_0 : i32, i32
  }
  func.func @transform_19(%arg0: i32) -> (i32, i32) {
    %c0_i32 = arith.constant 0 : i32
    %c0_i32_0 = arith.constant 0 : i32
    %c0_i32_1 = arith.constant 0 : i32
    return %c0_i32, %c0_i32_0 : i32, i32
  }
  func.func @transform_20(%arg0: i32) -> (i32, i32, i32) {
    %c0_i32 = arith.constant 0 : i32
    %c0_i32_0 = arith.constant 0 : i32
    %c0_i32_1 = arith.constant 0 : i32
    return %arg0, %c0_i32, %c0_i32_0 : i32, i32, i32
  }
}

</mosaic_0001>

<bundles_post_ra>
// kernel: decoder_forward.1
= control target key start
LH: loop header
LB: loop body
LE: loop exit
PB: predicated region body
PF: predicated region fallthrough
CT: control target
= control target key end

     0   :  { %s23163_s0 = inlined_call_operand.vmem [shape: bf16[2,192,128], index: 0, kind: input, shape index: {}]   ;;  %s23164_s1 = inlined_call_operand.vmem [shape: bf16[128,192], index: 1, kind: input, shape index: {}]   ;;  %s23165_s2 = inlined_call_operand.vmem [shape: f32[128,1], index: 2, kind: input, shape index: {}]   ;;  %s23166_s3 = inlined_call_operand.vmem [shape: bf16[128,512], index: 3, kind: input, shape index: {}]   ;;  %s23167_s4 = inlined_call_operand.vmem [shape: bf16[160,512], index: 4, kind: input, shape index: {}]   ;;  %s23168_s5 = inlined_call_operand.vmem [shape: f32[160,1], index: 5, kind: input, shape index: {}]   ;;  %s23169_s6 = inlined_call_operand.vmem [shape: bf16[128,512], index: 6, kind: input, shape index: {}]   ;;  %s23170_s7 = inlined_call_operand.vmem [shape: bf16[208,640], index: 7, kind: input, shape index: {}]   ;;  %s23171_s8 = inlined_call_operand.vmem [shape: f32[208,1], index: 8, kind: input, shape index: {}]   ;;  %s23172_s9 = inlined_call_operand.vmem [shape: bf16[128,512], index: 9, kind: input, shape index: {}]   ;;  %s23173_s10 = inlined_call_operand.vmem [shape: bf16[232,832], index: 10, kind: input, shape index: {}]   ;;  %s23174_s11 = inlined_call_operand.vmem [shape: f32[232,1], index: 11, kind: input, shape index: {}]   ;;  %s23175_s12 = inlined_call_operand.vmem [shape: bf16[128,512], index: 12, kind: input, shape index: {}]   ;;  %s23176_s13 = inlined_call_operand.vmem [shape: bf16[183,928], index: 13, kind: input, shape index: {}]   ;;  %s23177_s14 = inlined_call_operand.vmem [shape: f32[183,1], index: 14, kind: input, shape index: {}]   ;;  %s23178_s15 = inlined_call_operand.hbm [shape: bf16[128,512], index: 15, kind: input, shape index: {}]   ;;  %s23179_s16 = inlined_call_operand.vmem [shape: bf16[375,732], index: 16, kind: input, shape index: {}]   ;;  %s23180_s17 = inlined_call_operand.vmem [shape: f32[375,1], index: 17, kind: input, shape index: {}]   ;;  %s23181_s18 = inlined_call_operand.vmem [shape: bf16[128,64], index: 18, kind: input, shape index: {}]   ;;  %s23182_s19 = inlined_call_operand.vmem [shape: bf16[192,375], index: 19, kind: input, shape index: {}]   ;;  %s23183_s20 = inlined_call_operand.hbm [shape: f32[2,192,64], index: 20, kind: output, shape index: {}]  }
   0x1   :  { %23199 = sst [smem:[#allocation38_spill]] %s23163_s0 }
   0x2   :  { %23200 = sst [smem:[#allocation39_spill]] %s23164_s1 }
   0x3   :  { %23201 = sst [smem:[#allocation40_spill]] %s23165_s2 }
   0x4   :  { %23202 = sst [smem:[#allocation41_spill]] %s23166_s3 }
   0x5   :  { %23203 = sst [smem:[#allocation42_spill]] %s23167_s4 }
   0x6   :  { %23204 = sst [smem:[#allocation43_spill]] %s23168_s5 }
   0x7   :  { %23205 = sst [smem:[#allocation44_spill]] %s23169_s6 }
   0x8   :  { %23206 = sst [smem:[#allocation45_spill]] %s23170_s7 }
   0x9   :  { %23207 = sst [smem:[#allocation46_spill]] %s23178_s15 }
   0xa   :  { %25 = vsyncpa [#allocation3], 0 }
   0xb   :  { %26 = vsyncpa [#allocation4], 0 }
   0xc   :  { %28 = vsyncpa [#allocation4 + $0x1], 0  ;;  %s15733_s1 = smov 0   ;;  %s15735_s22 = smov 0  }
   0xd   :  { %s15737_s23 = smov 0   ;;  %s15739_s24 = smov 0  }
   0xe LB: > { %23208 = sst [smem:[#allocation8_spill]] %s15607_s1  ;;  %s15754_s2 = sadd.s32 4294967295, %s15619_s24   ;;  %s15619_s24 = sphi %s15739_s24, %s23322_s24   ;;  %s15615_s23 = sphi %s15737_s23, %s23324_s23   ;;  %s15611_s22 = sphi %s15735_s22, %s23326_s22   ;;  %s15607_s1 = sphi %s15733_s1, %s23325_s1  }
   0xf   : > { %23209 = sst [smem:[#allocation9_spill]] %s15615_s23  ;;  %s12067_s25 = sadd.s32 4294967294, %s15619_s24  }
  0x10   : > { %23210 = sst [smem:[#allocation10_spill]] %s15619_s24  ;;  %s15758_s3 = sadd.s32 1, %s15619_s24  }
  0x11   : > { %23211 = sst [smem:[#allocation11_spill]] %s15758_s3  ;;  %s466_s26 = sadd.s32 1, %s15615_s23 }
  0x12   : > { %s463_s27 = ssub.s32 %s15619_s24, %s15758_s3  ;;  %p476_p0 = scmp.ne.s32.totalorder %s15615_s23, %s15611_s22 }
  0x13   : > { %p464_p1 = scmp.eq.s32.totalorder %s463_s27, 0  ;;  %p477_p2 = scmp.eq.s32.totalorder %s15754_s2, 1 }
  0x14   : > { %p482_p3 = scmp.ne.s32.totalorder %s15611_s22, %s15607_s1  ;;  %p483_p4 = scmp.eq.s32.totalorder %s12067_s25, 1 }
  0x15   : > { %s15769_s28 = scalar_select %p464_p1, %s15615_s23, %s466_s26  }
  0x16   : > { %p15771_p5 = por %p477_p2, %p476_p0  ;;  %p15775_p6 = por %p483_p4, %p482_p3 }
  0x17   : > { %23212 = sst [smem:[#allocation12_spill]] %s15769_s28  ;;  %p12068_p7 = scmp.ge.s32.totalorder %s15619_s24, 1 }
  0x18   : > { %s23214_s29 = scalar_select %p15775_p6, 1, 0 }
  0x19   : > { %p490_p8 = scmp.lt.s32.totalorder %s15619_s24, 3  ;;  %p15478_p9 = scmp.eq.s32.totalorder %s15754_s2, 0 }
  0x1a   : > { %23215 = sst [smem:[#allocation13_spill]] %s23214_s29  ;;  %s15621_s25 = smov [#allocation2]  }
  0x1b   : > { %p491_p10 = pnand %p12068_p7, %p490_p8  ;;  %s23216_s15 = sld [smem:[#allocation46_spill]] }
  0x1c   : > { %s545_s26 = sshll.u32 %s15621_s25, 4  ;;  %s15622_s27 = smov 256   ;;  %s546_s26 = int_to_ptr.vmem [resolvable:$true] %s545_s26 }
  0x1d   : > { %p15470_p11 = pneg %p491_p10  ;;  %s15623_s28 = smov 16  }
  0x1e   : > { %581 = sbr.rel (%p491_p10) target bundleno = 4689 (0x1251), region = 100 }
  0x1f   : > { %p15471_p12 = pnand %p15478_p9, %p15470_p11 }
  0x21   : > { %s543_s21 = sshll.u32 %s23216_s15, 4  ;;  %s544_s21 = int_to_ptr.hbm [resolvable:$true] %s543_s21 }
  0x22   : > { %15473 = dma.hbm_to_vmem [thread:$0]  (!%p15471_p12), %s544_s21, 4096, %s546_s26, [#allocation3], %s15622_s27, %s15622_s27, %s15623_s28  }
  0x23   : > { %15598 = dma.done.wait (%p15478_p9), [#allocation3], 4096  }
  0x24   : > { %15600 = vsyncadd (%p15478_p9), [#allocation3], 4294963200  ;;  %p640_p13 = scmp.lt.s32.totalorder %s15754_s2, 1  ;;  %v15624_v0 = vmov 0   ;;  %s23217_s23 = sld [smem:[#allocation38_spill]]  ;;  %vm926_vm0 = vcmask 523264  }
  0x25   : > { %15522 = vset.pattern.permute.xlu2 %v15624_v0  ;;  %15521 = vset.pattern.permute.xlu1 %v15624_v0  ;;  %s23218_s27 = sld [smem:[#allocation40_spill]]  ;;  %vm6999_vm1 = vcmask 1043456   ;;  %vm7694_vm2 = vcmask 261120   ;;  %vm9079_vm3 = vcmask 1046528   ;;  %vm9150_vm4 = vsmask.f32 2304 }
  0x26   : > { %15520 = vset.pattern.permute.xlu0 %v15624_v0  ;;  %s641_s30 = scalar_select %p640_p13, %s15754_s2, 1  ;;  %vm8902_vm5 = vsmask.f32 3328  ;;  %vm9277_vm6 = vcmask 1042432   ;;  %vm10463_vm9 = vcmask 1045504   ;;  %vm10390_vm10 = vcmask 752640  }
  0x27   : > { %s23219_s3 = sld [smem:[#allocation39_spill]]  ;;  %vm9278_vm7 = vmand %vm9277_vm6, %vm9150_vm4  ;;  %vm11703_vm11 = vcmask 973824  }
  0x28   : > { %s15462_s0 = smul.u32 96, %s641_s30  ;;  %s23220_s5 = sld [smem:[#allocation43_spill]]  ;;  %vm21363_vm8 = vmand %vm6999_vm1, %vm8902_vm5 }
  0x29   : > { %s23221_s15 = sld [smem:[#allocation41_spill]] }
  0x2a   : > { %s15796_s28 = scalar_lea.vmem %s23217_s23, %s15462_s0  ;;  %s23222_s21 = sld [smem:[#allocation42_spill]] }
  0x2b   : > { %v694_v1 = vld [vmem:[%s23218_s27 + $0x40] sm:$0xff]  ;;  %v692_v2 = vld [vmem:[%s23218_s27 + $0x30] sm:$0xff]  ;;  %v14799_v4 = vld [vmem:[%s15796_s28 + $0x38] sm:$0xff]  ;;  %s23223_s6 = sld [smem:[#allocation44_spill]]  ;;  %s637_s0 = sand.u32 1, %s15611_s22  }
  0x2c   : > { %v690_v3 = vld [vmem:[%s23218_s27 + $0x20] sm:$0xff]  ;;  %744 = vperm.xlu2 %15522, %v694_v1   ;;  %734 = vperm.xlu1 %15521, %v692_v2   ;;  %v14798_v5 = vld [vmem:[%s15796_s28 + $0x30] sm:$0xff]  ;;  %v14803_v6 = vld [vmem:[%s15796_s28 + $0x58] sm:$0xff]  ;;  %s23224_s7 = sld [smem:[#allocation45_spill]]  ;;  %s15461_s25 = smul.u32 192, %s637_s0 }
  0x2d   : > { %724 = vperm.xlu0 %15520, %v690_v3   ;;  %951 = vmatpush.bf16.msra.mxu0 %v14799_v4  ;;  %v695_v7 = vld [vmem:[%s23218_s27 + $0x48] sm:$0xff]  ;;  %v693_v8 = vld [vmem:[%s23218_s27 + $0x38] sm:$0xff]  ;;  %v14802_v9 = vld [vmem:[%s15796_s28 + $0x50] sm:$0xff] }
  0x2e   : > { %1004 = vmatpush.bf16.msra.mxu1 %v14803_v6  ;;  %v691_v10 = vld [vmem:[%s23218_s27 + $0x28] sm:$0xff]  ;;  %v14796_v13 = vld [vmem:[%s15796_s28 + $0x20] sm:$0xff]  ;;  %v697_v15 = vld [vmem:[%s23218_s27 + $0x58] sm:$0xff]  ;;  %s23035_s26 = scalar_lea.vmem [#allocation5], %s15461_s25 }
  0x2f   : > { %v14797_v11 = vld [vmem:[%s15796_s28 + $0x28] sm:$0xff]  ;;  %v698_v14 = vld [vmem:[%s23218_s27 + $0x60] sm:$0xff]  ;;  %v696_v19 = vld [vmem:[%s23218_s27 + $0x50] sm:$0xff]  ;;  %s11990_s29 = sshll.u32 %s23035_s26, 4  ;;  %s11991_s29 = int_to_ptr.vmem [resolvable:$true] %s11990_s29 }
  0x30   : > { %v14801_v12 = vld [vmem:[%s15796_s28 + $0x48] sm:$0xff]  ;;  %v14800_v16 = vld [vmem:[%s15796_s28 + $0x40] sm:$0xff]  ;;  %v14795_v20 = vld [vmem:[%s15796_s28 + $0x18] sm:$0xff] }
  0x31   : > { %952 = vmatpush.bf16.msra.mxu0 %v14798_v5  ;;  %v14804_v17 = vld [vmem:[%s23219_s3 + $0x4] sm:$0xf]  ;;  %v12078_v18 = vld [vmem:[%s23219_s3 + $0x8] sm:$0xf0]  ;;  %v14794_v22 = vld [vmem:[%s15796_s28 + $0x10] sm:$0xff] }
  0x32   : > { %1005 = vmatpush.bf16.msra.mxu1 %v14802_v9  ;;  %v12081_v21 = vor.u32 %v14804_v17, %v12078_v18  ;;  %v701_v23 = vld [vmem:[%s23218_s27 + $0x78] sm:$0xff]  ;;  %v700_v24 = vld [vmem:[%s23218_s27 + $0x70] sm:$0xff]  ;;  %v699_v25 = vld [vmem:[%s23218_s27 + $0x68] sm:$0xff] }
  0x33   : > { %v14793_v26 = vld [vmem:[%s15796_s28 + $0x8] sm:$0xff]  ;;  %v14792_v27 = vld [vmem:[%s15796_s28] sm:$0xff]  ;;  %v688_v30 = vld [vmem:[%s23218_s27 + $0x10] sm:$0xff] }
  0x34   : > { %749 = vperm.xlu2 %15522, %v695_v7   ;;  %739 = vperm.xlu1 %15521, %v693_v8   ;;  %v12076_v28 = vld [vmem:[%s23219_s3] sm:$0xf]  ;;  %v14805_v29 = vld [vmem:[%s23219_s3 + $0x4] sm:$0xf0]  ;;  %v14806_v33 = vld [vmem:[%s23219_s3 + $0x14] sm:$0xf] }
  0x35   : > { %729 = vperm.xlu0 %15520, %v691_v10   ;;  %953 = vmatpush.bf16.msra.mxu0 %v14797_v11  ;;  %v687_v31 = vld [vmem:[%s23218_s27 + $0x8] sm:$0xff]  ;;  %v12077_v32 = vor.u32 %v14805_v29, %v12076_v28  ;;  %v12086_v34 = vld [vmem:[%s23219_s3 + $0x18] sm:$0xf0]  ;;  %v686_v35 = vld [vmem:[%s23218_s27] sm:$0xff] }
  0x36   : > { %1006 = vmatpush.bf16.msra.mxu1 %v14801_v12  ;;  %v12089_v36 = vor.u32 %v14806_v33, %v12086_v34  ;;  %v1694_v37 = vld [vmem:[%s23220_s5 + $0x8] sm:$0xff]  ;;  %v1693_v38 = vld [vmem:[%s23220_s5] sm:$0xff]  ;;  %v689_v39 = vld [vmem:[%s23218_s27 + $0x18] sm:$0xff] }
  0x37   : > { %v12084_v40 = vld [vmem:[%s23219_s3 + $0x10] sm:$0xf]  ;;  %v14807_v41 = vld [vmem:[%s23219_s3 + $0x14] sm:$0xf0]  ;;  %v1697_v42 = vld [vmem:[%s23220_s5 + $0x20] sm:$0xff] }
  0x38   : > { %v1696_v43 = vld [vmem:[%s23220_s5 + $0x18] sm:$0xff]  ;;  %v12085_v44 = vor.u32 %v14807_v41, %v12084_v40  ;;  %v14808_v45 = vld [vmem:[%s23219_s3 + $0x24] sm:$0xf]  ;;  %v12094_v46 = vld [vmem:[%s23219_s3 + $0x28] sm:$0xf0] }
  0x39   : > { %954 = vmatpush.bf16.msra.mxu0 %v14796_v13  ;;  %v1695_v47 = vld [vmem:[%s23220_s5 + $0x10] sm:$0xff]  ;;  %v12097_v48 = vor.u32 %v14808_v45, %v12094_v46  ;;  %v1700_v49 = vld [vmem:[%s23220_s5 + $0x38] sm:$0xff]  ;;  %v1698_v51 = vld [vmem:[%s23220_s5 + $0x28] sm:$0xff] }
  0x3a   : > { %1007 = vmatpush.bf16.msra.mxu1 %v14800_v16  ;;  %v1699_v50 = vld [vmem:[%s23220_s5 + $0x30] sm:$0xff]  ;;  %v12092_v52 = vld [vmem:[%s23219_s3 + $0x20] sm:$0xf]  ;;  %v14809_v53 = vld [vmem:[%s23219_s3 + $0x24] sm:$0xf0] }
  0x3b   : > { %v1703_v54 = vld [vmem:[%s23220_s5 + $0x50] sm:$0xff]  ;;  %v1702_v55 = vld [vmem:[%s23220_s5 + $0x48] sm:$0xff]  ;;  %v12093_v56 = vor.u32 %v14809_v53, %v12092_v52  ;;  %v12102_v58 = vld [vmem:[%s23219_s3 + $0x38] sm:$0xf0] }
  0x3c   : > { %764 = vperm.xlu2 %15522, %v698_v14   ;;  %759 = vperm.xlu1 %15521, %v697_v15   ;;  %v14810_v57 = vld [vmem:[%s23219_s3 + $0x34] sm:$0xf]  ;;  %v1701_v59 = vld [vmem:[%s23220_s5 + $0x40] sm:$0xff]  ;;  %v1706_v61 = vld [vmem:[%s23220_s5 + $0x68] sm:$0xff] }
  0x3d   : > { %754 = vperm.xlu0 %15520, %v696_v19   ;;  %955 = vmatpush.bf16.msra.mxu0 %v14795_v20  ;;  %v12105_v60 = vor.u32 %v14810_v57, %v12102_v58  ;;  %v1705_v62 = vld [vmem:[%s23220_s5 + $0x60] sm:$0xff]  ;;  %v1704_v63 = vld [vmem:[%s23220_s5 + $0x58] sm:$0xff]  ;;  %v12100_v0 = vld [vmem:[%s23219_s3 + $0x30] sm:$0xf] }
  0x3e   : > { %12186 = vmatmul.msk.bf16.vlgmr.msra.gmra.mxu1 %vm926_vm0, %v12081_v21  ;;  %v14811_v1 = vld [vmem:[%s23219_s3 + $0x34] sm:$0xf0]  ;;  %v1709_v2 = vld [vmem:[%s23220_s5 + $0x80] sm:$0xff]  ;;  %v12110_v6 = vld [vmem:[%s23219_s3 + $0x48] sm:$0xf0] }
  0x3f   : > { %v1708_v3 = vld [vmem:[%s23220_s5 + $0x78] sm:$0xff]  ;;  %v12101_v4 = vor.u32 %v14811_v1, %v12100_v0  ;;  %v14812_v5 = vld [vmem:[%s23219_s3 + $0x44] sm:$0xf]  ;;  %v1707_v7 = vld [vmem:[%s23220_s5 + $0x70] sm:$0xff] }
  0x40   : > { %v12113_v8 = vor.u32 %v14812_v5, %v12110_v6  ;;  %v1712_v9 = vld [vmem:[%s23220_s5 + $0x98] sm:$0xff]  ;;  %v1711_v10 = vld [vmem:[%s23220_s5 + $0x90] sm:$0xff]  ;;  %v1710_v11 = vld [vmem:[%s23220_s5 + $0x88] sm:$0xff]  ;;  %s15463_s5 = smul.u32 192, %s15754_s2  ;;  %s11978_s2 = scalar_lea.sflag [#allocation4], %s637_s0 }
  0x41   : > { %956 = vmatpush.bf16.msra.mxu0 %v14794_v22  ;;  %v12108_v12 = vld [vmem:[%s23219_s3 + $0x40] sm:$0xf]  ;;  %v14813_v13 = vld [vmem:[%s23219_s3 + $0x44] sm:$0xf0]  ;;  %v3007_v14 = vld [vmem:[%s23171_s8 + $0x10] sm:$0xff] }
  0x42   : > { %v3006_v15 = vld [vmem:[%s23171_s8 + $0x8] sm:$0xff]  ;;  %v12109_v16 = vor.u32 %v14813_v13, %v12108_v12  ;;  %v14814_v17 = vld [vmem:[%s23219_s3 + $0x54] sm:$0xf]  ;;  %v12118_v18 = vld [vmem:[%s23219_s3 + $0x58] sm:$0xf0]  ;;  %s11989_s23 = scalar_lea.hbm %s23183_s20, %s15463_s5  ;;  %s15573_s5 = scalar_lea.hbm %s23183_s20, 384 }
  0x43   : > { %v3005_v19 = vld [vmem:[%s23171_s8] sm:$0xff]  ;;  %v12121_v20 = vor.u32 %v14814_v17, %v12118_v18  ;;  %v3010_v21 = vld [vmem:[%s23171_s8 + $0x28] sm:$0xff]  ;;  %v14850_v28 = vld [vmem:[%s23221_s15 + $0xec] sm:$0xf0] }
  0x44   : > { %779 = vperm.xlu2 %15522, %v701_v23   ;;  %774 = vperm.xlu1 %15521, %v700_v24   ;;  %v3009_v22 = vld [vmem:[%s23171_s8 + $0x20] sm:$0xff]  ;;  %v3008_v23 = vld [vmem:[%s23171_s8 + $0x18] sm:$0xff]  ;;  %v12116_v24 = vld [vmem:[%s23219_s3 + $0x50] sm:$0xf] }
  0x45   : > { %769 = vperm.xlu0 %15520, %v699_v25   ;;  %957 = vmatpush.bf16.msra.mxu0 %v14793_v26  ;;  %v14815_v25 = vld [vmem:[%s23219_s3 + $0x54] sm:$0xf0]  ;;  %v3013_v26 = vld [vmem:[%s23171_s8 + $0x40] sm:$0xff]  ;;  %v12316_v34 = vld [vmem:[%s23221_s15 + $0xe8] sm:$0xf] }
  0x46   : > { %v3012_v29 = vld [vmem:[%s23171_s8 + $0x38] sm:$0xff]  ;;  %v12117_v33 = vor.u32 %v14815_v25, %v12116_v24  ;;  %v14842_v52 = vld [vmem:[%s23221_s15 + $0xac] sm:$0xf0]  ;;  %v14841_v58 = vld [vmem:[%s23221_s15 + $0xac] sm:$0xf] }
  0x47   : > { %v14847_v46 = vld [vmem:[%s23221_s15 + $0xd4] sm:$0xf0]  ;;  %v14817_v0 = vld [vmem:[%s23219_s3 + $0x64] sm:$0xf0]  ;;  %v12260_v1 = vld [vmem:[%s23221_s15 + $0x80] sm:$0xf] }
  0x48   : > { %v3016_v53 = vld [vmem:[%s23171_s8 + $0x58] sm:$0xff]  ;;  %v3017_v13 = vld [vmem:[%s23171_s8 + $0x60] sm:$0xff]  ;;  %v14834_v18 = vld [vmem:[%s23221_s15 + $0x6c] sm:$0xf0] }
  0x49   : > { %958 = vmatpush.bf16.msra.mxu0 %v14792_v27  ;;  %v12308_v27 = vld [vmem:[%s23221_s15 + $0xe0] sm:$0xf]  ;;  %v14843_v57 = vld [vmem:[%s23221_s15 + $0xb4] sm:$0xf0]  ;;  %v12254_v24 = vld [vmem:[%s23221_s15 + $0x78] sm:$0xf0] }
  0x4a   : > { %v14839_v6 = vld [vmem:[%s23221_s15 + $0x94] sm:$0xf0]  ;;  %v12244_v17 = vld [vmem:[%s23221_s15 + $0x60] sm:$0xf] }
  0x4c   : > { %714 = vperm.xlu2 %15522, %v688_v30   ;;  %709 = vperm.xlu1 %15521, %v687_v31   ;;  %v14816_v30 = vld [vmem:[%s23219_s3 + $0x64] sm:$0xf]  ;;  %v12126_v31 = vld [vmem:[%s23219_s3 + $0x68] sm:$0xf0] }
  0x4d   : > { %704 = vperm.xlu0 %15520, %v686_v35   ;;  %959 = vmatmul.bf16.vlgmr.msra.gmra.mxu0 %v12077_v32  ;;  %v12309_v32 = vor.u32 %v14850_v28, %v12308_v27  ;;  %v14851_v35 = vld [vmem:[%s23221_s15 + $0xf4] sm:$0xf0]  ;;  %v12129_v41 = vor.u32 %v14816_v30, %v12126_v31  ;;  %v12228_v28 = vld [vmem:[%s23221_s15 + $0x40] sm:$0xf]  ;;  %v12236_v30 = vld [vmem:[%s23221_s15 + $0x48] sm:$0xf] }
  0x4e   : > { %12187 = vmatmul.msk.bf16.gmra.mxu1 %vm926_vm0, %v12089_v36  ;;  %v14849_v36 = vld [vmem:[%s23221_s15 + $0xec] sm:$0xf] }
  0x4f   : > { %1265 = vmatpush.bf16.msra.mxu2 %v12309_v32  ;;  %15453 = vmatpush.bf16.msra.mxu3 %v12309_v32  ;;  %v14831_v32 = vld [vmem:[%s23221_s15 + $0x54] sm:$0xf0] }
  0x54   : > { %1720 = vperm.xlu2 %15522, %v1694_v37   ;;  %1715 = vperm.xlu1 %15521, %v1693_v38   ;;  %v3011_v37 = vld [vmem:[%s23171_s8 + $0x30] sm:$0xff]  ;;  %v12317_v38 = vor.u32 %v14851_v35, %v12316_v34  ;;  %v12238_v34 = vld [vmem:[%s23221_s15 + $0x58] sm:$0xf0]  ;;  %v12237_v35 = vor.u32 %v14831_v32, %v12236_v30 }
  0x55   : > { %719 = vperm.xlu0 %15520, %v689_v39   ;;  %v12318_v39 = vld [vmem:[%s23221_s15 + $0xf8] sm:$0xf0] }
  0x56   : > { %v12321_v40 = vor.u32 %v14849_v36, %v12318_v39  ;;  %1363 = vmatpush.bf16.msrb.mxu1 %v12317_v38  ;;  %v3022_v38 = vld [vmem:[%s23171_s8 + $0x88] sm:$0xff]  ;;  %v3021_v39 = vld [vmem:[%s23171_s8 + $0x80] sm:$0xff] }
  0x58   : > { %1412 = vmatpush.bf16.msrb.mxu0 %v12321_v40  ;;  %v3020_v40 = vld [vmem:[%s23171_s8 + $0x78] sm:$0xff] }
  0x5c   : > { %1735 = vperm.xlu2 %15522, %v1697_v42   ;;  %1730 = vperm.xlu1 %15521, %v1696_v43   ;;  %v12292_v42 = vld [vmem:[%s23221_s15 + $0xc0] sm:$0xf]  ;;  %v14846_v43 = vld [vmem:[%s23221_s15 + $0xcc] sm:$0xf0] }
  0x5d   : > { %1725 = vperm.xlu0 %15520, %v1695_v47   ;;  %964 = vmatmul.bf16.gmra.mxu0 %v12085_v44  ;;  %v12300_v44 = vld [vmem:[%s23221_s15 + $0xc8] sm:$0xf]  ;;  %v12293_v45 = vor.u32 %v14846_v43, %v12292_v42  ;;  %v14845_v47 = vld [vmem:[%s23221_s15 + $0xcc] sm:$0xf]  ;;  %v14826_v42 = vld [vmem:[%s23221_s15 + $0x2c] sm:$0xf0] }
  0x5e   : > { %12188 = vmatmul.msk.bf16.gmra.mxu1 %vm926_vm0, %v12097_v48  ;;  %v12302_v48 = vld [vmem:[%s23221_s15 + $0xd8] sm:$0xf0]  ;;  %v12220_v43 = vld [vmem:[%s23221_s15 + $0x28] sm:$0xf] }
  0x5f   : > { %1266 = vmatpush.bf16.msra.mxu2 %v12293_v45  ;;  %15454 = vmatpush.bf16.msra.mxu3 %v12293_v45  ;;  %v14827_v45 = vld [vmem:[%s23221_s15 + $0x34] sm:$0xf0] }
  0x64   : > { %1750 = vperm.xlu2 %15522, %v1700_v49   ;;  %1745 = vperm.xlu1 %15521, %v1699_v50   ;;  %v12301_v49 = vor.u32 %v14847_v46, %v12300_v44  ;;  %v12305_v50 = vor.u32 %v14845_v47, %v12302_v48  ;;  %v14825_v46 = vld [vmem:[%s23221_s15 + $0x2c] sm:$0xf]  ;;  %v12222_v47 = vld [vmem:[%s23221_s15 + $0x38] sm:$0xf0]  ;;  %v12221_v48 = vor.u32 %v14827_v45, %v12220_v43 }
  0x65   : > { %1740 = vperm.xlu0 %15520, %v1698_v51   ;;  %v12276_v51 = vld [vmem:[%s23221_s15 + $0xa0] sm:$0xf] }
  0x66   : > { %1364 = vmatpush.bf16.msrb.mxu1 %v12301_v49  ;;  %1413 = vmatpush.bf16.msrb.mxu0 %v12305_v50  ;;  %v12225_v49 = vor.u32 %v14825_v46, %v12222_v47  ;;  %v4806_v47 = vld [vmem:[%s23174_s11 + $0x40] sm:$0xff] }
  0x6c   : > { %1765 = vperm.xlu2 %15522, %v1703_v54   ;;  %1760 = vperm.xlu1 %15521, %v1702_v55   ;;  %v3015_v54 = vld [vmem:[%s23171_s8 + $0x50] sm:$0xff]  ;;  %v12277_v55 = vor.u32 %v14842_v52, %v12276_v51  ;;  %v14819_v52 = vld [vmem:[%s23219_s3 + $0x74] sm:$0xf0] }
  0x6d   : > { %1755 = vperm.xlu0 %15520, %v1701_v59   ;;  %969 = vmatmul.bf16.gmra.mxu0 %v12093_v56  ;;  %v12284_v56 = vld [vmem:[%s23221_s15 + $0xa8] sm:$0xf]  ;;  %v12132_v51 = vld [vmem:[%s23219_s3 + $0x70] sm:$0xf] }
  0x6e   : > { %12189 = vmatmul.msk.bf16.gmra.mxu1 %vm926_vm0, %v12105_v60  ;;  %v3014_v59 = vld [vmem:[%s23171_s8 + $0x48] sm:$0xff]  ;;  %v12285_v60 = vor.u32 %v14843_v57, %v12284_v56  ;;  %1267 = vmatpush.bf16.msra.mxu2 %v12277_v55 }
  0x6f   : > { %15455 = vmatpush.bf16.msra.mxu3 %v12277_v55  ;;  %v12204_v55 = vld [vmem:[%s23221_s15 + $0x8] sm:$0xf] }
  0x70   : > { %1365 = vmatpush.bf16.msrb.mxu1 %v12285_v60  ;;  %v12206_v60 = vld [vmem:[%s23221_s15 + $0x18] sm:$0xf0] }
  0x74   : > { %1780 = vperm.xlu2 %15522, %v1706_v61   ;;  %1775 = vperm.xlu1 %15521, %v1705_v62   ;;  %v12286_v61 = vld [vmem:[%s23221_s15 + $0xb8] sm:$0xf0] }
  0x75   : > { %1770 = vperm.xlu0 %15520, %v1704_v63   ;;  %v12289_v62 = vor.u32 %v14841_v58, %v12286_v61  ;;  %v12124_v63 = vld [vmem:[%s23219_s3 + $0x60] sm:$0xf]  ;;  %v14823_v58 = vld [vmem:[%s23221_s15 + $0x14] sm:$0xf0] }
  0x76   : > { %v12205_v61 = vor.u32 %v14823_v58, %v12204_v55  ;;  %v4810_v58 = vld [vmem:[%s23174_s11 + $0x60] sm:$0xff] }
  0x77   : > { %1414 = vmatpush.bf16.msrb.mxu0 %v12289_v62 }
  0x7c   : > { %1795 = vperm.xlu2 %15522, %v1709_v2   ;;  %1790 = vperm.xlu1 %15521, %v1708_v3   ;;  %v14838_v2 = vld [vmem:[%s23221_s15 + $0x8c] sm:$0xf0]  ;;  %v12268_v3 = vld [vmem:[%s23221_s15 + $0x88] sm:$0xf] }
  0x7d   : > { %1785 = vperm.xlu0 %15520, %v1707_v7   ;;  %974 = vmatmul.bf16.gmra.mxu0 %v12101_v4  ;;  %v12261_v5 = vor.u32 %v14838_v2, %v12260_v1  ;;  %v14837_v7 = vld [vmem:[%s23221_s15 + $0x8c] sm:$0xf]  ;;  %v12133_v1 = vor.u32 %v14819_v52, %v12132_v51 }
  0x7e   : > { %12190 = vmatmul.msk.bf16.gmra.mxu1 %vm926_vm0, %v12113_v8  ;;  %v12270_v8 = vld [vmem:[%s23221_s15 + $0x98] sm:$0xf0] }
  0x7f   : > { %v12273_v12 = vor.u32 %v14837_v7, %v12270_v8  ;;  %1268 = vmatpush.bf16.msra.mxu2 %v12261_v5  ;;  %15456 = vmatpush.bf16.msra.mxu3 %v12261_v5  ;;  %v3028_v8 = vld [vmem:[%s23171_s8 + $0xb8] sm:$0xff] }
  0x81   : > { %1415 = vmatpush.bf16.msrb.mxu0 %v12273_v12 }
  0x84   : > { %1810 = vperm.xlu2 %15522, %v1712_v9   ;;  %1805 = vperm.xlu1 %15521, %v1711_v10   ;;  %v3019_v9 = vld [vmem:[%s23171_s8 + $0x70] sm:$0xff]  ;;  %v3018_v10 = vld [vmem:[%s23171_s8 + $0x68] sm:$0xff] }
  0x85   : > { %1800 = vperm.xlu0 %15520, %v1710_v11   ;;  %v12269_v11 = vor.u32 %v14839_v6, %v12268_v3  ;;  %v3023_v3 = vld [vmem:[%s23171_s8 + $0x90] sm:$0xff] }
  0x86   : > { %v16219_v56 = vpop.permute.xlu2 %744 }
  0x87   : > { %1366 = vmatpush.bf16.msrb.mxu1 %v12269_v11 }
  0x8c   : > { %3043 = vperm.xlu2 %15522, %v3007_v14   ;;  %3038 = vperm.xlu1 %15521, %v3006_v15   ;;  %v14818_v14 = vld [vmem:[%s23219_s3 + $0x74] sm:$0xf]  ;;  %v12134_v15 = vld [vmem:[%s23219_s3 + $0x78] sm:$0xf0]  ;;  %s11992_s3 = sshll.u32 %s11989_s23, 4  ;;  %s11993_s3 = int_to_ptr.hbm [resolvable:$true] %s11992_s3 }
  0x8d   : > { %3033 = vperm.xlu0 %15520, %v3005_v19   ;;  %979 = vmatmul.bf16.gmra.mxu0 %v12109_v16  ;;  %v12125_v16 = vor.u32 %v14817_v0, %v12124_v63  ;;  %v12252_v19 = vld [vmem:[%s23221_s15 + $0x68] sm:$0xf]  ;;  %v12137_v27 = vor.u32 %v14818_v14, %v12134_v15  ;;  %v3025_v63 = vld [vmem:[%s23171_s8 + $0xa0] sm:$0xff]  ;;  %v3024_v0 = vld [vmem:[%s23171_s8 + $0x98] sm:$0xff]  ;;  %s15567_s1 = sshra.s32 %s11993_s3, 4  ;;  %s15568_s1 = int_to_ptr.hbm [resolvable:$true] %s15567_s1 }
  0x8e   : > { %12191 = vmatmul.msk.bf16.gmra.mxu1 %vm926_vm0, %v12121_v20  ;;  %v16243_v7 = vpop.permute.xlu2 %749  ;;  %v4798_v14 = vld [vmem:[%s23174_s11] sm:$0xff]  ;;  %v3030_v15 = vld [vmem:[%s23171_s8 + $0xc8] sm:$0xff]  ;;  %s15569_s25 = scalar_lea.hbm %s15568_s1, 192  ;;  %p15574_p3 = scmp.lt.s32.totalorder %s15568_s1, %s23183_s20 }
  0x8f   : > { %p15570_p0 = scmp.ne.s32.totalorder %s15568_s1, %s15569_s25  ;;  %p15575_p4 = scmp.lt.s32.totalorder %s15573_s5, %s15569_s25 }
  0x91   : > { %p15571_p1 = pnand %p15570_p0, %p15771_p5  ;;  %p15576_p7 = por %p15575_p4, %p15574_p3 }
  0x93   : > { %p15572_p2 = pneg %p15571_p1 }
  0x94   : > { %3058 = vperm.xlu2 %15522, %v3010_v21   ;;  %3053 = vperm.xlu1 %15521, %v3009_v22   ;;  %v12245_v21 = vor.u32 %v14834_v18, %v12244_v17  ;;  %v14835_v22 = vld [vmem:[%s23221_s15 + $0x74] sm:$0xf0]  ;;  %v3029_v18 = vld [vmem:[%s23171_s8 + $0xc0] sm:$0xff] }
  0x95   : > { %3048 = vperm.xlu0 %15520, %v3008_v23   ;;  %v14833_v23 = vld [vmem:[%s23221_s15 + $0x6c] sm:$0xf]  ;;  %v12253_v25 = vor.u32 %v14835_v22, %v12252_v19  ;;  %p15577_p8 = pnand %p15576_p7, %p15572_p2 }
  0x96   : > { %1269 = vmatpush.bf16.msra.mxu2 %v12245_v21  ;;  %15457 = vmatpush.bf16.msra.mxu3 %v12245_v21 }
  0x97   : > { %1367 = vmatpush.bf16.msrb.mxu1 %v12253_v25 }
  0x9b   : > { %1368 = vmatpush.bf16.msrb.mxu1 %v12237_v35 }
  0x9c   : > { %3073 = vperm.xlu2 %15522, %v3013_v26   ;;  %3068 = vperm.xlu1 %15521, %v3012_v29   ;;  %v12257_v26 = vor.u32 %v14833_v23, %v12254_v24  ;;  %v14830_v29 = vld [vmem:[%s23221_s15 + $0x4c] sm:$0xf0]  ;;  %v4801_v23 = vld [vmem:[%s23174_s11 + $0x18] sm:$0xff] }
  0x9d   : > { %3063 = vperm.xlu0 %15520, %v3011_v37   ;;  %984 = vmatmul.bf16.gmra.mxu0 %v12117_v33  ;;  %v12229_v31 = vor.u32 %v14830_v29, %v12228_v28  ;;  %v14829_v33 = vld [vmem:[%s23221_s15 + $0x4c] sm:$0xf]  ;;  %v4800_v24 = vld [vmem:[%s23174_s11 + $0x10] sm:$0xff] }
  0x9e   : > { %12192 = vmatmul.msk.bf16.gmra.mxu1 %vm926_vm0, %v12129_v41  ;;  %v16143_v20 = vpop.permute.xlu1 %734  ;;  %1416 = vmatpush.bf16.msrb.mxu0 %v12257_v26  ;;  %v12241_v36 = vor.u32 %v14829_v33, %v12238_v34  ;;  %v12212_v41 = vld [vmem:[%s23221_s15 + $0x20] sm:$0xf] }
  0x9f   : > { %v16108_v4 = vpop.permute.xlu0 %724  ;;  %1270 = vmatpush.bf16.msra.mxu2 %v12229_v31  ;;  %v12213_v44 = vor.u32 %v14826_v42, %v12212_v41  ;;  %15458 = vmatpush.bf16.msra.mxu3 %v12229_v31 }
  0xa0   : > { %1369 = vmatpush.bf16.msrb.mxu1 %v12221_v48  ;;  %v4805_v48 = vld [vmem:[%s23174_s11 + $0x38] sm:$0xff] }
  0xa2   : > { %1417 = vmatpush.bf16.msrb.mxu0 %v12241_v36  ;;  %v4804_v36 = vld [vmem:[%s23174_s11 + $0x30] sm:$0xff] }
  0xa3   : > { %1271 = vmatpush.bf16.msra.mxu2 %v12213_v44  ;;  %15459 = vmatpush.bf16.msra.mxu3 %v12213_v44  ;;  %v4807_v44 = vld [vmem:[%s23174_s11 + $0x48] sm:$0xff] }
  0xa4   : > { %3088 = vperm.xlu2 %15522, %v3016_v53   ;;  %3083 = vperm.xlu1 %15521, %v3015_v54   ;;  %v12196_v53 = vld [vmem:[%s23221_s15] sm:$0xf]  ;;  %v14822_v54 = vld [vmem:[%s23221_s15 + $0xc] sm:$0xf0] }
  0xa5   : > { %3078 = vperm.xlu0 %15520, %v3014_v59   ;;  %v12197_v57 = vor.u32 %v14822_v54, %v12196_v53  ;;  %v14821_v59 = vld [vmem:[%s23221_s15 + $0xc] sm:$0xf]  ;;  %1370 = vmatpush.bf16.msrb.mxu1 %v12205_v61  ;;  %v4808_v61 = vld [vmem:[%s23174_s11 + $0x50] sm:$0xff] }
  0xa6   : > { %v16202_v50 = vpop.permute.xlu1 %739  ;;  %1418 = vmatpush.bf16.msrb.mxu0 %v12225_v49  ;;  %v12209_v62 = vor.u32 %v14821_v59, %v12206_v60  ;;  %v4809_v60 = vld [vmem:[%s23174_s11 + $0x58] sm:$0xff] }
  0xa7   : > { %v16172_v37 = vpop.permute.xlu0 %729  ;;  %1272 = vmatpush.bf16.msra.mxu2 %v12197_v57  ;;  %15460 = vmatpush.bf16.msra.mxu3 %v12197_v57 }
  0xaa   : > { %1419 = vmatpush.bf16.msrb.mxu0 %v12209_v62 }
  0xac   : > { %3103 = vperm.xlu2 %15522, %v3019_v9   ;;  %3098 = vperm.xlu1 %15521, %v3018_v10   ;;  %v3027_v9 = vld [vmem:[%s23171_s8 + $0xb0] sm:$0xff]  ;;  %v3026_v10 = vld [vmem:[%s23171_s8 + $0xa8] sm:$0xff] }
  0xad   : > { %3093 = vperm.xlu0 %15520, %v3017_v13   ;;  %989 = vmatmul.bf16.gmra.mxu0 %v12125_v16  ;;  %v16264_v16 = vpop.permute.xlu2 %764 }
  0xae   : > { %12193 = vmatmul.msk.bf16.gmra.mxu1 %vm926_vm0, %v12137_v27  ;;  %v16241_v6 = vpop.permute.xlu1 %759  ;;  %v4799_v27 = vld [vmem:[%s23174_s11 + $0x8] sm:$0xff] }
  0xaf   : > { %v16236_v2 = vpop.permute.xlu0 %754 }
  0xb4   : > { %3118 = vperm.xlu2 %15522, %v3022_v38   ;;  %3113 = vperm.xlu1 %15521, %v3021_v39   ;;  %v4803_v39 = vld [vmem:[%s23174_s11 + $0x28] sm:$0xff] }
  0xb5   : > { %3108 = vperm.xlu0 %15520, %v3020_v40   ;;  %v16278_v30 = vpop.permute.xlu2 %779  ;;  %v4802_v40 = vld [vmem:[%s23174_s11 + $0x20] sm:$0xff] }
  0xb6   : > { %v16256_v13 = vpop.permute.xlu1 %774 }
  0xb7   : > { %v16254_v11 = vpop.permute.xlu0 %769 }
  0xbb   : > { %v1009_v5 = vpop.f32.mrf.mxu1 }
  0xbc   : > { %3133 = vperm.xlu2 %15522, %v3025_v63   ;;  %3128 = vperm.xlu1 %15521, %v3024_v0   ;;  %v4813_v0 = vld [vmem:[%s23174_s11 + $0x78] sm:$0xff] }
  0xbd   : > { %3123 = vperm.xlu0 %15520, %v3023_v3   ;;  %994 = vmatmul.bf16.gmra.mxu0 %v12133_v1  ;;  %v715_v42 = vpop.permute.xlu2 %714  ;;  %v4812_v3 = vld [vmem:[%s23174_s11 + $0x70] sm:$0xff] }
  0xbe   : > { %v710_v25 = vpop.permute.xlu1 %709 }
  0xbf   : > { %v705_v21 = vpop.permute.xlu0 %704 }
  0xc3   : > { %v1011_v12 = vpop.f32.mrf.mxu1 }
  0xc4   : > { %3148 = vperm.xlu2 %15522, %v3028_v8   ;;  %3143 = vperm.xlu1 %15521, %v3027_v9  }
  0xc5   : > { %3138 = vperm.xlu0 %15520, %v3026_v10  }
  0xc7   : > { %v720_v45 = vpop.permute.xlu0 %719 }
  0xca   : > { %v960_v17 = vpop.f32.mrf.mxu0 }
  0xcb   : > { %v1014_v19 = vpop.f32.mrf.mxu1  ;;  %v961_v22 = vadd.f32 %v960_v17, %v705_v21  ;;  %v4816_v17 = vld [vmem:[%s23174_s11 + $0x90] sm:$0xff] }
  0xcc   : > { %4829 = vperm.xlu2 %15522, %v4798_v14   ;;  %3158 = vperm.xlu1 %15521, %v3030_v15  }
  0xcd   : > { %3153 = vperm.xlu0 %15520, %v3029_v18   ;;  %v1010_v28 = vadd.f32 %v1009_v5, %v961_v22  ;;  %v4811_v5 = vld [vmem:[%s23174_s11 + $0x68] sm:$0xff] }
  0xcf   : > { %v1049_v33 = vmax.f32 %v1010_v28, 0.0 }
  0xd2   : > { %v962_v26 = vpop.f32.mrf.mxu0 }
  0xd3   : > { %v963_v29 = vadd.f32 %v962_v26, %v710_v25  ;;  %v1016_v32 = vpop.f32.mrf.mxu1  ;;  %v4818_v25 = vld [vmem:[%s23174_s11 + $0xa0] sm:$0xff]  ;;  %v4817_v26 = vld [vmem:[%s23174_s11 + $0x98] sm:$0xff] }
  0xd4   : > { %4844 = vperm.xlu2 %15522, %v4801_v23   ;;  %4839 = vperm.xlu1 %15521, %v4800_v24   ;;  %v4819_v23 = vld [vmem:[%s23174_s11 + $0xa8] sm:$0xff] }
  0xd5   : > { %v1012_v31 = vadd.f32 %v1011_v12, %v963_v29  ;;  %4834 = vperm.xlu0 %15520, %v4799_v27  }
  0xd7   : > { %v1050_v34 = vmax.f32 %v1012_v31, 0.0 }
  0xd9   : > { %v16280_v35 = vpack.c.bf16 %v1050_v34, %v1049_v33  ;;  %v4822_v34 = vld [vmem:[%s23174_s11 + $0xc0] sm:$0xff] }
  0xda   : > { %v965_v38 = vpop.f32.mrf.mxu0 }
  0xdb   : > { %1273 = vmatmul.bf16.vlgmr.msra.gmra.mxu2 %v16280_v35  ;;  %1371 = vmatmul.bf16.vlgmr.msrb.gmra.mxu1 %v16280_v35  ;;  %v1019_v41 = vpop.f32.mrf.mxu1  ;;  %v966_v43 = vadd.f32 %v965_v38, %v715_v42  ;;  %v4821_v38 = vld [vmem:[%s23174_s11 + $0xb8] sm:$0xff]  ;;  %v4824_v42 = vld [vmem:[%s23174_s11 + $0xd0] sm:$0xff] }
  0xdc   : > { %1420 = vmatmul.bf16.vlgmr.msrb.gmra.mxu0 %v16280_v35  ;;  %4859 = vperm.xlu2 %15522, %v4804_v36  }
  0xdd   : > { %4854 = vperm.xlu1 %15521, %v4803_v39   ;;  %4849 = vperm.xlu0 %15520, %v4802_v40   ;;  %v1015_v49 = vadd.f32 %v1014_v19, %v966_v43  ;;  %v4815_v19 = vld [vmem:[%s23174_s11 + $0x88] sm:$0xff]  ;;  %v4825_v40 = vld [vmem:[%s23174_s11 + $0xd8] sm:$0xff] }
  0xde   : > { %v4823_v43 = vld [vmem:[%s23174_s11 + $0xc8] sm:$0xff] }
  0xdf   : > { %v1051_v54 = vmax.f32 %v1015_v49, 0.0 }
  0xe2   : > { %v967_v46 = vpop.f32.mrf.mxu0 }
  0xe3   : > { %v968_v51 = vadd.f32 %v967_v46, %v720_v45  ;;  %v1021_v53 = vpop.f32.mrf.mxu1 }
  0xe4   : > { %4874 = vperm.xlu2 %15522, %v4807_v44  }
  0xe5   : > { %v1017_v52 = vadd.f32 %v1016_v32, %v968_v51  ;;  %4869 = vperm.xlu1 %15521, %v4806_v47   ;;  %4864 = vperm.xlu0 %15520, %v4805_v48   ;;  %v7101_v51 = vld [vmem:[%s23177_s14 + $0x8] sm:$0xff] }
  0xe7   : > { %v1052_v55 = vmax.f32 %v1017_v52, 0.0  ;;  %v7100_v52 = vld [vmem:[%s23177_s14] sm:$0xff] }
  0xe9   : > { %v16303_v57 = vpack.c.bf16 %v1052_v55, %v1051_v54  ;;  %v14848_v54 = vld [vmem:[%s23221_s15 + $0xe4] sm:$0xf]  ;;  %v12310_v55 = vld [vmem:[%s23221_s15 + $0xf0] sm:$0xf0] }
  0xea   : > { %v970_v59 = vpop.f32.mrf.mxu0 }
  0xeb   : > { %1278 = vmatmul.bf16.gmra.mxu2 %v16303_v57  ;;  %1376 = vmatmul.bf16.gmra.mxu1 %v16303_v57  ;;  %v1024_v62 = vpop.f32.mrf.mxu1  ;;  %v971_v63 = vadd.f32 %v970_v59, %v16108_v4 }
  0xec   : > { %1425 = vmatmul.bf16.gmra.mxu0 %v16303_v57  ;;  %4889 = vperm.xlu2 %15522, %v4810_v58   ;;  %v12313_v58 = vor.u32 %v14848_v54, %v12310_v55  ;;  %v7111_v54 = vld [vmem:[%s23177_s14 + $0x58] sm:$0xff] }
  0xed   : > { %4884 = vperm.xlu1 %15521, %v4809_v60   ;;  %4879 = vperm.xlu0 %15520, %v4808_v61   ;;  %v1020_v8 = vadd.f32 %v1019_v41, %v971_v63  ;;  %v14844_v60 = vld [vmem:[%s23221_s15 + $0xc4] sm:$0xf]  ;;  %v12294_v61 = vld [vmem:[%s23221_s15 + $0xd0] sm:$0xf0] }
  0xee   : > { %1314 = vmatpush.bf16.msrb.mxu3 %v12313_v58  ;;  %v12297_v63 = vor.u32 %v14844_v60, %v12294_v61  ;;  %v7116_v58 = vld [vmem:[%s23177_s14 + $0x80] sm:$0xff]  ;;  %v7115_v60 = vld [vmem:[%s23177_s14 + $0x78] sm:$0xff]  ;;  %v7114_v61 = vld [vmem:[%s23177_s14 + $0x70] sm:$0xff] }
  0xef   : > { %v1053_v12 = vmax.f32 %v1020_v8, 0.0  ;;  %v14840_v8 = vld [vmem:[%s23221_s15 + $0xa4] sm:$0xf] }
  0xf2   : > { %v972_v1 = vpop.f32.mrf.mxu0  ;;  %1315 = vmatpush.bf16.msrb.mxu3 %v12297_v63 }
  0xf3   : > { %v973_v9 = vadd.f32 %v972_v1, %v16172_v37  ;;  %v1026_v4 = vpop.f32.mrf.mxu1  ;;  %v4814_v37 = vld [vmem:[%s23174_s11 + $0x80] sm:$0xff]  ;;  %v7103_v1 = vld [vmem:[%s23177_s14 + $0x18] sm:$0xff] }
  0xf4   : > { %4904 = vperm.xlu2 %15522, %v4813_v0   ;;  %v7104_v0 = vld [vmem:[%s23177_s14 + $0x20] sm:$0xff] }
  0xf5   : > { %v1022_v10 = vadd.f32 %v1021_v53, %v973_v9  ;;  %4899 = vperm.xlu1 %15521, %v4812_v3   ;;  %4894 = vperm.xlu0 %15520, %v4811_v5   ;;  %v7102_v5 = vld [vmem:[%s23177_s14 + $0x10] sm:$0xff] }
  0xf7   : > { %v1054_v14 = vmax.f32 %v1022_v10, 0.0 }
  0xf9   : > { %v16328_v15 = vpack.c.bf16 %v1054_v14, %v1053_v12 }
  0xfa   : > { %v975_v18 = vpop.f32.mrf.mxu0 }
  0xfb   : > { %1283 = vmatmul.bf16.vlgmr.msra.gmra.mxu3 %v16328_v15  ;;  %1381 = vmatmul.bf16.gmra.mxu1 %v16328_v15  ;;  %v1029_v21 = vpop.f32.mrf.mxu1  ;;  %v976_v22 = vadd.f32 %v975_v18, %v16143_v20  ;;  %v12262_v18 = vld [vmem:[%s23221_s15 + $0x90] sm:$0xf0] }
  0xfc   : > { %1430 = vmatmul.bf16.gmra.mxu0 %v16328_v15  ;;  %4919 = vperm.xlu2 %15522, %v4816_v17   ;;  %v14836_v17 = vld [vmem:[%s23221_s15 + $0x84] sm:$0xf] }
  0xfd   : > { %4914 = vperm.xlu1 %15521, %v4815_v19   ;;  %4909 = vperm.xlu0 %15520, %v4814_v37   ;;  %v1025_v27 = vadd.f32 %v1024_v62, %v976_v22 }
  0xff   : > { %v1055_v20 = vmax.f32 %v1025_v27, 0.0  ;;  %v12246_v27 = vld [vmem:[%s23221_s15 + $0x70] sm:$0xf0] }
 0x102   : > { %v977_v24 = vpop.f32.mrf.mxu0 }
 0x103   : > { %v978_v28 = vadd.f32 %v977_v24, %v16202_v50  ;;  %v1031_v32 = vpop.f32.mrf.mxu1  ;;  %v4820_v50 = vld [vmem:[%s23174_s11 + $0xb0] sm:$0xff] }
 0x104   : > { %4934 = vperm.xlu2 %15522, %v4819_v23   ;;  %v7106_v23 = vld [vmem:[%s23177_s14 + $0x30] sm:$0xff] }
 0x105   : > { %v1027_v29 = vadd.f32 %v1026_v4, %v978_v28  ;;  %4929 = vperm.xlu1 %15521, %v4818_v25   ;;  %4924 = vperm.xlu0 %15520, %v4817_v26   ;;  %v7105_v25 = vld [vmem:[%s23177_s14 + $0x28] sm:$0xff]  ;;  %v14832_v26 = vld [vmem:[%s23221_s15 + $0x64] sm:$0xf] }
 0x106   : > { %v12249_v28 = vor.u32 %v14832_v26, %v12246_v27  ;;  %v9429_v27 = vld [vmem:[%s23180_s17 + $0x40] sm:$0xff] }
 0x107   : > { %v1056_v31 = vmax.f32 %v1027_v29, 0.0  ;;  %v14828_v29 = vld [vmem:[%s23221_s15 + $0x44] sm:$0xf] }
 0x109   : > { %v16353_v33 = vpack.c.bf16 %v1056_v31, %v1055_v20  ;;  %v12230_v20 = vld [vmem:[%s23221_s15 + $0x50] sm:$0xf0] }
 0x10a   : > { %v980_v36 = vpop.f32.mrf.mxu0 }
 0x10b   : > { %1288 = vmatmul.bf16.gmra.mxu3 %v16353_v33  ;;  %1386 = vmatmul.bf16.gmra.mxu1 %v16353_v33  ;;  %v981_v39 = vadd.f32 %v980_v36, %v16219_v56  ;;  %v1034_v44 = vpop.f32.mrf.mxu1  ;;  %v12214_v36 = vld [vmem:[%s23221_s15 + $0x30] sm:$0xf0] }
 0x10c   : > { %1435 = vmatmul.bf16.gmra.mxu0 %v16353_v33  ;;  %4949 = vperm.xlu2 %15522, %v4822_v34   ;;  %v14824_v34 = vld [vmem:[%s23221_s15 + $0x24] sm:$0xf] }
 0x10d   : > { %4944 = vperm.xlu1 %15521, %v4821_v38   ;;  %4939 = vperm.xlu0 %15520, %v4820_v50   ;;  %v1030_v45 = vadd.f32 %v1029_v21, %v981_v39  ;;  %v12265_v21 = vor.u32 %v14836_v17, %v12262_v18  ;;  %v7110_v50 = vld [vmem:[%s23177_s14 + $0x50] sm:$0xff] }
 0x10e   : > { %v9423_v17 = vld [vmem:[%s23180_s17 + $0x10] sm:$0xff] }
 0x10f   : > { %v1057_v56 = vmax.f32 %v1030_v45, 0.0  ;;  %v14820_v45 = vld [vmem:[%s23221_s15 + $0x4] sm:$0xf] }
 0x112   : > { %v982_v41 = vpop.f32.mrf.mxu0 }
 0x113   : > { %v983_v46 = vadd.f32 %v982_v41, %v16243_v7  ;;  %v4826_v7 = vld [vmem:[%s23174_s11 + $0xe0] sm:$0xff]  ;;  %v1036_v59 = vpop.f32.mrf.mxu1  ;;  %v12217_v41 = vor.u32 %v14824_v34, %v12214_v36  ;;  %v9432_v34 = vld [vmem:[%s23180_s17 + $0x58] sm:$0xff]  ;;  %v9431_v36 = vld [vmem:[%s23180_s17 + $0x50] sm:$0xff] }
 0x114   : > { %4964 = vperm.xlu2 %15522, %v4825_v40   ;;  %v7109_v40 = vld [vmem:[%s23177_s14 + $0x48] sm:$0xff] }
 0x115   : > { %v1032_v47 = vadd.f32 %v1031_v32, %v983_v46  ;;  %4959 = vperm.xlu1 %15521, %v4824_v42   ;;  %4954 = vperm.xlu0 %15520, %v4823_v43   ;;  %v12233_v32 = vor.u32 %v14828_v29, %v12230_v20  ;;  %v12198_v46 = vld [vmem:[%s23221_s15 + $0x10] sm:$0xf0]  ;;  %v9428_v29 = vld [vmem:[%s23180_s17 + $0x38] sm:$0xff] }
 0x116   : > { %v9427_v20 = vld [vmem:[%s23180_s17 + $0x30] sm:$0xff] }
 0x117   : > { %v1058_v48 = vmax.f32 %v1032_v47, 0.0 }
 0x119   : > { %v16378_v49 = vpack.c.bf16 %v1058_v48, %v1057_v56  ;;  %v12201_v48 = vor.u32 %v14820_v45, %v12198_v46  ;;  %v9438_v45 = vld [vmem:[%s23180_s17 + $0x88] sm:$0xff]  ;;  %v9437_v46 = vld [vmem:[%s23180_s17 + $0x80] sm:$0xff] }
 0x11a   : > { %v985_v53 = vpop.f32.mrf.mxu0 }
 0x11b   : > { %1293 = vmatmul.bf16.gmra.mxu3 %v16378_v49  ;;  %1391 = vmatmul.bf16.gmra.mxu1 %v16378_v49  ;;  %v986_v62 = vadd.f32 %v985_v53, %v16236_v2  ;;  %v12278_v2 = vld [vmem:[%s23221_s15 + $0xb0] sm:$0xf0]  ;;  %v1039_v14 = vpop.f32.mrf.mxu1 }
 0x11c   : > { %1440 = vmatmul.bf16.gmra.mxu0 %v16378_v49  ;;  %7130 = vperm.xlu2 %15522, %v7101_v51   ;;  %v12281_v4 = vor.u32 %v14840_v8, %v12278_v2  ;;  %v7119_v8 = vld [vmem:[%s23177_s14 + $0x98] sm:$0xff]  ;;  %v7118_v2 = vld [vmem:[%s23177_s14 + $0x90] sm:$0xff] }
 0x11d   : > { %7125 = vperm.xlu1 %15521, %v7100_v52   ;;  %4969 = vperm.xlu0 %15520, %v4826_v7   ;;  %v1035_v9 = vadd.f32 %v1034_v44, %v986_v62  ;;  %v7112_v7 = vld [vmem:[%s23177_s14 + $0x60] sm:$0xff] }
 0x11e   : > { %1316 = vmatpush.bf16.msrb.mxu3 %v12281_v4  ;;  %v7120_v4 = vld [vmem:[%s23177_s14 + $0xa0] sm:$0xff] }
 0x11f   : > { %v1059_v19 = vmax.f32 %v1035_v9, 0.0  ;;  %v7122_v9 = vld [vmem:[%s23177_s14 + $0xb0] sm:$0x7f] }
 0x122   : > { %v987_v3 = vpop.f32.mrf.mxu0  ;;  %1317 = vmatpush.bf16.msrb.mxu3 %v12265_v21 }
 0x123   : > { %v988_v10 = vadd.f32 %v987_v3, %v16241_v6  ;;  %v7107_v6 = vld [vmem:[%s23177_s14 + $0x38] sm:$0xff]  ;;  %v1041_v38 = vpop.f32.mrf.mxu1 }
 0x124   : > { %7145 = vperm.xlu2 %15522, %v7104_v0  }
 0x125   : > { %v1037_v12 = vadd.f32 %v1036_v59, %v988_v10  ;;  %7140 = vperm.xlu1 %15521, %v7103_v1   ;;  %7135 = vperm.xlu0 %15520, %v7102_v5   ;;  %v7121_v10 = vld [vmem:[%s23177_s14 + $0xa8] sm:$0xff] }
 0x126   : > { %1318 = vmatpush.bf16.msrb.mxu3 %v12249_v28 }
 0x127   : > { %v1060_v37 = vmax.f32 %v1037_v12, 0.0 }
 0x129   : > { %v16427_v22 = vpack.c.bf16 %v1060_v37, %v1059_v19  ;;  %v9422_v19 = vld [vmem:[%s23180_s17 + $0x8] sm:$0xff]  ;;  %v9421_v37 = vld [vmem:[%s23180_s17] sm:$0xff] }
 0x12a   : > { %v990_v24 = vpop.f32.mrf.mxu0  ;;  %1319 = vmatpush.bf16.msrb.mxu3 %v12233_v32 }
 0x12b   : > { %1298 = vmatmul.bf16.gmra.mxu3 %v16427_v22  ;;  %1396 = vmatmul.bf16.gmra.mxu1 %v16427_v22  ;;  %v991_v31 = vadd.f32 %v990_v24, %v16264_v16  ;;  %v7108_v16 = vld [vmem:[%s23177_s14 + $0x40] sm:$0xff]  ;;  %v1044_v52 = vpop.f32.mrf.mxu1 }
 0x12c   : > { %1445 = vmatmul.bf16.gmra.mxu0 %v16427_v22  ;;  %7160 = vperm.xlu2 %15522, %v7107_v6   ;;  %v9425_v24 = vld [vmem:[%s23180_s17 + $0x20] sm:$0xff] }
 0x12d   : > { %7155 = vperm.xlu1 %15521, %v7106_v23   ;;  %7150 = vperm.xlu0 %15520, %v7105_v25   ;;  %v1040_v42 = vadd.f32 %v1039_v14, %v991_v31  ;;  %v9426_v23 = vld [vmem:[%s23180_s17 + $0x28] sm:$0xff]  ;;  %v9424_v25 = vld [vmem:[%s23180_s17 + $0x18] sm:$0xff] }
 0x12e   : > { %1320 = vmatpush.bf16.msrb.mxu3 %v12217_v41  ;;  %v9433_v41 = vld [vmem:[%s23180_s17 + $0x60] sm:$0xff] }
 0x12f   : > { %v1061_v47 = vmax.f32 %v1040_v42, 0.0 }
 0x132   : > { %v992_v39 = vpop.f32.mrf.mxu0  ;;  %1321 = vmatpush.bf16.msrb.mxu3 %v12201_v48 }
 0x133   : > { %v993_v43 = vadd.f32 %v992_v39, %v16254_v11  ;;  %v7113_v11 = vld [vmem:[%s23177_s14 + $0x68] sm:$0xff]  ;;  %v1046_v0 = vpop.f32.mrf.mxu1  ;;  %v9435_v39 = vld [vmem:[%s23180_s17 + $0x70] sm:$0xff] }
 0x134   : > { %7175 = vperm.xlu2 %15522, %v7110_v50  }
 0x135   : > { %v1042_v44 = vadd.f32 %v1041_v38, %v993_v43  ;;  %7170 = vperm.xlu1 %15521, %v7109_v40   ;;  %7165 = vperm.xlu0 %15520, %v7108_v16   ;;  %v9430_v38 = vld [vmem:[%s23180_s17 + $0x48] sm:$0xff] }
 0x136   : > { %v9434_v16 = vld [vmem:[%s23180_s17 + $0x68] sm:$0xff] }
 0x137   : > { %v1062_v56 = vmax.f32 %v1042_v44, 0.0 }
 0x139   : > { %v16476_v51 = vpack.c.bf16 %v1062_v56, %v1061_v47 }
 0x13a   : > { %v995_v53 = vpop.f32.mrf.mxu0 }
 0x13b   : > { %1303 = vmatmul.bf16.gmra.mxu3 %v16476_v51  ;;  %1401 = vmatmul.bf16.gmra.mxu1 %v16476_v51  ;;  %v996_v55 = vadd.f32 %v995_v53, %v16256_v13  ;;  %v9440_v53 = vld [vmem:[%s23180_s17 + $0x98] sm:$0xff] }
 0x13c   : > { %1450 = vmatmul.bf16.gmra.mxu0 %v16476_v51  ;;  %7190 = vperm.xlu2 %15522, %v7113_v11   ;;  %v9441_v11 = vld [vmem:[%s23180_s17 + $0xa0] sm:$0xff] }
 0x13d   : > { %7185 = vperm.xlu1 %15521, %v7112_v7   ;;  %7180 = vperm.xlu0 %15520, %v7111_v54   ;;  %v1045_v62 = vadd.f32 %v1044_v52, %v996_v55  ;;  %v9439_v7 = vld [vmem:[%s23180_s17 + $0x90] sm:$0xff] }
 0x13f   : > { %v1063_v13 = vmax.f32 %v1045_v62, 0.0 }
 0x142   : > { %v997_v59 = vpop.f32.mrf.mxu0 }
 0x143   : > { %v998_v63 = vadd.f32 %v997_v59, %v16278_v30  ;;  %v7117_v30 = vld [vmem:[%s23177_s14 + $0x88] sm:$0xff]  ;;  %v9444_v59 = vld [vmem:[%s23180_s17 + $0xb8] sm:$0xff] }
 0x144   : > { %7205 = vperm.xlu2 %15522, %v7116_v58  }
 0x145   : > { %v1047_v1 = vadd.f32 %v1046_v0, %v998_v63  ;;  %7200 = vperm.xlu1 %15521, %v7115_v60   ;;  %7195 = vperm.xlu0 %15520, %v7114_v61   ;;  %v9443_v60 = vld [vmem:[%s23180_s17 + $0xb0] sm:$0xff] }
 0x146   : > { %v9447_v0 = vld [vmem:[%s23180_s17 + $0xd0] sm:$0xff] }
 0x147   : > { %v1064_v3 = vmax.f32 %v1047_v1, 0.0 }
 0x149   : > { %v16501_v5 = vpack.c.bf16 %v1064_v3, %v1063_v13  ;;  %v9446_v13 = vld [vmem:[%s23180_s17 + $0xc8] sm:$0xff]  ;;  %v9445_v3 = vld [vmem:[%s23180_s17 + $0xc0] sm:$0xff] }
 0x14b   : > { %1308 = vmatmul.bf16.gmra.mxu3 %v16501_v5  ;;  %1406 = vmatmul.bf16.gmra.mxu1 %v16501_v5 }
 0x14c   : > { %1455 = vmatmul.bf16.gmra.mxu0 %v16501_v5  ;;  %7220 = vperm.xlu2 %15522, %v7119_v8  }
 0x14d   : > { %7215 = vperm.xlu1 %15521, %v7118_v2   ;;  %7210 = vperm.xlu0 %15520, %v7117_v30  }
 0x154   : > { %7235 = vperm.xlu2 %15522, %v7122_v9   ;;  %v9450_v9 = vld [vmem:[%s23180_s17 + $0xe8] sm:$0xff] }
 0x155   : > { %7230 = vperm.xlu1 %15521, %v7121_v10   ;;  %7225 = vperm.xlu0 %15520, %v7120_v4   ;;  %v9449_v10 = vld [vmem:[%s23180_s17 + $0xe0] sm:$0xff] }
 0x158   : > { %v1372_v12 = vpop.f32.mrf.mxu1 }
 0x159   : > { %v1421_v14 = vpop.f32.mrf.mxu0 }
 0x15a   : > { %v16527_v18 = vpack.c.bf16 %v1421_v14, %v1372_v12 }
 0x15b   : > { %1322 = vmatmul.bf16.vlgmr.msrb.gmra.mxu3 %v16280_v35 }
 0x15c   : > { %9480 = vperm.xlu2 %15522, %v9423_v17   ;;  %v9453_v17 = vld [vmem:[%s23180_s17 + $0x100] sm:$0xff] }
 0x15d   : > { %9475 = vperm.xlu1 %15521, %v9422_v19   ;;  %9470 = vperm.xlu0 %15520, %v9421_v37   ;;  %v9452_v19 = vld [vmem:[%s23180_s17 + $0xf8] sm:$0xff]  ;;  %v9451_v37 = vld [vmem:[%s23180_s17 + $0xf0] sm:$0xff] }
 0x160   : > { %v16536_v21 = vpop.f32.mrf.mxu1 }
 0x161   : > { %v16538_v6 = vpop.f32.mrf.mxu0 }
 0x164   : > { %9495 = vperm.xlu2 %15522, %v9426_v23  }
 0x165   : > { %9490 = vperm.xlu1 %15521, %v9425_v24   ;;  %9485 = vperm.xlu0 %15520, %v9424_v25  }
 0x168   : > { %v1377_v35 = vpop.f32.mrf.mxu1 }
 0x169   : > { %v1426_v26 = vpop.f32.mrf.mxu0 }
 0x16a   : > { %v16552_v28 = vpack.c.bf16 %v1426_v26, %v1377_v35  ;;  %v9456_v35 = vld [vmem:[%s23180_s17 + $0x118] sm:$0xff]  ;;  %v9455_v26 = vld [vmem:[%s23180_s17 + $0x110] sm:$0xff] }
 0x16b   : > { %1327 = vmatmul.bf16.gmra.mxu3 %v16303_v57 }
 0x16c   : > { %9510 = vperm.xlu2 %15522, %v9429_v27   ;;  %v9454_v27 = vld [vmem:[%s23180_s17 + $0x108] sm:$0xff] }
 0x16d   : > { %9505 = vperm.xlu1 %15521, %v9428_v29   ;;  %9500 = vperm.xlu0 %15520, %v9427_v20  }
 0x170   : > { %v16561_v31 = vpop.f32.mrf.mxu1 }
 0x171   : > { %v16563_v32 = vpop.f32.mrf.mxu0 }
 0x174   : > { %9525 = vperm.xlu2 %15522, %v9432_v34   ;;  %v9459_v34 = vld [vmem:[%s23180_s17 + $0x130] sm:$0xff] }
 0x175   : > { %9520 = vperm.xlu1 %15521, %v9431_v36   ;;  %9515 = vperm.xlu0 %15520, %v9430_v38   ;;  %v9458_v36 = vld [vmem:[%s23180_s17 + $0x128] sm:$0xff]  ;;  %v9457_v38 = vld [vmem:[%s23180_s17 + $0x120] sm:$0xff] }
 0x178   : > { %v1382_v57 = vpop.f32.mrf.mxu1 }
 0x179   : > { %v1431_v50 = vpop.f32.mrf.mxu0 }
 0x17a   : > { %v16577_v40 = vpack.c.bf16 %v1431_v50, %v1382_v57 }
 0x17b   : > { %1332 = vmatmul.bf16.gmra.mxu3 %v16328_v15  ;;  %v9436_v15 = vld [vmem:[%s23180_s17 + $0x78] sm:$0xff] }
 0x17c   : > { %9540 = vperm.xlu2 %15522, %v9435_v39  }
 0x17d   : > { %9535 = vperm.xlu1 %15521, %v9434_v16   ;;  %9530 = vperm.xlu0 %15520, %v9433_v41   ;;  %v9462_v16 = vld [vmem:[%s23180_s17 + $0x148] sm:$0xff]  ;;  %v9461_v41 = vld [vmem:[%s23180_s17 + $0x140] sm:$0xff] }
 0x17e   : > { %v16586_v42 = vpop.f32.mrf.mxu3 }
 0x180   : > { %v16588_v43 = vpop.f32.mrf.mxu1 }
 0x181   : > { %v16590_v44 = vpop.f32.mrf.mxu0 }
 0x184   : > { %9555 = vperm.xlu2 %15522, %v9438_v45   ;;  %v9460_v45 = vld [vmem:[%s23180_s17 + $0x138] sm:$0xff] }
 0x185   : > { %9550 = vperm.xlu1 %15521, %v9437_v46   ;;  %9545 = vperm.xlu0 %15520, %v9436_v15  }
 0x186   : > { %v16601_v47 = vpop.f32.mrf.mxu3 }
 0x188   : > { %v1387_v56 = vpop.f32.mrf.mxu1 }
 0x189   : > { %v1436_v48 = vpop.f32.mrf.mxu0 }
 0x18a   : > { %v16606_v52 = vpack.c.bf16 %v1436_v48, %v1387_v56  ;;  %v9465_v56 = vld [vmem:[%s23180_s17 + $0x160] sm:$0xff]  ;;  %v9464_v48 = vld [vmem:[%s23180_s17 + $0x158] sm:$0xff] }
 0x18b   : > { %1337 = vmatmul.bf16.gmra.mxu3 %v16353_v33  ;;  %v9442_v33 = vld [vmem:[%s23180_s17 + $0xa8] sm:$0xff] }
 0x18c   : > { %9570 = vperm.xlu2 %15522, %v9441_v11   ;;  %v9463_v11 = vld [vmem:[%s23180_s17 + $0x150] sm:$0xff] }
 0x18d   : > { %9565 = vperm.xlu1 %15521, %v9440_v53   ;;  %9560 = vperm.xlu0 %15520, %v9439_v7  }
 0x18e   : > { %v16615_v54 = vpop.f32.mrf.mxu3 }
 0x190   : > { %v16617_v55 = vpop.f32.mrf.mxu1 }
 0x191   : > { %v16619_v58 = vpop.f32.mrf.mxu0 }
 0x194   : > { %9585 = vperm.xlu2 %15522, %v9444_v59  }
 0x195   : > { %9580 = vperm.xlu1 %15521, %v9443_v60   ;;  %9575 = vperm.xlu0 %15520, %v9442_v33  }
 0x196   : > { %v16630_v61 = vpop.f32.mrf.mxu3 }
 0x198   : > { %v1392_v62 = vpop.f32.mrf.mxu1 }
 0x199   : > { %v1441_v63 = vpop.f32.mrf.mxu0 }
 0x19a   : > { %v16635_v1 = vpack.c.bf16 %v1441_v63, %v1392_v62  ;;  %v9467_v63 = vld [vmem:[%s23180_s17 + $0x170] sm:$0x7f] }
 0x19b   : > { %1342 = vmatmul.bf16.gmra.mxu3 %v16378_v49  ;;  %v9448_v49 = vld [vmem:[%s23180_s17 + $0xd8] sm:$0xff] }
 0x19c   : > { %9600 = vperm.xlu2 %15522, %v9447_v0   ;;  %v9466_v0 = vld [vmem:[%s23180_s17 + $0x168] sm:$0xff] }
 0x19d   : > { %9595 = vperm.xlu1 %15521, %v9446_v13   ;;  %9590 = vperm.xlu0 %15520, %v9445_v3  }
 0x19e   : > { %v16644_v8 = vpop.f32.mrf.mxu3 }
 0x1a0   : > { %v16646_v2 = vpop.f32.mrf.mxu1 }
 0x1a1   : > { %v16648_v30 = vpop.f32.mrf.mxu0 }
 0x1a4   : > { %9615 = vperm.xlu2 %15522, %v9450_v9  }
 0x1a5   : > { %9610 = vperm.xlu1 %15521, %v9449_v10   ;;  %9605 = vperm.xlu0 %15520, %v9448_v49  }
 0x1a6   : > { %v16659_v4 = vpop.f32.mrf.mxu3 }
 0x1a8   : > { %v16661_v12 = vpop.f32.mrf.mxu1 }
 0x1a9   : > { %v16663_v14 = vpop.f32.mrf.mxu0 }
 0x1ab   : > { %1347 = vmatmul.bf16.gmra.mxu3 %v16427_v22 }
 0x1ac   : > { %9630 = vperm.xlu2 %15522, %v9453_v17  }
 0x1ad   : > { %9625 = vperm.xlu1 %15521, %v9452_v19   ;;  %9620 = vperm.xlu0 %15520, %v9451_v37  }
 0x1ae   : > { %v16675_v23 = vpop.f32.mrf.mxu3 }
 0x1b0   : > { %v1399_v24 = vpop.f32.mrf.mxu1 }
 0x1b1   : > { %v1448_v25 = vpop.f32.mrf.mxu0 }
 0x1b2   : > { %v1484_v49 = vpack.c.bf16 %v1448_v25, %v1399_v24 }
 0x1b4   : > { %9645 = vperm.xlu2 %15522, %v9456_v35   ;;  %v1632_v24 = vunpack.c.h.b16 %v1484_v49 }
 0x1b5   : > { %9640 = vperm.xlu1 %15521, %v9455_v26   ;;  %9635 = vperm.xlu0 %15520, %v9454_v27   ;;  %v1482_v27 = vpack.c.bf16 %v16663_v14, %v16661_v12 }
 0x1b6   : > { %v16686_v22 = vpop.f32.mrf.mxu3 }
 0x1b8   : > { %v1402_v29 = vpop.f32.mrf.mxu1 }
 0x1b9   : > { %v1451_v20 = vpop.f32.mrf.mxu0 }
 0x1ba   : > { %v1486_v13 = vpack.c.bf16 %v1451_v20, %v1402_v29  ;;  %v1480_v29 = vpack.c.bf16 %v16648_v30, %v16646_v2  ;;  %v1600_v20 = vunpack.c.l.b16 %v1484_v49  ;;  %v1629_v2 = vunpack.c.h.b16 %v16635_v1 }
 0x1bb   : > { %1352 = vmatmul.bf16.gmra.mxu3 %v16476_v51  ;;  %v1472_v30 = vpack.c.bf16 %v16590_v44, %v16588_v43  ;;  %v1593_v43 = vunpack.c.l.b16 %v16577_v40  ;;  %v1625_v44 = vunpack.c.h.b16 %v16577_v40 }
 0x1bc   : > { %9660 = vperm.xlu2 %15522, %v9459_v34   ;;  %v1601_v34 = vunpack.c.l.b16 %v1486_v13  ;;  %v1630_v12 = vunpack.c.h.b16 %v1480_v29 }
 0x1bd   : > { %9655 = vperm.xlu1 %15521, %v9458_v36   ;;  %9650 = vperm.xlu0 %15520, %v9457_v38   ;;  %v1633_v36 = vunpack.c.h.b16 %v1486_v13 }
 0x1be   : > { %v16698_v57 = vpop.f32.mrf.mxu3 }
 0x1c0   : > { %v1404_v50 = vpop.f32.mrf.mxu1 }
 0x1c1   : > { %v1453_v39 = vpop.f32.mrf.mxu0 }
 0x1c2   : > { %v1488_v33 = vpack.c.bf16 %v1453_v39, %v1404_v50  ;;  %v1599_v50 = vunpack.c.l.b16 %v1482_v27  ;;  %v1631_v39 = vunpack.c.h.b16 %v1482_v27 }
 0x1c4   : > { %9675 = vperm.xlu2 %15522, %v9462_v16   ;;  %v1602_v17 = vunpack.c.l.b16 %v1488_v33  ;;  %v1634_v19 = vunpack.c.h.b16 %v1488_v33  ;;  %v1476_v16 = vpack.c.bf16 %v16619_v58, %v16617_v55  ;;  %v1595_v55 = vunpack.c.l.b16 %v16606_v52 }
 0x1c5   : > { %9670 = vperm.xlu1 %15521, %v9461_v41   ;;  %9665 = vperm.xlu0 %15520, %v9460_v45   ;;  %v1598_v41 = vunpack.c.l.b16 %v1480_v29  ;;  %v1610_v45 = vpack.c.b16 %v1600_v20, %v1599_v50  ;;  %v1627_v58 = vunpack.c.h.b16 %v16606_v52  ;;  %v1464_v52 = vpack.c.bf16 %v16538_v6, %v16536_v21  ;;  %v16765_v50 = vpop.f32.mrf.mxu2 }
 0x1c6   : > { %v16709_v51 = vpop.f32.mrf.mxu3  ;;  %v1611_v25 = vpack.c.b16 %v1602_v17, %v1601_v34  ;;  %v1643_v38 = vpack.c.b16 %v1634_v19, %v1633_v36  ;;  %v1589_v19 = vunpack.c.l.b16 %v16527_v18  ;;  %v1621_v21 = vunpack.c.h.b16 %v16527_v18 }
 0x1c8   : > { %v1407_v46 = vpop.f32.mrf.mxu1 }
 0x1c9   : > { %v1456_v15 = vpop.f32.mrf.mxu0 }
 0x1ca   : > { %v1490_v7 = vpack.c.bf16 %v1456_v15, %v1407_v46  ;;  %v1642_v46 = vpack.c.b16 %v1632_v24, %v1631_v39  ;;  %v1597_v15 = vunpack.c.l.b16 %v16635_v1  ;;  %v1626_v1 = vunpack.c.h.b16 %v1472_v30 }
 0x1cb   : > { %1357 = vmatmul.bf16.gmra.mxu3 %v16501_v5 }
 0x1cc   : > { %9690 = vperm.xlu2 %15522, %v9465_v56   ;;  %v1603_v5 = vunpack.c.l.b16 %v1490_v7  ;;  %v1635_v3 = vunpack.c.h.b16 %v1490_v7  ;;  %v1596_v56 = vunpack.c.l.b16 %v1476_v16  ;;  %v1641_v7 = vpack.c.b16 %v1630_v12, %v1629_v2  ;;  %v14853_v12 = vld [vmem:[%s23222_s21 + $0xc] sm:$0xf] }
 0x1cd   : > { %9685 = vperm.xlu1 %15521, %v9464_v48   ;;  %9680 = vperm.xlu0 %15520, %v9463_v11   ;;  %v1628_v48 = vunpack.c.h.b16 %v1476_v16  ;;  %v1609_v11 = vpack.c.b16 %v1598_v41, %v1597_v15  ;;  %v12332_v16 = vld [vmem:[%s23222_s21 + $0x8] sm:$0xf]  ;;  %v14855_v41 = vld [vmem:[%s23222_s21 + $0x14] sm:$0xf0]  ;;  %v16779_v2 = vpop.f32.mrf.mxu2 }
 0x1ce   : > { %v16721_v53 = vpop.f32.mrf.mxu3 }
 0x1d0   : > { %v1409_v59 = vpop.f32.mrf.mxu1 }
 0x1d1   : > { %v1458_v60 = vpop.f32.mrf.mxu0 }
 0x1d2   : > { %v1492_v62 = vpack.c.bf16 %v1458_v60, %v1409_v59  ;;  %v1468_v59 = vpack.c.bf16 %v16563_v32, %v16561_v31  ;;  %v1594_v60 = vunpack.c.l.b16 %v1472_v30  ;;  %v1591_v31 = vunpack.c.l.b16 %v16552_v28 }
 0x1d3   : > { %v1623_v32 = vunpack.c.h.b16 %v16552_v28 }
 0x1d4   : > { %v1604_v9 = vunpack.c.l.b16 %v1492_v62  ;;  %v1636_v10 = vunpack.c.h.b16 %v1492_v62  ;;  %v1608_v62 = vpack.c.b16 %v1596_v56, %v1595_v55  ;;  %v1624_v13 = vunpack.c.h.b16 %v1468_v59 }
 0x1d5   : > { %9700 = vperm.xlu1 %15521, %v9467_v63   ;;  %9695 = vperm.xlu0 %15520, %v9466_v0   ;;  %v1640_v63 = vpack.c.b16 %v1628_v48, %v1627_v58  ;;  %v1592_v0 = vunpack.c.l.b16 %v1468_v59 }
 0x1d6   : > { %v1612_v37 = vpack.c.b16 %v1604_v9, %v1603_v5  ;;  %v1644_v35 = vpack.c.b16 %v1636_v10, %v1635_v3  ;;  %v16729_v26 = vpop.f32.mrf.mxu3  ;;  %v1607_v5 = vpack.c.b16 %v1594_v60, %v1593_v43  ;;  %v1639_v3 = vpack.c.b16 %v1626_v1, %v1625_v44 }
 0x1d7   : > { %v1590_v9 = vunpack.c.l.b16 %v1464_v52  ;;  %v1622_v10 = vunpack.c.h.b16 %v1464_v52  ;;  %v1606_v40 = vpack.c.b16 %v1592_v0, %v1591_v31  ;;  %v1638_v17 = vpack.c.b16 %v1624_v13, %v1623_v32  ;;  %v12350_v0 = vld [vmem:[%s23222_s21 + $0x38] sm:$0xf0] }
 0x1d8   : > { %2131 = vmatpush.bf16.msra.mxu1 %v1612_v37  ;;  %2190 = vmatpush.bf16.msra.mxu0 %v1644_v35 }
 0x1d9   : > { %v1605_v6 = vpack.c.b16 %v1590_v9, %v1589_v19  ;;  %v1637_v37 = vpack.c.b16 %v1622_v10, %v1621_v21 }
 0x1dc   : > { %2132 = vmatpush.bf16.msra.mxu1 %v1611_v25  ;;  %2191 = vmatpush.bf16.msra.mxu0 %v1643_v38 }
 0x1de   : > { %v16737_v14 = vpop.f32.mrf.mxu3 }
 0x1e0   : > { %2133 = vmatpush.bf16.msra.mxu1 %v1610_v45  ;;  %2192 = vmatpush.bf16.msra.mxu0 %v1642_v46  ;;  %v12333_v45 = vor.u32 %v14855_v41, %v12332_v16  ;;  %v12334_v46 = vld [vmem:[%s23222_s21 + $0x18] sm:$0xf0] }
 0x1e1   : > { %v12337_v15 = vor.u32 %v14853_v12, %v12334_v46 }
 0x1e4   : > { %2134 = vmatpush.bf16.msra.mxu1 %v1609_v11  ;;  %2193 = vmatpush.bf16.msra.mxu0 %v1641_v7 }
 0x1e6   : > { %v16747_v33 = vpop.f32.mrf.mxu3 }
 0x1e8   : > { %2135 = vmatpush.bf16.msra.mxu1 %v1608_v62  ;;  %2194 = vmatpush.bf16.msra.mxu0 %v1640_v63 }
 0x1ec   : > { %2136 = vmatpush.bf16.msra.mxu1 %v1607_v5  ;;  %2195 = vmatpush.bf16.msra.mxu0 %v1639_v3  ;;  %v1279_v3 = vpop.f32.mrf.mxu2 }
 0x1ee   : > { %v16755_v49 = vpop.f32.mrf.mxu3 }
 0x1f0   : > { %2137 = vmatpush.bf16.msra.mxu1 %v1606_v40  ;;  %2196 = vmatpush.bf16.msra.mxu0 %v1638_v17 }
 0x1f4   : > { %2138 = vmatpush.bf16.msra.mxu1 %v1605_v6  ;;  %2197 = vmatpush.bf16.msra.mxu0 %v1637_v37 }
 0x1f6   : > { %v16759_v35 = vpop.f32.mrf.mxu3 }
 0x1f7   : > { %2139 = vmatmul.bf16.vlgmr.msra.gmra.mxu1 %v12333_v45  ;;  %2198 = vmatmul.bf16.vlgmr.msra.gmra.mxu0 %v12337_v15 }
 0x1fe   : > { %v16761_v28 = vpop.f32.mrf.mxu3 }
 0x206   : > { %v16763_v27 = vpop.f32.mrf.mxu3 }
 0x20e   : > { %v1338_v34 = vpop.f32.mrf.mxu3 }
 0x216   : > { %v1340_v36 = vpop.f32.mrf.mxu3 }
 0x217   : > { %v1475_v21 = vpack.c.bf16 %v1340_v36, %v16630_v61  ;;  %v1281_v61 = vpop.f32.mrf.mxu2  ;;  %v1469_v36 = vpack.c.bf16 %v16761_v28, %v16586_v42  ;;  %v1465_v42 = vpack.c.bf16 %v16755_v49, %v1279_v3  ;;  %v14865_v3 = vld [vmem:[%s23222_s21 + $0x6c] sm:$0xf] }
 0x219   : > { %v1516_v16 = vunpack.c.l.b16 %v1475_v21  ;;  %v1513_v28 = vunpack.c.l.b16 %v1469_v36 }
 0x21e   : > { %v1343_v29 = vpop.f32.mrf.mxu3 }
 0x21f   : > { %v1477_v40 = vpack.c.bf16 %v1343_v29, %v16644_v8  ;;  %v1471_v8 = vpack.c.bf16 %v16763_v27, %v16601_v47  ;;  %v1548_v29 = vunpack.c.h.b16 %v1475_v21  ;;  %v12364_v47 = vld [vmem:[%s23222_s21 + $0x48] sm:$0xf]  ;;  %v14863_v27 = vld [vmem:[%s23222_s21 + $0x54] sm:$0xf0] }
 0x220   : > { %v12365_v49 = vor.u32 %v14863_v27, %v12364_v47  ;;  %v12374_v47 = vld [vmem:[%s23222_s21 + $0x70] sm:$0xf0] }
 0x221   : > { %v1514_v15 = vunpack.c.l.b16 %v1471_v8 }
 0x226   : > { %v1345_v20 = vpop.f32.mrf.mxu3 }
 0x227   : > { %v1479_v13 = vpack.c.bf16 %v1345_v20, %v16659_v4  ;;  %v1473_v4 = vpack.c.bf16 %v1338_v34, %v16615_v54  ;;  %v1517_v20 = vunpack.c.l.b16 %v1477_v40  ;;  %v1467_v54 = vpack.c.bf16 %v16759_v35, %v1281_v61  ;;  %v14861_v35 = vld [vmem:[%s23222_s21 + $0x4c] sm:$0xf]  ;;  %v12412_v61 = vld [vmem:[%s23222_s21 + $0xa8] sm:$0xf] }
 0x228   : > { %v1546_v34 = vunpack.c.h.b16 %v1471_v8  ;;  %v14862_v8 = vld [vmem:[%s23222_s21 + $0x4c] sm:$0xf0] }
 0x229   : > { %v1550_v6 = vunpack.c.h.b16 %v1479_v13  ;;  %v1515_v41 = vunpack.c.l.b16 %v1473_v4  ;;  %v1547_v12 = vunpack.c.h.b16 %v1473_v4 }
 0x22b   : > { %v1528_v45 = vpack.c.b16 %v1516_v16, %v1515_v41  ;;  %v1560_v46 = vpack.c.b16 %v1548_v29, %v1547_v12  ;;  %v14860_v29 = vld [vmem:[%s23222_s21 + $0x44] sm:$0xf]  ;;  %v14873_v41 = vld [vmem:[%s23222_s21 + $0xac] sm:$0xf]  ;;  %v12414_v12 = vld [vmem:[%s23222_s21 + $0xb8] sm:$0xf0] }
 0x22e   : > { %v1348_v24 = vpop.f32.mrf.mxu3 }
 0x236   : > { %v1350_v25 = vpop.f32.mrf.mxu3 }
 0x237   : > { %v1483_v1 = vpack.c.bf16 %v1350_v25, %v16686_v22  ;;  %v14857_v22 = vld [vmem:[%s23222_s21 + $0x2c] sm:$0xf]  ;;  %v1518_v25 = vunpack.c.l.b16 %v1479_v13  ;;  %v12380_v13 = vld [vmem:[%s23222_s21 + $0x68] sm:$0xf] }
 0x238   : > { %v12353_v10 = vor.u32 %v14857_v22, %v12350_v0 }
 0x239   : > { %v1552_v5 = vunpack.c.h.b16 %v1483_v1  ;;  %v1520_v9 = vunpack.c.l.b16 %v1483_v1  ;;  %v1511_v1 = vunpack.c.l.b16 %v1465_v42 }
 0x23a   : > { %2203 = vmatmul.bf16.gmra.mxu0 %v12353_v10  ;;  %v14858_v10 = vld [vmem:[%s23222_s21 + $0x2c] sm:$0xf0] }
 0x23e   : > { %v1353_v38 = vpop.f32.mrf.mxu3 }
 0x23f   : > { %v1485_v7 = vpack.c.bf16 %v1353_v38, %v16698_v57  ;;  %v1481_v57 = vpack.c.bf16 %v1348_v24, %v16675_v23  ;;  %v1549_v38 = vunpack.c.h.b16 %v1477_v40  ;;  %v14856_v40 = vld [vmem:[%s23222_s21 + $0x24] sm:$0xf] }
 0x241   : > { %v1553_v52 = vunpack.c.h.b16 %v1485_v7  ;;  %v1519_v17 = vunpack.c.l.b16 %v1481_v57  ;;  %v1551_v19 = vunpack.c.h.b16 %v1481_v57  ;;  %v12326_v57 = vld [vmem:[%s23222_s21 + $0x10] sm:$0xf0] }
 0x243   : > { %v1530_v37 = vpack.c.b16 %v1520_v9, %v1519_v17  ;;  %v1562_v24 = vpack.c.b16 %v1552_v5, %v1551_v19  ;;  %v14867_v5 = vld [vmem:[%s23222_s21 + $0x74] sm:$0xf0]  ;;  %v12342_v17 = vld [vmem:[%s23222_s21 + $0x30] sm:$0xf0] }
 0x244   : > { %v12345_v21 = vor.u32 %v14856_v40, %v12342_v17  ;;  %v14919_v40 = vld [vmem:[%s23223_s6 + $0xd4] sm:$0xf0]  ;;  %v14917_v17 = vld [vmem:[%s23223_s6 + $0xcc] sm:$0xf] }
 0x246   : > { %v1355_v18 = vpop.f32.mrf.mxu3 }
 0x247   : > { %v1487_v48 = vpack.c.bf16 %v1355_v18, %v16709_v51  ;;  %v14859_v51 = vld [vmem:[%s23222_s21 + $0x34] sm:$0xf0]  ;;  %v1529_v18 = vpack.c.b16 %v1518_v25, %v1517_v20  ;;  %v12398_v25 = vld [vmem:[%s23222_s21 + $0x98] sm:$0xf0] }
 0x249   : > { %v1554_v62 = vunpack.c.h.b16 %v1487_v48  ;;  %v1522_v44 = vunpack.c.l.b16 %v1487_v48  ;;  %v1463_v48 = vpack.c.bf16 %v16747_v33, %v16779_v2  ;;  %v12324_v33 = vld [vmem:[%s23222_s21] sm:$0xf] }
 0x24b   : > { %v1563_v32 = vpack.c.b16 %v1554_v62, %v1553_v52  ;;  %v1543_v62 = vunpack.c.h.b16 %v1465_v42 }
 0x24e   : > { %v1358_v39 = vpop.f32.mrf.mxu3 }
 0x24f   : > { %v1489_v30 = vpack.c.bf16 %v1358_v39, %v16721_v53  ;;  %v12348_v53 = vld [vmem:[%s23222_s21 + $0x28] sm:$0xf]  ;;  %v1561_v39 = vpack.c.b16 %v1550_v6, %v1549_v38  ;;  %v12356_v38 = vld [vmem:[%s23222_s21 + $0x40] sm:$0xf] }
 0x250   : > { %v12349_v23 = vor.u32 %v14859_v51, %v12348_v53  ;;  %v1510_v53 = vunpack.c.l.b16 %v1463_v48  ;;  %v12396_v6 = vld [vmem:[%s23222_s21 + $0x88] sm:$0xf] }
 0x251   : > { %v1523_v55 = vunpack.c.l.b16 %v1489_v30  ;;  %v1555_v58 = vunpack.c.h.b16 %v1489_v30  ;;  %v1545_v30 = vunpack.c.h.b16 %v1469_v36  ;;  %v14875_v36 = vld [vmem:[%s23222_s21 + $0xb4] sm:$0xf0] }
 0x252   : > { %2144 = vmatmul.bf16.gmra.mxu1 %v12349_v23  ;;  %v12340_v23 = vld [vmem:[%s23222_s21 + $0x20] sm:$0xf] }
 0x253   : > { %v12341_v19 = vor.u32 %v14858_v10, %v12340_v23 }
 0x256   : > { %v1360_v56 = vpop.f32.mrf.mxu3 }
 0x257   : > { %v1491_v11 = vpack.c.bf16 %v1360_v56, %v16729_v26  ;;  %v1521_v26 = vunpack.c.l.b16 %v1485_v7  ;;  %v12366_v56 = vld [vmem:[%s23222_s21 + $0x58] sm:$0xf0]  ;;  %v1527_v7 = vpack.c.b16 %v1514_v15, %v1513_v28  ;;  %v14864_v15 = vld [vmem:[%s23222_s21 + $0x64] sm:$0xf]  ;;  %v12428_v28 = vld [vmem:[%s23222_s21 + $0xc8] sm:$0xf] }
 0x258   : > { %v12377_v42 = vor.u32 %v14864_v15, %v12374_v47  ;;  %v14920_v15 = vld [vmem:[%s23223_s6 + $0xe4] sm:$0xf] }
 0x259   : > { %v1556_v59 = vunpack.c.h.b16 %v1491_v11  ;;  %v1524_v60 = vunpack.c.l.b16 %v1491_v11  ;;  %v1531_v31 = vpack.c.b16 %v1522_v44, %v1521_v26  ;;  %v1544_v11 = vunpack.c.h.b16 %v1467_v54 }
 0x25b   : > { %v1564_v63 = vpack.c.b16 %v1556_v59, %v1555_v58  ;;  %v1532_v43 = vpack.c.b16 %v1524_v60, %v1523_v55  ;;  %v1559_v55 = vpack.c.b16 %v1546_v34, %v1545_v30  ;;  %v1512_v58 = vunpack.c.l.b16 %v1467_v54  ;;  %v14879_v30 = vld [vmem:[%s23222_s21 + $0xd4] sm:$0xf0] }
 0x25c   : > { %v12369_v59 = vor.u32 %v14861_v35, %v12366_v56  ;;  %v1461_v60 = vpack.c.bf16 %v16737_v14, %v16765_v50  ;;  %v1558_v44 = vpack.c.b16 %v1544_v11, %v1543_v62  ;;  %v14854_v14 = vld [vmem:[%s23222_s21 + $0xc] sm:$0xf0]  ;;  %v14852_v50 = vld [vmem:[%s23222_s21 + $0x4] sm:$0xf]  ;;  %v12413_v54 = vor.u32 %v14875_v36, %v12412_v61  ;;  %v14877_v35 = vld [vmem:[%s23222_s21 + $0xcc] sm:$0xf] }
 0x25d   : > { %2013 = vmatpush.bf16.msrb.mxu2 %v1532_v43  ;;  %2072 = vmatpush.bf16.msra.mxu3 %v1564_v63  ;;  %v1542_v63 = vunpack.c.h.b16 %v1463_v48  ;;  %v1526_v43 = vpack.c.b16 %v1512_v58, %v1511_v1  ;;  %v12325_v22 = vor.u32 %v14854_v14, %v12324_v33  ;;  %v12329_v0 = vor.u32 %v14852_v50, %v12326_v57  ;;  %v12430_v56 = vld [vmem:[%s23222_s21 + $0xd8] sm:$0xf0]  ;;  %v14868_v58 = vld [vmem:[%s23222_s21 + $0x84] sm:$0xf]  ;;  %v12444_v1 = vld [vmem:[%s23222_s21 + $0xe8] sm:$0xf] }
 0x25e   : > { %2208 = vmatmul.bf16.gmra.mxu0 %v12369_v59  ;;  %v1509_v2 = vunpack.c.l.b16 %v1461_v60  ;;  %v1541_v51 = vunpack.c.h.b16 %v1461_v60  ;;  %v12417_v34 = vor.u32 %v14873_v41, %v12414_v12  ;;  %v12429_v48 = vor.u32 %v14879_v30, %v12428_v28  ;;  %v14883_v62 = vld [vmem:[%s23222_s21 + $0xf4] sm:$0xf0]  ;;  %v12404_v33 = vld [vmem:[%s23222_s21 + $0xa0] sm:$0xf]  ;;  %v12406_v14 = vld [vmem:[%s23222_s21 + $0xb0] sm:$0xf0] }
 0x25f   : > { %v12433_v11 = vor.u32 %v14877_v35, %v12430_v56  ;;  %v12422_v61 = vld [vmem:[%s23222_s21 + $0xd0] sm:$0xf0]  ;;  %v12556_v28 = vld [vmem:[%s23223_s6 + $0x88] sm:$0xf]  ;;  %v14911_v30 = vld [vmem:[%s23223_s6 + $0x94] sm:$0xf0] }
 0x260   : > { %v1525_v26 = vpack.c.b16 %v1510_v53, %v1509_v2  ;;  %v1557_v52 = vpack.c.b16 %v1542_v63, %v1541_v51  ;;  %v14881_v63 = vld [vmem:[%s23222_s21 + $0xec] sm:$0xf]  ;;  %v14874_v2 = vld [vmem:[%s23222_s21 + $0xac] sm:$0xf0]  ;;  %v14872_v51 = vld [vmem:[%s23222_s21 + $0xa4] sm:$0xf]  ;;  %v12557_v56 = vor.u32 %v14911_v30, %v12556_v28 }
 0x261   : > { %2014 = vmatpush.bf16.msrb.mxu2 %v1531_v31  ;;  %2073 = vmatpush.bf16.msra.mxu3 %v1563_v32  ;;  %v12382_v31 = vld [vmem:[%s23222_s21 + $0x78] sm:$0xf0]  ;;  %v12381_v32 = vor.u32 %v14867_v5, %v12380_v13  ;;  %v12405_v50 = vor.u32 %v14874_v2, %v12404_v33  ;;  %v12409_v57 = vor.u32 %v14872_v51, %v12406_v14  ;;  %v12604_v13 = vld [vmem:[%s23223_s6 + $0xe8] sm:$0xf]  ;;  %v14923_v5 = vld [vmem:[%s23223_s6 + $0xf4] sm:$0xf0] }
 0x262   : > { %2149 = vmatmul.bf16.gmra.mxu1 %v12365_v49  ;;  %v12385_v9 = vor.u32 %v14865_v3, %v12382_v31  ;;  %v12390_v49 = vld [vmem:[%s23222_s21 + $0x90] sm:$0xf0]  ;;  %v12605_v3 = vor.u32 %v14923_v5, %v12604_v13  ;;  %v14921_v31 = vld [vmem:[%s23223_s6 + $0xec] sm:$0xf]  ;;  %v12478_v33 = vld [vmem:[%s23222_s21 + $0x138] sm:$0xf0] }
 0x263   : > { %v12393_v60 = vor.u32 %v14868_v58, %v12390_v49  ;;  %v14909_v35 = vld [vmem:[%s23223_s6 + $0x8c] sm:$0xf]  ;;  %v14916_v58 = vld [vmem:[%s23223_s6 + $0xc4] sm:$0xf]  ;;  %v12540_v2 = vld [vmem:[%s23223_s6 + $0x68] sm:$0xf] }
 0x264   : > { %2569 = vmatpush.bf16.msrb.mxu1 %v12605_v3  ;;  %v14907_v14 = vld [vmem:[%s23223_s6 + $0x74] sm:$0xf0]  ;;  %v12564_v13 = vld [vmem:[%s23223_s6 + $0xa0] sm:$0xf]  ;;  %v14914_v5 = vld [vmem:[%s23223_s6 + $0xac] sm:$0xf0] }
 0x265   : > { %2015 = vmatpush.bf16.msrb.mxu2 %v1530_v37  ;;  %2074 = vmatpush.bf16.msra.mxu3 %v1562_v24  ;;  %v14871_v37 = vld [vmem:[%s23222_s21 + $0x94] sm:$0xf0]  ;;  %v14869_v24 = vld [vmem:[%s23222_s21 + $0x8c] sm:$0xf]  ;;  %v14912_v3 = vld [vmem:[%s23223_s6 + $0xa4] sm:$0xf] }
 0x266   : > { %v12397_v4 = vor.u32 %v14871_v37, %v12396_v6  ;;  %v12401_v20 = vor.u32 %v14869_v24, %v12398_v25  ;;  %v14904_v28 = vld [vmem:[%s23223_s6 + $0x64] sm:$0xf]  ;;  %v12534_v30 = vld [vmem:[%s23223_s6 + $0x70] sm:$0xf0] }
 0x269   : > { %2016 = vmatpush.bf16.msrb.mxu2 %v1529_v18  ;;  %2075 = vmatpush.bf16.msra.mxu3 %v1561_v39  ;;  %v12358_v18 = vld [vmem:[%s23222_s21 + $0x50] sm:$0xf0]  ;;  %v12357_v39 = vor.u32 %v14862_v8, %v12356_v38  ;;  %v14913_v38 = vld [vmem:[%s23223_s6 + $0xac] sm:$0xf]  ;;  %v12574_v8 = vld [vmem:[%s23223_s6 + $0xb8] sm:$0xf0] }
 0x26a   : > { %v12361_v16 = vor.u32 %v14860_v29, %v12358_v18  ;;  %v12420_v29 = vld [vmem:[%s23222_s21 + $0xc0] sm:$0xf]  ;;  %v12577_v36 = vor.u32 %v14913_v38, %v12574_v8  ;;  %v14908_v38 = vld [vmem:[%s23223_s6 + $0x84] sm:$0xf] }
 0x26d   : > { %2017 = vmatpush.bf16.msrb.mxu2 %v1528_v45  ;;  %2076 = vmatpush.bf16.msra.mxu3 %v1560_v46  ;;  %v12372_v45 = vld [vmem:[%s23222_s21 + $0x60] sm:$0xf]  ;;  %v14866_v46 = vld [vmem:[%s23222_s21 + $0x6c] sm:$0xf0] }
 0x26e   : > { %2213 = vmatmul.bf16.gmra.mxu0 %v12385_v9  ;;  %v12373_v27 = vor.u32 %v14866_v46, %v12372_v45  ;;  %v12588_v9 = vld [vmem:[%s23223_s6 + $0xc8] sm:$0xf]  ;;  %v12596_v45 = vld [vmem:[%s23223_s6 + $0xe0] sm:$0xf]  ;;  %v14922_v46 = vld [vmem:[%s23223_s6 + $0xec] sm:$0xf0] }
 0x26f   : > { %v12589_v37 = vor.u32 %v14919_v40, %v12588_v9  ;;  %v12597_v47 = vor.u32 %v14922_v46, %v12596_v45  ;;  %v12565_v9 = vor.u32 %v14914_v5, %v12564_v13  ;;  %v12524_v40 = vld [vmem:[%s23223_s6 + $0x48] sm:$0xf]  ;;  %v14897_v45 = vld [vmem:[%s23223_s6 + $0x2c] sm:$0xf]  ;;  %v12454_v13 = vld [vmem:[%s23222_s21 + $0x110] sm:$0xf0] }
 0x271   : > { %2018 = vmatpush.bf16.msrb.mxu2 %v1527_v7  ;;  %2077 = vmatpush.bf16.msra.mxu3 %v1559_v55  ;;  %v12388_v7 = vld [vmem:[%s23222_s21 + $0x80] sm:$0xf]  ;;  %v14870_v55 = vld [vmem:[%s23222_s21 + $0x8c] sm:$0xf0] }
 0x272   : > { %2154 = vmatmul.bf16.gmra.mxu1 %v12381_v32  ;;  %v12389_v59 = vor.u32 %v14870_v55, %v12388_v7  ;;  %v12606_v32 = vld [vmem:[%s23223_s6 + $0xf8] sm:$0xf0]  ;;  %v12580_v7 = vld [vmem:[%s23223_s6 + $0xc0] sm:$0xf]  ;;  %v14918_v55 = vld [vmem:[%s23223_s6 + $0xcc] sm:$0xf0] }
 0x273   : > { %v12609_v10 = vor.u32 %v14921_v31, %v12606_v32  ;;  %2570 = vmatpush.bf16.msrb.mxu1 %v12589_v37  ;;  %v14880_v31 = vld [vmem:[%s23222_s21 + $0xe4] sm:$0xf]  ;;  %v12438_v32 = vld [vmem:[%s23222_s21 + $0xf0] sm:$0xf0]  ;;  %v12526_v37 = vld [vmem:[%s23223_s6 + $0x58] sm:$0xf0] }
 0x274   : > { %v16995_v24 = vpop.f32.mrf.mxu0 }
 0x275   : > { %2019 = vmatpush.bf16.msrb.mxu2 %v1526_v43  ;;  %2078 = vmatpush.bf16.msra.mxu3 %v1558_v44  ;;  %v12446_v43 = vld [vmem:[%s23222_s21 + $0xf8] sm:$0xf0]  ;;  %v12445_v44 = vor.u32 %v14883_v62, %v12444_v1  ;;  %v12476_v1 = vld [vmem:[%s23222_s21 + $0x128] sm:$0xf]  ;;  %v14891_v62 = vld [vmem:[%s23222_s21 + $0x134] sm:$0xf0] }
 0x276   : > { %v12449_v53 = vor.u32 %v14881_v63, %v12446_v43  ;;  %2628 = vmatpush.bf16.msrb.mxu0 %v12609_v10 }
 0x279   : > { %2020 = vmatpush.bf16.msrb.mxu2 %v1525_v26  ;;  %2079 = vmatpush.bf16.msra.mxu3 %v1557_v52  ;;  %v12460_v26 = vld [vmem:[%s23222_s21 + $0x108] sm:$0xf]  ;;  %v14887_v52 = vld [vmem:[%s23222_s21 + $0x114] sm:$0xf0] }
 0x27a   : > { %v12461_v23 = vor.u32 %v14887_v52, %v12460_v26  ;;  %v12436_v26 = vld [vmem:[%s23222_s21 + $0xe0] sm:$0xf]  ;;  %v14882_v52 = vld [vmem:[%s23222_s21 + $0xec] sm:$0xf0] }
 0x27b   : > { %v12437_v8 = vor.u32 %v14882_v52, %v12436_v26  ;;  %v12502_v52 = vld [vmem:[%s23223_s6 + $0x30] sm:$0xf0] }
 0x27c   : > { %2021 = vmatmul.bf16.vlgmr.msrb.gmra.mxu2 %v12325_v22  ;;  %2080 = vmatmul.bf16.vlgmr.msra.gmra.mxu3 %v12329_v0  ;;  %v14885_v22 = vld [vmem:[%s23222_s21 + $0x10c] sm:$0xf]  ;;  %v12462_v0 = vld [vmem:[%s23222_s21 + $0x118] sm:$0xf0] }
 0x27d   : > { %v12465_v6 = vor.u32 %v14885_v22, %v12462_v0  ;;  %2451 = vmatpush.bf16.msra.mxu2 %v12597_v47  ;;  %v12541_v22 = vor.u32 %v14907_v14, %v12540_v2  ;;  %v14898_v14 = vld [vmem:[%s23223_s6 + $0x2c] sm:$0xf0] }
 0x27e   : > { %2218 = vmatmul.bf16.gmra.mxu0 %v12401_v20  ;;  %v14915_v20 = vld [vmem:[%s23223_s6 + $0xb4] sm:$0xf0] }
 0x282   : > { %2159 = vmatmul.bf16.gmra.mxu1 %v12397_v4  ;;  %v12572_v4 = vld [vmem:[%s23223_s6 + $0xa8] sm:$0xf] }
 0x283   : > { %v12573_v18 = vor.u32 %v14915_v20, %v12572_v4  ;;  %v12548_v4 = vld [vmem:[%s23223_s6 + $0x80] sm:$0xf]  ;;  %v14910_v20 = vld [vmem:[%s23223_s6 + $0x8c] sm:$0xf0] }
 0x285   : > { %2571 = vmatpush.bf16.msrb.mxu1 %v12573_v18 }
 0x289   : > { %2572 = vmatpush.bf16.msrb.mxu1 %v12557_v56  ;;  %v12537_v56 = vor.u32 %v14904_v28, %v12534_v30 }
 0x28c   : > { %2026 = vmatmul.bf16.gmra.mxu2 %v12341_v19  ;;  %2085 = vmatmul.bf16.gmra.mxu3 %v12345_v21  ;;  %v12590_v19 = vld [vmem:[%s23223_s6 + $0xd8] sm:$0xf0]  ;;  %v16993_v21 = vpop.f32.mrf.mxu1 }
 0x28d   : > { %v12593_v25 = vor.u32 %v14917_v17, %v12590_v19  ;;  %2573 = vmatpush.bf16.msrb.mxu1 %v12541_v22  ;;  %v14903_v17 = vld [vmem:[%s23223_s6 + $0x54] sm:$0xf0]  ;;  %v14901_v19 = vld [vmem:[%s23223_s6 + $0x4c] sm:$0xf]  ;;  %v14886_v22 = vld [vmem:[%s23222_s21 + $0x10c] sm:$0xf0] }
 0x28e   : > { %2223 = vmatmul.bf16.gmra.mxu0 %v12417_v34  ;;  %v17023_v34 = vpop.f32.mrf.mxu0 }
 0x28f   : > { %2629 = vmatpush.bf16.msrb.mxu0 %v12593_v25  ;;  %v12529_v25 = vor.u32 %v14901_v19, %v12526_v37 }
 0x292   : > { %2164 = vmatmul.bf16.gmra.mxu1 %v12413_v54 }
 0x293   : > { %2630 = vmatpush.bf16.msrb.mxu0 %v12577_v36 }
 0x294   : > { %v17021_v54 = vpop.f32.mrf.mxu1 }
 0x29c   : > { %2031 = vmatmul.bf16.gmra.mxu2 %v12357_v39  ;;  %2090 = vmatmul.bf16.gmra.mxu3 %v12361_v16  ;;  %v14878_v39 = vld [vmem:[%s23222_s21 + $0xcc] sm:$0xf0]  ;;  %v14876_v16 = vld [vmem:[%s23222_s21 + $0xc4] sm:$0xf] }
 0x29d   : > { %v12421_v41 = vor.u32 %v14878_v39, %v12420_v29  ;;  %v12425_v12 = vor.u32 %v14876_v16, %v12422_v61  ;;  %v12441_v29 = vor.u32 %v14880_v31, %v12438_v32  ;;  %v12549_v39 = vor.u32 %v14910_v20, %v12548_v4  ;;  %v12550_v16 = vld [vmem:[%s23223_s6 + $0x90] sm:$0xf0]  ;;  %v14894_v31 = vld [vmem:[%s23223_s6 + $0xc] sm:$0xf0]  ;;  %v14892_v32 = vld [vmem:[%s23223_s6 + $0x4] sm:$0xf]  ;;  %v1716_v4 = vpop.permute.xlu1 %1715 }
 0x29e   : > { %2228 = vmatmul.bf16.gmra.mxu0 %v12433_v11  ;;  %v12553_v36 = vor.u32 %v14908_v38, %v12550_v16  ;;  %v12468_v38 = vld [vmem:[%s23222_s21 + $0x120] sm:$0xf]  ;;  %v14888_v16 = vld [vmem:[%s23222_s21 + $0x124] sm:$0xf] }
 0x2a2   : > { %2169 = vmatmul.bf16.gmra.mxu1 %v12429_v48  ;;  %v12558_v48 = vld [vmem:[%s23223_s6 + $0x98] sm:$0xf0] }
 0x2a3   : > { %v12561_v11 = vor.u32 %v14909_v35, %v12558_v48  ;;  %v12492_v48 = vld [vmem:[%s23223_s6 + $0x8] sm:$0xf] }
 0x2a5   : > { %2631 = vmatpush.bf16.msrb.mxu0 %v12561_v11  ;;  %v14895_v11 = vld [vmem:[%s23223_s6 + $0x14] sm:$0xf0] }
 0x2ac   : > { %2036 = vmatmul.bf16.gmra.mxu2 %v12373_v27  ;;  %2095 = vmatmul.bf16.gmra.mxu3 %v12377_v42  ;;  %v12598_v27 = vld [vmem:[%s23223_s6 + $0xf0] sm:$0xf0] }
 0x2ad   : > { %v12601_v42 = vor.u32 %v14920_v15, %v12598_v27  ;;  %v12510_v15 = vld [vmem:[%s23223_s6 + $0x38] sm:$0xf0]  ;;  %v12532_v27 = vld [vmem:[%s23223_s6 + $0x60] sm:$0xf] }
 0x2ae   : > { %2233 = vmatmul.bf16.gmra.mxu0 %v12449_v53  ;;  %v14889_v53 = vld [vmem:[%s23222_s21 + $0x12c] sm:$0xf]  ;;  %v12513_v47 = vor.u32 %v14897_v45, %v12510_v15 }
 0x2af   : > { %2510 = vmatpush.bf16.msrb.mxu3 %v12601_v42  ;;  %v12481_v51 = vor.u32 %v14889_v53, %v12478_v33  ;;  %v14906_v42 = vld [vmem:[%s23223_s6 + $0x6c] sm:$0xf0]  ;;  %v12518_v53 = vld [vmem:[%s23223_s6 + $0x50] sm:$0xf0] }
 0x2b0   : > { %v12533_v35 = vor.u32 %v14906_v42, %v12532_v27 }
 0x2b2   : > { %2174 = vmatmul.bf16.gmra.mxu1 %v12445_v44  ;;  %v12477_v44 = vor.u32 %v14891_v62, %v12476_v1  ;;  %v14902_v1 = vld [vmem:[%s23223_s6 + $0x4c] sm:$0xf0]  ;;  %v14900_v62 = vld [vmem:[%s23223_s6 + $0x44] sm:$0xf] }
 0x2b3   : > { %v12521_v2 = vor.u32 %v14900_v62, %v12518_v53 }
 0x2b7   : > { %v17069_v63 = vpop.f32.mrf.mxu0 }
 0x2bc   : > { %2041 = vmatmul.bf16.gmra.mxu2 %v12389_v59  ;;  %2100 = vmatmul.bf16.gmra.mxu3 %v12393_v60  ;;  %v12581_v59 = vor.u32 %v14918_v55, %v12580_v7  ;;  %v12582_v60 = vld [vmem:[%s23223_s6 + $0xd0] sm:$0xf0]  ;;  %v14893_v7 = vld [vmem:[%s23223_s6 + $0xc] sm:$0xf]  ;;  %v12493_v55 = vor.u32 %v14895_v11, %v12492_v48 }
 0x2bd   : > { %v12585_v43 = vor.u32 %v14916_v58, %v12582_v60  ;;  %v12494_v58 = vld [vmem:[%s23223_s6 + $0x18] sm:$0xf0]  ;;  %v12516_v60 = vld [vmem:[%s23223_s6 + $0x40] sm:$0xf] }
 0x2be   : > { %2238 = vmatmul.bf16.gmra.mxu0 %v12465_v6  ;;  %2452 = vmatpush.bf16.msra.mxu2 %v12581_v59  ;;  %v12525_v6 = vor.u32 %v14903_v17, %v12524_v40  ;;  %v12497_v59 = vor.u32 %v14893_v7, %v12494_v58  ;;  %v12486_v40 = vld [vmem:[%s23223_s6 + $0x10] sm:$0xf0] }
 0x2bf   : > { %2511 = vmatpush.bf16.msrb.mxu3 %v12585_v43  ;;  %v17139_v61 = vpop.f32.mrf.mxu0  ;;  %v12489_v17 = vor.u32 %v14892_v32, %v12486_v40 }
 0x2c0   : > { %2574 = vmatpush.bf16.msrb.mxu1 %v12525_v6 }
 0x2c2   : > { %2179 = vmatmul.bf16.gmra.mxu1 %v12461_v23  ;;  %v12566_v23 = vld [vmem:[%s23223_s6 + $0xb0] sm:$0xf0]  ;;  %2453 = vmatpush.bf16.msra.mxu2 %v12565_v9 }
 0x2c3   : > { %v12569_v10 = vor.u32 %v14912_v3, %v12566_v23  ;;  %v12484_v3 = vld [vmem:[%s23223_s6] sm:$0xf] }
 0x2c5   : > { %2512 = vmatpush.bf16.msrb.mxu3 %v12569_v10  ;;  %v12485_v10 = vor.u32 %v14894_v31, %v12484_v3 }
 0x2c6   : > { %2454 = vmatpush.bf16.msra.mxu2 %v12549_v39  ;;  %v14890_v39 = vld [vmem:[%s23222_s21 + $0x12c] sm:$0xf0] }
 0x2c9   : > { %2513 = vmatpush.bf16.msrb.mxu3 %v12553_v36  ;;  %v12470_v36 = vld [vmem:[%s23222_s21 + $0x130] sm:$0xf0] }
 0x2ca   : > { %2455 = vmatpush.bf16.msra.mxu2 %v12533_v35  ;;  %v12473_v27 = vor.u32 %v14888_v16, %v12470_v36 }
 0x2cc   : > { %2046 = vmatmul.bf16.gmra.mxu2 %v12405_v50  ;;  %2105 = vmatmul.bf16.gmra.mxu3 %v12409_v57  ;;  %v14905_v50 = vld [vmem:[%s23223_s6 + $0x6c] sm:$0xf]  ;;  %v12542_v57 = vld [vmem:[%s23223_s6 + $0x78] sm:$0xf0] }
 0x2cd   : > { %v12545_v0 = vor.u32 %v14905_v50, %v12542_v57  ;;  %2514 = vmatpush.bf16.msrb.mxu3 %v12537_v56  ;;  %v14896_v50 = vld [vmem:[%s23223_s6 + $0x24] sm:$0xf]  ;;  %v12452_v57 = vld [vmem:[%s23222_s21 + $0x100] sm:$0xf] }
 0x2ce   : > { %2243 = vmatmul.bf16.gmra.mxu0 %v12481_v51  ;;  %v12500_v51 = vld [vmem:[%s23223_s6 + $0x20] sm:$0xf]  ;;  %v12505_v5 = vor.u32 %v14896_v50, %v12502_v52  ;;  %v12453_v9 = vor.u32 %v14886_v22, %v12452_v57 }
 0x2cf   : > { %v17058_v49 = vpop.f32.mrf.mxu1  ;;  %2632 = vmatpush.bf16.msrb.mxu0 %v12545_v0  ;;  %v12501_v26 = vor.u32 %v14898_v14, %v12500_v51  ;;  %v14884_v0 = vld [vmem:[%s23222_s21 + $0x104] sm:$0xf] }
 0x2d0   : > { %v12457_v23 = vor.u32 %v14884_v0, %v12454_v13 }
 0x2d1   : > { %2515 = vmatpush.bf16.msrb.mxu3 %v12521_v2 }
 0x2d2   : > { %2184 = vmatmul.bf16.gmra.mxu1 %v12477_v44  ;;  %v12517_v44 = vor.u32 %v14902_v1, %v12516_v60 }
 0x2d3   : > { %2633 = vmatpush.bf16.msrb.mxu0 %v12529_v25 }
 0x2d4   : > { %2456 = vmatpush.bf16.msra.mxu2 %v12517_v44 }
 0x2d5   : > { %2516 = vmatpush.bf16.msrb.mxu3 %v12505_v5 }
 0x2d7   : > { %v17134_v18 = vpop.f32.mrf.mxu1  ;;  %2634 = vmatpush.bf16.msrb.mxu0 %v12513_v47  ;;  %v12469_v47 = vor.u32 %v14890_v39, %v12468_v38 }
 0x2d8   : > { %2457 = vmatpush.bf16.msra.mxu2 %v12501_v26 }
 0x2d9   : > { %2517 = vmatpush.bf16.msrb.mxu3 %v12489_v17 }
 0x2db   : > { %v17191_v33 = vpop.f32.mrf.mxu0  ;;  %2635 = vmatpush.bf16.msrb.mxu0 %v12497_v59  ;;  %v1726_v59 = vpop.permute.xlu0 %1725 }
 0x2dc   : > { %2051 = vmatmul.bf16.gmra.mxu2 %v12421_v41  ;;  %2110 = vmatmul.bf16.gmra.mxu3 %v12425_v12  ;;  %v12508_v41 = vld [vmem:[%s23223_s6 + $0x28] sm:$0xf]  ;;  %v14899_v12 = vld [vmem:[%s23223_s6 + $0x34] sm:$0xf0] }
 0x2dd   : > { %v12509_v46 = vor.u32 %v14899_v12, %v12508_v41  ;;  %2458 = vmatpush.bf16.msra.mxu2 %v12485_v10  ;;  %v1721_v41 = vpop.permute.xlu2 %1720 }
 0x2df   : > { %2575 = vmatpush.bf16.msrb.mxu1 %v12509_v46  ;;  %v17186_v43 = vpop.f32.mrf.mxu1 }
 0x2e3   : > { %2576 = vmatpush.bf16.msrb.mxu1 %v12493_v55  ;;  %v17231_v6 = vpop.f32.mrf.mxu0  ;;  %v1741_v3 = vpop.permute.xlu0 %1740 }
 0x2e5   : > { %v1736_v22 = vpop.permute.xlu2 %1735 }
 0x2e7   : > { %v17229_v19 = vpop.f32.mrf.mxu1 }
 0x2ec   : > { %2056 = vmatmul.bf16.gmra.mxu2 %v12437_v8  ;;  %2115 = vmatmul.bf16.gmra.mxu3 %v12441_v29  ;;  %v17238_v29 = vpop.f32.mrf.mxu0 }
 0x2ef   : > { %v17236_v8 = vpop.f32.mrf.mxu1 }
 0x2f4   : > { %v17253_v11 = vpop.f32.mrf.mxu0 }
 0x2f7   : > { %v2157_v48 = vpop.f32.mrf.mxu1 }
 0x2fc   : > { %2061 = vmatmul.bf16.gmra.mxu2 %v12453_v9  ;;  %2120 = vmatmul.bf16.gmra.mxu3 %v12457_v23 }
 0x2ff   : > { %v2022_v37 = vpop.f32.mrf.mxu2  ;;  %v2081_v25 = vpop.f32.mrf.mxu3 }
 0x300   : > { %v2023_v20 = vadd.f32 %v2022_v37, %v1716_v4  ;;  %v17255_v53 = vpop.f32.mrf.mxu1 }
 0x302   : > { %v2082_v12 = vadd.f32 %v2081_v25, %v2023_v20 }
 0x304   : > { %v2141_v42 = vadd.f32 %v16993_v21, %v2082_v12  ;;  %v1731_v21 = vpop.permute.xlu1 %1730 }
 0x306   : > { %v2200_v35 = vadd.f32 %v16995_v24, %v2141_v42  ;;  %v17257_v24 = vpop.f32.mrf.mxu0 }
 0x307   : > { %v2024_v45 = vpop.f32.mrf.mxu2  ;;  %v2083_v46 = vpop.f32.mrf.mxu3 }
 0x308   : > { %v2025_v15 = vadd.f32 %v2024_v45, %v1721_v41  ;;  %v2162_v13 = vpop.f32.mrf.mxu1 }
 0x30a   : > { %v2084_v28 = vadd.f32 %v2083_v46, %v2025_v15 }
 0x30c   : > { %v2143_v30 = vadd.f32 %v17021_v54, %v2084_v28  ;;  %2066 = vmatmul.bf16.gmra.mxu2 %v12469_v47  ;;  %2125 = vmatmul.bf16.gmra.mxu3 %v12473_v27  ;;  %v1746_v20 = vpop.permute.xlu1 %1745 }
 0x30e   : > { %v2202_v56 = vadd.f32 %v17023_v34, %v2143_v30  ;;  %v2221_v5 = vpop.f32.mrf.mxu0 }
 0x30f   : > { %v2027_v7 = vpop.f32.mrf.mxu2  ;;  %v2086_v55 = vpop.f32.mrf.mxu3 }
 0x310   : > { %v2249_v58 = vpack.c.bf16 %v2202_v56, %v2200_v35  ;;  %v2028_v60 = vadd.f32 %v2027_v7, %v1726_v59  ;;  %v1756_v35 = vpop.permute.xlu0 %1755 }
 0x312   : > { %2577 = vmatmul.bf16.vlgmr.msrb.gmra.mxu1 %v2249_v58  ;;  %2636 = vmatmul.bf16.vlgmr.msrb.gmra.mxu0 %v2249_v58  ;;  %v2087_v1 = vadd.f32 %v2086_v55, %v2028_v60 }
 0x314   : > { %v2146_v34 = vadd.f32 %v17058_v49, %v2087_v1  ;;  %v1761_v7 = vpop.permute.xlu1 %1760 }
 0x316   : > { %v2205_v14 = vadd.f32 %v17069_v63, %v2146_v34  ;;  %v17265_v10 = vpop.f32.mrf.mxu0 }
 0x317   : > { %v2029_v62 = vpop.f32.mrf.mxu2  ;;  %v2088_v54 = vpop.f32.mrf.mxu3 }
 0x318   : > { %v2030_v44 = vadd.f32 %v2029_v62, %v1731_v21 }
 0x31a   : > { %v2089_v2 = vadd.f32 %v2088_v54, %v2030_v44 }
 0x31c   : > { %v2148_v51 = vadd.f32 %v17134_v18, %v2089_v2  ;;  %2459 = vmatmul.bf16.vlgmr.msra.gmra.mxu2 %v2249_v58  ;;  %2518 = vmatmul.bf16.vlgmr.msrb.gmra.mxu3 %v2249_v58 }
 0x31e   : > { %v2207_v50 = vadd.f32 %v17139_v61, %v2148_v51  ;;  %v2165_v61 = vpop.f32.mrf.mxu1 }
 0x31f   : > { %v2032_v57 = vpop.f32.mrf.mxu2  ;;  %v2091_v26 = vpop.f32.mrf.mxu3 }
 0x320   : > { %v2250_v52 = vpack.c.bf16 %v2207_v50, %v2205_v14  ;;  %v2033_v0 = vadd.f32 %v2032_v57, %v1736_v22  ;;  %v1771_v57 = vpop.permute.xlu0 %1770 }
 0x322   : > { %2582 = vmatmul.bf16.gmra.mxu1 %v2250_v52  ;;  %2641 = vmatmul.bf16.gmra.mxu0 %v2250_v52  ;;  %v2092_v49 = vadd.f32 %v2091_v26, %v2033_v0 }
 0x324   : > { %v2151_v9 = vadd.f32 %v17186_v43, %v2092_v49  ;;  %v1751_v43 = vpop.permute.xlu2 %1750 }
 0x326   : > { %v2210_v40 = vadd.f32 %v17191_v33, %v2151_v9  ;;  %v2167_v16 = vpop.f32.mrf.mxu1 }
 0x327   : > { %v2034_v31 = vpop.f32.mrf.mxu2  ;;  %v2093_v32 = vpop.f32.mrf.mxu3 }
 0x328   : > { %v2035_v18 = vadd.f32 %v2034_v31, %v1741_v3 }
 0x32a   : > { %v2094_v23 = vadd.f32 %v2093_v32, %v2035_v18 }
 0x32c   : > { %v2153_v63 = vadd.f32 %v17229_v19, %v2094_v23  ;;  %2464 = vmatmul.bf16.gmra.mxu2 %v2250_v52  ;;  %2523 = vmatmul.bf16.gmra.mxu3 %v2250_v52  ;;  %v2226_v19 = vpop.f32.mrf.mxu0  ;;  %v1766_v2 = vpop.permute.xlu2 %1765 }
 0x32d   : > { %v1776_v23 = vpop.permute.xlu1 %1775 }
 0x32e   : > { %v2212_v17 = vadd.f32 %v17231_v6, %v2153_v63  ;;  %v2170_v28 = vpop.f32.mrf.mxu1 }
 0x32f   : > { %v2037_v37 = vpop.f32.mrf.mxu2  ;;  %v2096_v25 = vpop.f32.mrf.mxu3 }
 0x330   : > { %v2251_v4 = vpack.c.bf16 %v2212_v17, %v2210_v40  ;;  %v2038_v38 = vadd.f32 %v2037_v37, %v1746_v20 }
 0x332   : > { %2587 = vmatmul.bf16.gmra.mxu1 %v2251_v4  ;;  %2646 = vmatmul.bf16.gmra.mxu0 %v2251_v4  ;;  %v2097_v39 = vadd.f32 %v2096_v25, %v2038_v38 }
 0x334   : > { %v2156_v45 = vadd.f32 %v17236_v8, %v2097_v39  ;;  %v2229_v30 = vpop.f32.mrf.mxu0  ;;  %v1781_v40 = vpop.permute.xlu2 %1780 }
 0x336   : > { %v2215_v6 = vadd.f32 %v17238_v29, %v2156_v45  ;;  %v2172_v29 = vpop.f32.mrf.mxu1 }
 0x337   : > { %v2039_v36 = vpop.f32.mrf.mxu2  ;;  %v2098_v41 = vpop.f32.mrf.mxu3 }
 0x338   : > { %v2040_v12 = vadd.f32 %v2039_v36, %v1751_v43 }
 0x33a   : > { %v2099_v46 = vadd.f32 %v2098_v41, %v2040_v12  ;;  %v1786_v12 = vpop.permute.xlu0 %1785 }
 0x33c   : > { %v2158_v33 = vadd.f32 %v2157_v48, %v2099_v46  ;;  %2469 = vmatmul.bf16.gmra.mxu2 %v2251_v4  ;;  %2528 = vmatmul.bf16.gmra.mxu3 %v2251_v4  ;;  %v2231_v21 = vpop.f32.mrf.mxu0 }
 0x33e   : > { %v2217_v15 = vadd.f32 %v17253_v11, %v2158_v33  ;;  %v2175_v14 = vpop.f32.mrf.mxu1 }
 0x33f   : > { %v2042_v47 = vpop.f32.mrf.mxu2  ;;  %v2101_v27 = vpop.f32.mrf.mxu3 }
 0x340   : > { %v2252_v42 = vpack.c.bf16 %v2217_v15, %v2215_v6  ;;  %v2043_v56 = vadd.f32 %v2042_v47, %v1756_v35  ;;  %v1791_v6 = vpop.permute.xlu1 %1790 }
 0x342   : > { %2592 = vmatmul.bf16.gmra.mxu1 %v2252_v42  ;;  %2651 = vmatmul.bf16.gmra.mxu0 %v2252_v42  ;;  %v2102_v55 = vadd.f32 %v2101_v27, %v2043_v56 }
 0x344   : > { %v2161_v59 = vadd.f32 %v17255_v53, %v2102_v55  ;;  %v2234_v50 = vpop.f32.mrf.mxu0 }
 0x346   : > { %v2220_v1 = vadd.f32 %v17257_v24, %v2161_v59  ;;  %v2177_v49 = vpop.f32.mrf.mxu1 }
 0x347   : > { %v2044_v8 = vpop.f32.mrf.mxu2  ;;  %v2103_v58 = vpop.f32.mrf.mxu3 }
 0x348   : > { %v2045_v48 = vadd.f32 %v2044_v8, %v1761_v7 }
 0x34a   : > { %v2104_v60 = vadd.f32 %v2103_v58, %v2045_v48 }
 0x34c   : > { %v2163_v11 = vadd.f32 %v2162_v13, %v2104_v60  ;;  %2474 = vmatmul.bf16.gmra.mxu2 %v2252_v42  ;;  %2533 = vmatmul.bf16.gmra.mxu3 %v2252_v42  ;;  %v2236_v31 = vpop.f32.mrf.mxu0  ;;  %v1796_v60 = vpop.permute.xlu2 %1795 }
 0x34e   : > { %v2222_v62 = vadd.f32 %v2221_v5, %v2163_v11  ;;  %v2180_v4 = vpop.f32.mrf.mxu1 }
 0x34f   : > { %v2047_v54 = vpop.f32.mrf.mxu2  ;;  %v2106_v44 = vpop.f32.mrf.mxu3 }
 0x350   : > { %v2253_v34 = vpack.c.bf16 %v2222_v62, %v2220_v1  ;;  %v2048_v51 = vadd.f32 %v2047_v54, %v1766_v2 }
 0x352   : > { %2597 = vmatmul.bf16.gmra.mxu1 %v2253_v34  ;;  %2656 = vmatmul.bf16.gmra.mxu0 %v2253_v34  ;;  %v2107_v53 = vadd.f32 %v2106_v44, %v2048_v51 }
 0x354   : > { %v2166_v0 = vadd.f32 %v2165_v61, %v2107_v53  ;;  %v2239_v20 = vpop.f32.mrf.mxu0 }
 0x356   : > { %v2225_v24 = vadd.f32 %v17265_v10, %v2166_v0  ;;  %v2182_v46 = vpop.f32.mrf.mxu1 }
 0x357   : > { %v2049_v26 = vpop.f32.mrf.mxu2  ;;  %v2108_v52 = vpop.f32.mrf.mxu3 }
 0x358   : > { %v2050_v22 = vadd.f32 %v2049_v26, %v1771_v57 }
 0x35a   : > { %v2109_v13 = vadd.f32 %v2108_v52, %v2050_v22 }
 0x35c   : > { %v2168_v3 = vadd.f32 %v2167_v16, %v2109_v13  ;;  %2479 = vmatmul.bf16.gmra.mxu2 %v2253_v34  ;;  %2538 = vmatmul.bf16.gmra.mxu3 %v2253_v34  ;;  %v2241_v33 = vpop.f32.mrf.mxu0  ;;  %v1806_v13 = vpop.permute.xlu1 %1805 }
 0x35e   : > { %v2227_v5 = vadd.f32 %v2226_v19, %v2168_v3 }
 0x35f   : > { %v2052_v32 = vpop.f32.mrf.mxu2  ;;  %v2111_v18 = vpop.f32.mrf.mxu3 }
 0x360   : > { %v2254_v9 = vpack.c.bf16 %v2227_v5, %v2225_v24  ;;  %v2053_v63 = vadd.f32 %v2052_v32, %v1776_v23  ;;  %v1811_v24 = vpop.permute.xlu2 %1810 }
 0x362   : > { %2602 = vmatmul.bf16.gmra.mxu1 %v2254_v9  ;;  %2661 = vmatmul.bf16.gmra.mxu0 %v2254_v9  ;;  %v2112_v17 = vadd.f32 %v2111_v18, %v2053_v63 }
 0x364   : > { %v2171_v38 = vadd.f32 %v2170_v28, %v2112_v17  ;;  %v2244_v7 = vpop.f32.mrf.mxu0 }
 0x366   : > { %v2230_v39 = vadd.f32 %v2229_v30, %v2171_v38  ;;  %v2185_v30 = vpop.f32.mrf.mxu1 }
 0x367   : > { %v2054_v37 = vpop.f32.mrf.mxu2  ;;  %v2113_v61 = vpop.f32.mrf.mxu3 }
 0x368   : > { %v2055_v25 = vadd.f32 %v2054_v37, %v1781_v40 }
 0x36a   : > { %v2114_v43 = vadd.f32 %v2113_v61, %v2055_v25 }
 0x36c   : > { %v2173_v10 = vadd.f32 %v2172_v29, %v2114_v43  ;;  %2484 = vmatmul.bf16.gmra.mxu2 %v2254_v9  ;;  %2543 = vmatmul.bf16.gmra.mxu3 %v2254_v9  ;;  %v2246_v62 = vpop.f32.mrf.mxu0 }
 0x36e   : > { %v2232_v16 = vadd.f32 %v2231_v21, %v2173_v10  ;;  %v1801_v21 = vpop.permute.xlu0 %1800  ;;  %v2187_v1 = vpop.f32.mrf.mxu1 }
 0x36f   : > { %v2057_v19 = vpop.f32.mrf.mxu2  ;;  %v2116_v36 = vpop.f32.mrf.mxu3 }
 0x370   : > { %v2255_v41 = vpack.c.bf16 %v2232_v16, %v2230_v39  ;;  %v2058_v45 = vadd.f32 %v2057_v19, %v1786_v12 }
 0x372   : > { %2607 = vmatmul.bf16.gmra.mxu1 %v2255_v41  ;;  %2666 = vmatmul.bf16.gmra.mxu0 %v2255_v41  ;;  %v2117_v15 = vadd.f32 %v2116_v36, %v2058_v45 }
 0x374   : > { %v2176_v28 = vadd.f32 %v2175_v14, %v2117_v15 }
 0x376   : > { %v2235_v55 = vadd.f32 %v2234_v50, %v2176_v28 }
 0x377   : > { %v2059_v47 = vpop.f32.mrf.mxu2  ;;  %v2118_v27 = vpop.f32.mrf.mxu3 }
 0x378   : > { %v2060_v42 = vadd.f32 %v2059_v47, %v1791_v6 }
 0x37a   : > { %v2119_v35 = vadd.f32 %v2118_v27, %v2060_v42 }
 0x37c   : > { %v2178_v56 = vadd.f32 %v2177_v49, %v2119_v35  ;;  %2489 = vmatmul.bf16.gmra.mxu2 %v2255_v41  ;;  %2548 = vmatmul.bf16.gmra.mxu3 %v2255_v41 }
 0x37e   : > { %v2237_v8 = vadd.f32 %v2236_v31, %v2178_v56 }
 0x37f   : > { %v2062_v58 = vpop.f32.mrf.mxu2  ;;  %v2121_v48 = vpop.f32.mrf.mxu3 }
 0x380   : > { %v2256_v59 = vpack.c.bf16 %v2237_v8, %v2235_v55  ;;  %v2063_v29 = vadd.f32 %v2062_v58, %v1796_v60 }
 0x382   : > { %2612 = vmatmul.bf16.gmra.mxu1 %v2256_v59  ;;  %2671 = vmatmul.bf16.gmra.mxu0 %v2256_v59  ;;  %v2122_v11 = vadd.f32 %v2121_v48, %v2063_v29 }
 0x384   : > { %v2181_v2 = vadd.f32 %v2180_v4, %v2122_v11 }
 0x386   : > { %v2240_v50 = vadd.f32 %v2239_v20, %v2181_v2 }
 0x387   : > { %v2064_v54 = vpop.f32.mrf.mxu2  ;;  %v2123_v44 = vpop.f32.mrf.mxu3 }
 0x388   : > { %v2065_v34 = vadd.f32 %v2064_v54, %v1801_v21 }
 0x38a   : > { %v2124_v51 = vadd.f32 %v2123_v44, %v2065_v34 }
 0x38c   : > { %v2183_v14 = vadd.f32 %v2182_v46, %v2124_v51  ;;  %2494 = vmatmul.bf16.gmra.mxu2 %v2256_v59  ;;  %2553 = vmatmul.bf16.gmra.mxu3 %v2256_v59 }
 0x38e   : > { %v2242_v57 = vadd.f32 %v2241_v33, %v2183_v14 }
 0x38f   : > { %v2067_v53 = vpop.f32.mrf.mxu2  ;;  %v2126_v26 = vpop.f32.mrf.mxu3 }
 0x390   : > { %v2578_v52 = vpop.f32.mrf.mxu1  ;;  %v2637_v22 = vpop.f32.mrf.mxu0  ;;  %v2257_v0 = vpack.c.bf16 %v2242_v57, %v2240_v50  ;;  %v2068_v3 = vadd.f32 %v2067_v53, %v1806_v13 }
 0x391   : > { %v17285_v45 = vpack.c.bf16 %v2637_v22, %v2578_v52 }
 0x392   : > { %2617 = vmatmul.bf16.gmra.mxu1 %v2257_v0  ;;  %2676 = vmatmul.bf16.gmra.mxu0 %v2257_v0  ;;  %v2127_v5 = vadd.f32 %v2126_v26, %v2068_v3 }
 0x393   : > { %v2887_v47 = vunpack.c.h.b16 %v17285_v45 }
 0x394   : > { %v2186_v23 = vadd.f32 %v2185_v30, %v2127_v5 }
 0x396   : > { %v2245_v17 = vadd.f32 %v2244_v7, %v2186_v23 }
 0x397   : > { %v2069_v49 = vpop.f32.mrf.mxu2  ;;  %v2128_v31 = vpop.f32.mrf.mxu3 }
 0x398   : > { %v2070_v32 = vadd.f32 %v2069_v49, %v1811_v24  ;;  %v2580_v18 = vpop.f32.mrf.mxu1  ;;  %v2639_v9 = vpop.f32.mrf.mxu0 }
 0x399   : > { %v17283_v41 = vpack.c.bf16 %v2639_v9, %v2580_v18 }
 0x39a   : > { %v2129_v63 = vadd.f32 %v2128_v31, %v2070_v32 }
 0x39b   : > { %v2888_v6 = vunpack.c.h.b16 %v17283_v41 }
 0x39c   : > { %v2188_v40 = vadd.f32 %v2187_v1, %v2129_v63  ;;  %2499 = vmatmul.bf16.gmra.mxu2 %v2257_v0  ;;  %2558 = vmatmul.bf16.gmra.mxu3 %v2257_v0 }
 0x39d   : > { %v2907_v30 = vpack.c.b16 %v2888_v6, %v2887_v47 }
 0x39e   : > { %v2247_v37 = vadd.f32 %v2246_v62, %v2188_v40  ;;  %v2848_v40 = vunpack.c.l.b16 %v17283_v41 }
 0x39f   : > { %v2460_v61 = vpop.f32.mrf.mxu2  ;;  %v2519_v25 = vpop.f32.mrf.mxu3 }
 0x3a0   : > { %v17275_v4 = vpack.c.bf16 %v2519_v25, %v2460_v61  ;;  %v2583_v20 = vpop.f32.mrf.mxu1  ;;  %v2642_v38 = vpop.f32.mrf.mxu0  ;;  %v2258_v43 = vpack.c.bf16 %v2247_v37, %v2245_v17  ;;  %v2847_v37 = vunpack.c.l.b16 %v17285_v45 }
 0x3a1   : > { %v17277_v10 = vpack.c.bf16 %v2642_v38, %v2583_v20 }
 0x3a2   : > { %2622 = vmatmul.bf16.gmra.mxu1 %v2258_v43  ;;  %2681 = vmatmul.bf16.gmra.mxu0 %v2258_v43 }
 0x3a3   : > { %v2889_v46 = vunpack.c.h.b16 %v17277_v10  ;;  %v2849_v63 = vunpack.c.l.b16 %v17277_v10 }
 0x3a7   : > { %v17279_v39 = vpop.f32.mrf.mxu2  ;;  %v17281_v16 = vpop.f32.mrf.mxu3 }
 0x3a8   : > { %v2585_v19 = vpop.f32.mrf.mxu1  ;;  %v2644_v36 = vpop.f32.mrf.mxu0 }
 0x3a9   : > { %v2694_v12 = vpack.c.bf16 %v2644_v36, %v2585_v19 }
 0x3ab   : > { %v2890_v33 = vunpack.c.h.b16 %v2694_v12  ;;  %v2850_v18 = vunpack.c.l.b16 %v2694_v12 }
 0x3ac   : > { %2504 = vmatmul.bf16.gmra.mxu2 %v2258_v43  ;;  %2563 = vmatmul.bf16.gmra.mxu3 %v2258_v43  ;;  %v2867_v43 = vpack.c.b16 %v2848_v40, %v2847_v37 }
 0x3ad   : > { %v2908_v15 = vpack.c.b16 %v2890_v33, %v2889_v46  ;;  %v2868_v17 = vpack.c.b16 %v2850_v18, %v2849_v63  ;;  %v17361_v18 = vpack.c.bf16 %v17281_v16, %v17279_v39 }
 0x3af   : > { %3721 = vmatpush.bf16.msra.mxu0 %v2908_v15  ;;  %v2465_v27 = vpop.f32.mrf.mxu2  ;;  %v2524_v42 = vpop.f32.mrf.mxu3 }
 0x3b0   : > { %v17290_v28 = vpack.c.bf16 %v2524_v42, %v2465_v27  ;;  %v2588_v35 = vpop.f32.mrf.mxu1  ;;  %v2647_v56 = vpop.f32.mrf.mxu0 }
 0x3b1   : > { %v2696_v7 = vpack.c.bf16 %v2647_v56, %v2588_v35 }
 0x3b3   : > { %3722 = vmatpush.bf16.msra.mxu0 %v2907_v30  ;;  %v2891_v60 = vunpack.c.h.b16 %v2696_v7  ;;  %v2851_v24 = vunpack.c.l.b16 %v2696_v7 }
 0x3b7   : > { %v17292_v55 = vpop.f32.mrf.mxu2  ;;  %v17294_v8 = vpop.f32.mrf.mxu3 }
 0x3b8   : > { %v2590_v58 = vpop.f32.mrf.mxu1  ;;  %v2649_v48 = vpop.f32.mrf.mxu0 }
 0x3b9   : > { %v2698_v59 = vpack.c.bf16 %v2649_v48, %v2590_v58 }
 0x3bb   : > { %v2892_v29 = vunpack.c.h.b16 %v2698_v59  ;;  %v2852_v0 = vunpack.c.l.b16 %v2698_v59 }
 0x3bd   : > { %v17296_v21 = vpack.c.b16 %v2892_v29, %v2891_v60  ;;  %v2869_v23 = vpack.c.b16 %v2852_v0, %v2851_v24 }
 0x3bf   : > { %v2470_v11 = vpop.f32.mrf.mxu2  ;;  %v2529_v1 = vpop.f32.mrf.mxu3 }
 0x3c0   : > { %v17298_v62 = vpack.c.bf16 %v2529_v1, %v2470_v11  ;;  %v2593_v54 = vpop.f32.mrf.mxu1  ;;  %v2652_v44 = vpop.f32.mrf.mxu0 }
 0x3c1   : > { %v2700_v34 = vpack.c.bf16 %v2652_v44, %v2593_v54 }
 0x3c3   : > { %v2853_v53 = vunpack.c.l.b16 %v2700_v34  ;;  %v2893_v26 = vunpack.c.h.b16 %v2700_v34 }
 0x3c7   : > { %v17300_v2 = vpop.f32.mrf.mxu2  ;;  %v17302_v51 = vpop.f32.mrf.mxu3 }
 0x3c8   : > { %v2595_v14 = vpop.f32.mrf.mxu1  ;;  %v2654_v50 = vpop.f32.mrf.mxu0 }
 0x3c9   : > { %v2702_v57 = vpack.c.bf16 %v2654_v50, %v2595_v14 }
 0x3cb   : > { %v2854_v52 = vunpack.c.l.b16 %v2702_v57  ;;  %v2894_v22 = vunpack.c.h.b16 %v2702_v57 }
 0x3cd   : > { %v2870_v13 = vpack.c.b16 %v2854_v52, %v2853_v53  ;;  %v17304_v3 = vpack.c.b16 %v2894_v22, %v2893_v26  ;;  %v17345_v26 = vpack.c.bf16 %v17302_v51, %v17300_v2  ;;  %v2791_v2 = vunpack.c.h.b16 %v17298_v62 }
 0x3cf   : > { %3647 = vmatpush.bf16.msra.mxu1 %v2870_v13  ;;  %v2475_v5 = vpop.f32.mrf.mxu2  ;;  %v2534_v49 = vpop.f32.mrf.mxu3 }
 0x3d0   : > { %v2598_v31 = vpop.f32.mrf.mxu1  ;;  %v2657_v32 = vpop.f32.mrf.mxu0  ;;  %v17340_v14 = vpack.c.bf16 %v2534_v49, %v2475_v5  ;;  %v17355_v5 = vpack.c.bf16 %v17294_v8, %v17292_v55  ;;  %v2792_v49 = vunpack.c.h.b16 %v17345_v26  ;;  %v2789_v55 = vunpack.c.h.b16 %v17290_v28 }
 0x3d1   : > { %v17306_v9 = vpack.c.bf16 %v2657_v32, %v2598_v31  ;;  %v2788_v8 = vunpack.c.h.b16 %v17361_v18 }
 0x3d2   : > { %v2793_v24 = vunpack.c.h.b16 %v17340_v14 }
 0x3d3   : > { %3648 = vmatpush.bf16.msra.mxu1 %v2869_v23  ;;  %v2790_v23 = vunpack.c.h.b16 %v17355_v5 }
 0x3d5   : > { %v2808_v37 = vpack.c.b16 %v2790_v23, %v2789_v55 }
 0x3d7   : > { %3649 = vmatpush.bf16.msra.mxu1 %v2868_v17  ;;  %v2477_v61 = vpop.f32.mrf.mxu2  ;;  %v2536_v25 = vpop.f32.mrf.mxu3  ;;  %v2809_v17 = vpack.c.b16 %v2792_v49, %v2791_v2 }
 0x3d8   : > { %v17311_v20 = vpop.f32.mrf.mxu1  ;;  %v17313_v38 = vpop.f32.mrf.mxu0  ;;  %v17337_v54 = vpack.c.bf16 %v2536_v25, %v2477_v61  ;;  %v2787_v61 = vunpack.c.h.b16 %v17275_v4 }
 0x3da   : > { %v2794_v52 = vunpack.c.h.b16 %v17337_v54  ;;  %v2807_v39 = vpack.c.b16 %v2788_v8, %v2787_v61  ;;  %v2754_v23 = vunpack.c.l.b16 %v17337_v54 }
 0x3db   : > { %3650 = vmatpush.bf16.msra.mxu1 %v2867_v43 }
 0x3dc   : > { %v2810_v31 = vpack.c.b16 %v2794_v52, %v2793_v24 }
 0x3df   : > { %v2480_v19 = vpop.f32.mrf.mxu2  ;;  %v2539_v36 = vpop.f32.mrf.mxu3 }
 0x3e0   : > { %v2603_v12 = vpop.f32.mrf.mxu1  ;;  %v2662_v46 = vpop.f32.mrf.mxu0  ;;  %v17333_v29 = vpack.c.bf16 %v2539_v36, %v2480_v19 }
 0x3e1   : > { %v17315_v10 = vpack.c.bf16 %v2662_v46, %v2603_v12 }
 0x3e2   : > { %v2795_v50 = vunpack.c.h.b16 %v17333_v29 }
 0x3e7   : > { %v2482_v33 = vpop.f32.mrf.mxu2  ;;  %v2541_v41 = vpop.f32.mrf.mxu3 }
 0x3e8   : > { %v17317_v6 = vpop.f32.mrf.mxu1  ;;  %v17319_v45 = vpop.f32.mrf.mxu0  ;;  %v17325_v58 = vpack.c.bf16 %v2541_v41, %v2482_v33 }
 0x3ea   : > { %v2796_v44 = vunpack.c.h.b16 %v17325_v58  ;;  %v2756_v24 = vunpack.c.l.b16 %v17325_v58 }
 0x3ec   : > { %v2811_v13 = vpack.c.b16 %v2796_v44, %v2795_v50 }
 0x3ef   : > { %v2485_v15 = vpop.f32.mrf.mxu2  ;;  %v2544_v47 = vpop.f32.mrf.mxu3 }
 0x3f0   : > { %v2608_v27 = vpop.f32.mrf.mxu1  ;;  %v2667_v42 = vpop.f32.mrf.mxu0  ;;  %v17323_v56 = vpack.c.bf16 %v2544_v47, %v2485_v15 }
 0x3f1   : > { %v17321_v35 = vpack.c.bf16 %v2667_v42, %v2608_v27 }
 0x3f2   : > { %v2797_v11 = vunpack.c.h.b16 %v17323_v56 }
 0x3f7   : > { %v2487_v30 = vpop.f32.mrf.mxu2  ;;  %v2546_v7 = vpop.f32.mrf.mxu3 }
 0x3f8   : > { %v17327_v48 = vpack.c.bf16 %v2546_v7, %v2487_v30  ;;  %v17329_v59 = vpop.f32.mrf.mxu1  ;;  %v17331_v60 = vpop.f32.mrf.mxu0 }
 0x3fa   : > { %v2798_v1 = vunpack.c.h.b16 %v17327_v48  ;;  %v2758_v50 = vunpack.c.l.b16 %v17327_v48 }
 0x3fc   : > { %v2812_v34 = vpack.c.b16 %v2798_v1, %v2797_v11 }
 0x3fe   : > { %3573 = vmatpush.bf16.msra.mxu3 %v2812_v34 }
 0x3ff   : > { %v2490_v57 = vpop.f32.mrf.mxu2  ;;  %v2549_v53 = vpop.f32.mrf.mxu3 }
 0x400   : > { %v17348_v22 = vpop.f32.mrf.mxu1  ;;  %v17350_v0 = vpop.f32.mrf.mxu0  ;;  %v17373_v27 = vpack.c.bf16 %v2549_v53, %v2490_v57  ;;  %v2757_v53 = vunpack.c.l.b16 %v17323_v56  ;;  %v2753_v56 = vunpack.c.l.b16 %v17340_v14 }
 0x402   : > { %3574 = vmatpush.bf16.msra.mxu3 %v2811_v13  ;;  %v2759_v1 = vunpack.c.l.b16 %v17373_v27  ;;  %v2772_v49 = vpack.c.b16 %v2758_v50, %v2757_v53 }
 0x406   : > { %3575 = vmatpush.bf16.msra.mxu3 %v2810_v31  ;;  %v2755_v31 = vunpack.c.l.b16 %v17333_v29  ;;  %v2752_v29 = vunpack.c.l.b16 %v17345_v26  ;;  %v2750_v26 = vunpack.c.l.b16 %v17355_v5 }
 0x407   : > { %v2492_v51 = vpop.f32.mrf.mxu2  ;;  %v2551_v32 = vpop.f32.mrf.mxu3 }
 0x408   : > { %v2615_v63 = vpop.f32.mrf.mxu1  ;;  %v2674_v40 = vpop.f32.mrf.mxu0  ;;  %v17369_v33 = vpack.c.bf16 %v2551_v32, %v2492_v51  ;;  %v2771_v48 = vpack.c.b16 %v2756_v24, %v2755_v31 }
 0x40a   : > { %3576 = vmatpush.bf16.msra.mxu3 %v2809_v17  ;;  %v2760_v7 = vunpack.c.l.b16 %v17369_v33 }
 0x40c   : > { %v2773_v57 = vpack.c.b16 %v2760_v7, %v2759_v1  ;;  %v2859_v1 = vunpack.c.l.b16 %v17321_v35 }
 0x40e   : > { %3577 = vmatpush.bf16.msra.mxu3 %v2808_v37 }
 0x40f   : > { %v2495_v25 = vpop.f32.mrf.mxu2  ;;  %v2554_v43 = vpop.f32.mrf.mxu3 }
 0x410   : > { %v2618_v19 = vpop.f32.mrf.mxu1  ;;  %v2677_v36 = vpop.f32.mrf.mxu0  ;;  %v17367_v16 = vpack.c.bf16 %v2554_v43, %v2495_v25  ;;  %v2770_v43 = vpack.c.b16 %v2754_v23, %v2753_v56 }
 0x411   : > { %v17391_v61 = vpack.c.bf16 %v2677_v36, %v2618_v19 }
 0x412   : > { %3578 = vmatpush.bf16.msra.mxu3 %v2807_v39  ;;  %v2761_v42 = vunpack.c.l.b16 %v17367_v16  ;;  %v17394_v39 = vpack.c.bf16 %v2674_v40, %v2615_v63  ;;  %v17406_v63 = vpack.c.bf16 %v17331_v60, %v17329_v59  ;;  %v2747_v60 = vunpack.c.l.b16 %v17275_v4 }
 0x413   : > { %v2863_v14 = vunpack.c.l.b16 %v17391_v61  ;;  %v2903_v56 = vunpack.c.h.b16 %v17391_v61  ;;  %v14924_v61 = vld [vmem:[%s23224_s7 + $0x4] sm:$0xf] }
 0x414   : > { %v2860_v5 = vunpack.c.l.b16 %v17406_v63 }
 0x417   : > { %v2497_v12 = vpop.f32.mrf.mxu2  ;;  %v2556_v46 = vpop.f32.mrf.mxu3 }
 0x418   : > { %v17371_v41 = vpack.c.bf16 %v2556_v46, %v2497_v12  ;;  %v2620_v15 = vpop.f32.mrf.mxu1  ;;  %v2679_v47 = vpop.f32.mrf.mxu0  ;;  %v2751_v46 = vunpack.c.l.b16 %v17298_v62 }
 0x419   : > { %v17388_v8 = vpack.c.bf16 %v2679_v47, %v2620_v15  ;;  %v17400_v15 = vpack.c.bf16 %v17350_v0, %v17348_v22  ;;  %v2862_v47 = vunpack.c.l.b16 %v17394_v39  ;;  %v2748_v22 = vunpack.c.l.b16 %v17361_v18  ;;  %v12612_v18 = vld [vmem:[%s23224_s7] sm:$0xf] }
 0x41a   : > { %v2762_v30 = vunpack.c.l.b16 %v17371_v41  ;;  %v2769_v40 = vpack.c.b16 %v2752_v29, %v2751_v46  ;;  %v2855_v46 = vunpack.c.l.b16 %v17306_v9 }
 0x41b   : > { %v2864_v54 = vunpack.c.l.b16 %v17388_v8  ;;  %v2861_v0 = vunpack.c.l.b16 %v17400_v15  ;;  %v2904_v31 = vunpack.c.h.b16 %v17388_v8 }
 0x41c   : > { %v2774_v11 = vpack.c.b16 %v2762_v30, %v2761_v42  ;;  %v2749_v42 = vunpack.c.l.b16 %v17290_v28  ;;  %v17414_v30 = vpack.c.bf16 %v17319_v45, %v17317_v6  ;;  %v14926_v6 = vld [vmem:[%s23224_s7 + $0x10] sm:$0xf0]  ;;  %v17427_v45 = vpack.c.bf16 %v17313_v38, %v17311_v20 }
 0x41d   : > { %v2875_v62 = vpack.c.b16 %v2864_v54, %v2863_v14  ;;  %v2915_v29 = vpack.c.b16 %v2904_v31, %v2903_v56  ;;  %v2901_v14 = vunpack.c.h.b16 %v17400_v15  ;;  %v2801_v15 = vunpack.c.h.b16 %v17367_v16  ;;  %v14932_v31 = vld [vmem:[%s23224_s7 + $0x40] sm:$0xf0]  ;;  %v12660_v56 = vld [vmem:[%s23224_s7 + $0x58] sm:$0xf] }
 0x41e   : > { %3499 = vmatpush.bf16.msrb.mxu2 %v2774_v11  ;;  %v2768_v59 = vpack.c.b16 %v2750_v26, %v2749_v42  ;;  %v2874_v11 = vpack.c.b16 %v2862_v47, %v2861_v0  ;;  %v2900_v47 = vunpack.c.h.b16 %v17406_v63  ;;  %v12632_v63 = vld [vmem:[%s23224_s7 + $0x28] sm:$0xf]  ;;  %v2799_v16 = vunpack.c.h.b16 %v17373_v27 }
 0x41f   : > { %v17379_v44 = vpop.f32.mrf.mxu2  ;;  %v17381_v34 = vpop.f32.mrf.mxu3  ;;  %v2896_v27 = vunpack.c.h.b16 %v17427_v45 }
 0x420   : > { %v2623_v52 = vpop.f32.mrf.mxu1  ;;  %v2682_v13 = vpop.f32.mrf.mxu0  ;;  %v2719_v23 = vpack.c.bf16 %v17381_v34, %v17379_v44  ;;  %v2902_v44 = vunpack.c.h.b16 %v17394_v39  ;;  %v14925_v39 = vld [vmem:[%s23224_s7 + $0xc] sm:$0xf] }
 0x421   : > { %v2724_v2 = vpack.c.bf16 %v2682_v13, %v2623_v52  ;;  %v2767_v13 = vpack.c.b16 %v2748_v22, %v2747_v60 }
 0x422   : > { %3500 = vmatpush.bf16.msrb.mxu2 %v2773_v57  ;;  %v2858_v57 = vunpack.c.l.b16 %v17414_v30  ;;  %v2803_v54 = vunpack.c.h.b16 %v2719_v23  ;;  %v2914_v42 = vpack.c.b16 %v2902_v44, %v2901_v14  ;;  %v14940_v44 = vld [vmem:[%s23224_s7 + $0x84] sm:$0xf] }
 0x423   : > { %v2865_v58 = vunpack.c.l.b16 %v2724_v2  ;;  %v2905_v50 = vunpack.c.h.b16 %v2724_v2 }
 0x426   : > { %3501 = vmatpush.bf16.msrb.mxu2 %v2772_v49  ;;  %v2873_v49 = vpack.c.b16 %v2860_v5, %v2859_v1  ;;  %v2899_v5 = vunpack.c.h.b16 %v17321_v35  ;;  %v14931_v35 = vld [vmem:[%s23224_s7 + $0x38] sm:$0xf0] }
 0x427   : > { %v2502_v51 = vpop.f32.mrf.mxu2  ;;  %v2561_v32 = vpop.f32.mrf.mxu3 }
 0x428   : > { %v2625_v17 = vpop.f32.mrf.mxu1  ;;  %v2684_v55 = vpop.f32.mrf.mxu0  ;;  %v2721_v53 = vpack.c.bf16 %v2561_v32, %v2502_v51 }
 0x429   : > { %v2726_v37 = vpack.c.bf16 %v2684_v55, %v2625_v17  ;;  %v12613_v55 = vor.u32 %v14926_v6, %v12612_v18  ;;  %v12633_v18 = vor.u32 %v14931_v35, %v12632_v63  ;;  %v12722_v63 = vld [vmem:[%s23224_s7 + $0xe4] sm:$0xf0] }
 0x42a   : > { %3502 = vmatpush.bf16.msrb.mxu2 %v2771_v48  ;;  %v2764_v51 = vunpack.c.l.b16 %v2721_v53  ;;  %v2804_v32 = vunpack.c.h.b16 %v2721_v53  ;;  %v12652_v53 = vld [vmem:[%s23224_s7 + $0x50] sm:$0xf] }
 0x42b   : > { %v2866_v25 = vunpack.c.l.b16 %v2726_v37  ;;  %v2906_v7 = vunpack.c.h.b16 %v2726_v37  ;;  %v2857_v37 = vunpack.c.l.b16 %v17315_v10 }
 0x42d   : > { %v2876_v12 = vpack.c.b16 %v2866_v25, %v2865_v58  ;;  %v2916_v17 = vpack.c.b16 %v2906_v7, %v2905_v50  ;;  %v2856_v25 = vunpack.c.l.b16 %v17427_v45  ;;  %v2872_v34 = vpack.c.b16 %v2858_v57, %v2857_v37  ;;  %v14930_v45 = vld [vmem:[%s23224_s7 + $0x34] sm:$0xf]  ;;  %v14941_v37 = vld [vmem:[%s23224_s7 + $0x88] sm:$0xf0] }
 0x42e   : > { %3503 = vmatpush.bf16.msrb.mxu2 %v2770_v43  ;;  %v2763_v43 = vunpack.c.l.b16 %v2719_v23  ;;  %v2913_v7 = vpack.c.b16 %v2900_v47, %v2899_v5  ;;  %v2895_v50 = vunpack.c.h.b16 %v17306_v9  ;;  %v12642_v9 = vld [vmem:[%s23224_s7 + $0x44] sm:$0xf0] }
 0x42f   : > { %3723 = vmatpush.bf16.msra.mxu0 %v2876_v12  ;;  %v2505_v19 = vpop.f32.mrf.mxu2  ;;  %v2564_v36 = vpop.f32.mrf.mxu3  ;;  %v12614_v12 = vld [vmem:[%s23224_s7 + $0x14] sm:$0xf0]  ;;  %v12645_v57 = vor.u32 %v14930_v45, %v12642_v9  ;;  %v14961_v9 = vld [vmem:[%s23224_s7 + $0x128] sm:$0xf0] }
 0x430   : > { %v2723_v28 = vpack.c.bf16 %v2564_v36, %v2505_v19  ;;  %v12622_v19 = vld [vmem:[%s23224_s7 + $0x1c] sm:$0xf0]  ;;  %v2802_v36 = vunpack.c.h.b16 %v17371_v41  ;;  %v2775_v26 = vpack.c.b16 %v2764_v51, %v2763_v43  ;;  %v12617_v22 = vor.u32 %v14924_v61, %v12614_v12  ;;  %v14937_v51 = vld [vmem:[%s23224_s7 + $0x68] sm:$0xf0]  ;;  %v14946_v61 = vld [vmem:[%s23224_s7 + $0xb0] sm:$0xf0] }
 0x431   : > { %v12625_v0 = vor.u32 %v14925_v39, %v12622_v19  ;;  %v2898_v41 = vunpack.c.h.b16 %v17414_v30  ;;  %v14927_v30 = vld [vmem:[%s23224_s7 + $0x18] sm:$0xf0]  ;;  %v12680_v12 = vld [vmem:[%s23224_s7 + $0x80] sm:$0xf]  ;;  %v14944_v19 = vld [vmem:[%s23224_s7 + $0xa4] sm:$0xf] }
 0x432   : > { %3504 = vmatpush.bf16.msrb.mxu2 %v2769_v40  ;;  %v2765_v48 = vunpack.c.l.b16 %v2723_v28  ;;  %v2805_v20 = vunpack.c.h.b16 %v2723_v28  ;;  %v2815_v40 = vpack.c.b16 %v2804_v32, %v2803_v54  ;;  %v2814_v60 = vpack.c.b16 %v2802_v36, %v2801_v15  ;;  %v12692_v54 = vld [vmem:[%s23224_s7 + $0xa0] sm:$0xf]  ;;  %v12694_v36 = vld [vmem:[%s23224_s7 + $0xb4] sm:$0xf0]  ;;  %v12700_v15 = vld [vmem:[%s23224_s7 + $0xa8] sm:$0xf] }
 0x433   : > { %3724 = vmatpush.bf16.msra.mxu0 %v2875_v62  ;;  %v2871_v62 = vpack.c.b16 %v2856_v25, %v2855_v46  ;;  %v12674_v25 = vld [vmem:[%s23224_s7 + $0x8c] sm:$0xf0]  ;;  %v14942_v46 = vld [vmem:[%s23224_s7 + $0x90] sm:$0xf0]  ;;  %v12693_v14 = vor.u32 %v14946_v61, %v12692_v54  ;;  %v12697_v47 = vor.u32 %v14944_v19, %v12694_v36  ;;  %v12752_v45 = vld [vmem:[%s23224_s7 + $0x118] sm:$0xf] }
 0x434   : > { %v12681_v39 = vor.u32 %v14942_v46, %v12680_v12  ;;  %v12780_v54 = vld [vmem:[%s23224_s7 + $0x148] sm:$0xf]  ;;  %v14967_v61 = vld [vmem:[%s23224_s7 + $0x158] sm:$0xf0] }
 0x436   : > { %3505 = vmatpush.bf16.msrb.mxu2 %v2768_v59  ;;  %v2800_v59 = vunpack.c.h.b16 %v17369_v33  ;;  %v12620_v33 = vld [vmem:[%s23224_s7 + $0x8] sm:$0xf] }
 0x437   : > { %3725 = vmatpush.bf16.msra.mxu0 %v2874_v11  ;;  %v2507_v4 = vpop.f32.mrf.mxu2  ;;  %v2566_v52 = vpop.f32.mrf.mxu3  ;;  %v2897_v11 = vunpack.c.h.b16 %v17315_v10  ;;  %v12621_v6 = vor.u32 %v14927_v30, %v12620_v33  ;;  %v12634_v10 = vld [vmem:[%s23224_s7 + $0x3c] sm:$0xf0]  ;;  %v12732_v33 = vld [vmem:[%s23224_s7 + $0xf0] sm:$0xf]  ;;  %v14956_v30 = vld [vmem:[%s23224_s7 + $0x100] sm:$0xf0] }
 0x438   : > { %v2725_v24 = vpack.c.bf16 %v2566_v52, %v2507_v4  ;;  %v2813_v1 = vpack.c.b16 %v2800_v59, %v2799_v16  ;;  %v2911_v4 = vpack.c.b16 %v2896_v27, %v2895_v50  ;;  %v14929_v52 = vld [vmem:[%s23224_s7 + $0x2c] sm:$0xf]  ;;  %v12733_v27 = vor.u32 %v14956_v30, %v12732_v33  ;;  %v14955_v50 = vld [vmem:[%s23224_s7 + $0xfc] sm:$0xf] }
 0x439   : > { %v2912_v28 = vpack.c.b16 %v2898_v41, %v2897_v11  ;;  %v12714_v41 = vld [vmem:[%s23224_s7 + $0xdc] sm:$0xf0]  ;;  %v12720_v11 = vld [vmem:[%s23224_s7 + $0xd0] sm:$0xf] }
 0x43a   : > { %v2766_v38 = vunpack.c.l.b16 %v2725_v24  ;;  %v2806_v2 = vunpack.c.h.b16 %v2725_v24  ;;  %3506 = vmatpush.bf16.msrb.mxu2 %v2767_v13  ;;  %v12637_v13 = vor.u32 %v14929_v52, %v12634_v10  ;;  %v14936_v24 = vld [vmem:[%s23224_s7 + $0x60] sm:$0xf0] }
 0x43b   : > { %3726 = vmatpush.bf16.msra.mxu0 %v2873_v49  ;;  %v12640_v49 = vld [vmem:[%s23224_s7 + $0x30] sm:$0xf] }
 0x43c   : > { %v2776_v58 = vpack.c.b16 %v2766_v38, %v2765_v48  ;;  %v2816_v8 = vpack.c.b16 %v2806_v2, %v2805_v20  ;;  %v12641_v23 = vor.u32 %v14932_v31, %v12640_v49  ;;  %v14935_v48 = vld [vmem:[%s23224_s7 + $0x5c] sm:$0xf]  ;;  %v12672_v2 = vld [vmem:[%s23224_s7 + $0x78] sm:$0xf]  ;;  %v12754_v31 = vld [vmem:[%s23224_s7 + $0x12c] sm:$0xf0] }
 0x43d   : > { %3507 = vmatmul.bf16.vlgmr.msrb.gmra.mxu2 %v12613_v55  ;;  %v12654_v55 = vld [vmem:[%s23224_s7 + $0x64] sm:$0xf0]  ;;  %v12673_v32 = vor.u32 %v14941_v37, %v12672_v2  ;;  %v14959_v49 = vld [vmem:[%s23224_s7 + $0x11c] sm:$0xf] }
 0x43e   : > { %3795 = vmatpush.bf16.msra.mxu2 %v2916_v17  ;;  %3579 = vmatpush.bf16.msra.mxu3 %v2776_v58  ;;  %v14934_v17 = vld [vmem:[%s23224_s7 + $0x54] sm:$0xf]  ;;  %v12661_v58 = vor.u32 %v14937_v51, %v12660_v56  ;;  %v14964_v56 = vld [vmem:[%s23224_s7 + $0x144] sm:$0xf]  ;;  %v12774_v51 = vld [vmem:[%s23224_s7 + $0x154] sm:$0xf0] }
 0x43f   : > { %3651 = vmatpush.bf16.msra.mxu1 %v2816_v8  ;;  %3727 = vmatpush.bf16.msra.mxu0 %v2872_v34  ;;  %v12657_v20 = vor.u32 %v14934_v17, %v12654_v55  ;;  %v14939_v8 = vld [vmem:[%s23224_s7 + $0x7c] sm:$0xf]  ;;  %v12682_v34 = vld [vmem:[%s23224_s7 + $0x94] sm:$0xf0]  ;;  %v12757_v17 = vor.u32 %v14959_v49, %v12754_v31  ;;  %v12822_v31 = vld [vmem:[%s23224_s7 + $0x1ac] sm:$0xf0] }
 0x440   : > { %v12685_v43 = vor.u32 %v14940_v44, %v12682_v34  ;;  %v12792_v34 = vld [vmem:[%s23224_s7 + $0x168] sm:$0xf]  ;;  %v14975_v49 = vld [vmem:[%s23224_s7 + $0x19c] sm:$0xf] }
 0x442   : > { %3796 = vmatpush.bf16.msra.mxu2 %v2915_v29  ;;  %3580 = vmatpush.bf16.msra.mxu3 %v2775_v26  ;;  %v12677_v29 = vor.u32 %v14939_v8, %v12674_v25  ;;  %v14945_v26 = vld [vmem:[%s23224_s7 + $0xac] sm:$0xf]  ;;  %v12777_v25 = vor.u32 %v14964_v56, %v12774_v51 }
 0x443   : > { %3652 = vmatpush.bf16.msra.mxu1 %v2815_v40  ;;  %3728 = vmatpush.bf16.msra.mxu0 %v2871_v62  ;;  %v12702_v40 = vld [vmem:[%s23224_s7 + $0xbc] sm:$0xf0] }
 0x444   : > { %v12705_v62 = vor.u32 %v14945_v26, %v12702_v40  ;;  %v12781_v26 = vor.u32 %v14967_v61, %v12780_v54  ;;  %v12834_v54 = vld [vmem:[%s23224_s7 + $0x1cc] sm:$0xf0]  ;;  %v14980_v61 = vld [vmem:[%s23224_s7 + $0x1c4] sm:$0xf] }
 0x445   : > { %3581 = vmatmul.bf16.vlgmr.msra.gmra.mxu3 %v12617_v22  ;;  %v14951_v22 = vld [vmem:[%s23224_s7 + $0xd8] sm:$0xf0] }
 0x446   : > { %3797 = vmatpush.bf16.msra.mxu2 %v2914_v42  ;;  %3729 = vmatmul.bf16.vlgmr.msra.gmra.mxu0 %v12625_v0  ;;  %v12712_v42 = vld [vmem:[%s23224_s7 + $0xc8] sm:$0xf]  ;;  %v14947_v0 = vld [vmem:[%s23224_s7 + $0xb8] sm:$0xf0] }
 0x447   : > { %3653 = vmatpush.bf16.msra.mxu1 %v2814_v60  ;;  %v12713_v5 = vor.u32 %v14951_v22, %v12712_v42  ;;  %v12701_v59 = vor.u32 %v14947_v0, %v12700_v15  ;;  %v14949_v60 = vld [vmem:[%s23224_s7 + $0xcc] sm:$0xf]  ;;  %v3039_v42 = vpop.permute.xlu1 %3038  ;;  %v12794_v15 = vld [vmem:[%s23224_s7 + $0x17c] sm:$0xf0] }
 0x448   : > { %v12717_v16 = vor.u32 %v14949_v60, %v12714_v41  ;;  %v14969_v22 = vld [vmem:[%s23224_s7 + $0x16c] sm:$0xf] }
 0x44a   : > { %3798 = vmatpush.bf16.msra.mxu2 %v2913_v7  ;;  %v14950_v7 = vld [vmem:[%s23224_s7 + $0xd4] sm:$0xf] }
 0x44b   : > { %3654 = vmatpush.bf16.msra.mxu1 %v2813_v1  ;;  %v12725_v35 = vor.u32 %v14950_v7, %v12722_v63  ;;  %v14952_v1 = vld [vmem:[%s23224_s7 + $0xe0] sm:$0xf0]  ;;  %v12797_v63 = vor.u32 %v14969_v22, %v12794_v15  ;;  %v14982_v22 = vld [vmem:[%s23224_s7 + $0x1d0] sm:$0xf0] }
 0x44d   : > { %3512 = vmatmul.bf16.gmra.mxu2 %v12633_v18  ;;  %v14954_v18 = vld [vmem:[%s23224_s7 + $0xf4] sm:$0xf] }
 0x44e   : > { %3799 = vmatpush.bf16.msra.mxu2 %v2912_v28  ;;  %3655 = vmatmul.bf16.vlgmr.msra.gmra.mxu1 %v12621_v6  ;;  %v12721_v28 = vor.u32 %v14952_v1, %v12720_v11  ;;  %v12734_v6 = vld [vmem:[%s23224_s7 + $0x104] sm:$0xf0]  ;;  %v12812_v1 = vld [vmem:[%s23224_s7 + $0x190] sm:$0xf] }
 0x44f   : > { %v12737_v52 = vor.u32 %v14954_v18, %v12734_v6  ;;  %v12800_v18 = vld [vmem:[%s23224_s7 + $0x170] sm:$0xf]  ;;  %v14972_v6 = vld [vmem:[%s23224_s7 + $0x180] sm:$0xf0] }
 0x452   : > { %3800 = vmatpush.bf16.msra.mxu2 %v2911_v4  ;;  %v12742_v4 = vld [vmem:[%s23224_s7 + $0x10c] sm:$0xf0] }
 0x453   : > { %v12745_v10 = vor.u32 %v14955_v50, %v12742_v4 }
 0x455   : > { %3586 = vmatmul.bf16.gmra.mxu3 %v12637_v13  ;;  %v12740_v13 = vld [vmem:[%s23224_s7 + $0xf8] sm:$0xf] }
 0x456   : > { %3801 = vmatpush.bf16.msra.mxu2 %v17304_v3  ;;  %3734 = vmatmul.bf16.gmra.mxu0 %v12645_v57  ;;  %v12653_v3 = vor.u32 %v14936_v24, %v12652_v53  ;;  %v14957_v57 = vld [vmem:[%s23224_s7 + $0x108] sm:$0xf0]  ;;  %v12753_v53 = vor.u32 %v14961_v9, %v12752_v45  ;;  %v12801_v9 = vor.u32 %v14972_v6, %v12800_v18 }
 0x457   : > { %v12741_v24 = vor.u32 %v14957_v57, %v12740_v13 }
 0x45a   : > { %3802 = vmatpush.bf16.msra.mxu2 %v17296_v21  ;;  %v12662_v21 = vld [vmem:[%s23224_s7 + $0x6c] sm:$0xf0] }
 0x45b   : > { %v12665_v38 = vor.u32 %v14935_v48, %v12662_v21  ;;  %v12772_v48 = vld [vmem:[%s23224_s7 + $0x140] sm:$0xf]  ;;  %v14966_v21 = vld [vmem:[%s23224_s7 + $0x150] sm:$0xf0] }
 0x45c   : > { %v12773_v2 = vor.u32 %v14966_v21, %v12772_v48  ;;  %v12825_v48 = vor.u32 %v14975_v49, %v12822_v31  ;;  %v12832_v21 = vld [vmem:[%s23224_s7 + $0x1b8] sm:$0xf] }
 0x45d   : > { %3517 = vmatmul.bf16.gmra.mxu2 %v12653_v3  ;;  %v14960_v3 = vld [vmem:[%s23224_s7 + $0x124] sm:$0xf] }
 0x45e   : > { %3660 = vmatmul.bf16.gmra.mxu1 %v12641_v23  ;;  %v12762_v23 = vld [vmem:[%s23224_s7 + $0x134] sm:$0xf0] }
 0x45f   : > { %v12765_v55 = vor.u32 %v14960_v3, %v12762_v23 }
 0x465   : > { %3591 = vmatmul.bf16.gmra.mxu3 %v12657_v20  ;;  %v12760_v20 = vld [vmem:[%s23224_s7 + $0x120] sm:$0xf] }
 0x466   : > { %3739 = vmatmul.bf16.gmra.mxu0 %v12665_v38  ;;  %v14962_v38 = vld [vmem:[%s23224_s7 + $0x130] sm:$0xf0] }
 0x467   : > { %v12761_v37 = vor.u32 %v14962_v38, %v12760_v20  ;;  %v3054_v20 = vpop.permute.xlu1 %3053  ;;  %v14981_v38 = vld [vmem:[%s23224_s7 + $0x1c8] sm:$0xf0] }
 0x46d   : > { %3522 = vmatmul.bf16.gmra.mxu2 %v12673_v32  ;;  %v14965_v32 = vld [vmem:[%s23224_s7 + $0x14c] sm:$0xf] }
 0x46e   : > { %3665 = vmatmul.bf16.gmra.mxu1 %v12661_v58  ;;  %v12782_v58 = vld [vmem:[%s23224_s7 + $0x15c] sm:$0xf0] }
 0x46f   : > { %v12785_v44 = vor.u32 %v14965_v32, %v12782_v58 }
 0x475   : > { %3596 = vmatmul.bf16.gmra.mxu3 %v12677_v29  ;;  %v3034_v29 = vpop.permute.xlu0 %3033 }
 0x476   : > { %3744 = vmatmul.bf16.gmra.mxu0 %v12685_v43  ;;  %v14971_v43 = vld [vmem:[%s23224_s7 + $0x178] sm:$0xf0] }
 0x477   : > { %v12793_v36 = vor.u32 %v14971_v43, %v12792_v34  ;;  %v14979_v43 = vld [vmem:[%s23224_s7 + $0x1bc] sm:$0xf] }
 0x47d   : > { %3527 = vmatmul.bf16.gmra.mxu2 %v12693_v14 }
 0x47e   : > { %3670 = vmatmul.bf16.gmra.mxu1 %v12681_v39 }
 0x485   : > { %3601 = vmatmul.bf16.gmra.mxu3 %v12697_v47 }
 0x486   : > { %3749 = vmatmul.bf16.gmra.mxu0 %v12705_v62 }
 0x48d   : > { %3532 = vmatmul.bf16.gmra.mxu2 %v12713_v5  ;;  %v14970_v5 = vld [vmem:[%s23224_s7 + $0x174] sm:$0xf] }
 0x48e   : > { %3675 = vmatmul.bf16.gmra.mxu1 %v12701_v59  ;;  %v12802_v59 = vld [vmem:[%s23224_s7 + $0x184] sm:$0xf0] }
 0x48f   : > { %v12805_v33 = vor.u32 %v14970_v5, %v12802_v59 }
 0x495   : > { %3606 = vmatmul.bf16.gmra.mxu3 %v12717_v16 }
 0x496   : > { %3754 = vmatmul.bf16.gmra.mxu0 %v12725_v35 }
 0x49d   : > { %3537 = vmatmul.bf16.gmra.mxu2 %v12733_v27  ;;  %v3044_v27 = vpop.permute.xlu2 %3043 }
 0x49e   : > { %3680 = vmatmul.bf16.gmra.mxu1 %v12721_v28  ;;  %v14976_v28 = vld [vmem:[%s23224_s7 + $0x1a0] sm:$0xf0] }
 0x49f   : > { %v12813_v45 = vor.u32 %v14976_v28, %v12812_v1  ;;  %v12862_v1 = vld [vmem:[%s23224_s7 + $0x1fc] sm:$0xf0] }
 0x4a5   : > { %3611 = vmatmul.bf16.gmra.mxu3 %v12737_v52 }
 0x4a6   : > { %3759 = vmatmul.bf16.gmra.mxu0 %v12745_v10 }
 0x4ad   : > { %3542 = vmatmul.bf16.gmra.mxu2 %v12753_v53  ;;  %v14974_v53 = vld [vmem:[%s23224_s7 + $0x194] sm:$0xf] }
 0x4ae   : > { %3685 = vmatmul.bf16.gmra.mxu1 %v12741_v24  ;;  %v12814_v24 = vld [vmem:[%s23224_s7 + $0x1a4] sm:$0xf0] }
 0x4b5   : > { %3616 = vmatmul.bf16.gmra.mxu3 %v12757_v17  ;;  %v12817_v17 = vor.u32 %v14974_v53, %v12814_v24 }
 0x4b6   : > { %3764 = vmatmul.bf16.gmra.mxu0 %v12765_v55 }
 0x4bd   : > { %3547 = vmatmul.bf16.gmra.mxu2 %v12773_v2  ;;  %v12820_v2 = vld [vmem:[%s23224_s7 + $0x198] sm:$0xf] }
 0x4be   : > { %3690 = vmatmul.bf16.gmra.mxu1 %v12761_v37  ;;  %v14977_v37 = vld [vmem:[%s23224_s7 + $0x1a8] sm:$0xf0] }
 0x4c0   : > { %v3508_v8 = vpop.f32.mrf.mxu2 }
 0x4c1   : > { %v3509_v12 = vadd.f32 %v3508_v8, %v3034_v29  ;;  %v12833_v8 = vor.u32 %v14981_v38, %v12832_v21  ;;  %v17731_v29 = vpop.permute.xlu0 %3048 }
 0x4c3   : > { %v3730_v46 = vpop.f32.mrf.mxu0 }
 0x4c5   : > { %3621 = vmatmul.bf16.gmra.mxu3 %v12777_v25  ;;  %v12821_v25 = vor.u32 %v14977_v37, %v12820_v2 }
 0x4c6   : > { %3769 = vmatmul.bf16.gmra.mxu0 %v12785_v44 }
 0x4c8   : > { %v3510_v14 = vpop.f32.mrf.mxu2  ;;  %v3582_v39 = vpop.f32.mrf.mxu3 }
 0x4c9   : > { %v3583_v19 = vadd.f32 %v3582_v39, %v3509_v12  ;;  %v3511_v0 = vadd.f32 %v3510_v14, %v3039_v42  ;;  %v12842_v12 = vld [vmem:[%s23224_s7 + $0x1d4] sm:$0xf0]  ;;  %v12837_v39 = vor.u32 %v14979_v43, %v12834_v54  ;;  %v12840_v42 = vld [vmem:[%s23224_s7 + $0x1c0] sm:$0xf] }
 0x4cb   : > { %v3656_v40 = vpop.f32.mrf.mxu1  ;;  %v3732_v35 = vpop.f32.mrf.mxu0 }
 0x4cc   : > { %v3657_v47 = vadd.f32 %v3656_v40, %v3583_v19  ;;  %v3064_v40 = vpop.permute.xlu0 %3063 }
 0x4cd   : > { %3552 = vmatmul.bf16.gmra.mxu2 %v12793_v36  ;;  %v12845_v36 = vor.u32 %v14980_v61, %v12842_v12 }
 0x4ce   : > { %v17667_v62 = vadd.f32 %v3730_v46, %v3657_v47  ;;  %3695 = vmatmul.bf16.gmra.mxu1 %v12781_v26  ;;  %v12852_v26 = vld [vmem:[%s23224_s7 + $0x1e0] sm:$0xf]  ;;  %v14986_v47 = vld [vmem:[%s23224_s7 + $0x1f0] sm:$0xf0] }
 0x4d0   : > { %v3513_v60 = vpop.f32.mrf.mxu2  ;;  %v3584_v41 = vpop.f32.mrf.mxu3 }
 0x4d1   : > { %v3585_v7 = vadd.f32 %v3584_v41, %v3511_v0  ;;  %v3514_v50 = vadd.f32 %v3513_v60, %v3044_v27  ;;  %v12853_v60 = vor.u32 %v14986_v47, %v12852_v26  ;;  %v12841_v41 = vor.u32 %v14982_v22, %v12840_v42  ;;  %v12668_v47 = vld [vmem:[%s23224_s7 + $0x60] sm:$0xf]  ;;  %v14938_v42 = vld [vmem:[%s23224_s7 + $0x70] sm:$0xf0] }
 0x4d3   : > { %v3658_v16 = vpop.f32.mrf.mxu1 }
 0x4d4   : > { %v3659_v30 = vadd.f32 %v3658_v16, %v3585_v7  ;;  %v17765_v16 = vpop.permute.xlu2 %3058 }
 0x4d5   : > { %3626 = vmatmul.bf16.gmra.mxu3 %v12797_v63 }
 0x4d6   : > { %v17681_v11 = vadd.f32 %v3732_v35, %v3659_v30  ;;  %3774 = vmatmul.bf16.gmra.mxu0 %v12805_v33  ;;  %v14984_v35 = vld [vmem:[%s23224_s7 + $0x1e4] sm:$0xf]  ;;  %v12854_v33 = vld [vmem:[%s23224_s7 + $0x1f4] sm:$0xf0]  ;;  %v14985_v30 = vld [vmem:[%s23224_s7 + $0x1ec] sm:$0xf] }
 0x4d7   : > { %v12857_v18 = vor.u32 %v14984_v35, %v12854_v33 }
 0x4d8   : > { %v17695_v4 = vpop.f32.mrf.mxu2  ;;  %v3587_v52 = vpop.f32.mrf.mxu3 }
 0x4d9   : > { %v3588_v10 = vadd.f32 %v3587_v52, %v3514_v50  ;;  %v12865_v50 = vor.u32 %v14985_v30, %v12862_v1  ;;  %v12860_v52 = vld [vmem:[%s23224_s7 + $0x1e8] sm:$0xf] }
 0x4db   : > { %v3661_v13 = vpop.f32.mrf.mxu1 }
 0x4dc   : > { %v17697_v57 = vadd.f32 %v3661_v13, %v3588_v10  ;;  %v3074_v10 = vpop.permute.xlu2 %3073  ;;  %v14928_v13 = vld [vmem:[%s23224_s7 + $0x20] sm:$0xf0] }
 0x4dd   : > { %3557 = vmatmul.bf16.gmra.mxu2 %v12813_v45  ;;  %v14987_v45 = vld [vmem:[%s23224_s7 + $0x1f8] sm:$0xf0] }
 0x4de   : > { %3700 = vmatmul.bf16.gmra.mxu1 %v12801_v9  ;;  %v12628_v9 = vld [vmem:[%s23224_s7 + $0x10] sm:$0xf] }
 0x4e0   : > { %v3518_v3 = vpop.f32.mrf.mxu2  ;;  %v17711_v23 = vpop.f32.mrf.mxu3 }
 0x4e1   : > { %v3519_v56 = vadd.f32 %v3518_v3, %v3054_v20  ;;  %v12861_v3 = vor.u32 %v14987_v45, %v12860_v52  ;;  %v17799_v20 = vpop.permute.xlu1 %3068 }
 0x4e3   : > { %v17713_v55 = vpop.f32.mrf.mxu1 }
 0x4e4   : > { %v17831_v35 = vpop.permute.xlu2 %3088 }
 0x4e5   : > { %3631 = vmatmul.bf16.gmra.mxu3 %v12817_v17  ;;  %v12629_v17 = vor.u32 %v14928_v13, %v12628_v9 }
 0x4e6   : > { %3779 = vmatmul.bf16.gmra.mxu0 %v12825_v48 }
 0x4e8   : > { %v17727_v51 = vpop.f32.mrf.mxu2  ;;  %v3592_v32 = vpop.f32.mrf.mxu3 }
 0x4e9   : > { %v3593_v58 = vadd.f32 %v3592_v32, %v3519_v56  ;;  %v3084_v56 = vpop.permute.xlu1 %3083  ;;  %v12648_v32 = vld [vmem:[%s23224_s7 + $0x38] sm:$0xf] }
 0x4eb   : > { %v3666_v44 = vpop.f32.mrf.mxu1 }
 0x4ec   : > { %v17729_v34 = vadd.f32 %v3666_v44, %v3593_v58  ;;  %v14933_v58 = vld [vmem:[%s23224_s7 + $0x48] sm:$0xf0] }
 0x4ed   : > { %3562 = vmatmul.bf16.gmra.mxu2 %v12833_v8  ;;  %v12649_v54 = vor.u32 %v14933_v58, %v12648_v32  ;;  %v12708_v32 = vld [vmem:[%s23224_s7 + $0xb0] sm:$0xf]  ;;  %v14948_v58 = vld [vmem:[%s23224_s7 + $0xc0] sm:$0xf0] }
 0x4ee   : > { %3705 = vmatmul.bf16.gmra.mxu1 %v12821_v25 }
 0x4f0   : > { %v3523_v46 = vpop.f32.mrf.mxu2  ;;  %v17745_v14 = vpop.f32.mrf.mxu3 }
 0x4f1   : > { %v3524_v15 = vadd.f32 %v3523_v46, %v3064_v40  ;;  %v17815_v46 = vpop.permute.xlu0 %3078 }
 0x4f3   : > { %v17747_v19 = vpop.f32.mrf.mxu1 }
 0x4f5   : > { %3636 = vmatmul.bf16.gmra.mxu3 %v12837_v39 }
 0x4f6   : > { %3784 = vmatmul.bf16.gmra.mxu0 %v12845_v36 }
 0x4f8   : > { %v17761_v0 = vpop.f32.mrf.mxu2  ;;  %v3597_v5 = vpop.f32.mrf.mxu3 }
 0x4f9   : > { %v3598_v59 = vadd.f32 %v3597_v5, %v3524_v15  ;;  %v3094_v40 = vpop.permute.xlu0 %3093 }
 0x4fb   : > { %v3671_v7 = vpop.f32.mrf.mxu1 }
 0x4fc   : > { %v17763_v63 = vadd.f32 %v3671_v7, %v3598_v59 }
 0x4fd   : > { %3567 = vmatmul.bf16.gmra.mxu2 %v12853_v60  ;;  %v12669_v60 = vor.u32 %v14938_v42, %v12668_v47 }
 0x4fe   : > { %3710 = vmatmul.bf16.gmra.mxu1 %v12841_v41 }
 0x500   : > { %v3528_v27 = vpop.f32.mrf.mxu2  ;;  %v17779_v28 = vpop.f32.mrf.mxu3 }
 0x501   : > { %v3529_v53 = vadd.f32 %v3528_v27, %v3074_v10  ;;  %v3104_v27 = vpop.permute.xlu2 %3103  ;;  %v17867_v42 = vpop.permute.xlu0 %3108 }
 0x503   : > { %v17781_v6 = vpop.f32.mrf.mxu1 }
 0x505   : > { %3641 = vmatmul.bf16.gmra.mxu3 %v12857_v18  ;;  %v12688_v18 = vld [vmem:[%s23224_s7 + $0x88] sm:$0xf] }
 0x506   : > { %3789 = vmatmul.bf16.gmra.mxu0 %v12865_v50  ;;  %v14943_v50 = vld [vmem:[%s23224_s7 + $0x98] sm:$0xf0] }
 0x507   : > { %v12689_v13 = vor.u32 %v14943_v50, %v12688_v18 }
 0x508   : > { %v17795_v24 = vpop.f32.mrf.mxu2  ;;  %v3602_v49 = vpop.f32.mrf.mxu3 }
 0x509   : > { %v3603_v31 = vadd.f32 %v3602_v49, %v3529_v53 }
 0x50b   : > { %v3676_v48 = vpop.f32.mrf.mxu1 }
 0x50c   : > { %v17797_v21 = vadd.f32 %v3676_v48, %v3603_v31  ;;  %v17847_v31 = vpop.permute.xlu1 %3098 }
 0x50d   : > { %3803 = vmatmul.bf16.vlgmr.msra.gmra.mxu2 %v12629_v17 }
 0x50e   : > { %3715 = vmatmul.bf16.gmra.mxu1 %v12861_v3  ;;  %v17849_v3 = vpop.f32.mrf.mxu0 }
 0x510   : > { %v3533_v38 = vpop.f32.mrf.mxu2  ;;  %v17801_v2 = vpop.f32.mrf.mxu3 }
 0x511   : > { %v3534_v8 = vadd.f32 %v3533_v38, %v3084_v56 }
 0x513   : > { %v17803_v37 = vpop.f32.mrf.mxu1 }
 0x514   : > { %v3114_v56 = vpop.permute.xlu1 %3113 }
 0x518   : > { %v17811_v25 = vpop.f32.mrf.mxu2  ;;  %v3607_v44 = vpop.f32.mrf.mxu3 }
 0x519   : > { %v3608_v43 = vadd.f32 %v3607_v44, %v3534_v8 }
 0x51b   : > { %v3681_v61 = vpop.f32.mrf.mxu1 }
 0x51c   : > { %v17813_v12 = vadd.f32 %v3681_v61, %v3608_v43 }
 0x51d   : > { %3808 = vmatmul.bf16.gmra.mxu2 %v12649_v54  ;;  %v17863_v54 = vpop.f32.mrf.mxu0 }
 0x520   : > { %v3538_v39 = vpop.f32.mrf.mxu2  ;;  %v17817_v36 = vpop.f32.mrf.mxu3 }
 0x521   : > { %v3539_v22 = vadd.f32 %v3538_v39, %v3094_v40  ;;  %v12709_v39 = vor.u32 %v14948_v58, %v12708_v32  ;;  %v15019_v32 = vld [vmem:[%s23172_s9 + $0xec] sm:$0xf0]  ;;  %v15017_v58 = vld [vmem:[%s23172_s9 + $0xe4] sm:$0xf] }
 0x523   : > { %v17819_v26 = vpop.f32.mrf.mxu1 }
 0x528   : > { %v17827_v15 = vpop.f32.mrf.mxu2  ;;  %v3612_v5 = vpop.f32.mrf.mxu3 }
 0x529   : > { %v3613_v59 = vadd.f32 %v3612_v5, %v3539_v22 }
 0x52b   : > { %v3686_v41 = vpop.f32.mrf.mxu1 }
 0x52c   : > { %v17829_v7 = vadd.f32 %v3686_v41, %v3613_v59  ;;  %v3124_v41 = vpop.permute.xlu0 %3123 }
 0x52d   : > { %3813 = vmatmul.bf16.gmra.mxu2 %v12669_v60  ;;  %v17873_v60 = vpop.f32.mrf.mxu0 }
 0x530   : > { %v3543_v33 = vpop.f32.mrf.mxu2  ;;  %v17833_v30 = vpop.f32.mrf.mxu3 }
 0x531   : > { %v3544_v52 = vadd.f32 %v3543_v33, %v3104_v27  ;;  %v12728_v33 = vld [vmem:[%s23224_s7 + $0xd8] sm:$0xf]  ;;  %v14953_v27 = vld [vmem:[%s23224_s7 + $0xe8] sm:$0xf0] }
 0x533   : > { %v17835_v1 = vpop.f32.mrf.mxu1 }
 0x538   : > { %v17843_v10 = vpop.f32.mrf.mxu2  ;;  %v3617_v45 = vpop.f32.mrf.mxu3 }
 0x539   : > { %v3618_v9 = vadd.f32 %v3617_v45, %v3544_v52 }
 0x53b   : > { %v3691_v53 = vpop.f32.mrf.mxu1 }
 0x53c   : > { %v17845_v49 = vadd.f32 %v3691_v53, %v3618_v9  ;;  %v12729_v9 = vor.u32 %v14953_v27, %v12728_v33 }
 0x53d   : > { %3818 = vmatmul.bf16.gmra.mxu2 %v12689_v13 }
 0x540   : > { %v3548_v17 = vpop.f32.mrf.mxu2  ;;  %v17851_v48 = vpop.f32.mrf.mxu3 }
 0x541   : > { %v3549_v8 = vadd.f32 %v3548_v17, %v3114_v56  ;;  %v17885_v17 = vpop.permute.xlu2 %3118  ;;  %v12984_v56 = vld [vmem:[%s23172_s9 + $0xe0] sm:$0xf] }
 0x543   : > { %v17853_v38 = vpop.f32.mrf.mxu1 }
 0x548   : > { %v17861_v44 = vpop.f32.mrf.mxu2  ;;  %v3622_v43 = vpop.f32.mrf.mxu3 }
 0x549   : > { %v3623_v61 = vadd.f32 %v3622_v43, %v3549_v8  ;;  %v17896_v8 = vpop.f32.mrf.mxu0  ;;  %v12985_v43 = vor.u32 %v15019_v32, %v12984_v56  ;;  %v12976_v56 = vld [vmem:[%s23172_s9 + $0xc8] sm:$0xf]  ;;  %v15016_v32 = vld [vmem:[%s23172_s9 + $0xd4] sm:$0xf0] }
 0x54b   : > { %v3696_v40 = vpop.f32.mrf.mxu1  ;;  %4074 = vmatpush.bf16.msrb.mxu3 %v12985_v43 }
 0x54c   : > { %v17865_v47 = vadd.f32 %v3696_v40, %v3623_v61  ;;  %v12986_v61 = vld [vmem:[%s23172_s9 + $0xf0] sm:$0xf0]  ;;  %v15020_v40 = vld [vmem:[%s23172_s9 + $0xf4] sm:$0xf0] }
 0x54d   : > { %3823 = vmatmul.bf16.gmra.mxu2 %v12709_v39  ;;  %v12992_v39 = vld [vmem:[%s23172_s9 + $0xe8] sm:$0xf] }
 0x54e   : > { %23225 = vst [vmem:[#allocation14_spill] sm:$0xff] %v17865_v47 }
 0x550   : > { %v3553_v22 = vpop.f32.mrf.mxu2  ;;  %v17869_v5 = vpop.f32.mrf.mxu3 }
 0x551   : > { %v3554_v18 = vadd.f32 %v3553_v22, %v3124_v41  ;;  %v12989_v22 = vor.u32 %v15017_v58, %v12986_v61  ;;  %v12993_v41 = vor.u32 %v15020_v40, %v12992_v39  ;;  %v12977_v61 = vor.u32 %v15016_v32, %v12976_v56  ;;  %v12952_v39 = vld [vmem:[%s23172_s9 + $0xa0] sm:$0xf]  ;;  %v15011_v40 = vld [vmem:[%s23172_s9 + $0xac] sm:$0xf0]  ;;  %v14958_v56 = vld [vmem:[%s23224_s7 + $0x110] sm:$0xf0] }
 0x553   : > { %v17871_v59 = vpop.f32.mrf.mxu1  ;;  %4148 = vmatpush.bf16.msrb.mxu1 %v12989_v22  ;;  %4222 = vmatpush.bf16.msrb.mxu0 %v12993_v41  ;;  %v15009_v22 = vld [vmem:[%s23172_s9 + $0xa4] sm:$0xf]  ;;  %v12953_v41 = vor.u32 %v15011_v40, %v12952_v39 }
 0x554   : > { %23226 = vst [vmem:[#allocation15_spill] sm:$0xff] %v17871_v59 }
 0x557   : > { %4223 = vmatpush.bf16.msrb.mxu0 %v12977_v61  ;;  %v17953_v61 = vpop.f32.mrf.mxu0 }
 0x558   : > { %v17881_v50 = vpop.f32.mrf.mxu2  ;;  %v3627_v52 = vpop.f32.mrf.mxu3 }
 0x559   : > { %23227 = vst [vmem:[#allocation16_spill] sm:$0xff] %v17881_v50  ;;  %v3628_v45 = vadd.f32 %v3627_v52, %v3554_v18  ;;  %v12968_v18 = vld [vmem:[%s23172_s9 + $0xc0] sm:$0xf]  ;;  %v15015_v52 = vld [vmem:[%s23172_s9 + $0xcc] sm:$0xf0] }
 0x55b   : > { %v3701_v13 = vpop.f32.mrf.mxu1 }
 0x55c   : > { %v17883_v53 = vadd.f32 %v3701_v13, %v3628_v45  ;;  %v15013_v45 = vld [vmem:[%s23172_s9 + $0xc4] sm:$0xf]  ;;  %v12970_v13 = vld [vmem:[%s23172_s9 + $0xd0] sm:$0xf0] }
 0x55d   : > { %3828 = vmatmul.bf16.gmra.mxu2 %v12729_v9  ;;  %v12969_v9 = vor.u32 %v15015_v52, %v12968_v18  ;;  %v12973_v43 = vor.u32 %v15013_v45, %v12970_v13  ;;  %v12954_v18 = vld [vmem:[%s23172_s9 + $0xb0] sm:$0xf0]  ;;  %v12960_v52 = vld [vmem:[%s23172_s9 + $0xa8] sm:$0xf]  ;;  %v15012_v45 = vld [vmem:[%s23172_s9 + $0xb4] sm:$0xf0] }
 0x55e   : > { %23228 = vst [vmem:[#allocation17_spill] sm:$0xff] %v17883_v53  ;;  %v12748_v13 = vld [vmem:[%s23224_s7 + $0x100] sm:$0xf]  ;;  %v12957_v32 = vor.u32 %v15009_v22, %v12954_v18  ;;  %v15005_v22 = vld [vmem:[%s23172_s9 + $0x84] sm:$0xf] }
 0x55f   : > { %4075 = vmatpush.bf16.msrb.mxu3 %v12969_v9  ;;  %4149 = vmatpush.bf16.msrb.mxu1 %v12973_v43  ;;  %v3134_v9 = vpop.permute.xlu2 %3133  ;;  %v12961_v43 = vor.u32 %v15012_v45, %v12960_v52  ;;  %v12938_v52 = vld [vmem:[%s23172_s9 + $0x90] sm:$0xf0]  ;;  %v12944_v45 = vld [vmem:[%s23172_s9 + $0x88] sm:$0xf] }
 0x560   : > { %v3558_v33 = vpop.f32.mrf.mxu2  ;;  %v17907_v27 = vpop.f32.mrf.mxu3 }
 0x561   : > { %23229 = vst [vmem:[#allocation18_spill] sm:$0xff] %v17907_v27  ;;  %v3559_v39 = vadd.f32 %v3558_v33, %v3134_v9  ;;  %4224 = vmatpush.bf16.msrb.mxu0 %v12961_v43  ;;  %v15007_v27 = vld [vmem:[%s23172_s9 + $0x8c] sm:$0xf0]  ;;  %v12749_v33 = vor.u32 %v14958_v56, %v12748_v13  ;;  %v15008_v9 = vld [vmem:[%s23172_s9 + $0x94] sm:$0xf0]  ;;  %v12941_v43 = vor.u32 %v15005_v22, %v12938_v52 }
 0x562   : > { %v15001_v13 = vld [vmem:[%s23172_s9 + $0x64] sm:$0xf]  ;;  %v15004_v22 = vld [vmem:[%s23172_s9 + $0x74] sm:$0xf0] }
 0x563   : > { %v17927_v58 = vpop.f32.mrf.mxu1  ;;  %4076 = vmatpush.bf16.msrb.mxu3 %v12953_v41  ;;  %4150 = vmatpush.bf16.msrb.mxu1 %v12957_v32 }
 0x564   : > { %23230 = vst [vmem:[#allocation19_spill] sm:$0xff] %v17927_v58  ;;  %v12936_v58 = vld [vmem:[%s23172_s9 + $0x80] sm:$0xf] }
 0x565   : > { %v12937_v41 = vor.u32 %v15007_v27, %v12936_v58  ;;  %v12920_v27 = vld [vmem:[%s23172_s9 + $0x60] sm:$0xf]  ;;  %v15003_v58 = vld [vmem:[%s23172_s9 + $0x6c] sm:$0xf0] }
 0x566   : > { %v12921_v56 = vor.u32 %v15003_v58, %v12920_v27  ;;  %v12906_v58 = vld [vmem:[%s23172_s9 + $0x50] sm:$0xf0] }
 0x567   : > { %4077 = vmatpush.bf16.msrb.mxu3 %v12937_v41  ;;  %4151 = vmatpush.bf16.msrb.mxu1 %v12941_v43  ;;  %v18008_v43 = vpop.f32.mrf.mxu0 }
 0x568   : > { %v17955_v40 = vpop.f32.mrf.mxu2  ;;  %v3632_v53 = vpop.f32.mrf.mxu3 }
 0x569   : > { %23231 = vst [vmem:[#allocation20_spill] sm:$0xff] %v17955_v40  ;;  %v3633_v18 = vadd.f32 %v3632_v53, %v3559_v39  ;;  %v12945_v40 = vor.u32 %v15008_v9, %v12944_v45  ;;  %v17977_v53 = vpop.permute.xlu1 %3128  ;;  %v12922_v39 = vld [vmem:[%s23172_s9 + $0x70] sm:$0xf0]  ;;  %v14999_v9 = vld [vmem:[%s23172_s9 + $0x4c] sm:$0xf0] }
 0x56a   : > { %23233 = vst [vmem:[#allocation22_spill] sm:$0xff] %v17977_v53  ;;  %v14991_v53 = vld [vmem:[%s23172_s9 + $0xc] sm:$0xf0] }
 0x56b   : > { %v3706_v32 = vpop.f32.mrf.mxu1  ;;  %4225 = vmatpush.bf16.msrb.mxu0 %v12945_v40  ;;  %v12928_v40 = vld [vmem:[%s23172_s9 + $0x68] sm:$0xf]  ;;  %4078 = vmatpush.bf16.msrb.mxu3 %v12921_v56  ;;  %v15000_v56 = vld [vmem:[%s23172_s9 + $0x54] sm:$0xf0] }
 0x56c   : > { %v17975_v50 = vadd.f32 %v3706_v32, %v3633_v18  ;;  %v12925_v18 = vor.u32 %v15001_v13, %v12922_v39  ;;  %v12929_v41 = vor.u32 %v15004_v22, %v12928_v40  ;;  %v14997_v32 = vld [vmem:[%s23172_s9 + $0x44] sm:$0xf]  ;;  %v12912_v13 = vld [vmem:[%s23172_s9 + $0x48] sm:$0xf] }
 0x56d   : > { %3833 = vmatmul.bf16.gmra.mxu2 %v12749_v33  ;;  %v12904_v33 = vld [vmem:[%s23172_s9 + $0x40] sm:$0xf]  ;;  %v12909_v40 = vor.u32 %v14997_v32, %v12906_v58  ;;  %v12913_v22 = vor.u32 %v15000_v56, %v12912_v13  ;;  %v12890_v32 = vld [vmem:[%s23172_s9 + $0x30] sm:$0xf0]  ;;  %v14996_v58 = vld [vmem:[%s23172_s9 + $0x34] sm:$0xf0] }
 0x56e   : > { %23232 = vst [vmem:[#allocation21_spill] sm:$0xff] %v17975_v50  ;;  %4152 = vmatpush.bf16.msrb.mxu1 %v12925_v18  ;;  %v12905_v27 = vor.u32 %v14999_v9, %v12904_v33  ;;  %v12888_v18 = vld [vmem:[%s23172_s9 + $0x20] sm:$0xf]  ;;  %v14993_v33 = vld [vmem:[%s23172_s9 + $0x24] sm:$0xf] }
 0x56f   : > { %4226 = vmatpush.bf16.msrb.mxu0 %v12929_v41  ;;  %v14995_v41 = vld [vmem:[%s23172_s9 + $0x2c] sm:$0xf0]  ;;  %v12768_v56 = vld [vmem:[%s23224_s7 + $0x128] sm:$0xf]  ;;  %v18065_v47 = vpop.f32.mrf.mxu0 }
 0x570   : > { %v3563_v52 = vpop.f32.mrf.mxu2  ;;  %v17997_v45 = vpop.f32.mrf.mxu3  ;;  %4079 = vmatpush.bf16.msrb.mxu3 %v12905_v27  ;;  %v12889_v9 = vor.u32 %v14995_v41, %v12888_v18  ;;  %v12896_v27 = vld [vmem:[%s23172_s9 + $0x28] sm:$0xf] }
 0x571   : > { %23234 = vst [vmem:[#allocation23_spill] sm:$0xff] %v17997_v45  ;;  %v3144_v13 = vpop.permute.xlu1 %3143  ;;  %v12897_v18 = vor.u32 %v14996_v58, %v12896_v27  ;;  %v12872_v45 = vld [vmem:[%s23172_s9] sm:$0xf]  ;;  %v12874_v27 = vld [vmem:[%s23172_s9 + $0x10] sm:$0xf0] }
 0x572   : > { %4153 = vmatpush.bf16.msrb.mxu1 %v12909_v40  ;;  %v14963_v40 = vld [vmem:[%s23224_s7 + $0x138] sm:$0xf0]  ;;  %v3564_v41 = vadd.f32 %v3563_v52, %v3144_v13  ;;  %v12880_v58 = vld [vmem:[%s23172_s9 + $0x8] sm:$0xf]  ;;  %v14992_v13 = vld [vmem:[%s23172_s9 + $0x14] sm:$0xf0] }
 0x573   : > { %v18019_v39 = vpop.f32.mrf.mxu1  ;;  %4227 = vmatpush.bf16.msrb.mxu0 %v12913_v22  ;;  %v12893_v22 = vor.u32 %v14993_v33, %v12890_v32  ;;  %v14989_v33 = vld [vmem:[%s23172_s9 + $0x4] sm:$0xf]  ;;  %v12769_v52 = vor.u32 %v14963_v40, %v12768_v56 }
 0x574   : > { %23235 = vst [vmem:[#allocation24_spill] sm:$0xff] %v18019_v39  ;;  %4080 = vmatpush.bf16.msrb.mxu3 %v12889_v9  ;;  %v12873_v9 = vor.u32 %v14991_v53, %v12872_v45  ;;  %v18069_v53 = vpop.permute.xlu0 %3138 }
 0x576   : > { %4154 = vmatpush.bf16.msrb.mxu1 %v12893_v22 }
 0x577   : > { %4228 = vmatpush.bf16.msrb.mxu0 %v12897_v18  ;;  %v12877_v18 = vor.u32 %v14989_v33, %v12874_v27  ;;  %v12788_v33 = vld [vmem:[%s23224_s7 + $0x150] sm:$0xf] }
 0x578   : > { %v18045_v50 = vpop.f32.mrf.mxu2  ;;  %v3637_v39 = vpop.f32.mrf.mxu3  ;;  %4081 = vmatpush.bf16.msrb.mxu3 %v12873_v9 }
 0x579   : > { %23236 = vst [vmem:[#allocation25_spill] sm:$0xff] %v18045_v50  ;;  %v3638_v32 = vadd.f32 %v3637_v39, %v3564_v41  ;;  %v12881_v50 = vor.u32 %v14992_v13, %v12880_v58  ;;  %v18075_v41 = vpop.f32.mrf.mxu0 }
 0x57a   : > { %4155 = vmatpush.bf16.msrb.mxu1 %v12877_v18 }
 0x57b   : > { %v3711_v22 = vpop.f32.mrf.mxu1  ;;  %4229 = vmatpush.bf16.msrb.mxu0 %v12881_v50 }
 0x57c   : > { %v18067_v39 = vadd.f32 %v3711_v22, %v3638_v32  ;;  %v3154_v59 = vpop.permute.xlu0 %3153  ;;  %v14968_v32 = vld [vmem:[%s23224_s7 + $0x160] sm:$0xf0] }
 0x57d   : > { %3838 = vmatmul.bf16.gmra.mxu2 %v12769_v52  ;;  %v12789_v58 = vor.u32 %v14968_v32, %v12788_v33 }
 0x57e   : > { %23237 = vst [vmem:[#allocation26_spill] sm:$0xff] %v18067_v39 }
 0x580   : > { %v3568_v45 = vpop.f32.mrf.mxu2  ;;  %v18071_v56 = vpop.f32.mrf.mxu3 }
 0x581   : > { %v3569_v9 = vadd.f32 %v3568_v45, %v3154_v59  ;;  %v18087_v18 = vpop.f32.mrf.mxu0  ;;  %v14973_v59 = vld [vmem:[%s23224_s7 + $0x188] sm:$0xf0] }
 0x583   : > { %v18073_v40 = vpop.f32.mrf.mxu1 }
 0x584   : > { %23238 = vst [vmem:[#allocation27_spill] sm:$0xff] %v18073_v40  ;;  %v12808_v40 = vld [vmem:[%s23224_s7 + $0x178] sm:$0xf] }
 0x588   : > { %v18083_v27 = vpop.f32.mrf.mxu2  ;;  %v3642_v50 = vpop.f32.mrf.mxu3 }
 0x589   : > { %23239 = vst [vmem:[#allocation28_spill] sm:$0xff] %v18083_v27  ;;  %v3643_v52 = vadd.f32 %v3642_v50, %v3569_v9  ;;  %v18095_v27 = vpop.f32.mrf.mxu0  ;;  %v12809_v9 = vor.u32 %v14973_v59, %v12808_v40  ;;  %v15014_v40 = vld [vmem:[%s23172_s9 + $0xcc] sm:$0xf] }
 0x58a   : > { %v15010_v59 = vld [vmem:[%s23172_s9 + $0xac] sm:$0xf] }
 0x58b   : > { %v3716_v13 = vpop.f32.mrf.mxu1 }
 0x58c   : > { %v18085_v22 = vadd.f32 %v3716_v13, %v3643_v52  ;;  %v15018_v52 = vld [vmem:[%s23172_s9 + $0xec] sm:$0xf]  ;;  %v3516_v13 = vadd.f32 %v17695_v4, %v17731_v29  ;;  %v12978_v4 = vld [vmem:[%s23172_s9 + $0xd8] sm:$0xf0] }
 0x58d   : > { %3843 = vmatmul.bf16.gmra.mxu2 %v12789_v58  ;;  %v12994_v58 = vld [vmem:[%s23172_s9 + $0xf8] sm:$0xf0]  ;;  %v12981_v29 = vor.u32 %v15014_v40, %v12978_v4 }
 0x590   : > { %v3804_v39 = vpop.f32.mrf.mxu2 }
 0x591   : > { %v3805_v33 = vadd.f32 %v3804_v39, %v17667_v62  ;;  %v12997_v62 = vor.u32 %v15018_v52, %v12994_v58  ;;  %v14978_v52 = vld [vmem:[%s23224_s7 + $0x1b0] sm:$0xf0]  ;;  %v3736_v58 = vadd.f32 %v17849_v3, %v17697_v57  ;;  %v15002_v57 = vld [vmem:[%s23172_s9 + $0x6c] sm:$0xf]  ;;  %v12930_v3 = vld [vmem:[%s23172_s9 + $0x78] sm:$0xf0] }
 0x593   : > { %4296 = vmatpush.bf16.msrb.mxu2 %v12997_v62 }
 0x597   : > { %4297 = vmatpush.bf16.msrb.mxu2 %v12981_v29 }
 0x598   : > { %v3806_v45 = vpop.f32.mrf.mxu2 }
 0x599   : > { %v3807_v32 = vadd.f32 %v3806_v45, %v17681_v11  ;;  %v3590_v11 = vadd.f32 %v17711_v23, %v3516_v13  ;;  %v12962_v45 = vld [vmem:[%s23172_s9 + $0xb8] sm:$0xf0] }
 0x59b   : > { %v18099_v50 = vpack.c.bf16 %v3807_v32, %v3805_v33  ;;  %v3664_v23 = vadd.f32 %v17713_v55, %v3590_v11  ;;  %v18126_v33 = vpop.f32.mrf.mxu0  ;;  %v12965_v32 = vor.u32 %v15010_v59, %v12962_v45  ;;  %v15006_v55 = vld [vmem:[%s23172_s9 + $0x8c] sm:$0xf]  ;;  %v12946_v11 = vld [vmem:[%s23172_s9 + $0x98] sm:$0xf0] }
 0x59c   : > { %v12949_v59 = vor.u32 %v15006_v55, %v12946_v11  ;;  %v12848_v55 = vld [vmem:[%s23224_s7 + $0x1c8] sm:$0xf]  ;;  %v14983_v11 = vld [vmem:[%s23224_s7 + $0x1d8] sm:$0xf0] }
 0x59d   : > { %3848 = vmatmul.bf16.gmra.mxu2 %v12809_v9  ;;  %4082 = vmatmul.bf16.vlgmr.msrb.gmra.mxu3 %v18099_v50  ;;  %v12828_v9 = vld [vmem:[%s23224_s7 + $0x1a0] sm:$0xf]  ;;  %v3738_v13 = vadd.f32 %v17863_v54, %v3664_v23  ;;  %v3521_v54 = vadd.f32 %v17727_v51, %v17765_v16  ;;  %v12914_v51 = vld [vmem:[%s23172_s9 + $0x58] sm:$0xf0] }
 0x59e   : > { %4156 = vmatmul.bf16.vlgmr.msrb.gmra.mxu1 %v18099_v50  ;;  %4230 = vmatmul.bf16.vlgmr.msrb.gmra.mxu0 %v18099_v50  ;;  %v12829_v29 = vor.u32 %v14978_v52, %v12828_v9  ;;  %v14998_v52 = vld [vmem:[%s23172_s9 + $0x4c] sm:$0xf] }
 0x59f   : > { %4298 = vmatpush.bf16.msrb.mxu2 %v12965_v32  ;;  %v3595_v32 = vadd.f32 %v17745_v14, %v3521_v54  ;;  %v12917_v16 = vor.u32 %v14998_v52, %v12914_v51 }
 0x5a0   : > { %v3809_v39 = vpop.f32.mrf.mxu2 }
 0x5a1   : > { %v3810_v40 = vadd.f32 %v3809_v39, %v3736_v58  ;;  %v12933_v39 = vor.u32 %v15002_v57, %v12930_v3  ;;  %v14994_v58 = vld [vmem:[%s23172_s9 + $0x2c] sm:$0xf]  ;;  %v3669_v14 = vadd.f32 %v17747_v19, %v3595_v32  ;;  %v12882_v57 = vld [vmem:[%s23172_s9 + $0x18] sm:$0xf0] }
 0x5a2   : > { %v14990_v19 = vld [vmem:[%s23172_s9 + $0xc] sm:$0xf] }
 0x5a3   : > { %4299 = vmatpush.bf16.msrb.mxu2 %v12949_v59  ;;  %v18153_v23 = vpop.f32.mrf.mxu0  ;;  %v12885_v32 = vor.u32 %v14990_v19, %v12882_v57 }
 0x5a7   : > { %4300 = vmatpush.bf16.msrb.mxu2 %v12933_v39  ;;  %v12849_v39 = vor.u32 %v14983_v11, %v12848_v55  ;;  %v3531_v11 = vadd.f32 %v17795_v24, %v17815_v46 }
 0x5a8   : > { %v3811_v62 = vpop.f32.mrf.mxu2 }
 0x5a9   : > { %v3812_v4 = vadd.f32 %v3811_v62, %v3738_v13  ;;  %v12898_v13 = vld [vmem:[%s23172_s9 + $0x38] sm:$0xf0] }
 0x5aa   : > { %v12901_v62 = vor.u32 %v14994_v58, %v12898_v13 }
 0x5ab   : > { %v18143_v45 = vpack.c.bf16 %v3812_v4, %v3810_v40  ;;  %4301 = vmatpush.bf16.msrb.mxu2 %v12917_v16  ;;  %v3741_v40 = vadd.f32 %v17873_v60, %v17729_v34  ;;  %v3743_v4 = vadd.f32 %v17896_v8, %v3669_v14  ;;  %v3526_v34 = vadd.f32 %v17761_v0, %v17799_v20  ;;  %v12868_v16 = vld [vmem:[%s23224_s7 + $0x1f0] sm:$0xf]  ;;  %v14988_v0 = vld [vmem:[%s23224_s7 + $0x200] sm:$0xf0] }
 0x5ac   : > { %v3746_v20 = vadd.f32 %v17953_v61, %v17763_v63  ;;  %v3605_v63 = vadd.f32 %v17801_v2, %v3531_v11 }
 0x5ad   : > { %3853 = vmatmul.bf16.gmra.mxu2 %v12829_v29  ;;  %4087 = vmatmul.bf16.gmra.mxu3 %v18143_v45  ;;  %v18181_v29 = vpop.f32.mrf.mxu0  ;;  %v3600_v60 = vadd.f32 %v17779_v28, %v3526_v34  ;;  %v3761_v34 = vadd.f32 %v18126_v33, %v17829_v7 }
 0x5ae   : > { %4161 = vmatmul.bf16.gmra.mxu1 %v18143_v45  ;;  %4235 = vmatmul.bf16.gmra.mxu0 %v18143_v45  ;;  %v3766_v33 = vadd.f32 %v18181_v29, %v17845_v49  ;;  %v23240_v29 = vld [vmem:[#allocation15_spill] sm:$0xff] }
 0x5af   : > { %4302 = vmatpush.bf16.msrb.mxu2 %v12901_v62  ;;  %v3674_v51 = vadd.f32 %v17781_v6, %v3600_v60  ;;  %v12869_v62 = vor.u32 %v14988_v0, %v12868_v16 }
 0x5b0   : > { %v3814_v9 = vpop.f32.mrf.mxu2 }
 0x5b1   : > { %v3815_v3 = vadd.f32 %v3814_v9, %v3741_v40  ;;  %v3748_v58 = vadd.f32 %v18008_v43, %v3674_v51  ;;  %v3679_v43 = vadd.f32 %v17803_v37, %v3605_v63  ;;  %v3546_v51 = vadd.f32 %v17843_v10, %v17867_v42 }
 0x5b3   : > { %4303 = vmatpush.bf16.msrb.mxu2 %v12885_v32  ;;  %v3620_v7 = vadd.f32 %v17851_v48, %v3546_v51 }
 0x5b5   : > { %v18197_v9 = vpop.f32.mrf.mxu0 }
 0x5b8   : > { %v3816_v59 = vpop.f32.mrf.mxu2 }
 0x5b9   : > { %v3817_v54 = vadd.f32 %v3816_v59, %v3743_v4  ;;  %v3751_v4 = vadd.f32 %v18065_v47, %v17797_v21  ;;  %v3753_v59 = vadd.f32 %v18075_v41, %v3679_v43  ;;  %v3756_v41 = vadd.f32 %v18087_v18, %v17813_v12  ;;  %v23242_v43 = vld [vmem:[#allocation22_spill] sm:$0xff] }
 0x5bb   : > { %v18189_v52 = vpack.c.bf16 %v3817_v54, %v3815_v3  ;;  %v3536_v3 = vadd.f32 %v17811_v25, %v17831_v35 }
 0x5bd   : > { %3858 = vmatmul.bf16.gmra.mxu2 %v12849_v39  ;;  %4092 = vmatmul.bf16.gmra.mxu3 %v18189_v52  ;;  %v18209_v55 = vpop.f32.mrf.mxu0  ;;  %v3610_v21 = vadd.f32 %v17817_v36, %v3536_v3  ;;  %v3541_v36 = vadd.f32 %v17827_v15, %v17847_v31 }
 0x5be   : > { %4166 = vmatmul.bf16.gmra.mxu1 %v18189_v52  ;;  %4240 = vmatmul.bf16.gmra.mxu0 %v18189_v52 }
 0x5bf   : > { %v3684_v47 = vadd.f32 %v17819_v26, %v3610_v21  ;;  %v3615_v12 = vadd.f32 %v17833_v30, %v3541_v36 }
 0x5c0   : > { %v3819_v8 = vpop.f32.mrf.mxu2 }
 0x5c1   : > { %v3820_v28 = vadd.f32 %v3819_v8, %v3746_v20  ;;  %v3758_v25 = vadd.f32 %v18095_v27, %v3684_v47  ;;  %v3689_v27 = vadd.f32 %v17835_v1, %v3615_v12  ;;  %v3694_v1 = vadd.f32 %v17853_v38, %v3620_v7  ;;  %v23246_v47 = vld [vmem:[#allocation17_spill] sm:$0xff] }
 0x5c3   : > { %v3763_v15 = vadd.f32 %v18153_v23, %v3689_v27  ;;  %v3768_v10 = vadd.f32 %v18197_v9, %v3694_v1  ;;  %v23249_v1 = vld [vmem:[#allocation24_spill] sm:$0xff] }
 0x5c5   : > { %v18220_v40 = vpop.f32.mrf.mxu0 }
 0x5c8   : > { %v3821_v13 = vpop.f32.mrf.mxu2 }
 0x5c9   : > { %v3822_v14 = vadd.f32 %v3821_v13, %v3748_v58  ;;  %v3551_v58 = vadd.f32 %v17861_v44, %v17885_v17  ;;  %v18286_v13 = vpop.f32.mrf.mxu1 }
 0x5cb   : > { %v18211_v6 = vpack.c.bf16 %v3822_v14, %v3820_v28  ;;  %v3625_v49 = vadd.f32 %v17869_v5, %v3551_v58  ;;  %v23241_v28 = vld [vmem:[#allocation14_spill] sm:$0xff]  ;;  %v18291_v14 = vpop.f32.mrf.mxu3 }
 0x5cc   : > { %v3771_v44 = vadd.f32 %v18209_v55, %v23241_v28  ;;  %v23244_v55 = vld [vmem:[#allocation18_spill] sm:$0xff] }
 0x5cd   : > { %3863 = vmatmul.bf16.gmra.mxu2 %v12869_v62  ;;  %4097 = vmatmul.bf16.gmra.mxu3 %v18211_v6  ;;  %v18234_v2 = vpop.f32.mrf.mxu0  ;;  %v3699_v9 = vadd.f32 %v23240_v29, %v3625_v49 }
 0x5ce   : > { %4171 = vmatmul.bf16.gmra.mxu1 %v18211_v6  ;;  %4245 = vmatmul.bf16.gmra.mxu0 %v18211_v6 }
 0x5cf   : > { %v3773_v17 = vadd.f32 %v18220_v40, %v3699_v9 }
 0x5d0   : > { %v3824_v61 = vpop.f32.mrf.mxu2 }
 0x5d1   : > { %v3825_v46 = vadd.f32 %v3824_v61, %v3751_v4  ;;  %v23243_v4 = vld [vmem:[#allocation16_spill] sm:$0xff] }
 0x5d5   : > { %v18240_v54 = vpop.f32.mrf.mxu0 }
 0x5d8   : > { %v3826_v24 = vpop.f32.mrf.mxu2 }
 0x5d9   : > { %v3827_v19 = vadd.f32 %v3826_v24, %v3753_v59  ;;  %v3556_v59 = vadd.f32 %v23243_v4, %v23242_v43 }
 0x5db   : > { %v18225_v57 = vpack.c.bf16 %v3827_v19, %v3825_v46  ;;  %v3630_v40 = vadd.f32 %v23244_v55, %v3556_v59  ;;  %v23245_v19 = vld [vmem:[#allocation19_spill] sm:$0xff] }
 0x5dc   : > { %v23252_v55 = vld [vmem:[#allocation27_spill] sm:$0xff] }
 0x5dd   : > { %4102 = vmatmul.bf16.gmra.mxu3 %v18225_v57  ;;  %4304 = vmatmul.bf16.vlgmr.msrb.gmra.mxu2 %v18099_v50  ;;  %v18252_v18 = vpop.f32.mrf.mxu0  ;;  %v3704_v3 = vadd.f32 %v23245_v19, %v3630_v40  ;;  %v23253_v19 = vld [vmem:[#allocation26_spill] sm:$0xff] }
 0x5de   : > { %4176 = vmatmul.bf16.gmra.mxu1 %v18225_v57  ;;  %4250 = vmatmul.bf16.gmra.mxu0 %v18225_v57 }
 0x5e0   : > { %v3829_v37 = vpop.f32.mrf.mxu2 }
 0x5e1   : > { %v3830_v50 = vadd.f32 %v3829_v37, %v3756_v41  ;;  %v3776_v41 = vadd.f32 %v18234_v2, %v23246_v47 }
 0x5e5   : > { %v18261_v16 = vpop.f32.mrf.mxu0 }
 0x5e8   : > { %v3831_v35 = vpop.f32.mrf.mxu2 }
 0x5e9   : > { %v3832_v39 = vadd.f32 %v3831_v35, %v3758_v25  ;;  %v3778_v25 = vadd.f32 %v18240_v54, %v3704_v3 }
 0x5eb   : > { %v18242_v32 = vpack.c.bf16 %v3832_v39, %v3830_v50 }
 0x5ed   : > { %4107 = vmatmul.bf16.gmra.mxu3 %v18242_v32  ;;  %4309 = vmatmul.bf16.gmra.mxu2 %v18143_v45  ;;  %v18272_v42 = vpop.f32.mrf.mxu0 }
 0x5ee   : > { %4181 = vmatmul.bf16.gmra.mxu1 %v18242_v32  ;;  %4255 = vmatmul.bf16.gmra.mxu0 %v18242_v32  ;;  %v3786_v3 = vadd.f32 %v18272_v42, %v23253_v19 }
 0x5f0   : > { %v3834_v26 = vpop.f32.mrf.mxu2 }
 0x5f1   : > { %v3835_v60 = vadd.f32 %v3834_v26, %v3761_v34 }
 0x5f5   : > { %v18283_v38 = vpop.f32.mrf.mxu0 }
 0x5f8   : > { %v3836_v31 = vpop.f32.mrf.mxu2 }
 0x5f9   : > { %v3837_v8 = vadd.f32 %v3836_v31, %v3763_v15  ;;  %v23247_v31 = vld [vmem:[#allocation20_spill] sm:$0xff] }
 0x5fa   : > { %v3561_v2 = vadd.f32 %v23247_v31, %v18069_v53  ;;  %v23250_v53 = vld [vmem:[#allocation21_spill] sm:$0xff]  ;;  %v3159_v31 = vpop.permute.xlu1 %3158 }
 0x5fb   : > { %v18257_v45 = vpack.c.bf16 %v3837_v8, %v3835_v60  ;;  %v23248_v8 = vld [vmem:[#allocation23_spill] sm:$0xff] }
 0x5fc   : > { %v3635_v51 = vadd.f32 %v23248_v8, %v3561_v2  ;;  %v23254_v2 = vld [vmem:[#allocation28_spill] sm:$0xff] }
 0x5fd   : > { %4112 = vmatmul.bf16.gmra.mxu3 %v18257_v45  ;;  %4314 = vmatmul.bf16.gmra.mxu2 %v18189_v52  ;;  %v18293_v63 = vpop.f32.mrf.mxu0  ;;  %v3571_v8 = vadd.f32 %v23254_v2, %v3159_v31 }
 0x5fe   : > { %4186 = vmatmul.bf16.gmra.mxu1 %v18257_v45  ;;  %4260 = vmatmul.bf16.gmra.mxu0 %v18257_v45 }
 0x600   : > { %v3839_v30 = vpop.f32.mrf.mxu2 }
 0x601   : > { %v3840_v0 = vadd.f32 %v3839_v30, %v3766_v33  ;;  %v3709_v33 = vadd.f32 %v23249_v1, %v3635_v51 }
 0x605   : > { %v18305_v37 = vpop.f32.mrf.mxu0 }
 0x608   : > { %v3841_v23 = vpop.f32.mrf.mxu2 }
 0x609   : > { %v3842_v20 = vadd.f32 %v3841_v23, %v3768_v10  ;;  %v3781_v23 = vadd.f32 %v18252_v18, %v23250_v53 }
 0x60b   : > { %v18274_v52 = vpack.c.bf16 %v3842_v20, %v3840_v0  ;;  %v3783_v0 = vadd.f32 %v18261_v16, %v3709_v33 }
 0x60d   : > { %4117 = vmatmul.bf16.gmra.mxu3 %v18274_v52  ;;  %4319 = vmatmul.bf16.gmra.mxu2 %v18211_v6 }
 0x60e   : > { %4191 = vmatmul.bf16.gmra.mxu1 %v18274_v52  ;;  %4265 = vmatmul.bf16.gmra.mxu0 %v18274_v52 }
 0x610   : > { %v3844_v48 = vpop.f32.mrf.mxu2 }
 0x611   : > { %v3845_v6 = vadd.f32 %v3844_v48, %v3771_v44 }
 0x618   : > { %v3846_v62 = vpop.f32.mrf.mxu2 }
 0x619   : > { %v3847_v11 = vadd.f32 %v3846_v62, %v3773_v17 }
 0x61b   : > { %v18295_v5 = vpack.c.bf16 %v3847_v11, %v3845_v6  ;;  %v4157_v61 = vpop.f32.mrf.mxu1  ;;  %v18320_v60 = vpop.f32.mrf.mxu0  ;;  %v23251_v11 = vld [vmem:[#allocation25_spill] sm:$0xff] }
 0x61c   : > { %v3149_v6 = vpop.permute.xlu2 %3148 }
 0x61d   : > { %4122 = vmatmul.bf16.gmra.mxu3 %v18295_v5  ;;  %4324 = vmatmul.bf16.gmra.mxu2 %v18225_v57 }
 0x61e   : > { %4196 = vmatmul.bf16.gmra.mxu1 %v18295_v5  ;;  %4270 = vmatmul.bf16.gmra.mxu0 %v18295_v5 }
 0x620   : > { %v3849_v24 = vpop.f32.mrf.mxu2  ;;  %v4083_v46 = vpop.f32.mrf.mxu3 }
 0x621   : > { %v18310_v35 = vpack.c.bf16 %v4157_v61, %v4083_v46  ;;  %v3850_v39 = vadd.f32 %v3849_v24, %v3776_v41  ;;  %v3566_v61 = vadd.f32 %v23251_v11, %v3149_v6 }
 0x623   : > { %v4159_v21 = vpop.f32.mrf.mxu1  ;;  %v4448_v26 = vunpack.c.l.b16 %v18310_v35  ;;  %v18333_v20 = vpop.f32.mrf.mxu0  ;;  %v3640_v16 = vadd.f32 %v18071_v56, %v3566_v61 }
 0x625   : > { %v3714_v40 = vadd.f32 %v23252_v55, %v3640_v16 }
 0x628   : > { %v3851_v57 = vpop.f32.mrf.mxu2  ;;  %v4085_v50 = vpop.f32.mrf.mxu3 }
 0x629   : > { %v3852_v36 = vadd.f32 %v3851_v57, %v3778_v25  ;;  %v18312_v12 = vpack.c.bf16 %v4159_v21, %v4085_v50 }
 0x62b   : > { %v18315_v27 = vpack.c.bf16 %v3852_v36, %v3850_v39  ;;  %v4449_v34 = vunpack.c.l.b16 %v18312_v12  ;;  %v4162_v15 = vpop.f32.mrf.mxu1  ;;  %v18345_v59 = vpop.f32.mrf.mxu0 }
 0x62d   : > { %4127 = vmatmul.bf16.gmra.mxu3 %v18315_v27  ;;  %4329 = vmatmul.bf16.gmra.mxu2 %v18242_v32  ;;  %v18324_v54 = vpack.c.b16 %v4449_v34, %v4448_v26 }
 0x62e   : > { %4201 = vmatmul.bf16.gmra.mxu1 %v18315_v27  ;;  %4275 = vmatmul.bf16.gmra.mxu0 %v18315_v27 }
 0x630   : > { %v3854_v7 = vpop.f32.mrf.mxu2  ;;  %v4088_v30 = vpop.f32.mrf.mxu3 }
 0x631   : > { %v4374_v32 = vpack.c.bf16 %v4162_v15, %v4088_v30  ;;  %v3855_v48 = vadd.f32 %v3854_v7, %v3781_v23  ;;  %v3645_v7 = vadd.f32 %v18291_v14, %v3571_v8  ;;  %v3791_v14 = vadd.f32 %v18293_v63, %v18085_v22 }
 0x633   : > { %v4164_v10 = vpop.f32.mrf.mxu1  ;;  %v4450_v28 = vunpack.c.l.b16 %v4374_v32  ;;  %v18351_v56 = vpop.f32.mrf.mxu0  ;;  %v4502_v30 = vunpack.c.h.b16 %v4374_v32 }
 0x638   : > { %v3856_v58 = vpop.f32.mrf.mxu2  ;;  %v4090_v49 = vpop.f32.mrf.mxu3 }
 0x639   : > { %v3857_v29 = vadd.f32 %v3856_v58, %v3783_v0  ;;  %v4376_v9 = vpack.c.bf16 %v4164_v10, %v4090_v49  ;;  %v4501_v10 = vunpack.c.h.b16 %v18312_v12  ;;  %v3719_v0 = vadd.f32 %v18286_v13, %v3645_v7 }
 0x63b   : > { %v18335_v44 = vpack.c.bf16 %v3857_v29, %v3855_v48  ;;  %v4451_v17 = vunpack.c.l.b16 %v4376_v9  ;;  %v4167_v62 = vpop.f32.mrf.mxu1  ;;  %v4503_v42 = vunpack.c.h.b16 %v4376_v9  ;;  %v4241_v49 = vpop.f32.mrf.mxu0  ;;  %v3793_v32 = vadd.f32 %v18305_v37, %v3719_v0 }
 0x63d   : > { %4132 = vmatmul.bf16.gmra.mxu3 %v18335_v44  ;;  %4334 = vmatmul.bf16.gmra.mxu2 %v18257_v45  ;;  %v18340_v18 = vpack.c.b16 %v4451_v17, %v4450_v28  ;;  %v3788_v45 = vadd.f32 %v18283_v38, %v3714_v40  ;;  %v4527_v23 = vpack.c.b16 %v4503_v42, %v4502_v30 }
 0x63e   : > { %4206 = vmatmul.bf16.gmra.mxu1 %v18335_v44  ;;  %4280 = vmatmul.bf16.gmra.mxu0 %v18335_v44 }
 0x640   : > { %v3859_v43 = vpop.f32.mrf.mxu2  ;;  %v4093_v4 = vpop.f32.mrf.mxu3 }
 0x641   : > { %v4378_v46 = vpack.c.bf16 %v4167_v62, %v4093_v4  ;;  %v3860_v41 = vadd.f32 %v3859_v43, %v3786_v3 }
 0x643   : > { %v4169_v24 = vpop.f32.mrf.mxu1  ;;  %v4452_v50 = vunpack.c.l.b16 %v4378_v46  ;;  %v4504_v39 = vunpack.c.h.b16 %v4378_v46  ;;  %v4243_v22 = vpop.f32.mrf.mxu0 }
 0x648   : > { %v3861_v21 = vpop.f32.mrf.mxu2  ;;  %v4095_v47 = vpop.f32.mrf.mxu3 }
 0x649   : > { %v3862_v25 = vadd.f32 %v3861_v21, %v3788_v45  ;;  %v4380_v57 = vpack.c.bf16 %v4169_v24, %v4095_v47 }
 0x64b   : > { %v18353_v36 = vpack.c.bf16 %v3862_v25, %v3860_v41  ;;  %v4453_v26 = vunpack.c.l.b16 %v4380_v57  ;;  %v4505_v34 = vunpack.c.h.b16 %v4380_v57  ;;  %v4172_v15 = vpop.f32.mrf.mxu1  ;;  %v4246_v16 = vpop.f32.mrf.mxu0 }
 0x64d   : > { %v4528_v51 = vpack.c.b16 %v4505_v34, %v4504_v39  ;;  %4137 = vmatmul.bf16.gmra.mxu3 %v18353_v36  ;;  %4339 = vmatmul.bf16.gmra.mxu2 %v18274_v52  ;;  %v18358_v38 = vpack.c.b16 %v4453_v26, %v4452_v50  ;;  %v4500_v52 = vunpack.c.h.b16 %v18310_v35 }
 0x64e   : > { %4211 = vmatmul.bf16.gmra.mxu1 %v18353_v36  ;;  %4285 = vmatmul.bf16.gmra.mxu0 %v18353_v36 }
 0x64f   : > { %5614 = vmatpush.bf16.msra.mxu1 %v4528_v51  ;;  %v4526_v48 = vpack.c.b16 %v4501_v10, %v4500_v52 }
 0x650   : > { %v3864_v1 = vpop.f32.mrf.mxu2  ;;  %v4098_v33 = vpop.f32.mrf.mxu3 }
 0x651   : > { %v18364_v53 = vpack.c.bf16 %v4172_v15, %v4098_v33  ;;  %v3865_v9 = vadd.f32 %v3864_v1, %v3791_v14 }
 0x653   : > { %v18368_v58 = vpop.f32.mrf.mxu1  ;;  %5615 = vmatpush.bf16.msra.mxu1 %v4527_v23  ;;  %v4248_v21 = vpop.f32.mrf.mxu0 }
 0x657   : > { %5616 = vmatpush.bf16.msra.mxu1 %v4526_v48 }
 0x658   : > { %v3866_v29 = vpop.f32.mrf.mxu2  ;;  %v18373_v12 = vpop.f32.mrf.mxu3 }
 0x659   : > { %v3867_v28 = vadd.f32 %v3866_v29, %v3793_v32 }
 0x65b   : > { %v18375_v17 = vpack.c.bf16 %v3867_v28, %v3865_v9  ;;  %v4177_v13 = vpop.f32.mrf.mxu1 }
 0x65d   : > { %4142 = vmatmul.bf16.gmra.mxu3 %v18375_v17  ;;  %4344 = vmatmul.bf16.gmra.mxu2 %v18295_v5 }
 0x65e   : > { %4216 = vmatmul.bf16.gmra.mxu1 %v18375_v17  ;;  %4290 = vmatmul.bf16.gmra.mxu0 %v18375_v17 }
 0x660   : > { %v4103_v63 = vpop.f32.mrf.mxu3  ;;  %v4305_v37 = vpop.f32.mrf.mxu2 }
 0x661   : > { %v18381_v35 = vpack.c.bf16 %v4177_v13, %v4103_v63  ;;  %v4371_v62 = vpack.c.bf16 %v4305_v37, %v18320_v60 }
 0x663   : > { %v18384_v6 = vpop.f32.mrf.mxu1  ;;  %v4578_v5 = vunpack.c.l.b16 %v4371_v62  ;;  %v4630_v4 = vunpack.c.h.b16 %v4371_v62 }
 0x668   : > { %v18386_v11 = vpop.f32.mrf.mxu3  ;;  %v4307_v61 = vpop.f32.mrf.mxu2 }
 0x669   : > { %v4373_v43 = vpack.c.bf16 %v4307_v61, %v18333_v20 }
 0x66b   : > { %v4579_v55 = vunpack.c.l.b16 %v4373_v43  ;;  %v4631_v40 = vunpack.c.h.b16 %v4373_v43  ;;  %v4182_v24 = vpop.f32.mrf.mxu1 }
 0x66d   : > { %v18389_v46 = vpack.c.b16 %v4631_v40, %v4630_v4  ;;  %4349 = vmatmul.bf16.gmra.mxu2 %v18315_v27  ;;  %v18392_v19 = vpack.c.b16 %v4579_v55, %v4578_v5  ;;  %v4251_v27 = vpop.f32.mrf.mxu0 }
 0x670   : > { %v4108_v60 = vpop.f32.mrf.mxu3  ;;  %v4310_v3 = vpop.f32.mrf.mxu2 }
 0x671   : > { %v18395_v45 = vpack.c.bf16 %v4310_v3, %v18345_v59  ;;  %v18438_v5 = vpack.c.bf16 %v4182_v24, %v4108_v60  ;;  %v18445_v3 = vpack.c.bf16 %v18384_v6, %v18386_v11  ;;  %v18453_v24 = vpack.c.bf16 %v18368_v58, %v18373_v12 }
 0x673   : > { %v4184_v47 = vpop.f32.mrf.mxu1  ;;  %v4632_v57 = vunpack.c.h.b16 %v18395_v45  ;;  %v4457_v60 = vunpack.c.l.b16 %v18445_v3 }
 0x675   : > { %v4253_v2 = vpop.f32.mrf.mxu0 }
 0x678   : > { %v4110_v41 = vpop.f32.mrf.mxu3  ;;  %v4312_v20 = vpop.f32.mrf.mxu2 }
 0x679   : > { %v18398_v25 = vpack.c.bf16 %v4312_v20, %v18351_v56  ;;  %v18432_v62 = vpack.c.bf16 %v4184_v47, %v4110_v41  ;;  %v4458_v41 = vunpack.c.l.b16 %v18438_v5 }
 0x67b   : > { %v4633_v50 = vunpack.c.h.b16 %v18398_v25  ;;  %v4187_v39 = vpop.f32.mrf.mxu1 }
 0x67d   : > { %4354 = vmatmul.bf16.gmra.mxu2 %v18335_v44  ;;  %v18403_v26 = vpack.c.b16 %v4633_v50, %v4632_v57  ;;  %v4256_v10 = vpop.f32.mrf.mxu0  ;;  %v4456_v50 = vunpack.c.l.b16 %v18381_v35 }
 0x680   : > { %v4113_v34 = vpop.f32.mrf.mxu3  ;;  %v4315_v59 = vpop.f32.mrf.mxu2 }
 0x681   : > { %v18405_v15 = vpack.c.bf16 %v4315_v59, %v4241_v49 }
 0x683   : > { %v4189_v31 = vpop.f32.mrf.mxu1  ;;  %v4634_v51 = vunpack.c.h.b16 %v18405_v15 }
 0x685   : > { %v4258_v9 = vpop.f32.mrf.mxu0 }
 0x688   : > { %v4115_v8 = vpop.f32.mrf.mxu3  ;;  %v4317_v42 = vpop.f32.mrf.mxu2 }
 0x689   : > { %v18407_v56 = vpack.c.bf16 %v4317_v42, %v4243_v22  ;;  %v18418_v14 = vpack.c.bf16 %v4189_v31, %v4115_v8  ;;  %v4478_v31 = vpack.c.b16 %v4457_v60, %v4456_v50  ;;  %v4454_v8 = vunpack.c.l.b16 %v18364_v53 }
 0x68b   : > { %v4635_v7 = vunpack.c.h.b16 %v18407_v56  ;;  %v4192_v30 = vpop.f32.mrf.mxu1  ;;  %v4461_v61 = vunpack.c.l.b16 %v18418_v14 }
 0x68d   : > { %4359 = vmatmul.bf16.gmra.mxu2 %v18353_v36  ;;  %v18412_v44 = vpack.c.b16 %v4635_v7, %v4634_v51  ;;  %v18424_v36 = vpack.c.bf16 %v4187_v39, %v4113_v34  ;;  %v4261_v20 = vpop.f32.mrf.mxu0  ;;  %v4455_v34 = vunpack.c.l.b16 %v18453_v24 }
 0x68f   : > { %v4460_v4 = vunpack.c.l.b16 %v18424_v36  ;;  %v4477_v51 = vpack.c.b16 %v4455_v34, %v4454_v8 }
 0x690   : > { %v4118_v1 = vpop.f32.mrf.mxu3  ;;  %v4320_v33 = vpop.f32.mrf.mxu2 }
 0x691   : > { %v18414_v0 = vpack.c.bf16 %v4192_v30, %v4118_v1  ;;  %v18416_v52 = vpack.c.bf16 %v4320_v33, %v4246_v16  ;;  %v4480_v47 = vpack.c.b16 %v4461_v61, %v4460_v4 }
 0x693   : > { %v4194_v23 = vpop.f32.mrf.mxu1  ;;  %v4462_v28 = vunpack.c.l.b16 %v18414_v0  ;;  %v4636_v37 = vunpack.c.h.b16 %v18416_v52 }
 0x695   : > { %v4263_v30 = vpop.f32.mrf.mxu0 }
 0x698   : > { %v4120_v49 = vpop.f32.mrf.mxu3  ;;  %v4322_v48 = vpop.f32.mrf.mxu2 }
 0x699   : > { %v18420_v32 = vpack.c.bf16 %v4194_v23, %v4120_v49  ;;  %v18422_v29 = vpack.c.bf16 %v4322_v48, %v4248_v21  ;;  %v4459_v21 = vunpack.c.l.b16 %v18432_v62  ;;  %v15024_v49 = vld [vmem:[%s23173_s10 + $0x18] sm:$0xf0] }
 0x69b   : > { %v4463_v13 = vunpack.c.l.b16 %v18420_v32  ;;  %v4637_v22 = vunpack.c.h.b16 %v18422_v29  ;;  %v18429_v63 = vpop.f32.mrf.mxu1  ;;  %v4479_v57 = vpack.c.b16 %v4459_v21, %v4458_v41 }
 0x69d   : > { %v4481_v16 = vpack.c.b16 %v4463_v13, %v4462_v28  ;;  %4364 = vmatmul.bf16.gmra.mxu2 %v18375_v17  ;;  %v18436_v43 = vpack.c.b16 %v4637_v22, %v4636_v37  ;;  %v18471_v13 = vpop.f32.mrf.mxu0 }
 0x69f   : > { %5531 = vmatpush.bf16.msra.mxu3 %v4481_v16 }
 0x6a0   : > { %v18441_v55 = vpop.f32.mrf.mxu3  ;;  %v4325_v40 = vpop.f32.mrf.mxu2 }
 0x6a1   : > { %v4387_v6 = vpack.c.bf16 %v4325_v40, %v4251_v27 }
 0x6a3   : > { %v18449_v17 = vpop.f32.mrf.mxu1  ;;  %5532 = vmatpush.bf16.msra.mxu3 %v4480_v47  ;;  %v4638_v12 = vunpack.c.h.b16 %v4387_v6  ;;  %v4586_v47 = vunpack.c.l.b16 %v4387_v6 }
 0x6a5   : > { %v4268_v34 = vpop.f32.mrf.mxu0 }
 0x6a7   : > { %5533 = vmatpush.bf16.msra.mxu3 %v4479_v57 }
 0x6a8   : > { %v18457_v11 = vpop.f32.mrf.mxu3  ;;  %v4327_v39 = vpop.f32.mrf.mxu2 }
 0x6a9   : > { %v4389_v59 = vpack.c.bf16 %v4327_v39, %v4253_v2  ;;  %v13000_v2 = vld [vmem:[%s23173_s10] sm:$0xf]  ;;  %v4584_v39 = vunpack.c.l.b16 %v18416_v52  ;;  %v4581_v52 = vunpack.c.l.b16 %v18398_v25 }
 0x6aa   : > { %v13001_v37 = vor.u32 %v15024_v49, %v13000_v2 }
 0x6ab   : > { %v4639_v42 = vunpack.c.h.b16 %v4389_v59  ;;  %v4202_v58 = vpop.f32.mrf.mxu1  ;;  %5534 = vmatpush.bf16.msra.mxu3 %v4478_v31  ;;  %v4582_v31 = vunpack.c.l.b16 %v18405_v15 }
 0x6ad   : > { %v18461_v7 = vpack.c.b16 %v4639_v42, %v4638_v12 }
 0x6af   : > { %5535 = vmatpush.bf16.msra.mxu3 %v4477_v51 }
 0x6b0   : > { %v4128_v1 = vpop.f32.mrf.mxu3  ;;  %v4330_v27 = vpop.f32.mrf.mxu2 }
 0x6b1   : > { %v4391_v23 = vpack.c.bf16 %v4330_v27, %v4256_v10  ;;  %v4580_v27 = vunpack.c.l.b16 %v18395_v45  ;;  %v18499_v2 = vpack.c.bf16 %v4202_v58, %v4128_v1 }
 0x6b3   : > { %v4204_v33 = vpop.f32.mrf.mxu1  ;;  %5536 = vmatpush.bf16.msra.mxu3 %v18358_v38  ;;  %v4588_v61 = vunpack.c.l.b16 %v4391_v23  ;;  %v4640_v16 = vunpack.c.h.b16 %v4391_v23  ;;  %v4605_v1 = vpack.c.b16 %v4581_v52, %v4580_v27  ;;  %v4508_v27 = vunpack.c.h.b16 %v18381_v35  ;;  %v13008_v35 = vld [vmem:[%s23173_s10 + $0x8] sm:$0xf] }
 0x6b7   : > { %5537 = vmatpush.bf16.msra.mxu3 %v18340_v18  ;;  %v4587_v18 = vunpack.c.l.b16 %v4389_v59 }
 0x6b8   : > { %v4130_v48 = vpop.f32.mrf.mxu3  ;;  %v4332_v28 = vpop.f32.mrf.mxu2 }
 0x6b9   : > { %v4393_v22 = vpack.c.bf16 %v4332_v28, %v4258_v9  ;;  %v4585_v9 = vunpack.c.l.b16 %v18422_v29  ;;  %v4608_v50 = vpack.c.b16 %v4587_v18, %v4586_v47  ;;  %v13028_v29 = vld [vmem:[%s23173_s10 + $0x38] sm:$0xf]  ;;  %v18492_v12 = vpack.c.bf16 %v4204_v33, %v4130_v48  ;;  %v4271_v48 = vpop.f32.mrf.mxu0 }
 0x6bb   : > { %v4589_v38 = vunpack.c.l.b16 %v4393_v22  ;;  %v4641_v10 = vunpack.c.h.b16 %v4393_v22  ;;  %v4207_v4 = vpop.f32.mrf.mxu1  ;;  %5538 = vmatpush.bf16.msra.mxu3 %v18324_v54  ;;  %v4607_v59 = vpack.c.b16 %v4585_v9, %v4584_v39  ;;  %v4519_v45 = vunpack.c.h.b16 %v18492_v12 }
 0x6bd   : > { %v4609_v40 = vpack.c.b16 %v4589_v38, %v4588_v61  ;;  %v18475_v21 = vpack.c.b16 %v4641_v10, %v4640_v16  ;;  %v18516_v61 = vpack.c.bf16 %v18429_v63, %v18441_v55  ;;  %v4518_v16 = vunpack.c.h.b16 %v18499_v2 }
 0x6be   : > { %5539 = vmatmul.bf16.vlgmr.msra.gmra.mxu3 %v13001_v37  ;;  %v4514_v63 = vunpack.c.h.b16 %v18414_v0 }
 0x6bf   : > { %5863 = vmatpush.bf16.msrb.mxu3 %v18389_v46  ;;  %5780 = vmatpush.bf16.msra.mxu2 %v4609_v40  ;;  %v4583_v46 = vunpack.c.l.b16 %v18407_v56  ;;  %v4515_v40 = vunpack.c.h.b16 %v18420_v32  ;;  %v4513_v32 = vunpack.c.h.b16 %v18418_v14  ;;  %v4510_v14 = vunpack.c.h.b16 %v18438_v5 }
 0x6c0   : > { %v4133_v41 = vpop.f32.mrf.mxu3  ;;  %v4335_v60 = vpop.f32.mrf.mxu2  ;;  %v4506_v5 = vunpack.c.h.b16 %v18364_v53 }
 0x6c1   : > { %v18478_v57 = vpack.c.bf16 %v4335_v60, %v4261_v20  ;;  %v18483_v8 = vpack.c.bf16 %v4207_v4, %v4133_v41  ;;  %v15031_v20 = vld [vmem:[%s23173_s10 + $0x50] sm:$0xf0]  ;;  %v4606_v51 = vpack.c.b16 %v4583_v46, %v4582_v31  ;;  %v4516_v4 = vunpack.c.h.b16 %v18516_v61  ;;  %v4273_v55 = vpop.f32.mrf.mxu0  ;;  %v13056_v41 = vld [vmem:[%s23173_s10 + $0x70] sm:$0xf]  ;;  %v15038_v60 = vld [vmem:[%s23173_s10 + $0x88] sm:$0xf0] }
 0x6c2   : > { %v13029_v23 = vor.u32 %v15031_v20, %v13028_v29  ;;  %v4533_v0 = vpack.c.b16 %v4515_v40, %v4514_v63  ;;  %v4512_v46 = vunpack.c.h.b16 %v18424_v36  ;;  %v4511_v29 = vunpack.c.h.b16 %v18432_v62 }
 0x6c3   : > { %v4209_v54 = vpop.f32.mrf.mxu1  ;;  %5781 = vmatpush.bf16.msra.mxu2 %v4608_v50  ;;  %v4520_v49 = vunpack.c.h.b16 %v18483_v8  ;;  %v4590_v33 = vunpack.c.l.b16 %v18478_v57 }
 0x6c4   : > { %v4531_v36 = vpack.c.b16 %v4511_v29, %v4510_v14 }
 0x6c7   : > { %5782 = vmatpush.bf16.msra.mxu2 %v4607_v59 }
 0x6c8   : > { %v4135_v6 = vpop.f32.mrf.mxu3  ;;  %v4337_v42 = vpop.f32.mrf.mxu2 }
 0x6c9   : > { %v18494_v56 = vpack.c.bf16 %v4209_v54, %v4135_v6  ;;  %v18496_v15 = vpack.c.bf16 %v4337_v42, %v4263_v30  ;;  %v18509_v30 = vpack.c.bf16 %v18449_v17, %v18457_v11  ;;  %v4535_v11 = vpack.c.b16 %v4519_v45, %v4518_v16 }
 0x6ca   : > { %v13057_v54 = vor.u32 %v15038_v60, %v13056_v41  ;;  %v4509_v42 = vunpack.c.h.b16 %v18445_v3  ;;  %v15045_v3 = vld [vmem:[%s23173_s10 + $0xc0] sm:$0xf0] }
 0x6cb   : > { %v4521_v28 = vunpack.c.h.b16 %v18494_v56  ;;  %v4591_v25 = vunpack.c.l.b16 %v18496_v15  ;;  %v18504_v22 = vpop.f32.mrf.mxu1  ;;  %5783 = vmatpush.bf16.msra.mxu2 %v4606_v51  ;;  %v4517_v17 = vunpack.c.h.b16 %v18509_v30  ;;  %v4276_v51 = vpop.f32.mrf.mxu0 }
 0x6cc   : > { %v4530_v62 = vpack.c.b16 %v4509_v42, %v4508_v27  ;;  %v13112_v27 = vld [vmem:[%s23173_s10 + $0xe0] sm:$0xf] }
 0x6cd   : > { %v4536_v58 = vpack.c.b16 %v4521_v28, %v4520_v49  ;;  %v18512_v37 = vpack.c.b16 %v4591_v25, %v4590_v33  ;;  %v4534_v47 = vpack.c.b16 %v4517_v17, %v4516_v4  ;;  %v13084_v28 = vld [vmem:[%s23173_s10 + $0xa8] sm:$0xf] }
 0x6ce   : > { %5544 = vmatmul.bf16.gmra.mxu3 %v13029_v23  ;;  %v4507_v23 = vunpack.c.h.b16 %v18453_v24  ;;  %v15025_v24 = vld [vmem:[%s23173_s10 + $0x20] sm:$0xf0]  ;;  %v13085_v4 = vor.u32 %v15045_v3, %v13084_v28 }
 0x6cf   : > { %5697 = vmatpush.bf16.msra.mxu0 %v4536_v58  ;;  %5784 = vmatpush.bf16.msra.mxu2 %v4605_v1  ;;  %v13009_v40 = vor.u32 %v15025_v24, %v13008_v35  ;;  %v15021_v3 = vld [vmem:[%s23173_s10 + $0x4] sm:$0xf]  ;;  %v13002_v35 = vld [vmem:[%s23173_s10 + $0x1c] sm:$0xf0] }
 0x6d0   : > { %v4138_v38 = vpop.f32.mrf.mxu3  ;;  %v4340_v10 = vpop.f32.mrf.mxu2 }
 0x6d1   : > { %v18531_v9 = vpack.c.bf16 %v4340_v10, %v18471_v13  ;;  %v4532_v13 = vpack.c.b16 %v4513_v32, %v4512_v46  ;;  %v4529_v10 = vpack.c.b16 %v4507_v23, %v4506_v5  ;;  %v4414_v17 = vpack.c.bf16 %v18504_v22, %v4138_v38  ;;  %v13010_v46 = vld [vmem:[%s23173_s10 + $0x24] sm:$0xf0] }
 0x6d3   : > { %v4214_v18 = vpop.f32.mrf.mxu1  ;;  %5698 = vmatpush.bf16.msra.mxu0 %v4535_v11  ;;  %5785 = vmatpush.bf16.msra.mxu2 %v18392_v19  ;;  %v4592_v31 = vunpack.c.l.b16 %v18531_v9  ;;  %v4470_v22 = vunpack.c.l.b16 %v4414_v17  ;;  %v4522_v38 = vunpack.c.h.b16 %v4414_v17 }
 0x6d7   : > { %5699 = vmatpush.bf16.msra.mxu0 %v4534_v47 }
 0x6d8   : > { %v4140_v50 = vpop.f32.mrf.mxu3  ;;  %v4342_v19 = vpop.f32.mrf.mxu2 }
 0x6d9   : > { %v18534_v39 = vpack.c.bf16 %v4342_v19, %v4268_v34  ;;  %v4416_v1 = vpack.c.bf16 %v4214_v18, %v4140_v50  ;;  %v18562_v19 = vpop.f32.mrf.mxu0 }
 0x6db   : > { %v4593_v59 = vunpack.c.l.b16 %v18534_v39  ;;  %5700 = vmatpush.bf16.msra.mxu0 %v4533_v0  ;;  %v4217_v20 = vpop.f32.mrf.mxu1  ;;  %v4471_v32 = vunpack.c.l.b16 %v4416_v1  ;;  %v4523_v0 = vunpack.c.h.b16 %v4416_v1  ;;  %v13005_v1 = vor.u32 %v15021_v3, %v13002_v35 }
 0x6dd   : > { %v18540_v52 = vpack.c.b16 %v4593_v59, %v4592_v31  ;;  %v4469_v31 = vunpack.c.l.b16 %v18494_v56  ;;  %v4466_v56 = vunpack.c.l.b16 %v18499_v2 }
 0x6de   : > { %5549 = vmatmul.bf16.gmra.mxu3 %v13057_v54  ;;  %v15022_v54 = vld [vmem:[%s23173_s10 + $0xc] sm:$0xf] }
 0x6df   : > { %5701 = vmatpush.bf16.msra.mxu0 %v4532_v13  ;;  %v4537_v13 = vpack.c.b16 %v4523_v0, %v4522_v38  ;;  %v13013_v14 = vor.u32 %v15022_v54, %v13010_v46  ;;  %v13030_v0 = vld [vmem:[%s23173_s10 + $0x54] sm:$0xf0] }
 0x6e0   : > { %v4143_v34 = vpop.f32.mrf.mxu3  ;;  %v4345_v6 = vpop.f32.mrf.mxu2 }
 0x6e1   : > { %v4418_v49 = vpack.c.bf16 %v4217_v20, %v4143_v34  ;;  %v18559_v33 = vpack.c.bf16 %v4345_v6, %v4271_v48  ;;  %v4485_v20 = vpack.c.b16 %v4471_v32, %v4470_v22  ;;  %v4468_v34 = vunpack.c.l.b16 %v18483_v8  ;;  %v13036_v8 = vld [vmem:[%s23173_s10 + $0x40] sm:$0xf]  ;;  %v15028_v32 = vld [vmem:[%s23173_s10 + $0x3c] sm:$0xf]  ;;  %v13066_v22 = vld [vmem:[%s23173_s10 + $0x94] sm:$0xf0] }
 0x6e2   : > { %v4467_v6 = vunpack.c.l.b16 %v18492_v12  ;;  %v15032_v12 = vld [vmem:[%s23173_s10 + $0x58] sm:$0xf0] }
 0x6e3   : > { %5702 = vmatpush.bf16.msra.mxu0 %v4531_v36  ;;  %v4219_v25 = vpop.f32.mrf.mxu1  ;;  %v4472_v11 = vunpack.c.l.b16 %v4418_v49  ;;  %v4524_v47 = vunpack.c.h.b16 %v4418_v49  ;;  %v4594_v48 = vunpack.c.l.b16 %v18559_v33  ;;  %v4484_v42 = vpack.c.b16 %v4469_v31, %v4468_v34  ;;  %v18578_v36 = vpop.f32.mrf.mxu0  ;;  %v13092_v31 = vld [vmem:[%s23173_s10 + $0xb0] sm:$0xf] }
 0x6e4   : > { %v4483_v49 = vpack.c.b16 %v4467_v6, %v4466_v56  ;;  %v13037_v5 = vor.u32 %v15032_v12, %v13036_v8  ;;  %v4646_v24 = vunpack.c.h.b16 %v18559_v33  ;;  %v4644_v33 = vunpack.c.h.b16 %v18531_v9  ;;  %v15059_v9 = vld [vmem:[%s23173_s10 + $0x130] sm:$0xf0]  ;;  %v13058_v34 = vld [vmem:[%s23173_s10 + $0x8c] sm:$0xf0]  ;;  %v13196_v8 = vld [vmem:[%s23173_s10 + $0x188] sm:$0xf] }
 0x6e5   : > { %v15073_v12 = vld [vmem:[%s23173_s10 + $0x1a0] sm:$0xf0] }
 0x6e6   : > { %v13197_v35 = vor.u32 %v15073_v12, %v13196_v8  ;;  %v13142_v12 = vld [vmem:[%s23173_s10 + $0x134] sm:$0xf0] }
 0x6e7   : > { %5703 = vmatpush.bf16.msra.mxu0 %v4530_v62  ;;  %v4465_v62 = vunpack.c.l.b16 %v18509_v30  ;;  %v4645_v30 = vunpack.c.h.b16 %v18534_v39  ;;  %v4643_v39 = vunpack.c.h.b16 %v18496_v15  ;;  %v13064_v15 = vld [vmem:[%s23173_s10 + $0x78] sm:$0xf] }
 0x6e8   : > { %v4145_v45 = vpop.f32.mrf.mxu3  ;;  %v4347_v58 = vpop.f32.mrf.mxu2 }
 0x6e9   : > { %v4420_v53 = vpack.c.bf16 %v4219_v25, %v4145_v45  ;;  %v4405_v16 = vpack.c.bf16 %v4347_v58, %v4273_v55  ;;  %v4464_v25 = vunpack.c.l.b16 %v18516_v61  ;;  %v15029_v61 = vld [vmem:[%s23173_s10 + $0x44] sm:$0xf]  ;;  %v4663_v17 = vpack.c.b16 %v4645_v30, %v4644_v33 }
 0x6eb   : > { %v4473_v63 = vunpack.c.l.b16 %v4420_v53  ;;  %v4525_v41 = vunpack.c.h.b16 %v4420_v53  ;;  %v4595_v60 = vunpack.c.l.b16 %v4405_v16  ;;  %5704 = vmatpush.bf16.msra.mxu0 %v4529_v10  ;;  %v4647_v28 = vunpack.c.h.b16 %v4405_v16  ;;  %v13038_v53 = vld [vmem:[%s23173_s10 + $0x5c] sm:$0xf0]  ;;  %v18611_v16 = vpop.f32.mrf.mxu0 }
 0x6ec   : > { %v4482_v45 = vpack.c.b16 %v4465_v62, %v4464_v25  ;;  %v13120_v62 = vld [vmem:[%s23173_s10 + $0xe8] sm:$0xf] }
 0x6ed   : > { %v4486_v18 = vpack.c.b16 %v4473_v63, %v4472_v11  ;;  %v4538_v50 = vpack.c.b16 %v4525_v41, %v4524_v47  ;;  %v18565_v55 = vpack.c.b16 %v4595_v60, %v4594_v48  ;;  %v4664_v58 = vpack.c.b16 %v4647_v28, %v4646_v24  ;;  %v13140_v47 = vld [vmem:[%s23173_s10 + $0x118] sm:$0xf]  ;;  %v15039_v63 = vld [vmem:[%s23173_s10 + $0x90] sm:$0xf0] }
 0x6ee   : > { %5554 = vmatmul.bf16.gmra.mxu3 %v13085_v4  ;;  %5705 = vmatmul.bf16.vlgmr.msra.gmra.mxu0 %v13009_v40  ;;  %v13041_v11 = vor.u32 %v15029_v61, %v13038_v53  ;;  %v4642_v4 = vunpack.c.h.b16 %v18478_v57  ;;  %v13141_v60 = vor.u32 %v15059_v9, %v13140_v47  ;;  %v13065_v48 = vor.u32 %v15039_v63, %v13064_v15  ;;  %v15042_v61 = vld [vmem:[%s23173_s10 + $0xac] sm:$0xf]  ;;  %v13086_v53 = vld [vmem:[%s23173_s10 + $0xc4] sm:$0xf0] }
 0x6ef   : > { %5617 = vmatpush.bf16.msra.mxu1 %v4486_v18  ;;  %5786 = vmatpush.bf16.msra.mxu2 %v4538_v50  ;;  %v13033_v18 = vor.u32 %v15028_v32, %v13030_v0  ;;  %v15036_v50 = vld [vmem:[%s23173_s10 + $0x7c] sm:$0xf]  ;;  %v15050_v63 = vld [vmem:[%s23173_s10 + $0xec] sm:$0xf] }
 0x6f0   : > { %v4350_v59 = vpop.f32.mrf.mxu2  ;;  %v4662_v40 = vpack.c.b16 %v4643_v39, %v4642_v4  ;;  %v13069_v54 = vor.u32 %v15036_v50, %v13066_v22 }
 0x6f1   : > { %v18574_v29 = vpack.c.bf16 %v4350_v59, %v4276_v51  ;;  %v15052_v51 = vld [vmem:[%s23173_s10 + $0xf8] sm:$0xf0]  ;;  %v15066_v59 = vld [vmem:[%s23173_s10 + $0x168] sm:$0xf0] }
 0x6f2   : > { %v13113_v2 = vor.u32 %v15052_v51, %v13112_v27  ;;  %v13094_v27 = vld [vmem:[%s23173_s10 + $0xcc] sm:$0xf0] }
 0x6f3   : > { %5618 = vmatpush.bf16.msra.mxu1 %v4485_v20  ;;  %5787 = vmatpush.bf16.msra.mxu2 %v4537_v13  ;;  %v4286_v41 = vpop.f32.mrf.mxu0 }
 0x6f6   : > { %5788 = vmatmul.bf16.vlgmr.msra.gmra.mxu2 %v13013_v14  ;;  %v15035_v14 = vld [vmem:[%s23173_s10 + $0x74] sm:$0xf] }
 0x6f7   : > { %5619 = vmatpush.bf16.msra.mxu1 %v4484_v42  ;;  %v13061_v42 = vor.u32 %v15035_v14, %v13058_v34  ;;  %v15057_v34 = vld [vmem:[%s23173_s10 + $0x124] sm:$0xf] }
 0x6f8   : > { %v18593_v23 = vpop.f32.mrf.mxu2 }
 0x6fb   : > { %5620 = vmatpush.bf16.msra.mxu1 %v4483_v49  ;;  %v4288_v46 = vpop.f32.mrf.mxu0  ;;  %v15053_v49 = vld [vmem:[%s23173_s10 + $0x100] sm:$0xf0] }
 0x6fc   : > { %v13121_v24 = vor.u32 %v15053_v49, %v13120_v62  ;;  %v15064_v49 = vld [vmem:[%s23173_s10 + $0x15c] sm:$0xf] }
 0x6fe   : > { %5559 = vmatmul.bf16.gmra.mxu3 %v13113_v2  ;;  %5710 = vmatmul.bf16.gmra.mxu0 %v13037_v5 }
 0x6ff   : > { %5621 = vmatpush.bf16.msra.mxu1 %v4482_v45 }
 0x700   : > { %v18614_v10 = vpop.f32.mrf.mxu2 }
 0x701   : > { %v4411_v47 = vpack.c.bf16 %v18614_v10, %v18578_v36 }
 0x702   : > { %5622 = vmatmul.bf16.vlgmr.msra.gmra.mxu1 %v13005_v1 }
 0x703   : > { %5946 = vmatpush.bf16.msrb.mxu1 %v4664_v58  ;;  %v4291_v6 = vpop.f32.mrf.mxu0  ;;  %v4598_v10 = vunpack.c.l.b16 %v4411_v47  ;;  %v4650_v0 = vunpack.c.h.b16 %v4411_v47  ;;  %v13232_v47 = vld [vmem:[%s23173_s10 + $0x1c8] sm:$0xf] }
 0x706   : > { %5793 = vmatmul.bf16.gmra.mxu2 %v13041_v11 }
 0x707   : > { %5947 = vmatpush.bf16.msrb.mxu1 %v4663_v17 }
 0x708   : > { %v4357_v57 = vpop.f32.mrf.mxu2 }
 0x709   : > { %v4413_v33 = vpack.c.bf16 %v4357_v57, %v18611_v16  ;;  %v13122_v16 = vld [vmem:[%s23173_s10 + $0x104] sm:$0xf0]  ;;  %v4409_v57 = vpack.c.bf16 %v18593_v23, %v18562_v19  ;;  %v4596_v19 = vunpack.c.l.b16 %v18574_v29  ;;  %v4648_v23 = vunpack.c.h.b16 %v18574_v29  ;;  %v15049_v29 = vld [vmem:[%s23173_s10 + $0xe4] sm:$0xf] }
 0x70a   : > { %v13125_v36 = vor.u32 %v15050_v63, %v13122_v16 }
 0x70b   : > { %5948 = vmatpush.bf16.msrb.mxu1 %v4662_v40  ;;  %v4293_v28 = vpop.f32.mrf.mxu0  ;;  %v13089_v40 = vor.u32 %v15042_v61, %v13086_v53  ;;  %v4649_v50 = vunpack.c.h.b16 %v4409_v57  ;;  %v13170_v61 = vld [vmem:[%s23173_s10 + $0x16c] sm:$0xf0] }
 0x70e   : > { %5564 = vmatmul.bf16.gmra.mxu3 %v13141_v60  ;;  %5715 = vmatmul.bf16.gmra.mxu0 %v13065_v48  ;;  %v4651_v60 = vunpack.c.h.b16 %v4413_v33 }
 0x70f   : > { %5949 = vmatpush.bf16.msrb.mxu1 %v18475_v21  ;;  %v13168_v21 = vld [vmem:[%s23173_s10 + $0x150] sm:$0xf] }
 0x710   : > { %v4360_v38 = vpop.f32.mrf.mxu2 }
 0x711   : > { %v4415_v3 = vpack.c.bf16 %v4360_v38, %v4286_v41  ;;  %v4599_v41 = vunpack.c.l.b16 %v4413_v33  ;;  %v4666_v38 = vpack.c.b16 %v4651_v60, %v4650_v0  ;;  %v15071_v33 = vld [vmem:[%s23173_s10 + $0x194] sm:$0xf]  ;;  %v13198_v60 = vld [vmem:[%s23173_s10 + $0x1a4] sm:$0xf0] }
 0x712   : > { %5627 = vmatmul.bf16.gmra.mxu1 %v13033_v18  ;;  %v4597_v18 = vunpack.c.l.b16 %v4409_v57 }
 0x713   : > { %5950 = vmatpush.bf16.msrb.mxu1 %v18461_v7  ;;  %v15046_v7 = vld [vmem:[%s23173_s10 + $0xc8] sm:$0xf0]  ;;  %v4600_v9 = vunpack.c.l.b16 %v4415_v3  ;;  %v4652_v15 = vunpack.c.h.b16 %v4415_v3  ;;  %v4614_v22 = vpack.c.b16 %v4599_v41, %v4598_v10 }
 0x714   : > { %v13093_v13 = vor.u32 %v15046_v7, %v13092_v31  ;;  %v4613_v31 = vpack.c.b16 %v4597_v18, %v4596_v19  ;;  %v4665_v7 = vpack.c.b16 %v4649_v50, %v4648_v23  ;;  %v15094_v3 = vld [vmem:[%s23173_s10 + $0x248] sm:$0xf0]  ;;  %v13336_v50 = vld [vmem:[%s23173_s10 + $0x2a0] sm:$0xf] }
 0x715   : > { %v15070_v41 = vld [vmem:[%s23173_s10 + $0x18c] sm:$0xf] }
 0x716   : > { %5798 = vmatmul.bf16.gmra.mxu2 %v13069_v54  ;;  %v13224_v54 = vld [vmem:[%s23173_s10 + $0x1c0] sm:$0xf] }
 0x717   : > { %5951 = vmatpush.bf16.msrb.mxu1 %v18436_v43  ;;  %v13169_v43 = vor.u32 %v15066_v59, %v13168_v21  ;;  %v13148_v21 = vld [vmem:[%s23173_s10 + $0x120] sm:$0xf]  ;;  %v15060_v59 = vld [vmem:[%s23173_s10 + $0x138] sm:$0xf0] }
 0x718   : > { %v4362_v20 = vpop.f32.mrf.mxu2 }
 0x719   : > { %v4417_v5 = vpack.c.bf16 %v4362_v20, %v4288_v46  ;;  %v15080_v46 = vld [vmem:[%s23173_s10 + $0x1d8] sm:$0xf0] }
 0x71a   : > { %v13225_v20 = vor.u32 %v15080_v46, %v13224_v54  ;;  %v15088_v54 = vld [vmem:[%s23173_s10 + $0x218] sm:$0xf0] }
 0x71b   : > { %5952 = vmatpush.bf16.msrb.mxu1 %v18412_v44  ;;  %v15043_v44 = vld [vmem:[%s23173_s10 + $0xb4] sm:$0xf]  ;;  %v4601_v39 = vunpack.c.l.b16 %v4417_v5  ;;  %v4653_v17 = vunpack.c.h.b16 %v4417_v5 }
 0x71c   : > { %v13097_v51 = vor.u32 %v15043_v44, %v13094_v27  ;;  %v13252_v27 = vld [vmem:[%s23173_s10 + $0x1f8] sm:$0xf] }
 0x71d   : > { %v4615_v48 = vpack.c.b16 %v4601_v39, %v4600_v9  ;;  %v4667_v32 = vpack.c.b16 %v4653_v17, %v4652_v15  ;;  %v13206_v39 = vld [vmem:[%s23173_s10 + $0x1ac] sm:$0xf0]  ;;  %v15081_v9 = vld [vmem:[%s23173_s10 + $0x1e0] sm:$0xf0] }
 0x71e   : > { %5569 = vmatmul.bf16.gmra.mxu3 %v13169_v43  ;;  %5720 = vmatmul.bf16.gmra.mxu0 %v13093_v13  ;;  %v13149_v43 = vor.u32 %v15060_v59, %v13148_v21  ;;  %v13114_v13 = vld [vmem:[%s23173_s10 + $0xfc] sm:$0xf0]  ;;  %v13233_v16 = vor.u32 %v15081_v9, %v13232_v47 }
 0x71f   : > { %5953 = vmatpush.bf16.msrb.mxu1 %v18403_v26  ;;  %v13117_v14 = vor.u32 %v15049_v29, %v13114_v13 }
 0x720   : > { %v4365_v56 = vpop.f32.mrf.mxu2 }
 0x721   : > { %v4419_v26 = vpack.c.bf16 %v4365_v56, %v4291_v6  ;;  %v13150_v6 = vld [vmem:[%s23173_s10 + $0x13c] sm:$0xf0]  ;;  %v13176_v56 = vld [vmem:[%s23173_s10 + $0x158] sm:$0xf] }
 0x722   : > { %5632 = vmatmul.bf16.gmra.mxu1 %v13061_v42  ;;  %v13153_v44 = vor.u32 %v15057_v34, %v13150_v6  ;;  %v13262_v34 = vld [vmem:[%s23173_s10 + $0x21c] sm:$0xf0] }
 0x723   : > { %v4602_v45 = vunpack.c.l.b16 %v4419_v26  ;;  %v4654_v30 = vunpack.c.h.b16 %v4419_v26 }
 0x726   : > { %5803 = vmatmul.bf16.gmra.mxu2 %v13097_v51  ;;  %v15067_v51 = vld [vmem:[%s23173_s10 + $0x170] sm:$0xf0] }
 0x727   : > { %v13177_v26 = vor.u32 %v15067_v51, %v13176_v56 }
 0x728   : > { %v4367_v2 = vpop.f32.mrf.mxu2 }
 0x729   : > { %v4421_v25 = vpack.c.bf16 %v4367_v2, %v4293_v28  ;;  %v13178_v28 = vld [vmem:[%s23173_s10 + $0x174] sm:$0xf0] }
 0x72a   : > { %v13181_v5 = vor.u32 %v15064_v49, %v13178_v28  ;;  %v13288_v49 = vld [vmem:[%s23173_s10 + $0x238] sm:$0xf]  ;;  %v15095_v28 = vld [vmem:[%s23173_s10 + $0x250] sm:$0xf0] }
 0x72b   : > { %v4603_v58 = vunpack.c.l.b16 %v4421_v25  ;;  %v4655_v1 = vunpack.c.h.b16 %v4421_v25  ;;  %v13280_v25 = vld [vmem:[%s23173_s10 + $0x230] sm:$0xf] }
 0x72d   : > { %v4668_v11 = vpack.c.b16 %v4655_v1, %v4654_v30  ;;  %v4616_v4 = vpack.c.b16 %v4603_v58, %v4602_v45  ;;  %v13281_v30 = vor.u32 %v15094_v3, %v13280_v25  ;;  %v15063_v1 = vld [vmem:[%s23173_s10 + $0x154] sm:$0xf] }
 0x72e   : > { %5574 = vmatmul.bf16.gmra.mxu3 %v13197_v35  ;;  %5725 = vmatmul.bf16.gmra.mxu0 %v13121_v24  ;;  %v13204_v35 = vld [vmem:[%s23173_s10 + $0x190] sm:$0xf]  ;;  %v15074_v24 = vld [vmem:[%s23173_s10 + $0x1a8] sm:$0xf0]  ;;  %v13173_v53 = vor.u32 %v15063_v1, %v13170_v61  ;;  %v13254_v1 = vld [vmem:[%s23173_s10 + $0x214] sm:$0xf0] }
 0x72f   : > { %5864 = vmatpush.bf16.msrb.mxu3 %v4616_v4  ;;  %6033 = vmatpush.bf16.msrb.mxu0 %v4668_v11  ;;  %v13205_v58 = vor.u32 %v15074_v24, %v13204_v35  ;;  %v13209_v11 = vor.u32 %v15071_v33, %v13206_v39  ;;  %v13308_v4 = vld [vmem:[%s23173_s10 + $0x268] sm:$0xf]  ;;  %v13289_v24 = vor.u32 %v15095_v28, %v13288_v49  ;;  %v15109_v49 = vld [vmem:[%s23173_s10 + $0x2c0] sm:$0xf0]  ;;  %v13016_v28 = vld [vmem:[%s23173_s10 + $0x10] sm:$0xf] }
 0x732   : > { %5637 = vmatmul.bf16.gmra.mxu1 %v13089_v40  ;;  %v15101_v40 = vld [vmem:[%s23173_s10 + $0x280] sm:$0xf0] }
 0x733   : > { %5865 = vmatpush.bf16.msrb.mxu3 %v4615_v48  ;;  %6034 = vmatpush.bf16.msrb.mxu0 %v4667_v32  ;;  %v13309_v63 = vor.u32 %v15101_v40, %v13308_v4  ;;  %v13201_v48 = vor.u32 %v15070_v41, %v13198_v60  ;;  %v15078_v32 = vld [vmem:[%s23173_s10 + $0x1cc] sm:$0xf]  ;;  %v15092_v4 = vld [vmem:[%s23173_s10 + $0x23c] sm:$0xf]  ;;  %v13290_v40 = vld [vmem:[%s23173_s10 + $0x254] sm:$0xf0] }
 0x734   : > { %v18881_v41 = vld [vmem:[%s23173_s10 + $0x310] sm:$0xff] }
 0x736   : > { %5808 = vmatmul.bf16.gmra.mxu2 %v13125_v36  ;;  %v13234_v36 = vld [vmem:[%s23173_s10 + $0x1e4] sm:$0xf0] }
 0x737   : > { %5866 = vmatpush.bf16.msrb.mxu3 %v4614_v22  ;;  %6035 = vmatpush.bf16.msrb.mxu0 %v4666_v38  ;;  %v13237_v0 = vor.u32 %v15078_v32, %v13234_v36  ;;  %v15108_v22 = vld [vmem:[%s23173_s10 + $0x2b8] sm:$0xf0]  ;;  %v13260_v38 = vld [vmem:[%s23173_s10 + $0x200] sm:$0xf]  ;;  %v5284_v36 = vunpack.c.l.b16 %v18881_v41 }
 0x738   : > { %v13337_v46 = vor.u32 %v15108_v22, %v13336_v50  ;;  %v13261_v21 = vor.u32 %v15088_v54, %v13260_v38  ;;  %v15102_v50 = vld [vmem:[%s23173_s10 + $0x288] sm:$0xf0] }
 0x73b   : > { %5867 = vmatpush.bf16.msrb.mxu3 %v4613_v31  ;;  %6036 = vmatpush.bf16.msrb.mxu0 %v4665_v7  ;;  %v15077_v31 = vld [vmem:[%s23173_s10 + $0x1c4] sm:$0xf]  ;;  %v13226_v7 = vld [vmem:[%s23173_s10 + $0x1dc] sm:$0xf0] }
 0x73c   : > { %v13229_v29 = vor.u32 %v15077_v31, %v13226_v7  ;;  %v13282_v31 = vld [vmem:[%s23173_s10 + $0x24c] sm:$0xf0] }
 0x73e   : > { %5579 = vmatmul.bf16.gmra.mxu3 %v13225_v20  ;;  %5730 = vmatmul.bf16.gmra.mxu0 %v13149_v43  ;;  %v4830_v20 = vpop.permute.xlu2 %4829 }
 0x73f   : > { %5868 = vmatpush.bf16.msrb.mxu3 %v18565_v55  ;;  %v15087_v55 = vld [vmem:[%s23173_s10 + $0x210] sm:$0xf0] }
 0x740   : > { %v13253_v8 = vor.u32 %v15087_v55, %v13252_v27 }
 0x741   : > { %v18727_v42 = vpop.f32.mrf.mxu3 }
 0x742   : > { %5642 = vmatmul.bf16.gmra.mxu1 %v13117_v14  ;;  %v5541_v43 = vadd.f32 %v18727_v42, %v4830_v20  ;;  %v15085_v14 = vld [vmem:[%s23173_s10 + $0x204] sm:$0xf] }
 0x743   : > { %5869 = vmatpush.bf16.msrb.mxu3 %v18540_v52  ;;  %v13265_v56 = vor.u32 %v15085_v14, %v13262_v34  ;;  %v15099_v14 = vld [vmem:[%s23173_s10 + $0x274] sm:$0xf]  ;;  %v13318_v34 = vld [vmem:[%s23173_s10 + $0x28c] sm:$0xf0] }
 0x746   : > { %5813 = vmatmul.bf16.gmra.mxu2 %v13153_v44 }
 0x747   : > { %5870 = vmatpush.bf16.msrb.mxu3 %v18512_v37  ;;  %v15056_v37 = vld [vmem:[%s23173_s10 + $0x11c] sm:$0xf] }
 0x748   : > { %v13145_v62 = vor.u32 %v15056_v37, %v13142_v12  ;;  %v13364_v37 = vld [vmem:[%s23173_s10 + $0x2d8] sm:$0xf] }
 0x749   : > { %v18743_v52 = vpop.f32.mrf.mxu3 }
 0x74e   : > { %5584 = vmatmul.bf16.gmra.mxu3 %v13253_v8  ;;  %5735 = vmatmul.bf16.gmra.mxu0 %v13177_v26  ;;  %v4835_v8 = vpop.permute.xlu0 %4834 }
 0x74f   : > { %v5543_v26 = vadd.f32 %v18743_v52, %v4835_v8 }
 0x751   : > { %v18757_v2 = vpop.f32.mrf.mxu3 }
 0x752   : > { %5647 = vmatmul.bf16.gmra.mxu1 %v13145_v62  ;;  %v15115_v62 = vld [vmem:[%s23173_s10 + $0x2f0] sm:$0xf0] }
 0x753   : > { %v13365_v35 = vor.u32 %v15115_v62, %v13364_v37 }
 0x756   : > { %5818 = vmatmul.bf16.gmra.mxu2 %v13181_v5  ;;  %v4850_v20 = vpop.permute.xlu0 %4849 }
 0x759   : > { %v18771_v45 = vpop.f32.mrf.mxu3 }
 0x75e   : > { %5589 = vmatmul.bf16.gmra.mxu3 %v13281_v30  ;;  %5740 = vmatmul.bf16.gmra.mxu0 %v13205_v58  ;;  %v15084_v58 = vld [vmem:[%s23173_s10 + $0x1fc] sm:$0xf] }
 0x75f   : > { %v13257_v39 = vor.u32 %v15084_v58, %v13254_v1  ;;  %v15098_v1 = vld [vmem:[%s23173_s10 + $0x26c] sm:$0xf] }
 0x761   : > { %v18785_v17 = vpop.f32.mrf.mxu3 }
 0x762   : > { %5652 = vmatmul.bf16.gmra.mxu1 %v13173_v53  ;;  %v4840_v53 = vpop.permute.xlu1 %4839 }
 0x763   : > { %v5546_v33 = vadd.f32 %v18757_v2, %v4840_v53  ;;  %v13310_v53 = vld [vmem:[%s23173_s10 + $0x284] sm:$0xf0] }
 0x766   : > { %5823 = vmatmul.bf16.gmra.mxu2 %v13209_v11 }
 0x769   : > { %v18799_v15 = vpop.f32.mrf.mxu3 }
 0x76b   : > { %v5706_v57 = vpop.f32.mrf.mxu0 }
 0x76e   : > { %5594 = vmatmul.bf16.gmra.mxu3 %v13309_v63  ;;  %5745 = vmatmul.bf16.gmra.mxu0 %v13233_v16 }
 0x771   : > { %v18813_v10 = vpop.f32.mrf.mxu3 }
 0x772   : > { %5657 = vmatmul.bf16.gmra.mxu1 %v13201_v48  ;;  %v4845_v48 = vpop.permute.xlu2 %4844 }
 0x773   : > { %v5708_v18 = vpop.f32.mrf.mxu0  ;;  %v5548_v32 = vadd.f32 %v18771_v45, %v4845_v48 }
 0x776   : > { %5828 = vmatmul.bf16.gmra.mxu2 %v13237_v0 }
 0x779   : > { %v18827_v19 = vpop.f32.mrf.mxu3  ;;  %v5789_v23 = vpop.f32.mrf.mxu2 }
 0x77b   : > { %v5711_v59 = vpop.f32.mrf.mxu0 }
 0x77e   : > { %5599 = vmatmul.bf16.gmra.mxu3 %v13337_v46  ;;  %5750 = vmatmul.bf16.gmra.mxu0 %v13261_v21  ;;  %v5389_v46 = vpack.c.b16 %v5284_v36, %v5284_v36 }
 0x77f   : > { %v5623_v13 = vpop.f32.mrf.mxu1 }
 0x780   : > { %v5624_v6 = vadd.f32 %v5623_v13, %v5541_v43  ;;  %v5551_v43 = vadd.f32 %v18785_v17, %v4850_v20 }
 0x781   : > { %v18842_v44 = vpop.f32.mrf.mxu3  ;;  %v5791_v27 = vpop.f32.mrf.mxu2 }
 0x782   : > { %5662 = vmatmul.bf16.gmra.mxu1 %v13229_v29  ;;  %v5707_v55 = vadd.f32 %v5706_v57, %v5624_v6  ;;  %v13293_v57 = vor.u32 %v15092_v4, %v13290_v40  ;;  %v13313_v4 = vor.u32 %v15098_v1, %v13310_v53 }
 0x783   : > { %v5713_v42 = vpop.f32.mrf.mxu0 }
 0x784   : > { %v18844_v51 = vadd.f32 %v5789_v23, %v5707_v55 }
 0x786   : > { %5833 = vmatmul.bf16.gmra.mxu2 %v13265_v56 }
 0x787   : > { %v5625_v12 = vpop.f32.mrf.mxu1 }
 0x788   : > { %v5626_v5 = vadd.f32 %v5625_v12, %v5543_v26  ;;  %v4855_v26 = vpop.permute.xlu1 %4854  ;;  %v13344_v12 = vld [vmem:[%s23173_s10 + $0x2a8] sm:$0xf] }
 0x789   : > { %v18859_v52 = vpop.f32.mrf.mxu3  ;;  %v5794_v25 = vpop.f32.mrf.mxu2  ;;  %v5553_v37 = vadd.f32 %v18799_v15, %v4855_v26 }
 0x78a   : > { %v5709_v3 = vadd.f32 %v5708_v18, %v5626_v5  ;;  %v13316_v18 = vld [vmem:[%s23173_s10 + $0x270] sm:$0xf]  ;;  %v15026_v5 = vld [vmem:[%s23173_s10 + $0x28] sm:$0xf0] }
 0x78b   : > { %v5716_v30 = vpop.f32.mrf.mxu0  ;;  %v13317_v21 = vor.u32 %v15102_v50, %v13316_v18  ;;  %v13372_v50 = vld [vmem:[%s23173_s10 + $0x2e0] sm:$0xf] }
 0x78c   : > { %v18867_v61 = vadd.f32 %v5791_v27, %v5709_v3 }
 0x78e   : > { %5604 = vmatmul.bf16.gmra.mxu3 %v13365_v35  ;;  %5755 = vmatmul.bf16.gmra.mxu0 %v13289_v24  ;;  %v13345_v24 = vor.u32 %v15109_v49, %v13344_v12  ;;  %v4795_v49 = vld [vmem:[%s23173_s10 + $0x318] sm:$0xff] }
 0x78f   : > { %v5628_v11 = vpop.f32.mrf.mxu1 }
 0x790   : > { %v5629_v47 = vadd.f32 %v5628_v11, %v5546_v33 }
 0x791   : > { %v18876_v9 = vpop.f32.mrf.mxu3  ;;  %v5796_v63 = vpop.f32.mrf.mxu2 }
 0x792   : > { %5667 = vmatmul.bf16.gmra.mxu1 %v13257_v39  ;;  %v5712_v16 = vadd.f32 %v5711_v59, %v5629_v47  ;;  %v15091_v59 = vld [vmem:[%s23173_s10 + $0x234] sm:$0xf]  ;;  %v4860_v39 = vpop.permute.xlu2 %4859  ;;  %v15106_v47 = vld [vmem:[%s23173_s10 + $0x2ac] sm:$0xf] }
 0x793   : > { %v5718_v2 = vpop.f32.mrf.mxu0  ;;  %v13285_v29 = vor.u32 %v15091_v59, %v13282_v31  ;;  %v5556_v11 = vadd.f32 %v18813_v10, %v4860_v39 }
 0x794   : > { %v18883_v60 = vadd.f32 %v5794_v25, %v5712_v16 }
 0x796   : > { %5838 = vmatmul.bf16.gmra.mxu2 %v13293_v57 }
 0x797   : > { %v5630_v0 = vpop.f32.mrf.mxu1 }
 0x798   : > { %v5631_v22 = vadd.f32 %v5630_v0, %v5548_v32  ;;  %v4865_v0 = vpop.permute.xlu0 %4864 }
 0x799   : > { %v18893_v38 = vpop.f32.mrf.mxu3  ;;  %v5799_v54 = vpop.f32.mrf.mxu2  ;;  %v5558_v18 = vadd.f32 %v18827_v19, %v4865_v0 }
 0x79a   : > { %v5714_v23 = vadd.f32 %v5713_v42, %v5631_v22  ;;  %v13321_v42 = vor.u32 %v15099_v14, %v13318_v34  ;;  %v4870_v14 = vpop.permute.xlu1 %4869 }
 0x79b   : > { %v5721_v45 = vpop.f32.mrf.mxu0  ;;  %v5561_v34 = vadd.f32 %v18842_v44, %v4870_v14 }
 0x79c   : > { %v18901_v7 = vadd.f32 %v5796_v63, %v5714_v23  ;;  %v13346_v63 = vld [vmem:[%s23173_s10 + $0x2c4] sm:$0xf0] }
 0x79d   : > { %v13349_v10 = vor.u32 %v15106_v47, %v13346_v63  ;;  %v13044_v23 = vld [vmem:[%s23173_s10 + $0x48] sm:$0xf]  ;;  %v13366_v47 = vld [vmem:[%s23173_s10 + $0x2f4] sm:$0xf0] }
 0x79e   : > { %5609 = vmatmul.bf16.gmra.mxu3 %v5389_v46  ;;  %5760 = vmatmul.bf16.gmra.mxu0 %v13317_v21  ;;  %v15033_v46 = vld [vmem:[%s23173_s10 + $0x60] sm:$0xf0] }
 0x79f   : > { %v5633_v13 = vpop.f32.mrf.mxu1  ;;  %v13045_v20 = vor.u32 %v15033_v46, %v13044_v23 }
 0x7a0   : > { %v5634_v6 = vadd.f32 %v5633_v13, %v5551_v43  ;;  %v13338_v13 = vld [vmem:[%s23173_s10 + $0x2bc] sm:$0xf0]  ;;  %v4880_v63 = vpop.permute.xlu0 %4879 }
 0x7a1   : > { %v18910_v27 = vpop.f32.mrf.mxu3  ;;  %v5801_v55 = vpop.f32.mrf.mxu2 }
 0x7a2   : > { %5672 = vmatmul.bf16.gmra.mxu1 %v13285_v29  ;;  %v5717_v56 = vadd.f32 %v5716_v30, %v5634_v6  ;;  %v13017_v30 = vor.u32 %v15026_v5, %v13016_v28  ;;  %v15105_v29 = vld [vmem:[%s23173_s10 + $0x2a4] sm:$0xf]  ;;  %v4875_v5 = vpop.permute.xlu2 %4874 }
 0x7a3   : > { %v5723_v17 = vpop.f32.mrf.mxu0  ;;  %v13341_v6 = vor.u32 %v15105_v29, %v13338_v13  ;;  %v15027_v29 = vld [vmem:[%s23173_s10 + $0x30] sm:$0xf0] }
 0x7a4   : > { %v18912_v8 = vadd.f32 %v5799_v54, %v5717_v56  ;;  %v15116_v54 = vld [vmem:[%s23173_s10 + $0x2f8] sm:$0xf0]  ;;  %v15113_v56 = vld [vmem:[%s23173_s10 + $0x2e4] sm:$0xf] }
 0x7a5   : > { %v13373_v31 = vor.u32 %v15116_v54, %v13372_v50 }
 0x7a6   : > { %5843 = vmatmul.bf16.gmra.mxu2 %v13321_v42  ;;  %v13374_v42 = vld [vmem:[%s23173_s10 + $0x2fc] sm:$0xf0] }
 0x7a7   : > { %v5635_v62 = vpop.f32.mrf.mxu1  ;;  %v13377_v44 = vor.u32 %v15113_v56, %v13374_v42  ;;  %v5285_v56 = vunpack.c.h.b16 %v18881_v41 }
 0x7a8   : > { %v5636_v25 = vadd.f32 %v5635_v62, %v5553_v37  ;;  %v4895_v41 = vpop.permute.xlu0 %4894 }
 0x7a9   : > { %v18927_v15 = vpop.f32.mrf.mxu3  ;;  %v5804_v3 = vpop.f32.mrf.mxu2 }
 0x7aa   : > { %v5719_v35 = vadd.f32 %v5718_v2, %v5636_v25  ;;  %v5563_v25 = vadd.f32 %v18859_v52, %v4875_v5 }
 0x7ab   : > { %v5726_v58 = vpop.f32.mrf.mxu0 }
 0x7ac   : > { %v18935_v33 = vadd.f32 %v5801_v55, %v5719_v35 }
 0x7ae   : > { %5765 = vmatmul.bf16.gmra.mxu0 %v13345_v24  ;;  %5871 = vmatmul.bf16.vlgmr.msrb.gmra.mxu3 %v13017_v30  ;;  %v13072_v24 = vld [vmem:[%s23173_s10 + $0x80] sm:$0xf]  ;;  %v15040_v30 = vld [vmem:[%s23173_s10 + $0x98] sm:$0xf0] }
 0x7af   : > { %v5638_v40 = vpop.f32.mrf.mxu1 }
 0x7b0   : > { %v5639_v16 = vadd.f32 %v5638_v40, %v5556_v11  ;;  %v15112_v40 = vld [vmem:[%s23173_s10 + $0x2dc] sm:$0xf] }
 0x7b1   : > { %v18944_v57 = vpop.f32.mrf.mxu3  ;;  %v18946_v2 = vpop.f32.mrf.mxu2 }
 0x7b2   : > { %5677 = vmatmul.bf16.gmra.mxu1 %v13313_v4  ;;  %v5722_v48 = vadd.f32 %v5721_v45, %v5639_v16  ;;  %v13073_v4 = vor.u32 %v15040_v30, %v13072_v24  ;;  %v5566_v16 = vadd.f32 %v18876_v9, %v4880_v63  ;;  %v13100_v9 = vld [vmem:[%s23173_s10 + $0xb8] sm:$0xf]  ;;  %v5573_v30 = vadd.f32 %v18927_v15, %v4895_v41  ;;  %v13046_v41 = vld [vmem:[%s23173_s10 + $0x64] sm:$0xf0] }
 0x7b3   : > { %v5728_v32 = vpop.f32.mrf.mxu0 }
 0x7b4   : > { %v18948_v36 = vadd.f32 %v5804_v3, %v5722_v48  ;;  %v5286_v3 = vunpack.c.l.b16 %v4795_v49  ;;  %v13369_v48 = vor.u32 %v15112_v40, %v13366_v47 }
 0x7b6   : > { %5848 = vmatmul.bf16.gmra.mxu2 %v13349_v10  ;;  %v5391_v11 = vpack.c.b16 %v5286_v3, %v5286_v3  ;;  %v5287_v10 = vunpack.c.h.b16 %v4795_v49 }
 0x7b7   : > { %v5640_v22 = vpop.f32.mrf.mxu1 }
 0x7b8   : > { %v5641_v21 = vadd.f32 %v5640_v22, %v5558_v18  ;;  %v5392_v54 = vpack.c.b16 %v5287_v10, %v5287_v10  ;;  %v15023_v10 = vld [vmem:[%s23173_s10 + $0x14] sm:$0xf] }
 0x7b9   : > { %v18963_v19 = vpop.f32.mrf.mxu3  ;;  %v5809_v45 = vpop.f32.mrf.mxu2 }
 0x7ba   : > { %v18965_v59 = vadd.f32 %v5723_v17, %v5641_v21  ;;  %v4885_v21 = vpop.permute.xlu1 %4884 }
 0x7bb   : > { %v5731_v43 = vpop.f32.mrf.mxu0 }
 0x7be   : > { %5770 = vmatmul.bf16.gmra.mxu0 %v13373_v31  ;;  %5876 = vmatmul.bf16.gmra.mxu3 %v13045_v20  ;;  %v15047_v20 = vld [vmem:[%s23173_s10 + $0xd0] sm:$0xf0] }
 0x7bf   : > { %v5643_v55 = vpop.f32.mrf.mxu1 }
 0x7c0   : > { %v5644_v17 = vadd.f32 %v5643_v55, %v5561_v34 }
 0x7c1   : > { %v18980_v26 = vpop.f32.mrf.mxu3  ;;  %v18982_v37 = vpop.f32.mrf.mxu2 }
 0x7c2   : > { %5682 = vmatmul.bf16.gmra.mxu1 %v13341_v6  ;;  %v5727_v12 = vadd.f32 %v5726_v58, %v5644_v17  ;;  %v13101_v6 = vor.u32 %v15047_v20, %v13100_v9  ;;  %v4890_v17 = vpop.permute.xlu2 %4889 }
 0x7c3   : > { %v5733_v62 = vpop.f32.mrf.mxu0 }
 0x7c4   : > { %v18987_v28 = vadd.f32 %v5809_v45, %v5727_v12  ;;  %v5568_v45 = vadd.f32 %v18893_v38, %v4885_v21  ;;  %v5571_v12 = vadd.f32 %v18910_v27, %v4890_v17  ;;  %v13128_v27 = vld [vmem:[%s23173_s10 + $0xf0] sm:$0xf] }
 0x7c6   : > { %5853 = vmatmul.bf16.gmra.mxu2 %v13377_v44  ;;  %v5390_v44 = vpack.c.b16 %v5285_v56, %v5285_v56  ;;  %v15041_v56 = vld [vmem:[%s23173_s10 + $0xa0] sm:$0xf0] }
 0x7c7   : > { %v5645_v35 = vpop.f32.mrf.mxu1 }
 0x7c8   : > { %v5646_v58 = vadd.f32 %v5645_v35, %v5563_v25 }
 0x7c9   : > { %v18996_v1 = vpop.f32.mrf.mxu3  ;;  %v5814_v53 = vpop.f32.mrf.mxu2 }
 0x7ca   : > { %v18998_v39 = vadd.f32 %v5728_v32, %v5646_v58 }
 0x7cb   : > { %v5736_v52 = vpop.f32.mrf.mxu0 }
 0x7ce   : > { %5775 = vmatmul.bf16.gmra.mxu0 %v5391_v11  ;;  %5881 = vmatmul.bf16.gmra.mxu3 %v13073_v4  ;;  %v13052_v11 = vld [vmem:[%s23173_s10 + $0x50] sm:$0xf]  ;;  %v15034_v4 = vld [vmem:[%s23173_s10 + $0x68] sm:$0xf0] }
 0x7cf   : > { %v5648_v32 = vpop.f32.mrf.mxu1 }
 0x7d0   : > { %v5649_v0 = vadd.f32 %v5648_v32, %v5566_v16  ;;  %v13053_v16 = vor.u32 %v15034_v4, %v13052_v11  ;;  %v13018_v32 = vld [vmem:[%s23173_s10 + $0x2c] sm:$0xf0] }
 0x7d1   : > { %v19007_v18 = vpop.f32.mrf.mxu3  ;;  %v19009_v50 = vpop.f32.mrf.mxu2 }
 0x7d2   : > { %5687 = vmatmul.bf16.gmra.mxu1 %v13369_v48  ;;  %v5732_v22 = vadd.f32 %v5731_v43, %v5649_v0  ;;  %v13024_v43 = vld [vmem:[%s23173_s10 + $0x18] sm:$0xf]  ;;  %v4900_v0 = vpop.permute.xlu1 %4899 }
 0x7d3   : > { %v5738_v23 = vpop.f32.mrf.mxu0  ;;  %v13025_v55 = vor.u32 %v15027_v29, %v13024_v43  ;;  %v4905_v29 = vpop.permute.xlu2 %4904 }
 0x7d4   : > { %v19011_v46 = vadd.f32 %v5814_v53, %v5732_v22  ;;  %v15054_v53 = vld [vmem:[%s23173_s10 + $0x108] sm:$0xf0]  ;;  %v5576_v22 = vadd.f32 %v18944_v57, %v4900_v0  ;;  %v13156_v57 = vld [vmem:[%s23173_s10 + $0x128] sm:$0xf]  ;;  %v15068_v0 = vld [vmem:[%s23173_s10 + $0x178] sm:$0xf0] }
 0x7d5   : > { %v13129_v63 = vor.u32 %v15054_v53, %v13128_v27 }
 0x7d6   : > { %5858 = vmatmul.bf16.gmra.mxu2 %v5392_v54  ;;  %v13021_v54 = vor.u32 %v15023_v10, %v13018_v32 }
 0x7d7   : > { %v5650_v31 = vpop.f32.mrf.mxu1 }
 0x7d8   : > { %v5651_v13 = vadd.f32 %v5650_v31, %v5568_v45 }
 0x7d9   : > { %v19026_v38 = vpop.f32.mrf.mxu3  ;;  %v5819_v14 = vpop.f32.mrf.mxu2 }
 0x7da   : > { %v19028_v34 = vadd.f32 %v5733_v62, %v5651_v13  ;;  %v5578_v13 = vadd.f32 %v18963_v19, %v4905_v29 }
 0x7db   : > { %v5741_v42 = vpop.f32.mrf.mxu0 }
 0x7de   : > { %5886 = vmatmul.bf16.gmra.mxu3 %v13101_v6  ;;  %13390 = vmatmul.msk.bf16.vlgmr.msrb.gmra.mxu0 %vm926_vm0, %v13025_v55  ;;  %v15061_v6 = vld [vmem:[%s23173_s10 + $0x140] sm:$0xf0]  ;;  %v13080_v55 = vld [vmem:[%s23173_s10 + $0x88] sm:$0xf] }
 0x7df   : > { %v5653_v49 = vpop.f32.mrf.mxu1 }
 0x7e0   : > { %v5654_v5 = vadd.f32 %v5653_v49, %v5571_v12  ;;  %v13081_v49 = vor.u32 %v15041_v56, %v13080_v55 }
 0x7e1   : > { %v19033_v25 = vpop.f32.mrf.mxu3  ;;  %v19035_v3 = vpop.f32.mrf.mxu2 }
 0x7e2   : > { %5692 = vmatmul.bf16.gmra.mxu1 %v5390_v44  ;;  %v5737_v62 = vadd.f32 %v5736_v52, %v5654_v5  ;;  %v13157_v44 = vor.u32 %v15061_v6, %v13156_v57  ;;  %v15037_v57 = vld [vmem:[%s23173_s10 + $0x84] sm:$0xf]  ;;  %v4920_v6 = vpop.permute.xlu2 %4919 }
 0x7e3   : > { %v5743_v35 = vpop.f32.mrf.mxu0  ;;  %v5586_v55 = vadd.f32 %v19007_v18, %v4920_v6  ;;  %v13212_v18 = vld [vmem:[%s23173_s10 + $0x198] sm:$0xf] }
 0x7e4   : > { %v19037_v24 = vadd.f32 %v5819_v14, %v5737_v62  ;;  %v15030_v62 = vld [vmem:[%s23173_s10 + $0x4c] sm:$0xf] }
 0x7e7   : > { %v5655_v58 = vpop.f32.mrf.mxu1 }
 0x7e8   : > { %v5656_v52 = vadd.f32 %v5655_v58, %v5573_v30  ;;  %v4910_v30 = vpop.permute.xlu0 %4909  ;;  %v13049_v58 = vor.u32 %v15030_v62, %v13046_v41 }
 0x7e9   : > { %v19052_v40 = vpop.f32.mrf.mxu3  ;;  %v5824_v15 = vpop.f32.mrf.mxu2  ;;  %v5581_v27 = vadd.f32 %v18980_v26, %v4910_v30  ;;  %v13184_v26 = vld [vmem:[%s23173_s10 + $0x160] sm:$0xf] }
 0x7ea   : > { %v19054_v47 = vadd.f32 %v5738_v23, %v5656_v52 }
 0x7eb   : > { %v5746_v48 = vpop.f32.mrf.mxu0 }
 0x7ee   : > { %5891 = vmatmul.bf16.gmra.mxu3 %v13129_v63  ;;  %13391 = vmatmul.msk.bf16.gmra.mxu0 %vm926_vm0, %v13053_v16  ;;  %v4915_v16 = vpop.permute.xlu1 %4914 }
 0x7ef   : > { %v5658_v23 = vpop.f32.mrf.mxu1  ;;  %v5583_v10 = vadd.f32 %v18996_v1, %v4915_v16 }
 0x7f0   : > { %v5659_v21 = vadd.f32 %v5658_v23, %v5576_v22  ;;  %v13108_v22 = vld [vmem:[%s23173_s10 + $0xc0] sm:$0xf]  ;;  %v4925_v30 = vpop.permute.xlu0 %4924 }
 0x7f1   : > { %v19064_v45 = vpop.f32.mrf.mxu3  ;;  %v19066_v9 = vpop.f32.mrf.mxu2 }
 0x7f2   : > { %5954 = vmatmul.bf16.vlgmr.msrb.gmra.mxu1 %v13021_v54  ;;  %v5742_v31 = vadd.f32 %v5741_v42, %v5659_v21 }
 0x7f3   : > { %v5748_v20 = vpop.f32.mrf.mxu0 }
 0x7f4   : > { %v19068_v43 = vadd.f32 %v5824_v15, %v5742_v31  ;;  %v13185_v31 = vor.u32 %v15068_v0, %v13184_v26 }
 0x7f7   : > { %v5660_v14 = vpop.f32.mrf.mxu1 }
 0x7f8   : > { %v5661_v42 = vadd.f32 %v5660_v14, %v5578_v13  ;;  %v13074_v14 = vld [vmem:[%s23173_s10 + $0x9c] sm:$0xf0] }
 0x7f9   : > { %v19083_v17 = vpop.f32.mrf.mxu3  ;;  %v5829_v19 = vpop.f32.mrf.mxu2  ;;  %v13077_v56 = vor.u32 %v15037_v57, %v13074_v14 }
 0x7fa   : > { %v19085_v12 = vadd.f32 %v5743_v35, %v5661_v42 }
 0x7fb   : > { %v5751_v5 = vpop.f32.mrf.mxu0 }
 0x7fe   : > { %5896 = vmatmul.bf16.gmra.mxu3 %v13157_v44  ;;  %13392 = vmatmul.msk.bf16.gmra.mxu0 %vm926_vm0, %v13081_v49 }
 0x7ff   : > { %v5663_v35 = vpop.f32.mrf.mxu1 }
 0x800   : > { %v5664_v53 = vadd.f32 %v5663_v35, %v5581_v27  ;;  %v5588_v27 = vadd.f32 %v19026_v38, %v4925_v30  ;;  %v15075_v35 = vld [vmem:[%s23173_s10 + $0x1b0] sm:$0xf0]  ;;  %v15082_v30 = vld [vmem:[%s23173_s10 + $0x1e8] sm:$0xf0] }
 0x801   : > { %v19095_v11 = vpop.f32.mrf.mxu3  ;;  %v19097_v4 = vpop.f32.mrf.mxu2  ;;  %v13213_v26 = vor.u32 %v15075_v35, %v13212_v18 }
 0x802   : > { %5959 = vmatmul.bf16.gmra.mxu1 %v13049_v58  ;;  %v5747_v52 = vadd.f32 %v5746_v48, %v5664_v53  ;;  %v15048_v48 = vld [vmem:[%s23173_s10 + $0xd8] sm:$0xf0]  ;;  %v13136_v53 = vld [vmem:[%s23173_s10 + $0xf8] sm:$0xf] }
 0x803   : > { %v5753_v15 = vpop.f32.mrf.mxu0  ;;  %v13109_v29 = vor.u32 %v15048_v48, %v13108_v22  ;;  %v15044_v22 = vld [vmem:[%s23173_s10 + $0xbc] sm:$0xf]  ;;  %v13102_v48 = vld [vmem:[%s23173_s10 + $0xd4] sm:$0xf0] }
 0x804   : > { %v19099_v63 = vadd.f32 %v5829_v19, %v5747_v52 }
 0x807   : > { %v5665_v32 = vpop.f32.mrf.mxu1 }
 0x808   : > { %v5666_v54 = vadd.f32 %v5665_v32, %v5583_v10 }
 0x809   : > { %v19114_v23 = vpop.f32.mrf.mxu3  ;;  %v5834_v1 = vpop.f32.mrf.mxu2 }
 0x80a   : > { %v19116_v21 = vadd.f32 %v5748_v20, %v5666_v54  ;;  %v4930_v54 = vpop.permute.xlu1 %4929 }
 0x80b   : > { %v5756_v13 = vpop.f32.mrf.mxu0 }
 0x80e   : > { %5901 = vmatmul.bf16.gmra.mxu3 %v13185_v31  ;;  %13393 = vmatmul.msk.bf16.gmra.mxu0 %vm926_vm0, %v13109_v29  ;;  %v13105_v31 = vor.u32 %v15044_v22, %v13102_v48 }
 0x80f   : > { %v5668_v20 = vpop.f32.mrf.mxu1 }
 0x810   : > { %v5669_v42 = vadd.f32 %v5668_v20, %v5586_v55  ;;  %v4935_v20 = vpop.permute.xlu2 %4934 }
 0x811   : > { %v19126_v19 = vpop.f32.mrf.mxu3  ;;  %v19128_v44 = vpop.f32.mrf.mxu2 }
 0x812   : > { %5964 = vmatmul.bf16.gmra.mxu1 %v13077_v56  ;;  %v5752_v49 = vadd.f32 %v5751_v5, %v5669_v42  ;;  %v15055_v5 = vld [vmem:[%s23173_s10 + $0x110] sm:$0xf0]  ;;  %v5593_v42 = vadd.f32 %v19052_v40, %v4935_v20 }
 0x813   : > { %v5758_v62 = vpop.f32.mrf.mxu0  ;;  %v13137_v32 = vor.u32 %v15055_v5, %v13136_v53 }
 0x814   : > { %v19130_v41 = vadd.f32 %v5834_v1, %v5752_v49  ;;  %v5591_v1 = vadd.f32 %v19033_v25, %v4930_v54  ;;  %v13240_v25 = vld [vmem:[%s23173_s10 + $0x1d0] sm:$0xf] }
 0x815   : > { %v13241_v53 = vor.u32 %v15082_v30, %v13240_v25  ;;  %v13268_v25 = vld [vmem:[%s23173_s10 + $0x208] sm:$0xf]  ;;  %v15089_v30 = vld [vmem:[%s23173_s10 + $0x220] sm:$0xf0] }
 0x817   : > { %v5670_v58 = vpop.f32.mrf.mxu1 }
 0x818   : > { %v5671_v52 = vadd.f32 %v5670_v58, %v5588_v27  ;;  %v13164_v27 = vld [vmem:[%s23173_s10 + $0x130] sm:$0xf] }
 0x819   : > { %v19145_v16 = vpop.f32.mrf.mxu3  ;;  %v5839_v38 = vpop.f32.mrf.mxu2 }
 0x81a   : > { %v19147_v10 = vadd.f32 %v5753_v15, %v5671_v52 }
 0x81b   : > { %v5761_v0 = vpop.f32.mrf.mxu0 }
 0x81e   : > { %5906 = vmatmul.bf16.gmra.mxu3 %v13213_v26  ;;  %13394 = vmatmul.msk.bf16.gmra.mxu0 %vm926_vm0, %v13137_v32  ;;  %v13130_v26 = vld [vmem:[%s23173_s10 + $0x10c] sm:$0xf0]  ;;  %v4940_v32 = vpop.permute.xlu0 %4939 }
 0x81f   : > { %v5673_v15 = vpop.f32.mrf.mxu1  ;;  %v5596_v22 = vadd.f32 %v19064_v45, %v4940_v32  ;;  %v13519_v32 = vld [vmem:[%s23175_s12 + $0xe0] sm:$0xf] }
 0x820   : > { %v5674_v29 = vadd.f32 %v5673_v15, %v5591_v1 }
 0x821   : > { %v19157_v57 = vpop.f32.mrf.mxu3  ;;  %v19159_v14 = vpop.f32.mrf.mxu2 }
 0x822   : > { %5969 = vmatmul.bf16.gmra.mxu1 %v13105_v31  ;;  %v5757_v6 = vadd.f32 %v5756_v13, %v5674_v29  ;;  %v15062_v13 = vld [vmem:[%s23173_s10 + $0x148] sm:$0xf0] }
 0x823   : > { %v5763_v55 = vpop.f32.mrf.mxu0  ;;  %v13165_v5 = vor.u32 %v15062_v13, %v13164_v27 }
 0x824   : > { %v19161_v56 = vadd.f32 %v5839_v38, %v5757_v6  ;;  %v15051_v38 = vld [vmem:[%s23173_s10 + $0xf4] sm:$0xf] }
 0x825   : > { %v13133_v48 = vor.u32 %v15051_v38, %v13130_v26  ;;  %v13158_v38 = vld [vmem:[%s23173_s10 + $0x144] sm:$0xf0]  ;;  %v4950_v26 = vpop.permute.xlu2 %4949 }
 0x827   : > { %v5675_v49 = vpop.f32.mrf.mxu1 }
 0x828   : > { %v5676_v18 = vadd.f32 %v5675_v49, %v5593_v42  ;;  %v4945_v42 = vpop.permute.xlu1 %4944 }
 0x829   : > { %v5612_v58 = vpop.f32.mrf.mxu3  ;;  %v5844_v40 = vpop.f32.mrf.mxu2  ;;  %v5598_v45 = vadd.f32 %v19083_v17, %v4945_v42 }
 0x82a   : > { %v19176_v35 = vadd.f32 %v5758_v62, %v5676_v18  ;;  %v13269_v58 = vor.u32 %v15089_v30, %v13268_v25  ;;  %v15145_v25 = vld [vmem:[%s23175_s12 + $0xcc] sm:$0xf0] }
 0x82b   : > { %v5766_v52 = vpop.f32.mrf.mxu0 }
 0x82e   : > { %5911 = vmatmul.bf16.gmra.mxu3 %v13241_v53  ;;  %13395 = vmatmul.msk.bf16.gmra.mxu0 %vm926_vm0, %v13165_v5  ;;  %v15058_v5 = vld [vmem:[%s23173_s10 + $0x12c] sm:$0xf] }
 0x82f   : > { %v5678_v62 = vpop.f32.mrf.mxu1 }
 0x830   : > { %v5679_v54 = vadd.f32 %v5678_v62, %v5596_v22  ;;  %v5601_v22 = vadd.f32 %v19095_v11, %v4950_v26  ;;  %v13220_v26 = vld [vmem:[%s23173_s10 + $0x1a0] sm:$0xf] }
 0x831   : > { %v5872_v1 = vpop.f32.mrf.mxu3  ;;  %v19186_v31 = vpop.f32.mrf.mxu2 }
 0x832   : > { %v19189_v15 = vadd.f32 %v5872_v1, %v18844_v51  ;;  %5974 = vmatmul.bf16.gmra.mxu1 %v13133_v48  ;;  %v5762_v29 = vadd.f32 %v5761_v0, %v5679_v54  ;;  %v13192_v51 = vld [vmem:[%s23173_s10 + $0x168] sm:$0xf]  ;;  %v15069_v0 = vld [vmem:[%s23173_s10 + $0x180] sm:$0xf0]  ;;  %v13161_v48 = vor.u32 %v15058_v5, %v13158_v38 }
 0x833   : > { %v5768_v6 = vpop.f32.mrf.mxu0 }
 0x834   : > { %v19191_v20 = vadd.f32 %v5844_v40, %v5762_v29  ;;  %v13193_v40 = vor.u32 %v15069_v0, %v13192_v51 }
 0x837   : > { %v5680_v49 = vpop.f32.mrf.mxu1 }
 0x838   : > { %v5681_v27 = vadd.f32 %v5680_v49, %v5598_v45  ;;  %v13503_v45 = vld [vmem:[%s23175_s12 + $0xc0] sm:$0xf] }
 0x839   : > { %v19206_v13 = vpop.f32.mrf.mxu3  ;;  %v5849_v17 = vpop.f32.mrf.mxu2  ;;  %v13504_v30 = vor.u32 %v15145_v25, %v13503_v45 }
 0x83a   : > { %v19208_v18 = vadd.f32 %v5763_v55, %v5681_v27  ;;  %v15149_v55 = vld [vmem:[%s23175_s12 + $0xec] sm:$0xf0]  ;;  %v4955_v27 = vpop.permute.xlu0 %4954 }
 0x83b   : > { %v19210_v53 = vpop.f32.mrf.mxu0  ;;  %v13520_v62 = vor.u32 %v15149_v55, %v13519_v32  ;;  %v15076_v32 = vld [vmem:[%s23173_s10 + $0x1b8] sm:$0xf0] }
 0x83d   : > { %6319 = vmatpush.bf16.msrb.mxu2 %v13520_v62  ;;  %v15137_v62 = vld [vmem:[%s23175_s12 + $0x8c] sm:$0xf0] }
 0x83e   : > { %5916 = vmatmul.bf16.gmra.mxu3 %v13269_v58  ;;  %13396 = vmatmul.msk.bf16.gmra.mxu0 %vm926_vm0, %v13193_v40  ;;  %v13487_v58 = vld [vmem:[%s23175_s12 + $0xa0] sm:$0xf]  ;;  %v15141_v40 = vld [vmem:[%s23175_s12 + $0xac] sm:$0xf0] }
 0x83f   : > { %v5683_v54 = vpop.f32.mrf.mxu1  ;;  %v13488_v5 = vor.u32 %v15141_v40, %v13487_v58  ;;  %v15133_v58 = vld [vmem:[%s23175_s12 + $0x6c] sm:$0xf0] }
 0x840   : > { %v5684_v1 = vadd.f32 %v5683_v54, %v5601_v22 }
 0x841   : > { %v5877_v29 = vpop.f32.mrf.mxu3  ;;  %v19226_v42 = vpop.f32.mrf.mxu2  ;;  %6320 = vmatpush.bf16.msrb.mxu2 %v13504_v30  ;;  %v13186_v30 = vld [vmem:[%s23173_s10 + $0x17c] sm:$0xf0] }
 0x842   : > { %v19235_v11 = vadd.f32 %v5877_v29, %v18883_v60  ;;  %5979 = vmatmul.bf16.gmra.mxu1 %v13161_v48  ;;  %v5767_v49 = vadd.f32 %v5766_v52, %v5684_v1  ;;  %v5603_v60 = vadd.f32 %v19114_v23, %v4955_v27  ;;  %v13296_v52 = vld [vmem:[%s23173_s10 + $0x240] sm:$0xf]  ;;  %v13221_v29 = vor.u32 %v15076_v32, %v13220_v26  ;;  %v4960_v27 = vpop.permute.xlu1 %4959 }
 0x843   : > { %v19237_v51 = vpop.f32.mrf.mxu0  ;;  %v13471_v48 = vld [vmem:[%s23175_s12 + $0x80] sm:$0xf]  ;;  %v5606_v40 = vadd.f32 %v19126_v19, %v4960_v27 }
 0x844   : > { %v19239_v0 = vadd.f32 %v5849_v17, %v5767_v49  ;;  %v15096_v17 = vld [vmem:[%s23173_s10 + $0x258] sm:$0xf0]  ;;  %v13472_v45 = vor.u32 %v15137_v62, %v13471_v48  ;;  %v15065_v49 = vld [vmem:[%s23173_s10 + $0x164] sm:$0xf]  ;;  %v13439_v32 = vld [vmem:[%s23175_s12 + $0x40] sm:$0xf] }
 0x845   : > { %6321 = vmatpush.bf16.msrb.mxu2 %v13488_v5  ;;  %v13297_v1 = vor.u32 %v15096_v17, %v13296_v52 }
 0x847   : > { %v5685_v38 = vpop.f32.mrf.mxu1 }
 0x848   : > { %v5686_v55 = vadd.f32 %v5685_v38, %v5603_v60  ;;  %v13189_v60 = vor.u32 %v15065_v49, %v13186_v30  ;;  %v13423_v49 = vld [vmem:[%s23175_s12 + $0x20] sm:$0xf]  ;;  %v15125_v30 = vld [vmem:[%s23175_s12 + $0x2c] sm:$0xf0] }
 0x849   : > { %v19260_v23 = vpop.f32.mrf.mxu3  ;;  %v5854_v22 = vpop.f32.mrf.mxu2  ;;  %6322 = vmatpush.bf16.msrb.mxu2 %v13472_v45  ;;  %v13424_v27 = vor.u32 %v15125_v30, %v13423_v49  ;;  %v13521_v30 = vld [vmem:[%s23175_s12 + $0xf0] sm:$0xf0] }
 0x84a   : > { %v19268_v54 = vadd.f32 %v5768_v6, %v5686_v55  ;;  %v13455_v6 = vld [vmem:[%s23175_s12 + $0x60] sm:$0xf]  ;;  %v15129_v55 = vld [vmem:[%s23175_s12 + $0x4c] sm:$0xf0]  ;;  %v4965_v45 = vpop.permute.xlu2 %4964  ;;  %v4970_v49 = vpop.permute.xlu0 %4969 }
 0x84b   : > { %v19270_v25 = vpop.f32.mrf.mxu0  ;;  %v13456_v52 = vor.u32 %v15133_v58, %v13455_v6  ;;  %v13440_v62 = vor.u32 %v15129_v55, %v13439_v32  ;;  %v13248_v58 = vld [vmem:[%s23173_s10 + $0x1d8] sm:$0xf] }
 0x84d   : > { %6323 = vmatpush.bf16.msrb.mxu2 %v13456_v52 }
 0x84e   : > { %5921 = vmatmul.bf16.gmra.mxu3 %v13297_v1  ;;  %13397 = vmatmul.msk.bf16.gmra.mxu0 %vm926_vm0, %v13221_v29 }
 0x84f   : > { %v5688_v5 = vpop.f32.mrf.mxu1 }
 0x850   : > { %v5689_v38 = vadd.f32 %v5688_v5, %v5606_v40  ;;  %v15083_v40 = vld [vmem:[%s23173_s10 + $0x1f0] sm:$0xf0]  ;;  %v13407_v5 = vld [vmem:[%s23175_s12] sm:$0xf] }
 0x851   : > { %v5882_v17 = vpop.f32.mrf.mxu3  ;;  %v19286_v26 = vpop.f32.mrf.mxu2  ;;  %6324 = vmatpush.bf16.msrb.mxu2 %v13440_v62  ;;  %v13249_v55 = vor.u32 %v15083_v40, %v13248_v58  ;;  %v15143_v40 = vld [vmem:[%s23175_s12 + $0xc4] sm:$0xf] }
 0x852   : > { %v19295_v19 = vadd.f32 %v5882_v17, %v18912_v8  ;;  %5984 = vmatmul.bf16.gmra.mxu1 %v13189_v60  ;;  %v5772_v48 = vadd.f32 %v19210_v53, %v5689_v38  ;;  %v5608_v8 = vadd.f32 %v19145_v16, %v4965_v45  ;;  %v13324_v53 = vld [vmem:[%s23173_s10 + $0x278] sm:$0xf]  ;;  %v15121_v38 = vld [vmem:[%s23175_s12 + $0xc] sm:$0xf0] }
 0x853   : > { %v5778_v1 = vpop.f32.mrf.mxu0  ;;  %v13214_v45 = vld [vmem:[%s23173_s10 + $0x1b4] sm:$0xf0] }
 0x854   : > { %v19298_v29 = vadd.f32 %v5854_v22, %v5772_v48  ;;  %v15103_v22 = vld [vmem:[%s23173_s10 + $0x290] sm:$0xf0]  ;;  %v13408_v48 = vor.u32 %v15121_v38, %v13407_v5  ;;  %v15072_v1 = vld [vmem:[%s23173_s10 + $0x19c] sm:$0xf] }
 0x855   : > { %6325 = vmatpush.bf16.msrb.mxu2 %v13424_v27  ;;  %v13325_v32 = vor.u32 %v15103_v22, %v13324_v53  ;;  %v13217_v53 = vor.u32 %v15072_v1, %v13214_v45  ;;  %v15139_v1 = vld [vmem:[%s23175_s12 + $0xa4] sm:$0xf]  ;;  %v13489_v45 = vld [vmem:[%s23175_s12 + $0xb0] sm:$0xf0] }
 0x857   : > { %v5690_v6 = vpop.f32.mrf.mxu1 }
 0x858   : > { %v5691_v60 = vadd.f32 %v5690_v6, %v5608_v8  ;;  %v5611_v8 = vadd.f32 %v19157_v57, %v4970_v49  ;;  %v13492_v49 = vor.u32 %v15139_v1, %v13489_v45 }
 0x859   : > { %v19319_v16 = vpop.f32.mrf.mxu3  ;;  %v5859_v52 = vpop.f32.mrf.mxu2  ;;  %6326 = vmatpush.bf16.msrb.mxu2 %v13408_v48 }
 0x85a   : > { %v19328_v17 = vadd.f32 %v19237_v51, %v5691_v60  ;;  %v15147_v51 = vld [vmem:[%s23175_s12 + $0xe4] sm:$0xf]  ;;  %v13505_v60 = vld [vmem:[%s23175_s12 + $0xd0] sm:$0xf0] }
 0x85b   : > { %v19330_v62 = vpop.f32.mrf.mxu0  ;;  %v13524_v27 = vor.u32 %v15147_v51, %v13521_v30  ;;  %v15090_v30 = vld [vmem:[%s23173_s10 + $0x228] sm:$0xf0] }
 0x85d   : > { %6402 = vmatpush.bf16.msra.mxu3 %v13524_v27  ;;  %v13473_v27 = vld [vmem:[%s23175_s12 + $0x90] sm:$0xf0] }
 0x85e   : > { %5926 = vmatmul.bf16.gmra.mxu3 %v13325_v32  ;;  %13398 = vmatmul.msk.bf16.gmra.mxu0 %vm926_vm0, %v13249_v55  ;;  %v13508_v32 = vor.u32 %v15143_v40, %v13505_v60  ;;  %v15079_v60 = vld [vmem:[%s23173_s10 + $0x1d4] sm:$0xf] }
 0x85f   : > { %v5693_v6 = vpop.f32.mrf.mxu1 }
 0x860   : > { %v5694_v22 = vadd.f32 %v5693_v6, %v5611_v8 }
 0x861   : > { %v5887_v58 = vpop.f32.mrf.mxu3  ;;  %v5861_v5 = vpop.f32.mrf.mxu2  ;;  %6403 = vmatpush.bf16.msra.mxu3 %v13508_v32  ;;  %v13457_v32 = vld [vmem:[%s23175_s12 + $0x70] sm:$0xf0] }
 0x862   : > { %v19353_v57 = vadd.f32 %v5887_v58, %v18948_v36  ;;  %5989 = vmatmul.bf16.gmra.mxu1 %v13217_v53  ;;  %v5777_v38 = vadd.f32 %v19270_v25, %v5694_v22  ;;  %v13352_v36 = vld [vmem:[%s23173_s10 + $0x2b0] sm:$0xf]  ;;  %v15110_v25 = vld [vmem:[%s23173_s10 + $0x2c8] sm:$0xf0]  ;;  %v15135_v53 = vld [vmem:[%s23175_s12 + $0x84] sm:$0xf] }
 0x863   : > { %v6040_v55 = vpop.f32.mrf.mxu0  ;;  %v13353_v6 = vor.u32 %v15110_v25, %v13352_v36  ;;  %v13476_v58 = vor.u32 %v15135_v53, %v13473_v27  ;;  %v13242_v5 = vld [vmem:[%s23173_s10 + $0x1ec] sm:$0xf0]  ;;  %v13441_v25 = vld [vmem:[%s23175_s12 + $0x50] sm:$0xf0]  ;;  %v15123_v27 = vld [vmem:[%s23175_s12 + $0x24] sm:$0xf] }
 0x864   : > { %v19356_v48 = vadd.f32 %v5859_v52, %v5777_v38  ;;  %v13276_v52 = vld [vmem:[%s23173_s10 + $0x210] sm:$0xf]  ;;  %v15131_v38 = vld [vmem:[%s23175_s12 + $0x64] sm:$0xf]  ;;  %v13245_v1 = vor.u32 %v15079_v60, %v13242_v5 }
 0x865   : > { %6404 = vmatpush.bf16.msra.mxu3 %v13492_v49  ;;  %v13277_v22 = vor.u32 %v15090_v30, %v13276_v52  ;;  %v13460_v45 = vor.u32 %v15131_v38, %v13457_v32  ;;  %v15117_v60 = vld [vmem:[%s23173_s10 + $0x300] sm:$0xf0]  ;;  %v13304_v32 = vld [vmem:[%s23173_s10 + $0x248] sm:$0xf] }
 0x867   : > { %v5695_v51 = vpop.f32.mrf.mxu1 }
 0x868   : > { %v15127_v51 = vld [vmem:[%s23175_s12 + $0x44] sm:$0xf] }
 0x869   : > { %v19376_v8 = vpop.f32.mrf.mxu3  ;;  %6405 = vmatpush.bf16.msra.mxu3 %v13476_v58  ;;  %v13444_v30 = vor.u32 %v15127_v51, %v13441_v25 }
 0x86b   : > { %v19384_v40 = vpop.f32.mrf.mxu0 }
 0x86d   : > { %6406 = vmatpush.bf16.msra.mxu3 %v13460_v45  ;;  %v15119_v45 = vld [vmem:[%s23175_s12 + $0x4] sm:$0xf] }
 0x86e   : > { %5931 = vmatmul.bf16.gmra.mxu3 %v13353_v6  ;;  %13399 = vmatmul.msk.bf16.gmra.mxu0 %vm926_vm0, %v13277_v22  ;;  %v13425_v6 = vld [vmem:[%s23175_s12 + $0x30] sm:$0xf0]  ;;  %v5875_v22 = vadd.f32 %v19206_v13, %v18867_v61  ;;  %v15097_v61 = vld [vmem:[%s23173_s10 + $0x260] sm:$0xf0] }
 0x86f   : > { %v5955_v36 = vpop.f32.mrf.mxu1  ;;  %v13428_v5 = vor.u32 %v15123_v27, %v13425_v6  ;;  %v13305_v25 = vor.u32 %v15097_v61, %v13304_v32  ;;  %v15086_v6 = vld [vmem:[%s23173_s10 + $0x20c] sm:$0xf]  ;;  %v5880_v32 = vadd.f32 %v19260_v23, %v18901_v7 }
 0x870   : > { %v5956_v58 = vadd.f32 %v5955_v36, %v19189_v15  ;;  %v13409_v36 = vld [vmem:[%s23175_s12 + $0x10] sm:$0xf0] }
 0x871   : > { %v5892_v49 = vpop.f32.mrf.mxu3  ;;  %6407 = vmatpush.bf16.msra.mxu3 %v13444_v30  ;;  %v13412_v30 = vor.u32 %v15119_v45, %v13409_v36  ;;  %v15104_v45 = vld [vmem:[%s23173_s10 + $0x298] sm:$0xf0] }
 0x872   : > { %v19406_v52 = vadd.f32 %v5892_v49, %v18987_v28  ;;  %5994 = vmatmul.bf16.gmra.mxu1 %v13245_v1  ;;  %v13380_v28 = vld [vmem:[%s23173_s10 + $0x2e8] sm:$0xf]  ;;  %v6039_v49 = vadd.f32 %v19330_v62, %v5956_v58 }
 0x873   : > { %v6045_v53 = vpop.f32.mrf.mxu0  ;;  %v13381_v1 = vor.u32 %v15117_v60, %v13380_v28 }
 0x875   : > { %6408 = vmatpush.bf16.msra.mxu3 %v13428_v5 }
 0x877   : > { %v5957_v38 = vpop.f32.mrf.mxu1 }
 0x878   : > { %v5958_v13 = vadd.f32 %v5957_v38, %v5875_v22  ;;  %v13270_v22 = vld [vmem:[%s23173_s10 + $0x224] sm:$0xf0]  ;;  %v19454_v38 = vld [vmem:[%s23173_s10 + $0x320] sm:$0xff] }
 0x879   : > { %v19429_v15 = vpop.f32.mrf.mxu3  ;;  %6409 = vmatpush.bf16.msra.mxu3 %v13412_v30  ;;  %v13273_v60 = vor.u32 %v15086_v6, %v13270_v22  ;;  %v15093_v30 = vld [vmem:[%s23173_s10 + $0x244] sm:$0xf]  ;;  %v13298_v6 = vld [vmem:[%s23173_s10 + $0x25c] sm:$0xf0] }
 0x87a   : > { %v6041_v51 = vadd.f32 %v6040_v55, %v5958_v13  ;;  %v5288_v13 = vunpack.c.l.b16 %v19454_v38 }
 0x87b   : > { %v6048_v27 = vpop.f32.mrf.mxu0 }
 0x87c   : > { %v19444_v28 = vpack.c.bf16 %v6041_v51, %v6039_v49  ;;  %v5393_v7 = vpack.c.b16 %v5288_v13, %v5288_v13  ;;  %v13513_v13 = vld [vmem:[%s23175_s12 + $0xd8] sm:$0xf0] }
 0x87e   : > { %5936 = vmatmul.bf16.gmra.mxu3 %v13381_v1  ;;  %13400 = vmatmul.msk.bf16.gmra.mxu0 %vm926_vm0, %v13305_v25 }
 0x87f   : > { %6327 = vmatmul.bf16.vlgmr.msrb.gmra.mxu2 %v19444_v28  ;;  %v5960_v62 = vpop.f32.mrf.mxu1 }
 0x880   : > { %v5961_v61 = vadd.f32 %v5960_v62, %v19235_v11 }
 0x881   : > { %v5897_v55 = vpop.f32.mrf.mxu3 }
 0x882   : > { %v19449_v58 = vadd.f32 %v5897_v55, %v19011_v46  ;;  %5999 = vmatmul.bf16.gmra.mxu1 %v13273_v60  ;;  %v13332_v46 = vld [vmem:[%s23173_s10 + $0x280] sm:$0xf]  ;;  %v6044_v51 = vadd.f32 %v19384_v40, %v5961_v61  ;;  %v15148_v60 = vld [vmem:[%s23175_s12 + $0xec] sm:$0xf]  ;;  %v13529_v40 = vld [vmem:[%s23175_s12 + $0xf8] sm:$0xf0] }
 0x883   : > { %v6050_v5 = vpop.f32.mrf.mxu0  ;;  %v13333_v23 = vor.u32 %v15104_v45, %v13332_v46  ;;  %v13532_v62 = vor.u32 %v15148_v60, %v13529_v40  ;;  %v15144_v61 = vld [vmem:[%s23175_s12 + $0xcc] sm:$0xf] }
 0x884   : > { %v13516_v46 = vor.u32 %v15144_v61, %v13513_v13  ;;  %v15100_v61 = vld [vmem:[%s23173_s10 + $0x27c] sm:$0xf]  ;;  %v13326_v13 = vld [vmem:[%s23173_s10 + $0x294] sm:$0xf0] }
 0x885   : > { %6568 = vmatpush.bf16.msra.mxu0 %v13532_v62 }
 0x887   : > { %v5962_v1 = vpop.f32.mrf.mxu1 }
 0x888   : > { %v5963_v36 = vadd.f32 %v5962_v1, %v5880_v32 }
 0x889   : > { %v19466_v49 = vpop.f32.mrf.mxu3  ;;  %6569 = vmatpush.bf16.msra.mxu0 %v13516_v46 }
 0x88a   : > { %v6046_v25 = vadd.f32 %v6045_v53, %v5963_v36  ;;  %v13301_v53 = vor.u32 %v15093_v30, %v13298_v6  ;;  %v15140_v36 = vld [vmem:[%s23175_s12 + $0xac] sm:$0xf]  ;;  %v13360_v30 = vld [vmem:[%s23173_s10 + $0x2b8] sm:$0xf]  ;;  %v15111_v6 = vld [vmem:[%s23173_s10 + $0x2d0] sm:$0xf0] }
 0x88b   : > { %v19469_v11 = vpop.f32.mrf.mxu0  ;;  %v13361_v62 = vor.u32 %v15111_v6, %v13360_v30  ;;  %v15128_v30 = vld [vmem:[%s23175_s12 + $0x4c] sm:$0xf] }
 0x88c   : > { %v19477_v22 = vpack.c.bf16 %v6046_v25, %v6044_v51  ;;  %v13497_v51 = vld [vmem:[%s23175_s12 + $0xb8] sm:$0xf0]  ;;  %v5885_v25 = vadd.f32 %v19319_v16, %v18935_v33  ;;  %v15136_v33 = vld [vmem:[%s23175_s12 + $0x8c] sm:$0xf] }
 0x88e   : > { %5941 = vmatmul.bf16.gmra.mxu3 %v5393_v7  ;;  %13401 = vmatmul.msk.bf16.gmra.mxu0 %vm926_vm0, %v13333_v23 }
 0x88f   : > { %6332 = vmatmul.bf16.gmra.mxu2 %v19477_v22  ;;  %v5965_v55 = vpop.f32.mrf.mxu1 }
 0x890   : > { %v5966_v7 = vadd.f32 %v5965_v55, %v19295_v19  ;;  %v13481_v19 = vld [vmem:[%s23175_s12 + $0x98] sm:$0xf0] }
 0x891   : > { %v5902_v32 = vpop.f32.mrf.mxu3  ;;  %v13484_v55 = vor.u32 %v15136_v33, %v13481_v19  ;;  %v13449_v33 = vld [vmem:[%s23175_s12 + $0x58] sm:$0xf0] }
 0x892   : > { %v19494_v1 = vadd.f32 %v5902_v32, %v19037_v24  ;;  %6004 = vmatmul.bf16.gmra.mxu1 %v13301_v53  ;;  %v13500_v24 = vor.u32 %v15140_v36, %v13497_v51  ;;  %v6049_v16 = vadd.f32 %v6048_v27, %v5966_v7  ;;  %v15132_v27 = vld [vmem:[%s23175_s12 + $0x6c] sm:$0xf]  ;;  %v13329_v36 = vor.u32 %v15100_v61, %v13326_v13 }
 0x893   : > { %v19496_v45 = vpop.f32.mrf.mxu0 }
 0x894   : > { %6570 = vmatpush.bf16.msra.mxu0 %v13500_v24  ;;  %v13527_v24 = vld [vmem:[%s23175_s12 + $0xe8] sm:$0xf] }
 0x897   : > { %v5967_v23 = vpop.f32.mrf.mxu1 }
 0x898   : > { %v5968_v60 = vadd.f32 %v5967_v23, %v5885_v25  ;;  %6571 = vmatpush.bf16.msra.mxu0 %v13484_v55  ;;  %v15150_v23 = vld [vmem:[%s23175_s12 + $0xf4] sm:$0xf0]  ;;  %v15124_v55 = vld [vmem:[%s23175_s12 + $0x2c] sm:$0xf] }
 0x899   : > { %v19513_v40 = vpop.f32.mrf.mxu3 }
 0x89a   : > { %v6051_v53 = vadd.f32 %v6050_v5, %v5968_v60  ;;  %v13465_v5 = vld [vmem:[%s23175_s12 + $0x78] sm:$0xf0]  ;;  %v13528_v60 = vor.u32 %v15150_v23, %v13527_v24  ;;  %v15120_v24 = vld [vmem:[%s23175_s12 + $0xc] sm:$0xf] }
 0x89b   : > { %v19521_v32 = vpop.f32.mrf.mxu0  ;;  %v13468_v51 = vor.u32 %v15132_v27, %v13465_v5  ;;  %v13388_v5 = vld [vmem:[%s23173_s10 + $0x2f0] sm:$0xf] }
 0x89c   : > { %v19529_v46 = vpack.c.bf16 %v6051_v53, %v6049_v16  ;;  %v13452_v16 = vor.u32 %v15128_v30, %v13449_v33  ;;  %v5807_v53 = vadd.f32 %v18946_v2, %v18965_v59  ;;  %6485 = vmatpush.bf16.msra.mxu1 %v13528_v60  ;;  %v13433_v2 = vld [vmem:[%s23175_s12 + $0x38] sm:$0xf0] }
 0x89d   : > { %6572 = vmatpush.bf16.msra.mxu0 %v13468_v51  ;;  %v13436_v51 = vor.u32 %v15124_v55, %v13433_v2 }
 0x89e   : > { %13402 = vmatmul.msk.bf16.gmra.mxu0 %vm926_vm0, %v13361_v62  ;;  %6410 = vmatmul.bf16.vlgmr.msra.gmra.mxu3 %v19444_v28  ;;  %v13511_v62 = vld [vmem:[%s23175_s12 + $0xc8] sm:$0xf]  ;;  %v5890_v61 = vadd.f32 %v19376_v8, %v5807_v53 }
 0x89f   : > { %6337 = vmatmul.bf16.gmra.mxu2 %v19529_v46  ;;  %v5970_v25 = vpop.f32.mrf.mxu1 }
 0x8a0   : > { %v5971_v13 = vadd.f32 %v5970_v25, %v19353_v57  ;;  %v13495_v57 = vld [vmem:[%s23175_s12 + $0xa8] sm:$0xf]  ;;  %v15142_v25 = vld [vmem:[%s23175_s12 + $0xb4] sm:$0xf0] }
 0x8a1   : > { %v5907_v7 = vpop.f32.mrf.mxu3  ;;  %6573 = vmatpush.bf16.msra.mxu0 %v13452_v16  ;;  %v13496_v33 = vor.u32 %v15142_v25, %v13495_v57  ;;  %v13417_v16 = vld [vmem:[%s23175_s12 + $0x18] sm:$0xf0]  ;;  %v4797_v25 = vld [vmem:[%s23173_s10 + $0x328] sm:$0xf] }
 0x8a2   : > { %v19550_v6 = vadd.f32 %v5907_v7, %v19068_v43  ;;  %6009 = vmatmul.bf16.gmra.mxu1 %v13329_v36  ;;  %v15146_v43 = vld [vmem:[%s23175_s12 + $0xd4] sm:$0xf0]  ;;  %v15118_v36 = vld [vmem:[%s23173_s10 + $0x308] sm:$0xf0]  ;;  %v6054_v23 = vadd.f32 %v19469_v11, %v5971_v13  ;;  %v13420_v55 = vor.u32 %v15120_v24, %v13417_v16  ;;  %v5812_v24 = vadd.f32 %v18982_v37, %v18998_v39  ;;  %v13431_v37 = vld [vmem:[%s23175_s12 + $0x28] sm:$0xf] }
 0x8a3   : > { %v19555_v19 = vpop.f32.mrf.mxu0  ;;  %v13512_v27 = vor.u32 %v15146_v43, %v13511_v62  ;;  %v13389_v60 = vor.u32 %v15118_v36, %v13388_v5  ;;  %v15107_v62 = vld [vmem:[%s23173_s10 + $0x2b4] sm:$0xf]  ;;  %v13354_v43 = vld [vmem:[%s23173_s10 + $0x2cc] sm:$0xf0]  ;;  %v13463_v5 = vld [vmem:[%s23175_s12 + $0x68] sm:$0xf] }
 0x8a4   : > { %v13357_v13 = vor.u32 %v15107_v62, %v13354_v43  ;;  %v15134_v36 = vld [vmem:[%s23175_s12 + $0x74] sm:$0xf0] }
 0x8a5   : > { %6486 = vmatpush.bf16.msra.mxu1 %v13512_v27  ;;  %6574 = vmatpush.bf16.msra.mxu0 %v13436_v51  ;;  %v15126_v39 = vld [vmem:[%s23175_s12 + $0x34] sm:$0xf0] }
 0x8a7   : > { %v5972_v59 = vpop.f32.mrf.mxu1 }
 0x8a8   : > { %v5973_v7 = vadd.f32 %v5972_v59, %v5890_v61  ;;  %v15138_v61 = vld [vmem:[%s23175_s12 + $0x94] sm:$0xf0] }
 0x8a9   : > { %v19579_v8 = vpop.f32.mrf.mxu3  ;;  %6487 = vmatpush.bf16.msra.mxu1 %v13496_v33  ;;  %6575 = vmatpush.bf16.msra.mxu0 %v13420_v55  ;;  %v5290_v33 = vunpack.c.l.b16 %v4797_v25 }
 0x8aa   : > { %v6056_v30 = vadd.f32 %v19496_v45, %v5973_v7  ;;  %v13479_v45 = vld [vmem:[%s23175_s12 + $0x88] sm:$0xf]  ;;  %v13464_v7 = vor.u32 %v15134_v36, %v13463_v5 }
 0x8ab   : > { %v19595_v53 = vpop.f32.mrf.mxu0  ;;  %v13480_v27 = vor.u32 %v15138_v61, %v13479_v45  ;;  %v13432_v61 = vor.u32 %v15126_v39, %v13431_v37  ;;  %v5289_v39 = vunpack.c.h.b16 %v19454_v38  ;;  %v5822_v38 = vadd.f32 %v19035_v3, %v19054_v47 }
 0x8ac   : > { %v19603_v11 = vpack.c.bf16 %v6056_v30, %v6054_v23  ;;  %v13447_v23 = vld [vmem:[%s23175_s12 + $0x48] sm:$0xf]  ;;  %v5895_v30 = vadd.f32 %v19429_v15, %v5812_v24 }
 0x8ad   : > { %6488 = vmatpush.bf16.msra.mxu1 %v13480_v27  ;;  %v15114_v27 = vld [vmem:[%s23173_s10 + $0x2ec] sm:$0xf] }
 0x8ae   : > { %13403 = vmatmul.msk.bf16.gmra.mxu0 %vm926_vm0, %v13389_v60  ;;  %6415 = vmatmul.bf16.gmra.mxu3 %v19477_v22 }
 0x8af   : > { %6342 = vmatmul.bf16.gmra.mxu2 %v19603_v11  ;;  %v5975_v2 = vpop.f32.mrf.mxu1 }
 0x8b0   : > { %v5976_v60 = vadd.f32 %v5975_v2, %v19406_v52  ;;  %v5395_v52 = vpack.c.b16 %v5290_v33, %v5290_v33  ;;  %v13382_v2 = vld [vmem:[%s23173_s10 + $0x304] sm:$0xf0] }
 0x8b1   : > { %v5912_v59 = vpop.f32.mrf.mxu3  ;;  %6489 = vmatpush.bf16.msra.mxu1 %v13464_v7  ;;  %v13385_v5 = vor.u32 %v15114_v27, %v13382_v2 }
 0x8b2   : > { %v19621_v51 = vadd.f32 %v5912_v59, %v19099_v63  ;;  %6014 = vmatmul.bf16.gmra.mxu1 %v13357_v13  ;;  %v15130_v63 = vld [vmem:[%s23175_s12 + $0x54] sm:$0xf0]  ;;  %v6059_v45 = vadd.f32 %v19521_v32, %v5976_v60  ;;  %v13415_v32 = vld [vmem:[%s23175_s12 + $0x8] sm:$0xf] }
 0x8b3   : > { %v6065_v57 = vpop.f32.mrf.mxu0  ;;  %v13448_v16 = vor.u32 %v15130_v63, %v13447_v23  ;;  %v5817_v63 = vadd.f32 %v19009_v50, %v19028_v34  ;;  %v5394_v50 = vpack.c.b16 %v5289_v39, %v5289_v39 }
 0x8b5   : > { %6490 = vmatpush.bf16.msra.mxu1 %v13448_v16 }
 0x8b7   : > { %v5977_v62 = vpop.f32.mrf.mxu1 }
 0x8b8   : > { %v5978_v43 = vadd.f32 %v5977_v62, %v5895_v30  ;;  %v5900_v30 = vadd.f32 %v19466_v49, %v5817_v63 }
 0x8b9   : > { %v19636_v55 = vpop.f32.mrf.mxu3  ;;  %6491 = vmatpush.bf16.msra.mxu1 %v13432_v61 }
 0x8ba   : > { %v6061_v15 = vadd.f32 %v19555_v19, %v5978_v43  ;;  %v15122_v19 = vld [vmem:[%s23175_s12 + $0x14] sm:$0xf0] }
 0x8bb   : > { %v6068_v13 = vpop.f32.mrf.mxu0  ;;  %v13416_v36 = vor.u32 %v15122_v19, %v13415_v32 }
 0x8bc   : > { %v19652_v59 = vpack.c.bf16 %v6061_v15, %v6059_v45 }
 0x8bd   : > { %6492 = vmatpush.bf16.msra.mxu1 %v13416_v36 }
 0x8be   : > { %13404 = vmatmul.msk.bf16.gmra.mxu0 %vm926_vm0, %v5395_v52  ;;  %6420 = vmatmul.bf16.gmra.mxu3 %v19529_v46 }
 0x8bf   : > { %6347 = vmatmul.bf16.gmra.mxu2 %v19652_v59  ;;  %v5980_v7 = vpop.f32.mrf.mxu1 }
 0x8c0   : > { %v5981_v60 = vadd.f32 %v5980_v7, %v19449_v58 }
 0x8c1   : > { %v5917_v25 = vpop.f32.mrf.mxu3 }
 0x8c2   : > { %v19664_v24 = vadd.f32 %v5917_v25, %v19130_v41  ;;  %6019 = vmatmul.bf16.gmra.mxu1 %v13385_v5  ;;  %v6064_v43 = vadd.f32 %v19595_v53, %v5981_v60 }
 0x8c3   : > { %v6070_v23 = vpop.f32.mrf.mxu0 }
 0x8c7   : > { %v5982_v33 = vpop.f32.mrf.mxu1 }
 0x8c8   : > { %v5983_v16 = vadd.f32 %v5982_v33, %v5900_v30 }
 0x8c9   : > { %v19670_v62 = vpop.f32.mrf.mxu3 }
 0x8ca   : > { %v6066_v37 = vadd.f32 %v6065_v57, %v5983_v16  ;;  %v5905_v57 = vadd.f32 %v19513_v40, %v5822_v38  ;;  %v5827_v40 = vadd.f32 %v19066_v9, %v19085_v12 }
 0x8cb   : > { %v6073_v41 = vpop.f32.mrf.mxu0 }
 0x8cc   : > { %v19674_v45 = vpack.c.bf16 %v6066_v37, %v6064_v43 }
 0x8ce   : > { %6425 = vmatmul.bf16.gmra.mxu3 %v19603_v11  ;;  %6576 = vmatmul.bf16.vlgmr.msra.gmra.mxu0 %v19444_v28 }
 0x8cf   : > { %6352 = vmatmul.bf16.gmra.mxu2 %v19674_v45  ;;  %v5985_v34 = vpop.f32.mrf.mxu1 }
 0x8d0   : > { %v5986_v15 = vadd.f32 %v5985_v34, %v19494_v1 }
 0x8d1   : > { %v5922_v58 = vpop.f32.mrf.mxu3 }
 0x8d2   : > { %v19680_v49 = vadd.f32 %v5922_v58, %v19161_v56  ;;  %6024 = vmatmul.bf16.gmra.mxu1 %v5394_v50  ;;  %v6069_v2 = vadd.f32 %v6068_v13, %v5986_v15  ;;  %v5910_v13 = vadd.f32 %v19579_v8, %v5827_v40 }
 0x8d3   : > { %v6075_v53 = vpop.f32.mrf.mxu0 }
 0x8d7   : > { %v5987_v52 = vpop.f32.mrf.mxu1 }
 0x8d8   : > { %v5988_v61 = vadd.f32 %v5987_v52, %v5905_v57 }
 0x8d9   : > { %v19686_v27 = vpop.f32.mrf.mxu3 }
 0x8da   : > { %v6071_v32 = vadd.f32 %v6070_v23, %v5988_v61 }
 0x8db   : > { %v6078_v19 = vpop.f32.mrf.mxu0 }
 0x8dc   : > { %v19688_v5 = vpack.c.bf16 %v6071_v32, %v6069_v2 }
 0x8de   : > { %6430 = vmatmul.bf16.gmra.mxu3 %v19652_v59  ;;  %6581 = vmatmul.bf16.gmra.mxu0 %v19477_v22 }
 0x8df   : > { %6357 = vmatmul.bf16.gmra.mxu2 %v19688_v5  ;;  %v5990_v3 = vpop.f32.mrf.mxu1 }
 0x8e0   : > { %v5991_v36 = vadd.f32 %v5990_v3, %v19550_v6  ;;  %v5832_v6 = vadd.f32 %v19097_v4, %v19116_v21  ;;  %v5842_v3 = vadd.f32 %v19159_v14, %v19176_v35 }
 0x8e1   : > { %v5927_v47 = vpop.f32.mrf.mxu3 }
 0x8e2   : > { %v19694_v56 = vadd.f32 %v5927_v47, %v19191_v20  ;;  %6493 = vmatmul.bf16.vlgmr.msra.gmra.mxu1 %v19444_v28  ;;  %v6074_v63 = vadd.f32 %v6073_v41, %v5991_v36  ;;  %v5915_v8 = vadd.f32 %v19636_v55, %v5832_v6  ;;  %v5837_v55 = vadd.f32 %v19128_v44, %v19147_v10 }
 0x8e3   : > { %v6080_v1 = vpop.f32.mrf.mxu0  ;;  %v5925_v47 = vadd.f32 %v19686_v27, %v5842_v3 }
 0x8e7   : > { %v5992_v7 = vpop.f32.mrf.mxu1 }
 0x8e8   : > { %v5993_v25 = vadd.f32 %v5992_v7, %v5910_v13 }
 0x8e9   : > { %v19701_v23 = vpop.f32.mrf.mxu3 }
 0x8ea   : > { %v6076_v30 = vadd.f32 %v6075_v53, %v5993_v25  ;;  %v5920_v53 = vadd.f32 %v19670_v62, %v5837_v55 }
 0x8eb   : > { %v6083_v60 = vpop.f32.mrf.mxu0 }
 0x8ec   : > { %v19703_v33 = vpack.c.bf16 %v6076_v30, %v6074_v63 }
 0x8ee   : > { %6435 = vmatmul.bf16.gmra.mxu3 %v19674_v45  ;;  %6586 = vmatmul.bf16.gmra.mxu0 %v19529_v46 }
 0x8ef   : > { %6362 = vmatmul.bf16.gmra.mxu2 %v19703_v33  ;;  %v5995_v9 = vpop.f32.mrf.mxu1 }
 0x8f0   : > { %v5996_v16 = vadd.f32 %v5995_v9, %v19621_v51 }
 0x8f1   : > { %v5932_v12 = vpop.f32.mrf.mxu3 }
 0x8f2   : > { %v19709_v20 = vadd.f32 %v5932_v12, %v19239_v0  ;;  %6498 = vmatmul.bf16.gmra.mxu1 %v19477_v22  ;;  %v6079_v41 = vadd.f32 %v6078_v19, %v5996_v16 }
 0x8f3   : > { %v6085_v28 = vpop.f32.mrf.mxu0 }
 0x8f7   : > { %v5997_v43 = vpop.f32.mrf.mxu1 }
 0x8f8   : > { %v5998_v37 = vadd.f32 %v5997_v43, %v5915_v8 }
 0x8f9   : > { %v19716_v39 = vpop.f32.mrf.mxu3 }
 0x8fa   : > { %v6081_v50 = vadd.f32 %v6080_v1, %v5998_v37 }
 0x8fb   : > { %v6088_v34 = vpop.f32.mrf.mxu0 }
 0x8fc   : > { %v19718_v58 = vpack.c.bf16 %v6081_v50, %v6079_v41 }
 0x8fe   : > { %6440 = vmatmul.bf16.gmra.mxu3 %v19688_v5  ;;  %6591 = vmatmul.bf16.gmra.mxu0 %v19603_v11 }
 0x8ff   : > { %6367 = vmatmul.bf16.gmra.mxu2 %v19718_v58  ;;  %v6000_v4 = vpop.f32.mrf.mxu1 }
 0x900   : > { %v6001_v38 = vadd.f32 %v6000_v4, %v19664_v24 }
 0x901   : > { %v5937_v21 = vpop.f32.mrf.mxu3 }
 0x902   : > { %v19724_v0 = vadd.f32 %v5937_v21, %v19298_v29  ;;  %v6328_v22 = vpop.f32.mrf.mxu2  ;;  %6503 = vmatmul.bf16.gmra.mxu1 %v19529_v46  ;;  %v6084_v61 = vadd.f32 %v6083_v60, %v6001_v38  ;;  %v5847_v60 = vadd.f32 %v19186_v31, %v19208_v18 }
 0x903   : > { %v6090_v51 = vpop.f32.mrf.mxu0 }
 0x904   : > { %v5930_v9 = vadd.f32 %v19701_v23, %v5847_v60 }
 0x907   : > { %v6002_v57 = vpop.f32.mrf.mxu1 }
 0x908   : > { %v6003_v15 = vadd.f32 %v6002_v57, %v5920_v53 }
 0x909   : > { %v19731_v52 = vpop.f32.mrf.mxu3 }
 0x90a   : > { %v6086_v2 = vadd.f32 %v6085_v28, %v6003_v15  ;;  %v6330_v32 = vpop.f32.mrf.mxu2 }
 0x90b   : > { %v6093_v29 = vpop.f32.mrf.mxu0 }
 0x90c   : > { %v19733_v19 = vpack.c.bf16 %v6086_v2, %v6084_v61 }
 0x90e   : > { %6445 = vmatmul.bf16.gmra.mxu3 %v19703_v33  ;;  %6596 = vmatmul.bf16.gmra.mxu0 %v19652_v59 }
 0x90f   : > { %6372 = vmatmul.bf16.gmra.mxu2 %v19733_v19  ;;  %v6005_v44 = vpop.f32.mrf.mxu1 }
 0x910   : > { %v6006_v1 = vadd.f32 %v6005_v44, %v19680_v49 }
 0x911   : > { %v5942_v10 = vpop.f32.mrf.mxu3 }
 0x912   : > { %v19739_v46 = vadd.f32 %v5942_v10, %v19356_v48  ;;  %v6333_v24 = vpop.f32.mrf.mxu2  ;;  %6508 = vmatmul.bf16.gmra.mxu1 %v19603_v11  ;;  %v6089_v7 = vadd.f32 %v6088_v34, %v6006_v1 }
 0x913   : > { %v6095_v62 = vpop.f32.mrf.mxu0 }
 0x917   : > { %v6007_v40 = vpop.f32.mrf.mxu1 }
 0x918   : > { %v6008_v13 = vadd.f32 %v6007_v40, %v5925_v47 }
 0x919   : > { %v5944_v36 = vpop.f32.mrf.mxu3 }
 0x91a   : > { %v6091_v25 = vadd.f32 %v6090_v51, %v6008_v13  ;;  %v6335_v63 = vpop.f32.mrf.mxu2  ;;  %v5852_v51 = vadd.f32 %v19226_v42, %v19268_v54  ;;  %v5857_v13 = vadd.f32 %v19286_v26, %v19328_v17 }
 0x91b   : > { %v6098_v30 = vpop.f32.mrf.mxu0 }
 0x91c   : > { %v19746_v48 = vpack.c.bf16 %v6091_v25, %v6089_v7  ;;  %v5935_v38 = vadd.f32 %v19716_v39, %v5852_v51  ;;  %v5940_v25 = vadd.f32 %v19731_v52, %v5857_v13 }
 0x91e   : > { %6450 = vmatmul.bf16.gmra.mxu3 %v19718_v58  ;;  %6601 = vmatmul.bf16.gmra.mxu0 %v19674_v45 }
 0x91f   : > { %6377 = vmatmul.bf16.gmra.mxu2 %v19746_v48  ;;  %v6010_v14 = vpop.f32.mrf.mxu1 }
 0x920   : > { %v6011_v12 = vadd.f32 %v6010_v14, %v19694_v56 }
 0x921   : > { %v6411_v35 = vpop.f32.mrf.mxu3 }
 0x922   : > { %v6338_v11 = vpop.f32.mrf.mxu2  ;;  %v19751_v27 = vpack.c.bf16 %v6411_v35, %v6328_v22  ;;  %6513 = vmatmul.bf16.gmra.mxu1 %v19652_v59  ;;  %v6094_v16 = vadd.f32 %v6093_v29, %v6011_v12 }
 0x923   : > { %v6100_v49 = vpop.f32.mrf.mxu0 }
 0x924   : > { %v6738_v34 = vunpack.c.l.b16 %v19751_v27 }
 0x927   : > { %v6012_v28 = vpop.f32.mrf.mxu1 }
 0x928   : > { %v6013_v6 = vadd.f32 %v6012_v28, %v5930_v9 }
 0x929   : > { %v6413_v8 = vpop.f32.mrf.mxu3 }
 0x92a   : > { %v6096_v43 = vadd.f32 %v6095_v62, %v6013_v6  ;;  %v6340_v37 = vpop.f32.mrf.mxu2  ;;  %v6653_v41 = vpack.c.bf16 %v6413_v8, %v6330_v32 }
 0x92b   : > { %v6103_v50 = vpop.f32.mrf.mxu0 }
 0x92c   : > { %v19759_v4 = vpack.c.bf16 %v6096_v43, %v6094_v16  ;;  %v6739_v59 = vunpack.c.l.b16 %v6653_v41  ;;  %v6797_v55 = vunpack.c.h.b16 %v6653_v41 }
 0x92e   : > { %6455 = vmatmul.bf16.gmra.mxu3 %v19733_v19  ;;  %6606 = vmatmul.bf16.gmra.mxu0 %v19688_v5  ;;  %v19763_v31 = vpack.c.b16 %v6739_v59, %v6738_v34 }
 0x92f   : > { %6382 = vmatmul.bf16.gmra.mxu2 %v19759_v4  ;;  %v6015_v18 = vpop.f32.mrf.mxu1 }
 0x930   : > { %v6016_v57 = vadd.f32 %v6015_v18, %v19709_v20 }
 0x931   : > { %v6416_v56 = vpop.f32.mrf.mxu3 }
 0x932   : > { %v6343_v23 = vpop.f32.mrf.mxu2  ;;  %v6655_v21 = vpack.c.bf16 %v6416_v56, %v6333_v24  ;;  %6518 = vmatmul.bf16.gmra.mxu1 %v19674_v45  ;;  %v6099_v29 = vadd.f32 %v6098_v30, %v6016_v57 }
 0x933   : > { %v6105_v22 = vpop.f32.mrf.mxu0 }
 0x934   : > { %v6798_v53 = vunpack.c.h.b16 %v6655_v21  ;;  %v6740_v62 = vunpack.c.l.b16 %v6655_v21 }
 0x936   : > { %v6826_v15 = vpack.c.b16 %v6798_v53, %v6797_v55 }
 0x937   : > { %v6017_v61 = vpop.f32.mrf.mxu1 }
 0x938   : > { %v6018_v2 = vadd.f32 %v6017_v61, %v5935_v38  ;;  %7799 = vmatpush.bf16.msrb.mxu3 %v6826_v15 }
 0x939   : > { %v6418_v32 = vpop.f32.mrf.mxu3 }
 0x93a   : > { %v6101_v44 = vadd.f32 %v6100_v49, %v6018_v2  ;;  %v19771_v10 = vpop.f32.mrf.mxu2  ;;  %v6657_v45 = vpack.c.bf16 %v6418_v32, %v6335_v63 }
 0x93b   : > { %v6108_v24 = vpop.f32.mrf.mxu0 }
 0x93c   : > { %v19773_v3 = vpack.c.bf16 %v6101_v44, %v6099_v29  ;;  %v6741_v42 = vunpack.c.l.b16 %v6657_v45  ;;  %v6799_v36 = vunpack.c.h.b16 %v6657_v45 }
 0x93e   : > { %6460 = vmatmul.bf16.gmra.mxu3 %v19746_v48  ;;  %6611 = vmatmul.bf16.gmra.mxu0 %v19703_v33  ;;  %v19777_v54 = vpack.c.b16 %v6741_v42, %v6740_v62 }
 0x93f   : > { %6387 = vmatmul.bf16.gmra.mxu2 %v19773_v3  ;;  %v6020_v20 = vpop.f32.mrf.mxu1 }
 0x940   : > { %v6021_v63 = vadd.f32 %v6020_v20, %v19724_v0 }
 0x941   : > { %v6421_v39 = vpop.f32.mrf.mxu3 }
 0x942   : > { %v6348_v47 = vpop.f32.mrf.mxu2  ;;  %v6659_v1 = vpack.c.bf16 %v6421_v39, %v6338_v11  ;;  %6523 = vmatmul.bf16.gmra.mxu1 %v19688_v5  ;;  %v6104_v60 = vadd.f32 %v6103_v50, %v6021_v63 }
 0x943   : > { %v6110_v40 = vpop.f32.mrf.mxu0 }
 0x944   : > { %v6800_v7 = vunpack.c.h.b16 %v6659_v1  ;;  %v6742_v28 = vunpack.c.l.b16 %v6659_v1 }
 0x946   : > { %v19785_v30 = vpack.c.b16 %v6800_v7, %v6799_v36 }
 0x947   : > { %v6022_v14 = vpop.f32.mrf.mxu1 }
 0x948   : > { %v6023_v35 = vadd.f32 %v6022_v14, %v5940_v25 }
 0x949   : > { %v6423_v49 = vpop.f32.mrf.mxu3 }
 0x94a   : > { %v6106_v9 = vadd.f32 %v6105_v22, %v6023_v35  ;;  %v19787_v11 = vpop.f32.mrf.mxu2  ;;  %v6661_v5 = vpack.c.bf16 %v6423_v49, %v6340_v37 }
 0x94b   : > { %v19789_v12 = vpop.f32.mrf.mxu0 }
 0x94c   : > { %v19791_v26 = vpack.c.bf16 %v6106_v9, %v6104_v60  ;;  %v6743_v17 = vunpack.c.l.b16 %v6661_v5  ;;  %v6801_v37 = vunpack.c.h.b16 %v6661_v5 }
 0x94e   : > { %6465 = vmatmul.bf16.gmra.mxu3 %v19759_v4  ;;  %6616 = vmatmul.bf16.gmra.mxu0 %v19718_v58  ;;  %v19795_v0 = vpack.c.b16 %v6743_v17, %v6742_v28 }
 0x94f   : > { %6392 = vmatmul.bf16.gmra.mxu2 %v19791_v26  ;;  %v6025_v52 = vpop.f32.mrf.mxu1 }
 0x950   : > { %v6026_v50 = vadd.f32 %v6025_v52, %v19739_v46 }
 0x951   : > { %v6426_v6 = vpop.f32.mrf.mxu3 }
 0x952   : > { %v19798_v8 = vpop.f32.mrf.mxu2  ;;  %v19800_v16 = vpack.c.bf16 %v6426_v6, %v6343_v23  ;;  %6528 = vmatmul.bf16.gmra.mxu1 %v19703_v33  ;;  %v6109_v18 = vadd.f32 %v6108_v24, %v6026_v50 }
 0x953   : > { %v6579_v43 = vpop.f32.mrf.mxu0 }
 0x954   : > { %v6802_v41 = vunpack.c.h.b16 %v19800_v16  ;;  %v19811_v51 = vpack.c.bf16 %v6109_v18, %v6109_v18 }
 0x956   : > { %v19805_v34 = vpack.c.b16 %v6802_v41, %v6801_v37 }
 0x957   : > { %v6027_v59 = vpop.f32.mrf.mxu1 }
 0x959   : > { %v19807_v56 = vpop.f32.mrf.mxu3 }
 0x95a   : > { %v19809_v21 = vpop.f32.mrf.mxu2 }
 0x95b   : > { %v6582_v22 = vpop.f32.mrf.mxu0 }
 0x95e   : > { %6470 = vmatmul.bf16.gmra.mxu3 %v19773_v3  ;;  %6621 = vmatmul.bf16.gmra.mxu0 %v19733_v19 }
 0x95f   : > { %6397 = vmatmul.bf16.gmra.mxu2 %v19811_v51  ;;  %v6494_v33 = vpop.f32.mrf.mxu1 }
 0x960   : > { %v19841_v37 = vpack.c.bf16 %v19789_v12, %v6494_v33 }
 0x961   : > { %v6431_v23 = vpop.f32.mrf.mxu3 }
 0x962   : > { %v19816_v46 = vpop.f32.mrf.mxu2  ;;  %v19818_v55 = vpack.c.bf16 %v6431_v23, %v6348_v47  ;;  %6533 = vmatmul.bf16.gmra.mxu1 %v19718_v58  ;;  %23257 = vst [vmem:[#allocation22_spill] sm:$0xff] %v19841_v37 }
 0x963   : > { %v6584_v53 = vpop.f32.mrf.mxu0 }
 0x967   : > { %v6496_v38 = vpop.f32.mrf.mxu1 }
 0x968   : > { %v6654_v2 = vpack.c.bf16 %v6579_v43, %v6496_v38 }
 0x969   : > { %v19821_v57 = vpop.f32.mrf.mxu3 }
 0x96a   : > { %v6360_v15 = vpop.f32.mrf.mxu2  ;;  %v6942_v45 = vunpack.c.h.b16 %v6654_v2  ;;  %v6884_v59 = vunpack.c.l.b16 %v6654_v2 }
 0x96b   : > { %v6587_v61 = vpop.f32.mrf.mxu0 }
 0x96e   : > { %6475 = vmatmul.bf16.gmra.mxu3 %v19791_v26  ;;  %6626 = vmatmul.bf16.gmra.mxu0 %v19746_v48 }
 0x96f   : > { %v6499_v32 = vpop.f32.mrf.mxu1 }
 0x970   : > { %v6656_v29 = vpack.c.bf16 %v6582_v22, %v6499_v32 }
 0x971   : > { %v19825_v44 = vpop.f32.mrf.mxu3 }
 0x972   : > { %v6943_v24 = vunpack.c.h.b16 %v6656_v29  ;;  %v6363_v62 = vpop.f32.mrf.mxu2  ;;  %6538 = vmatmul.bf16.gmra.mxu1 %v19733_v19  ;;  %v6885_v41 = vunpack.c.l.b16 %v6656_v29 }
 0x973   : > { %v6589_v58 = vpop.f32.mrf.mxu0 }
 0x974   : > { %v19828_v42 = vpack.c.b16 %v6943_v24, %v6942_v45 }
 0x976   : > { %23255 = vst [vmem:[#allocation15_spill] sm:$0xff] %v19828_v42 }
 0x977   : > { %v6501_v20 = vpop.f32.mrf.mxu1 }
 0x978   : > { %v6658_v40 = vpack.c.bf16 %v6584_v53, %v6501_v20 }
 0x979   : > { %v6438_v39 = vpop.f32.mrf.mxu3 }
 0x97a   : > { %v6365_v47 = vpop.f32.mrf.mxu2  ;;  %v6944_v25 = vunpack.c.h.b16 %v6658_v40  ;;  %v6886_v43 = vunpack.c.l.b16 %v6658_v40 }
 0x97b   : > { %v6592_v1 = vpop.f32.mrf.mxu0 }
 0x97c   : > { %v6913_v22 = vpack.c.b16 %v6886_v43, %v6885_v41 }
 0x97e   : > { %6480 = vmatmul.bf16.gmra.mxu3 %v19811_v51  ;;  %6631 = vmatmul.bf16.gmra.mxu0 %v19759_v4 }
 0x97f   : > { %v6504_v13 = vpop.f32.mrf.mxu1 }
 0x980   : > { %v6660_v36 = vpack.c.bf16 %v6587_v61, %v6504_v13  ;;  %v6883_v61 = vunpack.c.l.b16 %v19841_v37 }
 0x981   : > { %v6441_v7 = vpop.f32.mrf.mxu3 }
 0x982   : > { %v6945_v63 = vunpack.c.h.b16 %v6660_v36  ;;  %v19832_v14 = vpop.f32.mrf.mxu2  ;;  %6543 = vmatmul.bf16.gmra.mxu1 %v19746_v48  ;;  %v6887_v5 = vunpack.c.l.b16 %v6660_v36  ;;  %v6912_v33 = vpack.c.b16 %v6884_v59, %v6883_v61  ;;  %v19868_v36 = vpack.c.bf16 %v6438_v39, %v19809_v21 }
 0x983   : > { %v19835_v19 = vpop.f32.mrf.mxu0  ;;  %v19881_v21 = vpack.c.bf16 %v19821_v57, %v19787_v11 }
 0x984   : > { %v19837_v35 = vpack.c.b16 %v6945_v63, %v6944_v25  ;;  %v6749_v39 = vunpack.c.l.b16 %v19868_v36 }
 0x986   : > { %23256 = vst [vmem:[#allocation14_spill] sm:$0xff] %v19837_v35 }
 0x987   : > { %v6506_v49 = vpop.f32.mrf.mxu1 }
 0x988   : > { %v6662_v60 = vpack.c.bf16 %v6589_v58, %v6506_v49 }
 0x989   : > { %v6443_v9 = vpop.f32.mrf.mxu3 }
 0x98a   : > { %v6888_v28 = vunpack.c.l.b16 %v6662_v60  ;;  %v6370_v17 = vpop.f32.mrf.mxu2  ;;  %v6946_v23 = vunpack.c.h.b16 %v6662_v60  ;;  %v19856_v24 = vpack.c.bf16 %v6443_v9, %v6360_v15 }
 0x98b   : > { %v6597_v52 = vpop.f32.mrf.mxu0 }
 0x98c   : > { %v6914_v6 = vpack.c.b16 %v6888_v28, %v6887_v5  ;;  %v6747_v5 = vunpack.c.l.b16 %v19881_v21  ;;  %v6746_v28 = vunpack.c.l.b16 %v19818_v55 }
 0x98e   : > { %6636 = vmatmul.bf16.gmra.mxu0 %v19773_v3 }
 0x98f   : > { %7935 = vmatpush.bf16.msrb.mxu0 %v6914_v6  ;;  %v6509_v48 = vpop.f32.mrf.mxu1 }
 0x990   : > { %v19843_v50 = vpack.c.bf16 %v6592_v1, %v6509_v48  ;;  %v19863_v1 = vpack.c.bf16 %v6441_v7, %v19816_v46  ;;  %v6771_v48 = vpack.c.b16 %v6747_v5, %v6746_v28 }
 0x991   : > { %v6446_v18 = vpop.f32.mrf.mxu3 }
 0x992   : > { %v6947_v53 = vunpack.c.h.b16 %v19843_v50  ;;  %v6373_v38 = vpop.f32.mrf.mxu2  ;;  %6548 = vmatmul.bf16.gmra.mxu1 %v19759_v4  ;;  %v19854_v2 = vpack.c.bf16 %v6446_v18, %v6363_v62  ;;  %v6751_v62 = vunpack.c.l.b16 %v19856_v24  ;;  %v6750_v46 = vunpack.c.l.b16 %v19863_v1 }
 0x993   : > { %7936 = vmatpush.bf16.msrb.mxu0 %v6913_v22  ;;  %v19848_v32 = vpop.f32.mrf.mxu0 }
 0x994   : > { %v19850_v12 = vpack.c.b16 %v6947_v53, %v6946_v23  ;;  %v6752_v40 = vunpack.c.l.b16 %v19854_v2  ;;  %v6773_v60 = vpack.c.b16 %v6751_v62, %v6750_v46 }
 0x996   : > { %23258 = vst [vmem:[#allocation16_spill] sm:$0xff] %v19850_v12 }
 0x997   : > { %7937 = vmatpush.bf16.msrb.mxu0 %v6912_v33  ;;  %v19852_v29 = vpop.f32.mrf.mxu1 }
 0x999   : > { %v6448_v45 = vpop.f32.mrf.mxu3 }
 0x99a   : > { %v19858_v58 = vpop.f32.mrf.mxu2  ;;  %v19860_v20 = vpack.c.bf16 %v6448_v45, %v6365_v47  ;;  %v19874_v47 = vpack.c.bf16 %v19825_v44, %v19798_v8  ;;  %v19892_v44 = vpack.c.bf16 %v19807_v56, %v19771_v10  ;;  %v6744_v10 = vunpack.c.l.b16 %v19800_v16 }
 0x99b   : > { %v6602_v4 = vpop.f32.mrf.mxu0 }
 0x99c   : > { %v6753_v13 = vunpack.c.l.b16 %v19860_v20  ;;  %v6748_v8 = vunpack.c.l.b16 %v19874_v47  ;;  %v6745_v6 = vunpack.c.l.b16 %v19892_v44 }
 0x99e   : > { %v6774_v25 = vpack.c.b16 %v6753_v13, %v6752_v40  ;;  %6641 = vmatmul.bf16.gmra.mxu0 %v19791_v26  ;;  %v6772_v11 = vpack.c.b16 %v6749_v39, %v6748_v8  ;;  %v6770_v22 = vpack.c.b16 %v6745_v6, %v6744_v10  ;;  %v6805_v6 = vunpack.c.h.b16 %v19881_v21 }
 0x99f   : > { %v6514_v15 = vpop.f32.mrf.mxu1 }
 0x9a0   : > { %v19877_v7 = vpack.c.bf16 %v6597_v52, %v6514_v15  ;;  %7731 = vmatpush.bf16.msra.mxu2 %v6774_v25 }
 0x9a1   : > { %v6451_v63 = vpop.f32.mrf.mxu3 }
 0x9a2   : > { %v19884_v49 = vpop.f32.mrf.mxu2  ;;  %6553 = vmatmul.bf16.gmra.mxu1 %v19773_v3  ;;  %v6683_v52 = vpack.c.bf16 %v6451_v63, %v19832_v14 }
 0x9a3   : > { %v19887_v9 = vpop.f32.mrf.mxu0 }
 0x9a4   : > { %7732 = vmatpush.bf16.msra.mxu2 %v6773_v60  ;;  %v6754_v56 = vunpack.c.l.b16 %v6683_v52  ;;  %v6812_v13 = vunpack.c.h.b16 %v6683_v52  ;;  %v6808_v60 = vunpack.c.h.b16 %v19863_v1  ;;  %v6806_v52 = vunpack.c.h.b16 %v19874_v47 }
 0x9a5   : > { %v6803_v47 = vunpack.c.h.b16 %v19892_v44 }
 0x9a7   : > { %v19895_v57 = vpop.f32.mrf.mxu1 }
 0x9a8   : > { %7733 = vmatpush.bf16.msra.mxu2 %v6772_v11  ;;  %v6807_v11 = vunpack.c.h.b16 %v19868_v36  ;;  %v6804_v36 = vunpack.c.h.b16 %v19818_v55 }
 0x9a9   : > { %v6453_v3 = vpop.f32.mrf.mxu3 }
 0x9aa   : > { %v19900_v43 = vpop.f32.mrf.mxu2  ;;  %v6685_v41 = vpack.c.bf16 %v6453_v3, %v6370_v17  ;;  %v6829_v10 = vpack.c.b16 %v6804_v36, %v6803_v47 }
 0x9ab   : > { %v6607_v59 = vpop.f32.mrf.mxu0 }
 0x9ac   : > { %v6755_v18 = vunpack.c.l.b16 %v6685_v41  ;;  %7734 = vmatpush.bf16.msra.mxu2 %v6771_v48  ;;  %v6813_v45 = vunpack.c.h.b16 %v6685_v41  ;;  %v6830_v41 = vpack.c.b16 %v6806_v52, %v6805_v6  ;;  %v15179_v52 = vld [vmem:[%s23176_s13 + $0xdc] sm:$0xf0] }
 0x9ae   : > { %6646 = vmatmul.bf16.gmra.mxu0 %v19811_v51  ;;  %v19904_v23 = vpack.c.b16 %v6755_v18, %v6754_v56 }
 0x9af   : > { %v6519_v14 = vpop.f32.mrf.mxu1 }
 0x9b0   : > { %v19906_v53 = vpack.c.bf16 %v6602_v4, %v6519_v14  ;;  %7735 = vmatpush.bf16.msra.mxu2 %v6770_v22  ;;  %v6811_v4 = vunpack.c.h.b16 %v19860_v20 }
 0x9b1   : > { %v6456_v61 = vpop.f32.mrf.mxu3 }
 0x9b2   : > { %v19908_v33 = vpop.f32.mrf.mxu2  ;;  %v19910_v17 = vpack.c.bf16 %v6456_v61, %v6373_v38  ;;  %6558 = vmatmul.bf16.gmra.mxu1 %v19791_v26  ;;  %v13535_v26 = vld [vmem:[%s23176_s13] sm:$0xf]  ;;  %v6833_v63 = vpack.c.b16 %v6812_v13, %v6811_v4 }
 0x9b3   : > { %v19913_v16 = vpop.f32.mrf.mxu0  ;;  %v15155_v38 = vld [vmem:[%s23176_s13 + $0x1c] sm:$0xf0] }
 0x9b4   : > { %v6814_v40 = vunpack.c.h.b16 %v19910_v17  ;;  %7736 = vmatpush.bf16.msra.mxu2 %v19795_v0  ;;  %v6810_v0 = vunpack.c.h.b16 %v19854_v2  ;;  %v13536_v20 = vor.u32 %v15155_v38, %v13535_v26  ;;  %v15171_v4 = vld [vmem:[%s23176_s13 + $0x9c] sm:$0xf0] }
 0x9b6   : > { %v6834_v62 = vpack.c.b16 %v6814_v40, %v6813_v45  ;;  %v13543_v45 = vld [vmem:[%s23176_s13 + $0x8] sm:$0xf] }
 0x9b7   : > { %v19917_v25 = vpop.f32.mrf.mxu1  ;;  %v15156_v40 = vld [vmem:[%s23176_s13 + $0x24] sm:$0xf0] }
 0x9b8   : > { %7737 = vmatpush.bf16.msra.mxu2 %v19777_v54  ;;  %7867 = vmatpush.bf16.msrb.mxu1 %v6834_v62  ;;  %v6809_v54 = vunpack.c.h.b16 %v19856_v24  ;;  %v13544_v62 = vor.u32 %v15156_v40, %v13543_v45  ;;  %v13663_v40 = vld [vmem:[%s23176_s13 + $0x100] sm:$0xf] }
 0x9b9   : > { %v19927_v15 = vpop.f32.mrf.mxu3 }
 0x9ba   : > { %v19930_v46 = vpop.f32.mrf.mxu2  ;;  %v6832_v8 = vpack.c.b16 %v6810_v0, %v6809_v54 }
 0x9bb   : > { %v6612_v39 = vpop.f32.mrf.mxu0 }
 0x9bc   : > { %7738 = vmatpush.bf16.msra.mxu2 %v19763_v31  ;;  %7868 = vmatpush.bf16.msrb.mxu1 %v6833_v63  ;;  %v6831_v31 = vpack.c.b16 %v6808_v60, %v6807_v11  ;;  %v13575_v60 = vld [vmem:[%s23176_s13 + $0x48] sm:$0xf] }
 0x9bf   : > { %v6524_v5 = vpop.f32.mrf.mxu1  ;;  %7739 = vmatmul.bf16.vlgmr.msra.gmra.mxu2 %v13536_v20 }
 0x9c0   : > { %v19936_v28 = vpack.c.bf16 %v6607_v59, %v6524_v5  ;;  %7869 = vmatpush.bf16.msrb.mxu1 %v6832_v8  ;;  %v15164_v8 = vld [vmem:[%s23176_s13 + $0x64] sm:$0xf0] }
 0x9c1   : > { %v6461_v2 = vpop.f32.mrf.mxu3  ;;  %v13576_v11 = vor.u32 %v15164_v8, %v13575_v60 }
 0x9c2   : > { %v19939_v3 = vpop.f32.mrf.mxu2  ;;  %v19942_v24 = vpack.c.bf16 %v6461_v2, %v19884_v49  ;;  %6563 = vmatmul.bf16.gmra.mxu1 %v19811_v51  ;;  %v13567_v49 = vld [vmem:[%s23176_s13 + $0x40] sm:$0xf] }
 0x9c3   : > { %v19945_v1 = vpop.f32.mrf.mxu0  ;;  %v15163_v51 = vld [vmem:[%s23176_s13 + $0x5c] sm:$0xf0] }
 0x9c4   : > { %7870 = vmatpush.bf16.msrb.mxu1 %v6831_v31  ;;  %v13568_v55 = vor.u32 %v15163_v51, %v13567_v49  ;;  %v13631_v2 = vld [vmem:[%s23176_s13 + $0xc0] sm:$0xf] }
 0x9c7   : > { %v19949_v48 = vpop.f32.mrf.mxu1 }
 0x9c8   : > { %7871 = vmatpush.bf16.msrb.mxu1 %v6830_v41  ;;  %v13632_v41 = vor.u32 %v15179_v52, %v13631_v2 }
 0x9c9   : > { %v19958_v59 = vpop.f32.mrf.mxu3 }
 0x9ca   : > { %v6390_v21 = vpop.f32.mrf.mxu2 }
 0x9cb   : > { %v19960_v56 = vpop.f32.mrf.mxu0 }
 0x9cc   : > { %7872 = vmatpush.bf16.msrb.mxu1 %v6829_v10  ;;  %v13607_v10 = vld [vmem:[%s23176_s13 + $0x88] sm:$0xf] }
 0x9cf   : > { %v6529_v18 = vpop.f32.mrf.mxu1  ;;  %7744 = vmatmul.bf16.gmra.mxu2 %v13568_v55  ;;  %v15172_v55 = vld [vmem:[%s23176_s13 + $0xa4] sm:$0xf0] }
 0x9d0   : > { %v19962_v44 = vpack.c.bf16 %v6612_v39, %v6529_v18  ;;  %7873 = vmatpush.bf16.msrb.mxu1 %v19805_v34  ;;  %v13599_v34 = vld [vmem:[%s23176_s13 + $0x80] sm:$0xf]  ;;  %v13608_v45 = vor.u32 %v15172_v55, %v13607_v10 }
 0x9d1   : > { %v19965_v22 = vpop.f32.mrf.mxu3  ;;  %v13600_v0 = vor.u32 %v15171_v4, %v13599_v34 }
 0x9d2   : > { %v6393_v14 = vpop.f32.mrf.mxu2 }
 0x9d3   : > { %v19967_v61 = vpop.f32.mrf.mxu0 }
 0x9d4   : > { %7874 = vmatpush.bf16.msrb.mxu1 %v19785_v30 }
 0x9d7   : > { %v19976_v13 = vpop.f32.mrf.mxu1  ;;  %7875 = vmatmul.bf16.vlgmr.msrb.gmra.mxu1 %v13544_v62  ;;  %v15187_v62 = vld [vmem:[%s23176_s13 + $0x11c] sm:$0xf0] }
 0x9d9   : > { %v6468_v30 = vpop.f32.mrf.mxu3 }
 0x9da   : > { %v6395_v26 = vpop.f32.mrf.mxu2 }
 0x9db   : > { %v19984_v38 = vpop.f32.mrf.mxu0 }
 0x9df   : > { %v19986_v63 = vpop.f32.mrf.mxu1  ;;  %7749 = vmatmul.bf16.gmra.mxu2 %v13600_v0  ;;  %v13664_v0 = vor.u32 %v15187_v62, %v13663_v40 }
 0x9e1   : > { %v6471_v39 = vpop.f32.mrf.mxu3 }
 0x9e2   : > { %v6398_v20 = vpop.f32.mrf.mxu2 }
 0x9e3   : > { %v6624_v54 = vpop.f32.mrf.mxu0 }
 0x9e7   : > { %v19994_v5 = vpop.f32.mrf.mxu1  ;;  %7880 = vmatmul.bf16.gmra.mxu1 %v13576_v11  ;;  %v6796_v11 = vunpack.c.h.b16 %v19751_v27  ;;  %v13639_v27 = vld [vmem:[%s23176_s13 + $0xc8] sm:$0xf] }
 0x9e9   : > { %v6473_v31 = vpop.f32.mrf.mxu3  ;;  %v6825_v35 = vpack.c.b16 %v6796_v11, %v6796_v11 }
 0x9ea   : > { %v6400_v6 = vpop.f32.mrf.mxu2  ;;  %v6701_v10 = vpack.c.bf16 %v6473_v31, %v6390_v21  ;;  %v15180_v21 = vld [vmem:[%s23176_s13 + $0xe4] sm:$0xf0] }
 0x9eb   : > { %v6627_v36 = vpop.f32.mrf.mxu0 }
 0x9ec   : > { %v6763_v11 = vunpack.c.l.b16 %v6701_v10 }
 0x9ef   : > { %v6539_v47 = vpop.f32.mrf.mxu1  ;;  %7754 = vmatmul.bf16.gmra.mxu2 %v13632_v41 }
 0x9f1   : > { %v6476_v49 = vpop.f32.mrf.mxu3 }
 0x9f2   : > { %v6703_v52 = vpack.c.bf16 %v6476_v49, %v6393_v14  ;;  %v6697_v14 = vpack.c.bf16 %v6468_v30, %v19930_v46  ;;  %v13640_v49 = vor.u32 %v15180_v21, %v13639_v27  ;;  %v6695_v46 = vpack.c.bf16 %v19965_v22, %v19908_v33 }
 0x9f3   : > { %v6629_v51 = vpop.f32.mrf.mxu0 }
 0x9f4   : > { %v6822_v12 = vunpack.c.h.b16 %v6703_v52  ;;  %v6760_v21 = vunpack.c.l.b16 %v6695_v46 }
 0x9f7   : > { %v6541_v18 = vpop.f32.mrf.mxu1  ;;  %7885 = vmatmul.bf16.gmra.mxu1 %v13608_v45  ;;  %v6699_v45 = vpack.c.bf16 %v6471_v39, %v19939_v3  ;;  %v6821_v3 = vunpack.c.h.b16 %v6701_v10 }
 0x9f8   : > { %v20029_v39 = vpack.c.bf16 %v6624_v54, %v6541_v18 }
 0x9f9   : > { %v6478_v34 = vpop.f32.mrf.mxu3  ;;  %v6820_v30 = vunpack.c.h.b16 %v6699_v45 }
 0x9fa   : > { %v6705_v8 = vpack.c.bf16 %v6478_v34, %v6395_v26  ;;  %v15195_v34 = vld [vmem:[%s23176_s13 + $0x15c] sm:$0xf0] }
 0x9fb   : > { %v20014_v4 = vpop.f32.mrf.mxu0 }
 0x9fc   : > { %v6823_v55 = vunpack.c.h.b16 %v6705_v8 }
 0x9ff   : > { %v6544_v60 = vpop.f32.mrf.mxu1  ;;  %7759 = vmatmul.bf16.gmra.mxu2 %v13664_v0  ;;  %v6764_v0 = vunpack.c.l.b16 %v6703_v52  ;;  %v6819_v52 = vunpack.c.h.b16 %v6697_v14 }
 0xa00   : > { %v20020_v40 = vpack.c.bf16 %v6627_v36, %v6544_v60  ;;  %v6838_v60 = vpack.c.b16 %v6822_v12, %v6821_v3  ;;  %v6818_v12 = vunpack.c.h.b16 %v6695_v46  ;;  %v6758_v46 = vunpack.c.l.b16 %v19942_v24 }
 0xa01   : > { %v6481_v2 = vpop.f32.mrf.mxu3  ;;  %v6837_v10 = vpack.c.b16 %v6820_v30, %v6819_v52  ;;  %v6897_v30 = vunpack.c.l.b16 %v19962_v44  ;;  %v15203_v52 = vld [vmem:[%s23176_s13 + $0x19c] sm:$0xf0] }
 0xa02   : > { %v6707_v6 = vpack.c.bf16 %v6481_v2, %v6398_v20  ;;  %v6765_v20 = vunpack.c.l.b16 %v6705_v8  ;;  %v6693_v8 = vpack.c.bf16 %v19958_v59, %v19900_v43  ;;  %v20058_v43 = vpack.c.bf16 %v19960_v56, %v19986_v63 }
 0xa03   : > { %v20017_v41 = vpop.f32.mrf.mxu0 }
 0xa04   : > { %v6766_v37 = vunpack.c.l.b16 %v6707_v6  ;;  %v6824_v42 = vunpack.c.h.b16 %v6707_v6  ;;  %v6780_v33 = vpack.c.b16 %v6765_v20, %v6764_v0  ;;  %v20053_v6 = vpack.c.bf16 %v19967_v61, %v19994_v5  ;;  %v15188_v0 = vld [vmem:[%s23176_s13 + $0x124] sm:$0xf0] }
 0xa05   : > { %v6761_v61 = vunpack.c.l.b16 %v6697_v14  ;;  %v6817_v27 = vunpack.c.h.b16 %v6693_v8  ;;  %v6816_v20 = vunpack.c.h.b16 %v19942_v24  ;;  %v6759_v14 = vunpack.c.l.b16 %v6693_v8 }
 0xa06   : > { %v6781_v62 = vpack.c.b16 %v6766_v37, %v6766_v37  ;;  %v6839_v26 = vpack.c.b16 %v6824_v42, %v6823_v55  ;;  %v13695_v37 = vld [vmem:[%s23176_s13 + $0x140] sm:$0xf]  ;;  %v6762_v55 = vunpack.c.l.b16 %v6699_v45  ;;  %v20067_v45 = vpack.c.bf16 %v19945_v1, %v19976_v13 }
 0xa07   : > { %v6546_v31 = vpop.f32.mrf.mxu1  ;;  %7890 = vmatmul.bf16.gmra.mxu1 %v13640_v49  ;;  %v13696_v22 = vor.u32 %v15195_v34, %v13695_v37  ;;  %v6900_v56 = vunpack.c.l.b16 %v20053_v6  ;;  %v6778_v49 = vpack.c.b16 %v6761_v61, %v6760_v21  ;;  %v20076_v1 = vpack.c.bf16 %v19913_v16, %v19949_v48  ;;  %v15152_v37 = vld [vmem:[%s23176_s13 + $0xc] sm:$0xf]  ;;  %v13671_v48 = vld [vmem:[%s23176_s13 + $0x108] sm:$0xf]  ;;  %v13537_v61 = vld [vmem:[%s23176_s13 + $0x20] sm:$0xf0] }
 0xa08   : > { %v20031_v36 = vpack.c.bf16 %v6629_v51, %v6546_v31  ;;  %7938 = vmatpush.bf16.msrb.mxu0 %v6839_v26  ;;  %v7002_v42 = vsel %vm6999_vm1, %v6781_v62, %v6825_v35  ;;  %v20043_v51 = vpack.c.bf16 %v19984_v38, %v6539_v47  ;;  %v6903_v35 = vunpack.c.l.b16 %v20020_v40  ;;  %v13545_v34 = vld [vmem:[%s23176_s13 + $0x28] sm:$0xf0] }
 0xa09   : > { %v6483_v54 = vpop.f32.mrf.mxu3  ;;  %7800 = vmatpush.bf16.msrb.mxu3 %v7002_v42  ;;  %v6902_v38 = vunpack.c.l.b16 %v20029_v39  ;;  %v6689_v62 = vpack.c.bf16 %v19927_v15, %v19858_v58  ;;  %v6779_v26 = vpack.c.b16 %v6763_v11, %v6762_v55  ;;  %v6899_v58 = vunpack.c.l.b16 %v20058_v43 }
 0xa0a   : > { %v6904_v18 = vunpack.c.l.b16 %v20031_v36  ;;  %v6901_v59 = vunpack.c.l.b16 %v20043_v51  ;;  %v6836_v15 = vpack.c.b16 %v6818_v12, %v6817_v27  ;;  %v6898_v13 = vunpack.c.l.b16 %v20067_v45 }
 0xa0b   : > { %v20049_v2 = vpop.f32.mrf.mxu0  ;;  %v6815_v3 = vunpack.c.h.b16 %v6689_v62  ;;  %v6920_v42 = vpack.c.b16 %v6900_v56, %v6899_v58  ;;  %v6757_v54 = vunpack.c.l.b16 %v6689_v62  ;;  %v13672_v8 = vor.u32 %v15188_v0, %v13671_v48  ;;  %v15151_v62 = vld [vmem:[%s23176_s13 + $0x4] sm:$0xf] }
 0xa0c   : > { %v6922_v47 = vpack.c.b16 %v6904_v18, %v6903_v35  ;;  %7939 = vmatpush.bf16.msrb.mxu0 %v6838_v60  ;;  %v6921_v63 = vpack.c.b16 %v6902_v38, %v6901_v59  ;;  %v6777_v18 = vpack.c.b16 %v6759_v14, %v6758_v46  ;;  %v13548_v60 = vor.u32 %v15152_v37, %v13545_v34  ;;  %v13703_v37 = vld [vmem:[%s23176_s13 + $0x148] sm:$0xf] }
 0xa0d   : > { %7801 = vmatpush.bf16.msrb.mxu3 %v6780_v33  ;;  %v6835_v16 = vpack.c.b16 %v6816_v20, %v6815_v3  ;;  %v20095_v24 = vpack.c.bf16 %v19887_v9, %v19917_v25  ;;  %v6896_v11 = vunpack.c.l.b16 %v20076_v1  ;;  %v6919_v33 = vpack.c.b16 %v6898_v13, %v6897_v30  ;;  %v15196_v34 = vld [vmem:[%s23176_s13 + $0x164] sm:$0xf0] }
 0xa0e   : > { %8003 = vmatpush.bf16.msrb.mxu2 %v6922_v47  ;;  %v6666_v38 = vpack.c.bf16 %v19835_v19, %v19852_v29  ;;  %v6756_v47 = vunpack.c.l.b16 %v19910_v17  ;;  %v6895_v9 = vunpack.c.l.b16 %v19936_v28  ;;  %v6949_v25 = vunpack.c.h.b16 %v19877_v7 }
 0xa0f   : > { %v20063_v5 = vpop.f32.mrf.mxu1  ;;  %7764 = vmatmul.bf16.gmra.mxu2 %v13696_v22  ;;  %v13727_v22 = vld [vmem:[%s23176_s13 + $0x180] sm:$0xf]  ;;  %v6894_v19 = vunpack.c.l.b16 %v20095_v24  ;;  %v13540_v20 = vor.u32 %v15151_v62, %v13537_v61  ;;  %v6962_v46 = vunpack.c.h.b16 %v20031_v36  ;;  %v13704_v48 = vor.u32 %v15196_v34, %v13703_v37 }
 0xa10   : > { %7940 = vmatpush.bf16.msrb.mxu0 %v6837_v10  ;;  %v6776_v12 = vpack.c.b16 %v6757_v54, %v6756_v47  ;;  %v13728_v59 = vor.u32 %v15203_v52, %v13727_v22  ;;  %v20113_v10 = vpack.c.bf16 %v19848_v32, %v19895_v57  ;;  %v6918_v29 = vpack.c.b16 %v6896_v11, %v6895_v9  ;;  %v15211_v54 = vld [vmem:[%s23176_s13 + $0x1dc] sm:$0xf0]  ;;  %v15159_v52 = vld [vmem:[%s23176_s13 + $0x44] sm:$0xf] }
 0xa11   : > { %7802 = vmatpush.bf16.msrb.mxu3 %v6779_v26  ;;  %v6948_v17 = vunpack.c.h.b16 %v6666_v38  ;;  %v6893_v26 = vunpack.c.l.b16 %v19906_v53  ;;  %v20132_v58 = vpack.c.bf16 %v20014_v4, %v20063_v5  ;;  %v15160_v4 = vld [vmem:[%s23176_s13 + $0x4c] sm:$0xf]  ;;  %v6889_v5 = vunpack.c.l.b16 %v19843_v50  ;;  %v13759_v50 = vld [vmem:[%s23176_s13 + $0x1c0] sm:$0xf] }
 0xa12   : > { %8004 = vmatpush.bf16.msrb.mxu2 %v6921_v63  ;;  %v6892_v56 = vunpack.c.l.b16 %v20113_v10  ;;  %v23260_v36 = vld [vmem:[#allocation14_spill] sm:$0xff]  ;;  %v13760_v11 = vor.u32 %v15211_v54, %v13759_v50  ;;  %v6958_v47 = vunpack.c.h.b16 %v20053_v6  ;;  %v13609_v6 = vld [vmem:[%s23176_s13 + $0xa8] sm:$0xf0]  ;;  %v6954_v61 = vunpack.c.h.b16 %v20076_v1 }
 0xa13   : > { %v20072_v31 = vpop.f32.mrf.mxu0  ;;  %v6974_v32 = vpack.c.b16 %v6949_v25, %v6948_v17  ;;  %v6917_v21 = vpack.c.b16 %v6894_v19, %v6893_v26  ;;  %v6957_v25 = vunpack.c.h.b16 %v20058_v43  ;;  %v15168_v19 = vld [vmem:[%s23176_s13 + $0x8c] sm:$0xf]  ;;  %v15204_v43 = vld [vmem:[%s23176_s13 + $0x1a4] sm:$0xf0] }
 0xa14   : > { %7941 = vmatpush.bf16.msrb.mxu0 %v6836_v15  ;;  %v13641_v50 = vld [vmem:[%s23176_s13 + $0xe8] sm:$0xf0] }
 0xa15   : > { %7803 = vmatpush.bf16.msrb.mxu3 %v6778_v49 }
 0xa16   : > { %8005 = vmatpush.bf16.msrb.mxu2 %v6920_v42  ;;  %v23259_v42 = vld [vmem:[#allocation16_spill] sm:$0xff] }
 0xa17   : > { %v6551_v35 = vpop.f32.mrf.mxu1  ;;  %7895 = vmatmul.bf16.gmra.mxu1 %v13672_v8 }
 0xa18   : > { %7942 = vmatpush.bf16.msrb.mxu0 %v6835_v16  ;;  %v20124_v27 = vpack.c.bf16 %v20017_v41, %v6551_v35  ;;  %v6891_v41 = vunpack.c.l.b16 %v19877_v7  ;;  %v13577_v7 = vld [vmem:[%s23176_s13 + $0x68] sm:$0xf0]  ;;  %v6961_v35 = vunpack.c.h.b16 %v20020_v40  ;;  %v13569_v40 = vld [vmem:[%s23176_s13 + $0x60] sm:$0xf0] }
 0xa19   : > { %7804 = vmatpush.bf16.msrb.mxu3 %v6777_v18  ;;  %v13580_v16 = vor.u32 %v15160_v4, %v13577_v7  ;;  %v13572_v9 = vor.u32 %v15159_v52, %v13569_v40  ;;  %v15227_v52 = vld [vmem:[%s23176_s13 + $0x25c] sm:$0xf0] }
 0xa1a   : > { %8006 = vmatpush.bf16.msrb.mxu2 %v6919_v33  ;;  %v6964_v15 = vunpack.c.h.b16 %v20124_v27  ;;  %v6916_v13 = vpack.c.b16 %v6892_v56, %v6891_v41  ;;  %v6959_v33 = vunpack.c.h.b16 %v20043_v51  ;;  %v15219_v56 = vld [vmem:[%s23176_s13 + $0x21c] sm:$0xf0]  ;;  %v6951_v41 = vunpack.c.h.b16 %v19906_v53 }
 0xa1b   : > { %v20109_v55 = vpop.f32.mrf.mxu0  ;;  %7943 = vmatmul.bf16.vlgmr.msrb.gmra.mxu0 %v13548_v60  ;;  %v6960_v60 = vunpack.c.h.b16 %v20029_v39 }
 0xa1c   : > { %v6979_v51 = vpack.c.b16 %v6959_v33, %v6958_v47 }
 0xa1d   : > { %7805 = vmatpush.bf16.msrb.mxu3 %v6776_v12  ;;  %v6980_v22 = vpack.c.b16 %v6961_v35, %v6960_v60  ;;  %v6956_v12 = vunpack.c.h.b16 %v20067_v45  ;;  %v6955_v45 = vunpack.c.h.b16 %v19962_v44  ;;  %v6952_v44 = vunpack.c.h.b16 %v20095_v24 }
 0xa1e   : > { %8007 = vmatpush.bf16.msrb.mxu2 %v6918_v29  ;;  %v13735_v29 = vld [vmem:[%s23176_s13 + $0x188] sm:$0xf] }
 0xa1f   : > { %v6554_v57 = vpop.f32.mrf.mxu1  ;;  %7769 = vmatmul.bf16.gmra.mxu2 %v13728_v59  ;;  %v6978_v17 = vpack.c.b16 %v6957_v25, %v6956_v12  ;;  %v13736_v62 = vor.u32 %v15204_v43, %v13735_v29  ;;  %v6906_v25 = vunpack.c.l.b16 %v20124_v27  ;;  %v15175_v12 = vld [vmem:[%s23176_s13 + $0xc4] sm:$0xf]  ;;  %v15184_v27 = vld [vmem:[%s23176_s13 + $0x10c] sm:$0xf] }
 0xa20   : > { %v20128_v63 = vpack.c.bf16 %v20049_v2, %v6554_v57  ;;  %v6890_v2 = vunpack.c.l.b16 %v6666_v38  ;;  %v23261_v38 = vld [vmem:[#allocation15_spill] sm:$0xff]  ;;  %v13791_v57 = vld [vmem:[%s23176_s13 + $0x200] sm:$0xf] }
 0xa21   : > { %7806 = vmatpush.bf16.msrb.mxu3 %v19904_v23  ;;  %v6963_v23 = vunpack.c.h.b16 %v20132_v58  ;;  %v13792_v1 = vor.u32 %v15219_v56, %v13791_v57  ;;  %v13673_v43 = vld [vmem:[%s23176_s13 + $0x128] sm:$0xf0] }
 0xa22   : > { %v6965_v14 = vunpack.c.h.b16 %v20128_v63  ;;  %8008 = vmatpush.bf16.msrb.mxu2 %v6917_v21  ;;  %v6915_v0 = vpack.c.b16 %v6890_v2, %v6889_v5  ;;  %v6953_v21 = vunpack.c.h.b16 %v19936_v28  ;;  %v13601_v2 = vld [vmem:[%s23176_s13 + $0xa0] sm:$0xf0] }
 0xa23   : > { %v20138_v49 = vpop.f32.mrf.mxu0  ;;  %v6981_v18 = vpack.c.b16 %v6963_v23, %v6962_v46 }
 0xa24   : > { %v6982_v3 = vpack.c.b16 %v6965_v14, %v6964_v15  ;;  %7807 = vmatmul.bf16.vlgmr.msrb.gmra.mxu3 %v13540_v20  ;;  %v6977_v20 = vpack.c.b16 %v6955_v45, %v6954_v61  ;;  %v6976_v15 = vpack.c.b16 %v6953_v21, %v6952_v44  ;;  %v15167_v14 = vld [vmem:[%s23176_s13 + $0x84] sm:$0xf]  ;;  %v15220_v45 = vld [vmem:[%s23176_s13 + $0x224] sm:$0xf0]  ;;  %v13676_v61 = vor.u32 %v15184_v27, %v13673_v43 }
 0xa25   : > { %8071 = vmatpush.bf16.msra.mxu3 %v6974_v32  ;;  %v13612_v32 = vor.u32 %v15168_v19, %v13609_v6  ;;  %v13604_v23 = vor.u32 %v15167_v14, %v13601_v2  ;;  %v6905_v19 = vunpack.c.l.b16 %v20132_v58  ;;  %v13799_v58 = vld [vmem:[%s23176_s13 + $0x208] sm:$0xf]  ;;  %v15183_v21 = vld [vmem:[%s23176_s13 + $0x104] sm:$0xf]  ;;  %v13705_v14 = vld [vmem:[%s23176_s13 + $0x168] sm:$0xf0] }
 0xa26   : > { %8009 = vmatpush.bf16.msrb.mxu2 %v6916_v13  ;;  %8139 = vmatpush.bf16.msra.mxu1 %v6982_v3  ;;  %v6950_v3 = vunpack.c.h.b16 %v20113_v10  ;;  %v23262_v13 = vld [vmem:[#allocation22_spill] sm:$0xff]  ;;  %v15176_v10 = vld [vmem:[%s23176_s13 + $0xcc] sm:$0xf] }
 0xa27   : > { %v20156_v30 = vpop.f32.mrf.mxu1  ;;  %7900 = vmatmul.bf16.gmra.mxu1 %v13704_v48  ;;  %v6941_v4 = vunpack.c.h.b16 %v23262_v13  ;;  %v20288_v2 = vld [vmem:[%s23176_s13 + $0x2c0] sm:$0xff] }
 0xa28   : > { %v6975_v5 = vpack.c.b16 %v6951_v41, %v6950_v3  ;;  %v15228_v3 = vld [vmem:[%s23176_s13 + $0x264] sm:$0xf0] }
 0xa29   : > { %8072 = vmatpush.bf16.msra.mxu3 %v23259_v42  ;;  %v6702_v42 = vpack.c.bf16 %v20072_v31, %v20156_v30  ;;  %v13767_v31 = vld [vmem:[%s23176_s13 + $0x1c8] sm:$0xf] }
 0xa2a   : > { %8010 = vmatpush.bf16.msrb.mxu2 %v6915_v0  ;;  %8140 = vmatpush.bf16.msra.mxu1 %v6981_v18  ;;  %v15212_v30 = vld [vmem:[%s23176_s13 + $0x1e4] sm:$0xf0] }
 0xa2b   : > { %v6647_v8 = vpop.f32.mrf.mxu0  ;;  %7948 = vmatmul.bf16.gmra.mxu0 %v13580_v16  ;;  %v13768_v35 = vor.u32 %v15212_v30, %v13767_v31  ;;  %v6966_v18 = vunpack.c.h.b16 %v6702_v42  ;;  %v6908_v40 = vunpack.c.l.b16 %v6702_v42  ;;  %v13697_v42 = vld [vmem:[%s23176_s13 + $0x160] sm:$0xf0]  ;;  %v13551_v30 = vld [vmem:[%s23176_s13 + $0x10] sm:$0xf] }
 0xa2d   : > { %8073 = vmatpush.bf16.msra.mxu3 %v23260_v36 }
 0xa2e   : > { %8141 = vmatpush.bf16.msra.mxu1 %v6980_v22  ;;  %v13823_v22 = vld [vmem:[%s23176_s13 + $0x240] sm:$0xf] }
 0xa2f   : > { %v6559_v39 = vpop.f32.mrf.mxu1  ;;  %7774 = vmatmul.bf16.gmra.mxu2 %v13760_v11  ;;  %v13644_v11 = vor.u32 %v15176_v10, %v13641_v50  ;;  %v15200_v10 = vld [vmem:[%s23176_s13 + $0x18c] sm:$0xf] }
 0xa30   : > { %v6704_v53 = vpack.c.bf16 %v20109_v55, %v6559_v39  ;;  %v6907_v39 = vunpack.c.l.b16 %v20128_v63  ;;  %v6923_v63 = vpack.c.b16 %v6906_v25, %v6905_v19 }
 0xa31   : > { %8074 = vmatpush.bf16.msra.mxu3 %v23261_v38 }
 0xa32   : > { %8142 = vmatpush.bf16.msra.mxu1 %v6979_v51  ;;  %v6967_v48 = vunpack.c.h.b16 %v6704_v53  ;;  %v6909_v60 = vunpack.c.l.b16 %v6704_v53  ;;  %v6924_v51 = vpack.c.b16 %v6908_v40, %v6907_v39  ;;  %v7506_v53 = vunpack.c.l.b16 %v20288_v2  ;;  %v20352_v40 = vld [vmem:[%s23176_s13 + $0x2c8] sm:$0xff] }
 0xa33   : > { %v6649_v59 = vpop.f32.mrf.mxu0 }
 0xa34   : > { %7812 = vmatmul.bf16.gmra.mxu3 %v13572_v9  ;;  %v6983_v33 = vpack.c.b16 %v6967_v48, %v6966_v18  ;;  %v13824_v9 = vor.u32 %v15227_v52, %v13823_v22  ;;  %v13633_v59 = vld [vmem:[%s23176_s13 + $0xe0] sm:$0xf0]  ;;  %v13863_v48 = vld [vmem:[%s23176_s13 + $0x288] sm:$0xf]  ;;  %v15208_v22 = vld [vmem:[%s23176_s13 + $0x1cc] sm:$0xf] }
 0xa35   : > { %v13636_v6 = vor.u32 %v15175_v12, %v13633_v59  ;;  %v13769_v52 = vld [vmem:[%s23176_s13 + $0x1e8] sm:$0xf0]  ;;  %v15165_v12 = vld [vmem:[%s23176_s13 + $0x6c] sm:$0xf0] }
 0xa36   : > { %8143 = vmatpush.bf16.msra.mxu1 %v6978_v17  ;;  %v13800_v17 = vor.u32 %v15220_v45, %v13799_v58  ;;  %v15216_v45 = vld [vmem:[%s23176_s13 + $0x20c] sm:$0xf] }
 0xa37   : > { %v6561_v26 = vpop.f32.mrf.mxu1  ;;  %7905 = vmatmul.bf16.gmra.mxu1 %v13736_v62 }
 0xa38   : > { %v6706_v28 = vpack.c.bf16 %v20138_v49, %v6561_v26  ;;  %v6970_v49 = vpack.c.b16 %v6941_v4, %v6941_v4  ;;  %v13855_v26 = vld [vmem:[%s23176_s13 + $0x280] sm:$0xf] }
 0xa3a   : > { %8144 = vmatpush.bf16.msra.mxu1 %v6977_v20  ;;  %v6968_v37 = vunpack.c.h.b16 %v6706_v28  ;;  %v6910_v54 = vunpack.c.l.b16 %v6706_v28  ;;  %v13665_v20 = vld [vmem:[%s23176_s13 + $0x120] sm:$0xf0]  ;;  %v13831_v28 = vld [vmem:[%s23176_s13 + $0x248] sm:$0xf] }
 0xa3b   : > { %7953 = vmatmul.bf16.gmra.mxu0 %v13612_v32  ;;  %v15235_v32 = vld [vmem:[%s23176_s13 + $0x29c] sm:$0xf0] }
 0xa3c   : > { %v6925_v38 = vpack.c.b16 %v6910_v54, %v6909_v60  ;;  %v13856_v56 = vor.u32 %v15235_v32, %v13855_v26  ;;  %v15157_v54 = vld [vmem:[%s23176_s13 + $0x2c] sm:$0xf0]  ;;  %v13729_v60 = vld [vmem:[%s23176_s13 + $0x1a0] sm:$0xf0]  ;;  %v13559_v26 = vld [vmem:[%s23176_s13 + $0x18] sm:$0xf] }
 0xa3d   : > { %v13552_v18 = vor.u32 %v15157_v54, %v13551_v30  ;;  %v15158_v32 = vld [vmem:[%s23176_s13 + $0x34] sm:$0xf0] }
 0xa3e   : > { %8145 = vmatpush.bf16.msra.mxu1 %v6976_v15  ;;  %v15192_v15 = vld [vmem:[%s23176_s13 + $0x14c] sm:$0xf] }
 0xa3f   : > { %v6564_v24 = vpop.f32.mrf.mxu1  ;;  %7779 = vmatmul.bf16.gmra.mxu2 %v13792_v1  ;;  %v13668_v1 = vor.u32 %v15183_v21, %v13665_v20  ;;  %v13708_v4 = vor.u32 %v15192_v15, %v13705_v14  ;;  %v13560_v21 = vor.u32 %v15158_v32, %v13559_v26  ;;  %v15173_v15 = vld [vmem:[%s23176_s13 + $0xac] sm:$0xf0]  ;;  %v15232_v26 = vld [vmem:[%s23176_s13 + $0x28c] sm:$0xf] }
 0xa40   : > { %v6708_v7 = vpack.c.bf16 %v6647_v8, %v6564_v24  ;;  %v13832_v24 = vor.u32 %v15228_v3, %v13831_v28  ;;  %v15215_v3 = vld [vmem:[%s23176_s13 + $0x204] sm:$0xf] }
 0xa42   : > { %v6911_v34 = vunpack.c.l.b16 %v6708_v7  ;;  %v6969_v46 = vunpack.c.h.b16 %v6708_v7  ;;  %v20213_v16 = vpop.f32.mrf.mxu2  ;;  %8146 = vmatpush.bf16.msra.mxu1 %v6975_v5  ;;  %v15191_v5 = vld [vmem:[%s23176_s13 + $0x144] sm:$0xf] }
 0xa44   : > { %v6926_v0 = vpack.c.b16 %v6911_v34, %v6911_v34  ;;  %v6984_v55 = vpack.c.b16 %v6969_v46, %v6968_v37  ;;  %7817 = vmatmul.bf16.gmra.mxu3 %v13604_v23  ;;  %v7602_v23 = vpack.c.b16 %v7506_v53, %v7506_v53  ;;  %v13700_v34 = vor.u32 %v15191_v5, %v13697_v42  ;;  %v15224_v42 = vld [vmem:[%s23176_s13 + $0x24c] sm:$0xf] }
 0xa46   : > { %8213 = vmatpush.bf16.msra.mxu0 %v6984_v55  ;;  %v7006_v36 = vsel %vm6999_vm1, %v6926_v0, %v6970_v49  ;;  %v13737_v49 = vld [vmem:[%s23176_s13 + $0x1a8] sm:$0xf0]  ;;  %v15236_v0 = vld [vmem:[%s23176_s13 + $0x2a4] sm:$0xf0] }
 0xa47   : > { %v6566_v8 = vpop.f32.mrf.mxu1  ;;  %8075 = vmatpush.bf16.msra.mxu3 %v7006_v36  ;;  %7910 = vmatmul.bf16.gmra.mxu1 %v13768_v35  ;;  %v13864_v55 = vor.u32 %v15236_v0, %v13863_v48  ;;  %v13740_v31 = vor.u32 %v15200_v10, %v13737_v49  ;;  %v15199_v36 = vld [vmem:[%s23176_s13 + $0x184] sm:$0xf]  ;;  %v7126_v10 = vpop.permute.xlu1 %7125  ;;  %v13591_v0 = vld [vmem:[%s23176_s13 + $0x58] sm:$0xf] }
 0xa48   : > { %v7741_v49 = vadd.f32 %v20213_v16, %v7126_v10  ;;  %v15181_v16 = vld [vmem:[%s23176_s13 + $0xec] sm:$0xf0] }
 0xa4a   : > { %v20234_v47 = vpop.f32.mrf.mxu2  ;;  %8214 = vmatpush.bf16.msra.mxu0 %v6983_v33 }
 0xa4b   : > { %7958 = vmatmul.bf16.gmra.mxu0 %v13644_v11  ;;  %8076 = vmatpush.bf16.msra.mxu3 %v6925_v38  ;;  %v13732_v11 = vor.u32 %v15199_v36, %v13729_v60  ;;  %v7508_v38 = vunpack.c.l.b16 %v20352_v40  ;;  %v13647_v60 = vld [vmem:[%s23176_s13 + $0xd0] sm:$0xf] }
 0xa4d   : > { %v7604_v25 = vpack.c.b16 %v7508_v38, %v7508_v38 }
 0xa4f   : > { %7784 = vmatmul.bf16.gmra.mxu2 %v13824_v9  ;;  %8077 = vmatpush.bf16.msra.mxu3 %v6924_v51  ;;  %v13772_v9 = vor.u32 %v15208_v22, %v13769_v52  ;;  %v13583_v51 = vld [vmem:[%s23176_s13 + $0x50] sm:$0xf]  ;;  %v13648_v52 = vor.u32 %v15181_v16, %v13647_v60 }
 0xa50   : > { %v13584_v19 = vor.u32 %v15165_v12, %v13583_v51  ;;  %v13825_v51 = vld [vmem:[%s23176_s13 + $0x260] sm:$0xf0] }
 0xa52   : > { %v20245_v29 = vpop.f32.mrf.mxu2 }
 0xa53   : > { %8078 = vmatpush.bf16.msra.mxu3 %v6923_v63  ;;  %v13761_v63 = vld [vmem:[%s23176_s13 + $0x1e0] sm:$0xf0] }
 0xa54   : > { %7822 = vmatmul.bf16.gmra.mxu3 %v13636_v6  ;;  %v20259_v62 = vpop.f32.mrf.mxu1  ;;  %v15207_v6 = vld [vmem:[%s23176_s13 + $0x1c4] sm:$0xf] }
 0xa55   : > { %v13764_v43 = vor.u32 %v15207_v6, %v13761_v63 }
 0xa57   : > { %7915 = vmatmul.bf16.gmra.mxu1 %v13800_v17  ;;  %v13801_v17 = vld [vmem:[%s23176_s13 + $0x228] sm:$0xf0] }
 0xa5a   : > { %v20267_v57 = vpop.f32.mrf.mxu2 }
 0xa5b   : > { %7963 = vmatmul.bf16.gmra.mxu0 %v13676_v61 }
 0xa5c   : > { %v20275_v44 = vpop.f32.mrf.mxu1 }
 0xa5f   : > { %7789 = vmatmul.bf16.gmra.mxu2 %v13856_v56  ;;  %v13804_v56 = vor.u32 %v15216_v45, %v13801_v17 }
 0xa62   : > { %v20277_v41 = vpop.f32.mrf.mxu2 }
 0xa64   : > { %7827 = vmatmul.bf16.gmra.mxu3 %v13668_v1  ;;  %v20296_v13 = vpop.f32.mrf.mxu1  ;;  %v13615_v1 = vld [vmem:[%s23176_s13 + $0x90] sm:$0xf] }
 0xa65   : > { %v13616_v28 = vor.u32 %v15173_v15, %v13615_v1  ;;  %v15174_v1 = vld [vmem:[%s23176_s13 + $0xb4] sm:$0xf0] }
 0xa67   : > { %7920 = vmatmul.bf16.gmra.mxu1 %v13832_v24  ;;  %v13793_v24 = vld [vmem:[%s23176_s13 + $0x220] sm:$0xf0] }
 0xa6a   : > { %v20299_v7 = vpop.f32.mrf.mxu2 }
 0xa6b   : > { %7968 = vmatmul.bf16.gmra.mxu0 %v13708_v4 }
 0xa6c   : > { %v20307_v37 = vpop.f32.mrf.mxu1 }
 0xa6f   : > { %7794 = vmatmul.bf16.gmra.mxu2 %v7602_v23  ;;  %v13796_v23 = vor.u32 %v15215_v3, %v13793_v24 }
 0xa72   : > { %v20309_v46 = vpop.f32.mrf.mxu2 }
 0xa74   : > { %7832 = vmatmul.bf16.gmra.mxu3 %v13700_v34  ;;  %v20323_v50 = vpop.f32.mrf.mxu1  ;;  %v13833_v34 = vld [vmem:[%s23176_s13 + $0x268] sm:$0xf0] }
 0xa75   : > { %v13836_v30 = vor.u32 %v15224_v42, %v13833_v34 }
 0xa77   : > { %7925 = vmatmul.bf16.gmra.mxu1 %v13864_v55  ;;  %v15166_v55 = vld [vmem:[%s23176_s13 + $0x74] sm:$0xf0] }
 0xa78   : > { %v13592_v54 = vor.u32 %v15166_v55, %v13591_v0  ;;  %v7141_v0 = vpop.permute.xlu1 %7140  ;;  %v15231_v55 = vld [vmem:[%s23176_s13 + $0x284] sm:$0xf] }
 0xa7a   : > { %v20331_v35 = vpop.f32.mrf.mxu2 }
 0xa7b   : > { %7973 = vmatmul.bf16.gmra.mxu0 %v13740_v31 }
 0xa7c   : > { %v20339_v8 = vpop.f32.mrf.mxu1 }
 0xa7f   : > { %8011 = vmatmul.bf16.vlgmr.msrb.gmra.mxu2 %v13552_v18 }
 0xa82   : > { %v20341_v33 = vpop.f32.mrf.mxu2 }
 0xa84   : > { %7837 = vmatmul.bf16.gmra.mxu3 %v13732_v11  ;;  %v20355_v39 = vpop.f32.mrf.mxu1 }
 0xa87   : > { %7930 = vmatmul.bf16.gmra.mxu1 %v7604_v25  ;;  %v15223_v25 = vld [vmem:[%s23176_s13 + $0x244] sm:$0xf] }
 0xa8a   : > { %v20363_v59 = vpop.f32.mrf.mxu2 }
 0xa8b   : > { %7978 = vmatmul.bf16.gmra.mxu0 %v13772_v9  ;;  %v7131_v9 = vpop.permute.xlu2 %7130 }
 0xa8c   : > { %v20371_v27 = vpop.f32.mrf.mxu1  ;;  %v7743_v12 = vadd.f32 %v20234_v47, %v7131_v9  ;;  %v13865_v47 = vld [vmem:[%s23176_s13 + $0x2a8] sm:$0xf0] }
 0xa8f   : > { %8016 = vmatmul.bf16.gmra.mxu2 %v13584_v19 }
 0xa92   : > { %v20373_v58 = vpop.f32.mrf.mxu2 }
 0xa94   : > { %7842 = vmatmul.bf16.gmra.mxu3 %v13764_v43  ;;  %v20381_v61 = vpop.f32.mrf.mxu1  ;;  %v13828_v43 = vor.u32 %v15223_v25, %v13825_v51  ;;  %v7146_v25 = vpop.permute.xlu2 %7145 }
 0xa95   : > { %v7751_v51 = vadd.f32 %v20277_v41, %v7146_v25  ;;  %v15197_v41 = vld [vmem:[%s23176_s13 + $0x16c] sm:$0xf0] }
 0xa97   : > { %8147 = vmatmul.bf16.vlgmr.msra.gmra.mxu1 %v13560_v21 }
 0xa98   : > { %v7944_v20 = vpop.f32.mrf.mxu0 }
 0xa9a   : > { %v20395_v14 = vpop.f32.mrf.mxu2 }
 0xa9b   : > { %7983 = vmatmul.bf16.gmra.mxu0 %v13804_v56  ;;  %v7136_v56 = vpop.permute.xlu0 %7135 }
 0xa9c   : > { %v20403_v4 = vpop.f32.mrf.mxu1  ;;  %v7746_v21 = vadd.f32 %v20245_v29, %v7136_v56  ;;  %v15189_v29 = vld [vmem:[%s23176_s13 + $0x12c] sm:$0xf0] }
 0xa9f   : > { %8021 = vmatmul.bf16.gmra.mxu2 %v13616_v28  ;;  %v13868_v28 = vor.u32 %v15232_v26, %v13865_v47 }
 0xaa0   : > { %v7946_v53 = vpop.f32.mrf.mxu0 }
 0xaa2   : > { %v20405_v5 = vpop.f32.mrf.mxu2 }
 0xaa4   : > { %7847 = vmatmul.bf16.gmra.mxu3 %v13796_v23  ;;  %v20414_v48 = vpop.f32.mrf.mxu1 }
 0xaa7   : > { %v7808_v31 = vpop.f32.mrf.mxu3  ;;  %8152 = vmatmul.bf16.gmra.mxu1 %v13592_v54 }
 0xaa8   : > { %v7809_v18 = vadd.f32 %v7808_v31, %v7741_v49  ;;  %v7949_v36 = vpop.f32.mrf.mxu0  ;;  %v13857_v31 = vld [vmem:[%s23176_s13 + $0x2a0] sm:$0xf0] }
 0xaa9   : > { %v13860_v16 = vor.u32 %v15231_v55, %v13857_v31  ;;  %v15190_v31 = vld [vmem:[%s23176_s13 + $0x134] sm:$0xf0] }
 0xaaa   : > { %v7877_v11 = vadd.f32 %v20259_v62, %v7809_v18  ;;  %v20429_v22 = vpop.f32.mrf.mxu2 }
 0xaab   : > { %7988 = vmatmul.bf16.gmra.mxu0 %v13836_v30  ;;  %v7748_v30 = vadd.f32 %v20267_v57, %v7141_v0 }
 0xaac   : > { %v20431_v38 = vadd.f32 %v7944_v20, %v7877_v11  ;;  %v20440_v19 = vpop.f32.mrf.mxu1 }
 0xaaf   : > { %v7810_v62 = vpop.f32.mrf.mxu3  ;;  %8026 = vmatmul.bf16.gmra.mxu2 %v13648_v52  ;;  %v7509_v52 = vunpack.c.h.b16 %v20352_v40 }
 0xab0   : > { %v7811_v6 = vadd.f32 %v7810_v62, %v7743_v12  ;;  %v7951_v63 = vpop.f32.mrf.mxu0  ;;  %v13655_v12 = vld [vmem:[%s23176_s13 + $0xd8] sm:$0xf] }
 0xab2   : > { %v7879_v45 = vadd.f32 %v20275_v44, %v7811_v6  ;;  %v20443_v17 = vpop.f32.mrf.mxu2  ;;  %v13623_v44 = vld [vmem:[%s23176_s13 + $0x98] sm:$0xf]  ;;  %v7605_v6 = vpack.c.b16 %v7509_v52, %v7509_v52 }
 0xab3   : > { %v13624_v3 = vor.u32 %v15174_v1, %v13623_v44  ;;  %v7151_v1 = vpop.permute.xlu0 %7150 }
 0xab4   : > { %7852 = vmatmul.bf16.gmra.mxu3 %v13828_v43  ;;  %v20451_v32 = vadd.f32 %v7946_v53, %v7879_v45  ;;  %v20454_v20 = vpop.f32.mrf.mxu1  ;;  %v13679_v53 = vld [vmem:[%s23176_s13 + $0x110] sm:$0xf] }
 0xab5   : > { %v13680_v10 = vor.u32 %v15189_v29, %v13679_v53 }
 0xab7   : > { %v7813_v15 = vpop.f32.mrf.mxu3  ;;  %8157 = vmatmul.bf16.gmra.mxu1 %v13624_v3 }
 0xab8   : > { %v7814_v24 = vadd.f32 %v7813_v15, %v7746_v21  ;;  %v7954_v23 = vpop.f32.mrf.mxu0  ;;  %v7507_v21 = vunpack.c.h.b16 %v20288_v2  ;;  %v7753_v15 = vadd.f32 %v20299_v7, %v7151_v1  ;;  %v15154_v2 = vld [vmem:[%s23176_s13 + $0x1c] sm:$0xf] }
 0xab9   : > { %v13561_v7 = vld [vmem:[%s23176_s13 + $0x38] sm:$0xf0] }
 0xaba   : > { %v7882_v42 = vadd.f32 %v20296_v13, %v7814_v24  ;;  %v20469_v34 = vpop.f32.mrf.mxu2  ;;  %v7603_v29 = vpack.c.b16 %v7507_v21, %v7507_v21  ;;  %v15162_v21 = vld [vmem:[%s23176_s13 + $0x5c] sm:$0xf] }
 0xabb   : > { %7993 = vmatmul.bf16.gmra.mxu0 %v13868_v28 }
 0xabc   : > { %v20471_v49 = vadd.f32 %v7949_v36, %v7882_v42  ;;  %v20480_v54 = vpop.f32.mrf.mxu1 }
 0xabf   : > { %v7815_v13 = vpop.f32.mrf.mxu3  ;;  %8031 = vmatmul.bf16.gmra.mxu2 %v13680_v10  ;;  %v7156_v10 = vpop.permute.xlu1 %7155 }
 0xac0   : > { %v7816_v18 = vadd.f32 %v7815_v13, %v7748_v30  ;;  %v7956_v60 = vpop.f32.mrf.mxu0  ;;  %v7756_v0 = vadd.f32 %v20309_v46, %v7156_v10  ;;  %v13564_v13 = vor.u32 %v15154_v2, %v13561_v7  ;;  %v13743_v46 = vld [vmem:[%s23176_s13 + $0x190] sm:$0xf] }
 0xac2   : > { %v7884_v36 = vadd.f32 %v20307_v37, %v7816_v18  ;;  %v20483_v11 = vpop.f32.mrf.mxu2  ;;  %v15182_v37 = vld [vmem:[%s23176_s13 + $0xf4] sm:$0xf0] }
 0xac3   : > { %v13656_v43 = vor.u32 %v15182_v37, %v13655_v12  ;;  %v7161_v37 = vpop.permute.xlu2 %7160 }
 0xac4   : > { %7857 = vmatmul.bf16.gmra.mxu3 %v13860_v16  ;;  %v20486_v9 = vadd.f32 %v7951_v63, %v7884_v36  ;;  %v20489_v57 = vpop.f32.mrf.mxu1  ;;  %v13711_v63 = vld [vmem:[%s23176_s13 + $0x150] sm:$0xf] }
 0xac5   : > { %v13712_v56 = vor.u32 %v15197_v41, %v13711_v63 }
 0xac7   : > { %v7818_v62 = vpop.f32.mrf.mxu3  ;;  %8162 = vmatmul.bf16.gmra.mxu1 %v13656_v43  ;;  %v7758_v43 = vadd.f32 %v20331_v35, %v7161_v37  ;;  %v13593_v35 = vld [vmem:[%s23176_s13 + $0x78] sm:$0xf0] }
 0xac8   : > { %v7819_v40 = vadd.f32 %v7818_v62, %v7751_v51  ;;  %v7959_v45 = vpop.f32.mrf.mxu0  ;;  %v15153_v62 = vld [vmem:[%s23176_s13 + $0x14] sm:$0xf]  ;;  %v13596_v2 = vor.u32 %v15162_v21, %v13593_v35  ;;  %v15206_v21 = vld [vmem:[%s23176_s13 + $0x1b4] sm:$0xf0] }
 0xaca   : > { %v7887_v26 = vadd.f32 %v20323_v50, %v7819_v40  ;;  %v20504_v47 = vpop.f32.mrf.mxu2 }
 0xacb   : > { %7998 = vmatmul.bf16.gmra.mxu0 %v7605_v6  ;;  %v13553_v6 = vld [vmem:[%s23176_s13 + $0x30] sm:$0xf0] }
 0xacc   : > { %v20507_v44 = vadd.f32 %v7954_v23, %v7887_v26  ;;  %v20510_v28 = vpop.f32.mrf.mxu1  ;;  %v13556_v26 = vor.u32 %v15153_v62, %v13553_v6 }
 0xacf   : > { %v7820_v3 = vpop.f32.mrf.mxu3  ;;  %8036 = vmatmul.bf16.gmra.mxu2 %v13712_v56 }
 0xad0   : > { %v7821_v24 = vadd.f32 %v7820_v3, %v7753_v15  ;;  %v7961_v53 = vpop.f32.mrf.mxu0  ;;  %v7166_v15 = vpop.permute.xlu0 %7165 }
 0xad1   : > { %v7761_v3 = vadd.f32 %v20341_v33, %v7166_v15  ;;  %v15213_v33 = vld [vmem:[%s23176_s13 + $0x1ec] sm:$0xf0] }
 0xad2   : > { %v7889_v50 = vadd.f32 %v20339_v8, %v7821_v24  ;;  %v20513_v42 = vpop.f32.mrf.mxu2  ;;  %v13687_v8 = vld [vmem:[%s23176_s13 + $0x118] sm:$0xf] }
 0xad3   : > { %v13688_v18 = vor.u32 %v15190_v31, %v13687_v8 }
 0xad4   : > { %7862 = vmatmul.bf16.gmra.mxu3 %v7603_v29  ;;  %v20521_v23 = vadd.f32 %v7956_v60, %v7889_v50  ;;  %v20524_v55 = vpop.f32.mrf.mxu1  ;;  %v15205_v60 = vld [vmem:[%s23176_s13 + $0x1ac] sm:$0xf0]  ;;  %v15198_v29 = vld [vmem:[%s23176_s13 + $0x174] sm:$0xf0] }
 0xad5   : > { %v13744_v51 = vor.u32 %v15205_v60, %v13743_v46  ;;  %v13585_v46 = vld [vmem:[%s23176_s13 + $0x70] sm:$0xf0] }
 0xad7   : > { %v7823_v30 = vpop.f32.mrf.mxu3  ;;  %8167 = vmatmul.bf16.gmra.mxu1 %v13688_v18  ;;  %v7171_v18 = vpop.permute.xlu1 %7170 }
 0xad8   : > { %v7824_v16 = vadd.f32 %v7823_v30, %v7756_v0  ;;  %v7964_v36 = vpop.f32.mrf.mxu0  ;;  %v7763_v60 = vadd.f32 %v20363_v59, %v7171_v18  ;;  %v13625_v59 = vld [vmem:[%s23176_s13 + $0xb8] sm:$0xf0] }
 0xada   : > { %v7892_v52 = vadd.f32 %v20355_v39, %v7824_v16  ;;  %v20539_v25 = vpop.f32.mrf.mxu2  ;;  %v15161_v16 = vld [vmem:[%s23176_s13 + $0x54] sm:$0xf] }
 0xadb   : > { %13885 = vmatmul.msk.bf16.vlgmr.msra.gmra.mxu0 %vm7694_vm2, %v13564_v13  ;;  %v13588_v62 = vor.u32 %v15161_v16, %v13585_v46 }
 0xadc   : > { %v20542_v12 = vadd.f32 %v7959_v45, %v7892_v52  ;;  %v20551_v40 = vpop.f32.mrf.mxu1 }
 0xadf   : > { %v7825_v39 = vpop.f32.mrf.mxu3  ;;  %8041 = vmatmul.bf16.gmra.mxu2 %v13744_v51 }
 0xae0   : > { %v7826_v63 = vadd.f32 %v7825_v39, %v7758_v43  ;;  %v7966_v41 = vpop.f32.mrf.mxu0  ;;  %v15170_v43 = vld [vmem:[%s23176_s13 + $0x9c] sm:$0xf] }
 0xae1   : > { %v13628_v15 = vor.u32 %v15170_v43, %v13625_v59  ;;  %v7186_v43 = vpop.permute.xlu1 %7185 }
 0xae2   : > { %v7894_v45 = vadd.f32 %v20371_v27, %v7826_v63  ;;  %v20554_v56 = vpop.f32.mrf.mxu2  ;;  %v13719_v27 = vld [vmem:[%s23176_s13 + $0x158] sm:$0xf]  ;;  %v7176_v63 = vpop.permute.xlu2 %7175  ;;  %v7771_v59 = vadd.f32 %v20405_v5, %v7186_v43  ;;  %v15229_v5 = vld [vmem:[%s23176_s13 + $0x26c] sm:$0xf0] }
 0xae3   : > { %v13720_v7 = vor.u32 %v15198_v29, %v13719_v27 }
 0xae4   : > { %8079 = vmatmul.bf16.vlgmr.msra.gmra.mxu3 %v13556_v26  ;;  %v20562_v1 = vadd.f32 %v7961_v53, %v7894_v45  ;;  %v20565_v24 = vpop.f32.mrf.mxu1  ;;  %v13775_v53 = vld [vmem:[%s23176_s13 + $0x1d0] sm:$0xf]  ;;  %v7766_v26 = vadd.f32 %v20373_v58, %v7176_v63 }
 0xae5   : > { %v13776_v30 = vor.u32 %v15213_v33, %v13775_v53  ;;  %v15221_v58 = vld [vmem:[%s23176_s13 + $0x22c] sm:$0xf0]  ;;  %v7181_v53 = vpop.permute.xlu0 %7180  ;;  %v15169_v33 = vld [vmem:[%s23176_s13 + $0x94] sm:$0xf] }
 0xae7   : > { %v7828_v50 = vpop.f32.mrf.mxu3  ;;  %8172 = vmatmul.bf16.gmra.mxu1 %v13720_v7 }
 0xae8   : > { %v7829_v10 = vadd.f32 %v7828_v50, %v7761_v3  ;;  %v7969_v0 = vpop.f32.mrf.mxu0 }
 0xaea   : > { %v7897_v8 = vadd.f32 %v20381_v61, %v7829_v10  ;;  %v20580_v31 = vpop.f32.mrf.mxu2 }
 0xaeb   : > { %13886 = vmatmul.msk.bf16.gmra.mxu0 %vm7694_vm2, %v13596_v2 }
 0xaec   : > { %v20583_v13 = vadd.f32 %v7964_v36, %v7897_v8  ;;  %v20592_v52 = vpop.f32.mrf.mxu1  ;;  %v13617_v8 = vld [vmem:[%s23176_s13 + $0xb0] sm:$0xf0] }
 0xaef   : > { %v7830_v61 = vpop.f32.mrf.mxu3  ;;  %8046 = vmatmul.bf16.gmra.mxu2 %v13776_v30  ;;  %v7768_v30 = vadd.f32 %v20395_v14, %v7181_v53  ;;  %v13657_v14 = vld [vmem:[%s23176_s13 + $0xf8] sm:$0xf0] }
 0xaf0   : > { %v7831_v51 = vadd.f32 %v7830_v61, %v7763_v60  ;;  %v7971_v37 = vpop.f32.mrf.mxu0  ;;  %v13620_v60 = vor.u32 %v15169_v33, %v13617_v8 }
 0xaf2   : > { %v7899_v36 = vadd.f32 %v20403_v4, %v7831_v51  ;;  %v20595_v6 = vpop.f32.mrf.mxu2  ;;  %v13751_v4 = vld [vmem:[%s23176_s13 + $0x198] sm:$0xf] }
 0xaf3   : > { %v13752_v3 = vor.u32 %v15206_v21, %v13751_v4 }
 0xaf4   : > { %8084 = vmatmul.bf16.gmra.mxu3 %v13588_v62  ;;  %v20603_v39 = vadd.f32 %v7966_v41, %v7899_v36  ;;  %v20606_v45 = vpop.f32.mrf.mxu1  ;;  %v13807_v41 = vld [vmem:[%s23176_s13 + $0x210] sm:$0xf]  ;;  %v15178_v62 = vld [vmem:[%s23176_s13 + $0xdc] sm:$0xf] }
 0xaf5   : > { %v13808_v7 = vor.u32 %v15221_v58, %v13807_v41  ;;  %v13660_v4 = vor.u32 %v15178_v62, %v13657_v14  ;;  %v7196_v62 = vpop.permute.xlu0 %7195 }
 0xaf6   : > { %v7776_v14 = vadd.f32 %v20443_v17, %v7196_v62  ;;  %v15237_v17 = vld [vmem:[%s23176_s13 + $0x2ac] sm:$0xf0]  ;;  %v13847_v62 = vld [vmem:[%s23176_s13 + $0x258] sm:$0xf] }
 0xaf7   : > { %v7833_v35 = vpop.f32.mrf.mxu3  ;;  %8177 = vmatmul.bf16.gmra.mxu1 %v13752_v3 }
 0xaf8   : > { %v7834_v27 = vadd.f32 %v7833_v35, %v7766_v26  ;;  %v7974_v29 = vpop.f32.mrf.mxu0 }
 0xafa   : > { %v7902_v50 = vadd.f32 %v20414_v48, %v7834_v27  ;;  %v7797_v2 = vpop.f32.mrf.mxu2 }
 0xafb   : > { %13887 = vmatmul.msk.bf16.gmra.mxu0 %vm7694_vm2, %v13628_v15  ;;  %v15177_v2 = vld [vmem:[%s23176_s13 + $0xd4] sm:$0xf] }
 0xafc   : > { %v20622_v10 = vadd.f32 %v7969_v0, %v7902_v50  ;;  %v20631_v18 = vpop.f32.mrf.mxu1  ;;  %v7191_v50 = vpop.permute.xlu2 %7190 }
 0xafd   : > { %v7773_v53 = vadd.f32 %v20429_v22, %v7191_v50  ;;  %v13689_v22 = vld [vmem:[%s23176_s13 + $0x138] sm:$0xf0]  ;;  %v13681_v50 = vld [vmem:[%s23176_s13 + $0x130] sm:$0xf0] }
 0xaff   : > { %v7835_v48 = vpop.f32.mrf.mxu3  ;;  %8051 = vmatmul.bf16.gmra.mxu2 %v13808_v7  ;;  %v13649_v7 = vld [vmem:[%s23176_s13 + $0xf0] sm:$0xf0] }
 0xb00   : > { %v7836_v16 = vadd.f32 %v7835_v48, %v7768_v30  ;;  %v7976_v46 = vpop.f32.mrf.mxu0  ;;  %v13652_v48 = vor.u32 %v15177_v2, %v13649_v7 }
 0xb02   : > { %v7904_v0 = vadd.f32 %v20440_v19, %v7836_v16  ;;  %v8012_v61 = vpop.f32.mrf.mxu2  ;;  %v15214_v19 = vld [vmem:[%s23176_s13 + $0x1f4] sm:$0xf0] }
 0xb03   : > { %v20635_v51 = vadd.f32 %v8012_v61, %v20431_v38  ;;  %v13783_v38 = vld [vmem:[%s23176_s13 + $0x1d8] sm:$0xf] }
 0xb04   : > { %8089 = vmatmul.bf16.gmra.mxu3 %v13620_v60  ;;  %v20643_v36 = vadd.f32 %v7971_v37, %v7904_v0  ;;  %v20646_v63 = vpop.f32.mrf.mxu1  ;;  %v13784_v21 = vor.u32 %v15214_v19, %v13783_v38  ;;  %v13839_v37 = vld [vmem:[%s23176_s13 + $0x250] sm:$0xf]  ;;  %v15186_v0 = vld [vmem:[%s23176_s13 + $0x11c] sm:$0xf] }
 0xb05   : > { %v13840_v41 = vor.u32 %v15229_v5, %v13839_v37  ;;  %v13692_v38 = vor.u32 %v15186_v0, %v13689_v22 }
 0xb07   : > { %v7838_v26 = vpop.f32.mrf.mxu3  ;;  %8182 = vmatmul.bf16.gmra.mxu1 %v13784_v21 }
 0xb08   : > { %v7839_v35 = vadd.f32 %v7838_v26, %v7771_v59  ;;  %v7979_v15 = vpop.f32.mrf.mxu0 }
 0xb0a   : > { %v7907_v3 = vadd.f32 %v20454_v20, %v7839_v35  ;;  %v20661_v27 = vpop.f32.mrf.mxu2 }
 0xb0b   : > { %13888 = vmatmul.msk.bf16.gmra.mxu0 %vm7694_vm2, %v13660_v4 }
 0xb0c   : > { %v20664_v58 = vadd.f32 %v7974_v29, %v7907_v3  ;;  %v7933_v33 = vpop.f32.mrf.mxu1  ;;  %v7201_v3 = vpop.permute.xlu1 %7200 }
 0xb0d   : > { %v7778_v2 = vadd.f32 %v20469_v34, %v7201_v3  ;;  %v13721_v34 = vld [vmem:[%s23176_s13 + $0x178] sm:$0xf0]  ;;  %v13713_v3 = vld [vmem:[%s23176_s13 + $0x170] sm:$0xf0] }
 0xb0f   : > { %v7840_v20 = vpop.f32.mrf.mxu3  ;;  %8056 = vmatmul.bf16.gmra.mxu2 %v13840_v41  ;;  %v15185_v41 = vld [vmem:[%s23176_s13 + $0x114] sm:$0xf] }
 0xb10   : > { %v7841_v8 = vadd.f32 %v7840_v20, %v7773_v53  ;;  %v7981_v30 = vpop.f32.mrf.mxu0  ;;  %v13684_v20 = vor.u32 %v15185_v41, %v13681_v50 }
 0xb12   : > { %v7909_v29 = vadd.f32 %v20480_v54, %v7841_v8  ;;  %v8017_v16 = vpop.f32.mrf.mxu2  ;;  %v15222_v54 = vld [vmem:[%s23176_s13 + $0x234] sm:$0xf0] }
 0xb13   : > { %v20675_v60 = vadd.f32 %v8017_v16, %v20471_v49  ;;  %v13815_v49 = vld [vmem:[%s23176_s13 + $0x218] sm:$0xf]  ;;  %v20728_v16 = vld [vmem:[%s23176_s13 + $0x2d0] sm:$0xff] }
 0xb14   : > { %8094 = vmatmul.bf16.gmra.mxu3 %v13652_v48  ;;  %v20683_v61 = vadd.f32 %v7976_v46, %v7909_v29  ;;  %v20686_v43 = vpop.f32.mrf.mxu1  ;;  %v13816_v19 = vor.u32 %v15222_v54, %v13815_v49  ;;  %v13871_v46 = vld [vmem:[%s23176_s13 + $0x290] sm:$0xf]  ;;  %v15194_v29 = vld [vmem:[%s23176_s13 + $0x15c] sm:$0xf] }
 0xb15   : > { %v13872_v37 = vor.u32 %v15237_v17, %v13871_v46  ;;  %v13724_v54 = vor.u32 %v15194_v29, %v13721_v34  ;;  %v7216_v34 = vpop.permute.xlu1 %7215 }
 0xb17   : > { %v7843_v59 = vpop.f32.mrf.mxu3  ;;  %8187 = vmatmul.bf16.gmra.mxu1 %v13816_v19 }
 0xb18   : > { %v7844_v26 = vadd.f32 %v7843_v59, %v7776_v14  ;;  %v7984_v4 = vpop.f32.mrf.mxu0  ;;  %v15230_v14 = vld [vmem:[%s23176_s13 + $0x274] sm:$0xf0]  ;;  %v7510_v59 = vunpack.c.l.b16 %v20728_v16 }
 0xb1a   : > { %v7912_v21 = vadd.f32 %v20489_v57, %v7844_v26  ;;  %v20701_v35 = vpop.f32.mrf.mxu2  ;;  %v7606_v46 = vpack.c.b16 %v7510_v59, %v7510_v59  ;;  %v15269_v59 = vld [vmem:[#allocation2 + $0xec] sm:$0xf0] }
 0xb1b   : > { %13889 = vmatmul.msk.bf16.gmra.mxu0 %vm7694_vm2, %v13692_v38  ;;  %v13848_v38 = vor.u32 %v15230_v14, %v13847_v62 }
 0xb1c   : > { %v20704_v5 = vadd.f32 %v7979_v15, %v7912_v21  ;;  %v20713_v7 = vpop.f32.mrf.mxu1  ;;  %v7211_v21 = vpop.permute.xlu0 %7210 }
 0xb1d   : > { %v7783_v41 = vadd.f32 %v20504_v47, %v7211_v21  ;;  %v13753_v47 = vld [vmem:[%s23176_s13 + $0x1b8] sm:$0xf0] }
 0xb1f   : > { %v7845_v57 = vpop.f32.mrf.mxu3  ;;  %8061 = vmatmul.bf16.gmra.mxu2 %v13872_v37  ;;  %v15193_v37 = vld [vmem:[%s23176_s13 + $0x154] sm:$0xf] }
 0xb20   : > { %v7846_v53 = vadd.f32 %v7845_v57, %v7778_v2  ;;  %v7986_v33 = vpop.f32.mrf.mxu0 }
 0xb22   : > { %v7914_v15 = vadd.f32 %v20510_v28, %v7846_v53  ;;  %v8022_v8 = vpop.f32.mrf.mxu2  ;;  %v7206_v28 = vpop.permute.xlu2 %7205 }
 0xb23   : > { %v20717_v48 = vadd.f32 %v8022_v8, %v20507_v44  ;;  %v7781_v44 = vadd.f32 %v20483_v11, %v7206_v28  ;;  %v15202_v8 = vld [vmem:[%s23176_s13 + $0x19c] sm:$0xf]  ;;  %v7786_v28 = vadd.f32 %v20513_v42, %v7216_v34 }
 0xb24   : > { %8099 = vmatmul.bf16.gmra.mxu3 %v13684_v20  ;;  %v20730_v0 = vadd.f32 %v7981_v30, %v7914_v15  ;;  %v20733_v22 = vpop.f32.mrf.mxu1  ;;  %v13756_v14 = vor.u32 %v15202_v8, %v13753_v47  ;;  %v15201_v8 = vld [vmem:[%s23176_s13 + $0x194] sm:$0xf] }
 0xb27   : > { %v7848_v49 = vpop.f32.mrf.mxu3  ;;  %8192 = vmatmul.bf16.gmra.mxu1 %v13848_v38 }
 0xb28   : > { %v7849_v30 = vadd.f32 %v7848_v49, %v7781_v44  ;;  %v7989_v19 = vpop.f32.mrf.mxu0 }
 0xb2a   : > { %v7917_v11 = vadd.f32 %v20524_v55, %v7849_v30  ;;  %v20743_v26 = vpop.f32.mrf.mxu2 }
 0xb2b   : > { %13890 = vmatmul.msk.bf16.gmra.mxu0 %vm7694_vm2, %v13724_v54  ;;  %v14011_v54 = vld [vmem:[#allocation2 + $0xe0] sm:$0xf] }
 0xb2c   : > { %v20746_v17 = vadd.f32 %v7984_v4, %v7917_v11  ;;  %v20755_v50 = vpop.f32.mrf.mxu1  ;;  %v13716_v4 = vor.u32 %v15193_v37, %v13713_v3  ;;  %v14012_v42 = vor.u32 %v15269_v59, %v14011_v54  ;;  %v15270_v11 = vld [vmem:[#allocation2 + $0xf4] sm:$0xf0]  ;;  %v13995_v3 = vld [vmem:[#allocation2 + $0xc0] sm:$0xf] }
 0xb2e   : > { %8479 = vmatpush.bf16.msra.mxu2 %v14012_v42 }
 0xb2f   : > { %v7850_v55 = vpop.f32.mrf.mxu3  ;;  %8066 = vmatmul.bf16.gmra.mxu2 %v7606_v46 }
 0xb30   : > { %v7851_v2 = vadd.f32 %v7850_v55, %v7783_v41  ;;  %v20757_v57 = vpop.f32.mrf.mxu0  ;;  %v15265_v41 = vld [vmem:[#allocation2 + $0xcc] sm:$0xf0]  ;;  %v14003_v55 = vld [vmem:[#allocation2 + $0xc8] sm:$0xf] }
 0xb32   : > { %v7919_v53 = vadd.f32 %v20551_v40, %v7851_v2  ;;  %v8027_v20 = vpop.f32.mrf.mxu2  ;;  %v15238_v40 = vld [vmem:[%s23176_s13 + $0x2b4] sm:$0xf0]  ;;  %v13996_v2 = vor.u32 %v15265_v41, %v13995_v3  ;;  %v15257_v3 = vld [vmem:[#allocation2 + $0x8c] sm:$0xf0]  ;;  %v13971_v41 = vld [vmem:[#allocation2 + $0x88] sm:$0xf] }
 0xb33   : > { %v20761_v15 = vadd.f32 %v8027_v20, %v20542_v12  ;;  %v13879_v12 = vld [vmem:[%s23176_s13 + $0x298] sm:$0xf]  ;;  %v7221_v20 = vpop.permute.xlu2 %7220 }
 0xb34   : > { %8104 = vmatmul.bf16.gmra.mxu3 %v13716_v4  ;;  %v20769_v29 = vadd.f32 %v7986_v33, %v7919_v53  ;;  %v20772_v44 = vpop.f32.mrf.mxu1  ;;  %v13880_v49 = vor.u32 %v15238_v40, %v13879_v12  ;;  %v14019_v33 = vld [vmem:[#allocation2 + $0xe8] sm:$0xf]  ;;  %v15266_v4 = vld [vmem:[#allocation2 + $0xd4] sm:$0xf0]  ;;  %v7788_v34 = vadd.f32 %v20539_v25, %v7221_v20  ;;  %8480 = vmatpush.bf16.msra.mxu2 %v13996_v2  ;;  %v13979_v40 = vld [vmem:[#allocation2 + $0xa0] sm:$0xf] }
 0xb35   : > { %v14020_v46 = vor.u32 %v15270_v11, %v14019_v33  ;;  %v14004_v47 = vor.u32 %v15266_v4, %v14003_v55  ;;  %v15262_v33 = vld [vmem:[#allocation2 + $0xb4] sm:$0xf0]  ;;  %v15210_v25 = vld [vmem:[%s23176_s13 + $0x1dc] sm:$0xf] }
 0xb36   : > { %v13785_v55 = vld [vmem:[%s23176_s13 + $0x1f8] sm:$0xf0] }
 0xb37   : > { %v7853_v62 = vpop.f32.mrf.mxu3  ;;  %8197 = vmatmul.bf16.gmra.mxu1 %v13880_v49  ;;  %v20812_v4 = vld [vmem:[%s23176_s13 + $0x2d8] sm:$0xff] }
 0xb38   : > { %v7854_v38 = vadd.f32 %v7853_v62, %v7786_v28  ;;  %v20780_v30 = vpop.f32.mrf.mxu0  ;;  %8615 = vmatpush.bf16.msrb.mxu1 %v14020_v46  ;;  %v13987_v62 = vld [vmem:[#allocation2 + $0xa8] sm:$0xf] }
 0xb3a   : > { %v7922_v21 = vadd.f32 %v20565_v24, %v7854_v38  ;;  %v20783_v37 = vpop.f32.mrf.mxu2  ;;  %v13745_v24 = vld [vmem:[%s23176_s13 + $0x1b0] sm:$0xf0]  ;;  %v13988_v38 = vor.u32 %v15262_v33, %v13987_v62  ;;  %v13947_v62 = vld [vmem:[#allocation2 + $0x60] sm:$0xf] }
 0xb3b   : > { %13891 = vmatmul.msk.bf16.gmra.mxu0 %vm7694_vm2, %v13756_v14  ;;  %v13748_v54 = vor.u32 %v15201_v8, %v13745_v24  ;;  %v7512_v24 = vunpack.c.l.b16 %v20812_v4 }
 0xb3c   : > { %v20786_v53 = vadd.f32 %v7989_v19, %v7922_v21  ;;  %v20795_v28 = vpop.f32.mrf.mxu1  ;;  %8616 = vmatpush.bf16.msrb.mxu1 %v14004_v47  ;;  %v15261_v19 = vld [vmem:[#allocation2 + $0xac] sm:$0xf0]  ;;  %v13963_v21 = vld [vmem:[#allocation2 + $0x80] sm:$0xf] }
 0xb3d   : > { %v13980_v59 = vor.u32 %v15261_v19, %v13979_v40  ;;  %v13964_v2 = vor.u32 %v15257_v3, %v13963_v21  ;;  %v13788_v40 = vor.u32 %v15210_v25, %v13785_v55  ;;  %v7608_v19 = vpack.c.b16 %v7512_v24, %v7512_v24  ;;  %v13931_v25 = vld [vmem:[#allocation2 + $0x40] sm:$0xf]  ;;  %v15249_v21 = vld [vmem:[#allocation2 + $0x4c] sm:$0xf0]  ;;  %v13939_v3 = vld [vmem:[#allocation2 + $0x48] sm:$0xf] }
 0xb3e   : > { %v15250_v55 = vld [vmem:[#allocation2 + $0x54] sm:$0xf0] }
 0xb3f   : > { %v7855_v12 = vpop.f32.mrf.mxu3  ;;  %8481 = vmatpush.bf16.msra.mxu2 %v13980_v59 }
 0xb40   : > { %v7856_v14 = vadd.f32 %v7855_v12, %v7788_v34  ;;  %v20797_v49 = vpop.f32.mrf.mxu0  ;;  %8617 = vmatpush.bf16.msrb.mxu1 %v13988_v38  ;;  %v15254_v38 = vld [vmem:[#allocation2 + $0x74] sm:$0xf0] }
 0xb42   : > { %v7924_v42 = vadd.f32 %v20592_v52, %v7856_v14  ;;  %v8032_v11 = vpop.f32.mrf.mxu2  ;;  %v15258_v52 = vld [vmem:[#allocation2 + $0x94] sm:$0xf0]  ;;  %v15253_v14 = vld [vmem:[#allocation2 + $0x6c] sm:$0xf0] }
 0xb43   : > { %v20804_v46 = vadd.f32 %v8032_v11, %v20583_v13  ;;  %v7226_v13 = vpop.permute.xlu0 %7225  ;;  %v13972_v8 = vor.u32 %v15258_v52, %v13971_v41  ;;  %8482 = vmatpush.bf16.msra.mxu2 %v13964_v2  ;;  %v13932_v41 = vor.u32 %v15249_v21, %v13931_v25  ;;  %v7231_v52 = vpop.permute.xlu1 %7230  ;;  %v13899_v25 = vld [vmem:[#allocation2] sm:$0xf]  ;;  %v15241_v21 = vld [vmem:[#allocation2 + $0xc] sm:$0xf0] }
 0xb44   : > { %8109 = vmatmul.bf16.gmra.mxu3 %v13748_v54  ;;  %v20815_v20 = vadd.f32 %v20757_v57, %v7924_v42  ;;  %v7791_v47 = vadd.f32 %v20554_v56, %v7226_v13  ;;  %v20819_v34 = vpop.f32.mrf.mxu1  ;;  %v13955_v54 = vld [vmem:[#allocation2 + $0x68] sm:$0xf]  ;;  %v13948_v57 = vor.u32 %v15253_v14, %v13947_v62  ;;  %v15209_v13 = vld [vmem:[%s23176_s13 + $0x1d4] sm:$0xf]  ;;  %v7793_v24 = vadd.f32 %v20580_v31, %v7231_v52 }
 0xb45   : > { %8618 = vmatpush.bf16.msrb.mxu1 %v13972_v8  ;;  %v13956_v42 = vor.u32 %v15254_v38, %v13955_v54  ;;  %v13940_v8 = vor.u32 %v15250_v55, %v13939_v3  ;;  %v13907_v3 = vld [vmem:[#allocation2 + $0x8] sm:$0xf]  ;;  %v13817_v55 = vld [vmem:[%s23176_s13 + $0x238] sm:$0xf0]  ;;  %v13900_v52 = vor.u32 %v15241_v21, %v13899_v25 }
 0xb46   : > { %23263 = vst [vmem:[#allocation18_spill] sm:$0xff] %v20815_v20 }
 0xb47   : > { %v7858_v12 = vpop.f32.mrf.mxu3  ;;  %8202 = vmatmul.bf16.gmra.mxu1 %v7608_v19  ;;  %8483 = vmatpush.bf16.msra.mxu2 %v13948_v57  ;;  %v13923_v19 = vld [vmem:[#allocation2 + $0x28] sm:$0xf]  ;;  %v15246_v57 = vld [vmem:[#allocation2 + $0x34] sm:$0xf0] }
 0xb48   : > { %v7859_v59 = vadd.f32 %v7858_v12, %v7791_v47  ;;  %v20821_v33 = vpop.f32.mrf.mxu0  ;;  %v13924_v38 = vor.u32 %v15246_v57, %v13923_v19  ;;  %v15217_v57 = vld [vmem:[%s23176_s13 + $0x214] sm:$0xf] }
 0xb49   : > { %8619 = vmatpush.bf16.msrb.mxu1 %v13956_v42 }
 0xb4a   : > { %v7927_v11 = vadd.f32 %v20606_v45, %v7859_v59  ;;  %v20824_v56 = vpop.f32.mrf.mxu2  ;;  %v13777_v45 = vld [vmem:[%s23176_s13 + $0x1f0] sm:$0xf0] }
 0xb4b   : > { %13892 = vmatmul.msk.bf16.gmra.mxu0 %vm7694_vm2, %v13788_v40  ;;  %8484 = vmatpush.bf16.msra.mxu2 %v13932_v41  ;;  %v13915_v40 = vld [vmem:[#allocation2 + $0x20] sm:$0xf]  ;;  %v13780_v54 = vor.u32 %v15209_v13, %v13777_v45  ;;  %v15218_v41 = vld [vmem:[%s23176_s13 + $0x21c] sm:$0xf] }
 0xb4c   : > { %v20828_v2 = vadd.f32 %v20780_v30, %v7927_v11  ;;  %v20837_v47 = vpop.f32.mrf.mxu1  ;;  %v15245_v30 = vld [vmem:[#allocation2 + $0x2c] sm:$0xf0] }
 0xb4d   : > { %8620 = vmatpush.bf16.msrb.mxu1 %v13940_v8  ;;  %v13916_v59 = vor.u32 %v15245_v30, %v13915_v40  ;;  %v13820_v40 = vor.u32 %v15218_v41, %v13817_v55  ;;  %v15260_v55 = vld [vmem:[#allocation2 + $0xac] sm:$0xf] }
 0xb4f   : > { %v7860_v12 = vpop.f32.mrf.mxu3  ;;  %8485 = vmatpush.bf16.msra.mxu2 %v13916_v59 }
 0xb50   : > { %v7861_v62 = vadd.f32 %v7860_v12, %v7793_v24  ;;  %v8001_v14 = vpop.f32.mrf.mxu0 }
 0xb51   : > { %8621 = vmatpush.bf16.msrb.mxu1 %v13924_v38  ;;  %v13809_v38 = vld [vmem:[%s23176_s13 + $0x230] sm:$0xf0] }
 0xb52   : > { %v7929_v42 = vadd.f32 %v20631_v18, %v7861_v62  ;;  %v8037_v11 = vpop.f32.mrf.mxu2  ;;  %v15242_v18 = vld [vmem:[#allocation2 + $0x14] sm:$0xf0]  ;;  %v13812_v41 = vor.u32 %v15217_v57, %v13809_v38  ;;  %v15263_v38 = vld [vmem:[#allocation2 + $0xc4] sm:$0xf] }
 0xb53   : > { %v20841_v31 = vadd.f32 %v8037_v11, %v20622_v10  ;;  %v7236_v10 = vpop.permute.xlu2 %7235  ;;  %v13908_v45 = vor.u32 %v15242_v18, %v13907_v3  ;;  %8486 = vmatpush.bf16.msra.mxu2 %v13900_v52  ;;  %v14005_v11 = vld [vmem:[#allocation2 + $0xd8] sm:$0xf0] }
 0xb54   : > { %8114 = vmatmul.bf16.gmra.mxu3 %v13780_v54  ;;  %v20850_v13 = vadd.f32 %v20797_v49, %v7929_v42  ;;  %v7796_v8 = vadd.f32 %v20595_v6, %v7236_v10  ;;  %v20853_v24 = vpop.f32.mrf.mxu1  ;;  %v15268_v54 = vld [vmem:[#allocation2 + $0xec] sm:$0xf]  ;;  %v14021_v49 = vld [vmem:[#allocation2 + $0xf8] sm:$0xf0]  ;;  %v15267_v10 = vld [vmem:[#allocation2 + $0xe4] sm:$0xf] }
 0xb55   : > { %8622 = vmatpush.bf16.msrb.mxu1 %v13908_v45  ;;  %v14024_v59 = vor.u32 %v15268_v54, %v14021_v49  ;;  %v15264_v42 = vld [vmem:[#allocation2 + $0xcc] sm:$0xf]  ;;  %v13989_v18 = vld [vmem:[#allocation2 + $0xb8] sm:$0xf0]  ;;  %v14013_v45 = vld [vmem:[#allocation2 + $0xf0] sm:$0xf0] }
 0xb56   : > { %23264 = vst [vmem:[#allocation19_spill] sm:$0xff] %v20850_v13  ;;  %v14008_v21 = vor.u32 %v15264_v42, %v14005_v11  ;;  %v13973_v54 = vld [vmem:[#allocation2 + $0x98] sm:$0xf0]  ;;  %v13997_v42 = vld [vmem:[#allocation2 + $0xd0] sm:$0xf0] }
 0xb57   : > { %v7863_v12 = vpop.f32.mrf.mxu3  ;;  %8683 = vmatpush.bf16.msrb.mxu0 %v14024_v59 }
 0xb58   : > { %v7864_v30 = vadd.f32 %v7863_v12, %v7796_v8  ;;  %v20855_v19 = vpop.f32.mrf.mxu0  ;;  %v15226_v8 = vld [vmem:[%s23176_s13 + $0x25c] sm:$0xf] }
 0xb59   : > { %v13849_v12 = vld [vmem:[%s23176_s13 + $0x278] sm:$0xf0] }
 0xb5a   : > { %v7932_v62 = vadd.f32 %v20646_v63, %v7864_v30  ;;  %v20858_v14 = vpop.f32.mrf.mxu2  ;;  %v14016_v30 = vor.u32 %v15267_v10, %v14013_v45  ;;  %v13852_v59 = vor.u32 %v15226_v8, %v13849_v12  ;;  %v13981_v10 = vld [vmem:[#allocation2 + $0xb0] sm:$0xf0] }
 0xb5b   : > { %13893 = vmatmul.msk.bf16.gmra.mxu0 %vm7694_vm2, %v13820_v40  ;;  %v13992_v40 = vor.u32 %v15260_v55, %v13989_v18  ;;  %v15259_v18 = vld [vmem:[#allocation2 + $0xa4] sm:$0xf]  ;;  %v15225_v12 = vld [vmem:[%s23176_s13 + $0x254] sm:$0xf] }
 0xb5c   : > { %v20862_v6 = vadd.f32 %v20821_v33, %v7932_v62  ;;  %v20870_v63 = vpop.f32.mrf.mxu1  ;;  %8684 = vmatpush.bf16.msrb.mxu0 %v14008_v21  ;;  %8547 = vmatpush.bf16.msrb.mxu3 %v14016_v30  ;;  %v13984_v8 = vor.u32 %v15259_v18, %v13981_v10  ;;  %v8015_v30 = vadd.f32 %v20661_v27, %v20451_v32  ;;  %v15244_v32 = vld [vmem:[#allocation2 + $0x2c] sm:$0xf]  ;;  %v13925_v27 = vld [vmem:[#allocation2 + $0x38] sm:$0xf0] }
 0xb5f   : > { %v7865_v25 = vpop.f32.mrf.mxu3 }
 0xb60   : > { %v20872_v3 = vpop.f32.mrf.mxu0  ;;  %8685 = vmatpush.bf16.msrb.mxu0 %v13992_v40  ;;  %v14000_v25 = vor.u32 %v15263_v38, %v13997_v42  ;;  %v13841_v40 = vld [vmem:[%s23176_s13 + $0x270] sm:$0xf0] }
 0xb61   : > { %v13965_v38 = vld [vmem:[#allocation2 + $0x90] sm:$0xf0] }
 0xb62   : > { %v8042_v33 = vpop.f32.mrf.mxu2  ;;  %8548 = vmatpush.bf16.msrb.mxu3 %v14000_v25 }
 0xb63   : > { %v20875_v52 = vadd.f32 %v8042_v33, %v20664_v58  ;;  %v15256_v58 = vld [vmem:[#allocation2 + $0x8c] sm:$0xf]  ;;  %v13957_v33 = vld [vmem:[#allocation2 + $0x78] sm:$0xf0] }
 0xb64   : > { %8119 = vmatmul.bf16.gmra.mxu3 %v13812_v41  ;;  %v20883_v62 = vpop.f32.mrf.mxu1  ;;  %v13976_v57 = vor.u32 %v15256_v58, %v13973_v54  ;;  %v15252_v41 = vld [vmem:[#allocation2 + $0x6c] sm:$0xf] }
 0xb65   : > { %v13960_v55 = vor.u32 %v15252_v41, %v13957_v33  ;;  %v15248_v54 = vld [vmem:[#allocation2 + $0x4c] sm:$0xf]  ;;  %v13844_v33 = vor.u32 %v15225_v12, %v13841_v40 }
 0xb66   : > { %8686 = vmatpush.bf16.msrb.mxu0 %v13976_v57  ;;  %8549 = vmatpush.bf16.msrb.mxu3 %v13984_v8  ;;  %v13928_v8 = vor.u32 %v15244_v32, %v13925_v27  ;;  %v15233_v32 = vld [vmem:[%s23176_s13 + $0x294] sm:$0xf] }
 0xb67   : > { %v8080_v49 = vpop.f32.mrf.mxu3  ;;  %v13873_v27 = vld [vmem:[%s23176_s13 + $0x2b0] sm:$0xf0] }
 0xb68   : > { %v20885_v11 = vpop.f32.mrf.mxu0  ;;  %v8081_v45 = vadd.f32 %v8080_v49, %v20635_v51  ;;  %v15255_v49 = vld [vmem:[#allocation2 + $0x84] sm:$0xf] }
 0xb69   : > { %v13968_v18 = vor.u32 %v15255_v49, %v13965_v38  ;;  %v13933_v49 = vld [vmem:[#allocation2 + $0x50] sm:$0xf0] }
 0xb6a   : > { %v20887_v21 = vpop.f32.mrf.mxu2  ;;  %8687 = vmatpush.bf16.msrb.mxu0 %v13960_v55  ;;  %v8149_v42 = vadd.f32 %v20686_v43, %v8081_v45  ;;  %v13881_v45 = vld [vmem:[%s23176_s13 + $0x2b8] sm:$0xf0] }
 0xb6b   : > { %13894 = vmatmul.msk.bf16.gmra.mxu0 %vm7694_vm2, %v13852_v59  ;;  %v13941_v59 = vld [vmem:[#allocation2 + $0x58] sm:$0xf0]  ;;  %8550 = vmatpush.bf16.msrb.mxu3 %v13968_v18 }
 0xb6c   : > { %v20899_v58 = vpop.f32.mrf.mxu1  ;;  %v13944_v51 = vor.u32 %v15248_v54, %v13941_v59  ;;  %v15251_v54 = vld [vmem:[#allocation2 + $0x64] sm:$0xf]  ;;  %v13949_v59 = vld [vmem:[#allocation2 + $0x70] sm:$0xf0]  ;;  %v8217_v20 = vadd.f32 %v20855_v19, %v8149_v42  ;;  %v13909_v19 = vld [vmem:[#allocation2 + $0x18] sm:$0xf0] }
 0xb6d   : > { %v13952_v12 = vor.u32 %v15251_v54, %v13949_v59 }
 0xb6e   : > { %8688 = vmatpush.bf16.msrb.mxu0 %v13944_v51  ;;  %v15247_v51 = vld [vmem:[#allocation2 + $0x44] sm:$0xf] }
 0xb6f   : > { %v8082_v57 = vpop.f32.mrf.mxu3  ;;  %8551 = vmatpush.bf16.msrb.mxu3 %v13952_v12  ;;  %v13936_v42 = vor.u32 %v15247_v51, %v13933_v49 }
 0xb70   : > { %v8083_v25 = vadd.f32 %v8082_v57, %v8015_v30  ;;  %v8223_v41 = vpop.f32.mrf.mxu0 }
 0xb72   : > { %v8151_v10 = vadd.f32 %v20713_v7, %v8083_v25  ;;  %v8047_v13 = vpop.f32.mrf.mxu2  ;;  %v15234_v7 = vld [vmem:[%s23176_s13 + $0x29c] sm:$0xf]  ;;  %8689 = vmatpush.bf16.msrb.mxu0 %v13928_v8  ;;  %v8020_v8 = vadd.f32 %v20701_v35, %v20486_v9 }
 0xb73   : > { %v20904_v55 = vadd.f32 %v8047_v13, %v20704_v5  ;;  %v15240_v13 = vld [vmem:[#allocation2 + $0xc] sm:$0xf]  ;;  %8552 = vmatpush.bf16.msrb.mxu3 %v13936_v42 }
 0xb74   : > { %v8219_v43 = vadd.f32 %v20872_v3, %v8151_v10  ;;  %8124 = vmatmul.bf16.gmra.mxu3 %v13844_v33  ;;  %v20916_v5 = vpop.f32.mrf.mxu1  ;;  %v13884_v3 = vor.u32 %v15234_v7, %v13881_v45  ;;  %v13912_v57 = vor.u32 %v15240_v13, %v13909_v19  ;;  %v13917_v33 = vld [vmem:[#allocation2 + $0x30] sm:$0xf0]  ;;  %v13876_v13 = vor.u32 %v15233_v32, %v13873_v27 }
 0xb75   : > { %v13901_v7 = vld [vmem:[#allocation2 + $0x10] sm:$0xf0] }
 0xb76   : > { %v20914_v40 = vpack.c.bf16 %v8219_v43, %v8217_v20  ;;  %8690 = vmatpush.bf16.msrb.mxu0 %v13912_v57  ;;  %v15243_v20 = vld [vmem:[#allocation2 + $0x24] sm:$0xf]  ;;  %v7513_v57 = vunpack.c.h.b16 %v20812_v4  ;;  %v7511_v4 = vunpack.c.h.b16 %v20728_v16 }
 0xb77   : > { %v8085_v30 = vpop.f32.mrf.mxu3  ;;  %v13920_v10 = vor.u32 %v15243_v20, %v13917_v33  ;;  %v15239_v43 = vld [vmem:[#allocation2 + $0x4] sm:$0xf] }
 0xb78   : > { %v8226_v38 = vpop.f32.mrf.mxu0  ;;  %8487 = vmatmul.bf16.vlgmr.msra.gmra.mxu2 %v20914_v40  ;;  %8623 = vmatmul.bf16.vlgmr.msrb.gmra.mxu1 %v20914_v40  ;;  %v8086_v18 = vadd.f32 %v8085_v30, %v20675_v60  ;;  %v13904_v19 = vor.u32 %v15239_v43, %v13901_v7  ;;  %v7609_v42 = vpack.c.b16 %v7513_v57, %v7513_v57 }
 0xb79   : > { %8553 = vmatpush.bf16.msrb.mxu3 %v13920_v10 }
 0xb7a   : > { %v20920_v25 = vpop.f32.mrf.mxu2  ;;  %v8154_v60 = vadd.f32 %v20733_v22, %v8086_v18 }
 0xb7b   : > { %13895 = vmatmul.msk.bf16.gmra.mxu0 %vm7694_vm2, %v13884_v3 }
 0xb7c   : > { %v20932_v54 = vpop.f32.mrf.mxu1  ;;  %v8222_v35 = vadd.f32 %v20885_v11, %v8154_v60  ;;  %v8025_v11 = vadd.f32 %v20743_v26, %v20521_v23 }
 0xb7d   : > { %8554 = vmatpush.bf16.msrb.mxu3 %v13904_v19 }
 0xb7f   : > { %v8087_v59 = vpop.f32.mrf.mxu3 }
 0xb80   : > { %v8088_v45 = vadd.f32 %v8087_v59, %v8020_v8  ;;  %v8228_v12 = vpop.f32.mrf.mxu0  ;;  %v7607_v8 = vpack.c.b16 %v7511_v4, %v7511_v4 }
 0xb82   : > { %v8156_v30 = vadd.f32 %v20755_v50, %v8088_v45  ;;  %v8052_v3 = vpop.f32.mrf.mxu2 }
 0xb83   : > { %v20938_v9 = vadd.f32 %v8052_v3, %v20746_v17 }
 0xb84   : > { %v8224_v51 = vadd.f32 %v8223_v41, %v8156_v30  ;;  %8129 = vmatmul.bf16.gmra.mxu3 %v13876_v13  ;;  %v20943_v22 = vpop.f32.mrf.mxu1 }
 0xb86   : > { %v20941_v49 = vpack.c.bf16 %v8224_v51, %v8222_v35 }
 0xb87   : > { %v8090_v20 = vpop.f32.mrf.mxu3 }
 0xb88   : > { %v8231_v33 = vpop.f32.mrf.mxu0  ;;  %8492 = vmatmul.bf16.gmra.mxu2 %v20941_v49  ;;  %8628 = vmatmul.bf16.gmra.mxu1 %v20941_v49  ;;  %v8091_v17 = vadd.f32 %v8090_v20, %v20717_v48 }
 0xb8a   : > { %v20947_v50 = vpop.f32.mrf.mxu2  ;;  %v8159_v10 = vadd.f32 %v20772_v44, %v8091_v17 }
 0xb8b   : > { %13896 = vmatmul.msk.bf16.gmra.mxu0 %vm7694_vm2, %v7609_v42 }
 0xb8c   : > { %v20954_v41 = vpop.f32.mrf.mxu1  ;;  %v8227_v48 = vadd.f32 %v8226_v38, %v8159_v10 }
 0xb8f   : > { %v8092_v18 = vpop.f32.mrf.mxu3 }
 0xb90   : > { %v8093_v32 = vadd.f32 %v8092_v18, %v8025_v11  ;;  %v8233_v27 = vpop.f32.mrf.mxu0 }
 0xb92   : > { %v8161_v59 = vadd.f32 %v20795_v28, %v8093_v32  ;;  %v8057_v43 = vpop.f32.mrf.mxu2 }
 0xb93   : > { %v20959_v7 = vadd.f32 %v8057_v43, %v20786_v53  ;;  %v8030_v53 = vadd.f32 %v20783_v37, %v20562_v1 }
 0xb94   : > { %v8229_v60 = vadd.f32 %v8228_v12, %v8161_v59  ;;  %8134 = vmatmul.bf16.gmra.mxu3 %v7607_v8  ;;  %v20961_v45 = vpop.f32.mrf.mxu1 }
 0xb96   : > { %v8277_v16 = vpack.c.bf16 %v8229_v60, %v8227_v48 }
 0xb97   : > { %v8095_v23 = vpop.f32.mrf.mxu3 }
 0xb98   : > { %v8236_v26 = vpop.f32.mrf.mxu0  ;;  %8497 = vmatmul.bf16.gmra.mxu2 %v8277_v16  ;;  %8633 = vmatmul.bf16.gmra.mxu1 %v8277_v16  ;;  %v8096_v28 = vadd.f32 %v8095_v23, %v20761_v15 }
 0xb9a   : > { %v20963_v44 = vpop.f32.mrf.mxu2  ;;  %v8164_v12 = vadd.f32 %v20819_v34, %v8096_v28 }
 0xb9b   : > { %8691 = vmatmul.bf16.vlgmr.msrb.gmra.mxu0 %v20914_v40 }
 0xb9c   : > { %v20969_v13 = vpop.f32.mrf.mxu1  ;;  %v8232_v51 = vadd.f32 %v8231_v33, %v8164_v12 }
 0xb9f   : > { %v8097_v38 = vpop.f32.mrf.mxu3 }
 0xba0   : > { %v8098_v19 = vadd.f32 %v8097_v38, %v8030_v53  ;;  %v8238_v30 = vpop.f32.mrf.mxu0 }
 0xba2   : > { %v8166_v3 = vadd.f32 %v20837_v47, %v8098_v19  ;;  %v8062_v57 = vpop.f32.mrf.mxu2 }
 0xba3   : > { %v20974_v35 = vadd.f32 %v8062_v57, %v20828_v2  ;;  %v8035_v2 = vadd.f32 %v20824_v56, %v20603_v39 }
 0xba4   : > { %v8234_v42 = vadd.f32 %v8233_v27, %v8166_v3  ;;  %8555 = vmatmul.bf16.vlgmr.msrb.gmra.mxu3 %v20914_v40  ;;  %v20977_v20 = vpop.f32.mrf.mxu1 }
 0xba6   : > { %v8278_v15 = vpack.c.bf16 %v8234_v42, %v8232_v51 }
 0xba7   : > { %v8100_v1 = vpop.f32.mrf.mxu3 }
 0xba8   : > { %v8241_v37 = vpop.f32.mrf.mxu0  ;;  %8502 = vmatmul.bf16.gmra.mxu2 %v8278_v15  ;;  %8638 = vmatmul.bf16.gmra.mxu1 %v8278_v15  ;;  %v8101_v47 = vadd.f32 %v8100_v1, %v20804_v46 }
 0xbaa   : > { %v20979_v34 = vpop.f32.mrf.mxu2  ;;  %v8169_v40 = vadd.f32 %v20853_v24, %v8101_v47 }
 0xbab   : > { %8696 = vmatmul.bf16.gmra.mxu0 %v20941_v49 }
 0xbac   : > { %v20985_v33 = vpop.f32.mrf.mxu1  ;;  %v8237_v27 = vadd.f32 %v8236_v26, %v8169_v40 }
 0xbaf   : > { %v8102_v17 = vpop.f32.mrf.mxu3 }
 0xbb0   : > { %v8103_v4 = vadd.f32 %v8102_v17, %v8035_v2  ;;  %v8243_v11 = vpop.f32.mrf.mxu0 }
 0xbb2   : > { %v8171_v18 = vadd.f32 %v20870_v63, %v8103_v4  ;;  %v8067_v10 = vpop.f32.mrf.mxu2  ;;  %v8040_v63 = vadd.f32 %v20858_v14, %v20643_v36  ;;  %v8045_v14 = vadd.f32 %v20887_v21, %v20683_v61  ;;  %v8050_v61 = vadd.f32 %v20920_v25, %v20730_v0 }
 0xbb3   : > { %v20990_v32 = vadd.f32 %v8067_v10, %v20862_v6  ;;  %v8055_v0 = vadd.f32 %v20947_v50, %v20769_v29 }
 0xbb4   : > { %v8239_v8 = vadd.f32 %v8238_v30, %v8171_v18  ;;  %8560 = vmatmul.bf16.gmra.mxu3 %v20941_v49  ;;  %v20993_v59 = vpop.f32.mrf.mxu1 }
 0xbb6   : > { %v8279_v46 = vpack.c.bf16 %v8239_v8, %v8237_v27 }
 0xbb7   : > { %v8105_v39 = vpop.f32.mrf.mxu3 }
 0xbb8   : > { %v8246_v56 = vpop.f32.mrf.mxu0  ;;  %8507 = vmatmul.bf16.gmra.mxu2 %v8279_v46  ;;  %8643 = vmatmul.bf16.gmra.mxu1 %v8279_v46  ;;  %v8106_v43 = vadd.f32 %v8105_v39, %v20841_v31 }
 0xbba   : > { %v8069_v24 = vpop.f32.mrf.mxu2  ;;  %v8174_v60 = vadd.f32 %v20883_v62, %v8106_v43 }
 0xbbb   : > { %8701 = vmatmul.bf16.gmra.mxu0 %v8277_v16 }
 0xbbc   : > { %v20998_v6 = vpop.f32.mrf.mxu1  ;;  %v8242_v28 = vadd.f32 %v8241_v37, %v8174_v60 }
 0xbbf   : > { %v8107_v48 = vpop.f32.mrf.mxu3 }
 0xbc0   : > { %v8108_v49 = vadd.f32 %v8107_v48, %v8040_v63  ;;  %v8248_v23 = vpop.f32.mrf.mxu0  ;;  %v23265_v63 = vld [vmem:[#allocation18_spill] sm:$0xff] }
 0xbc2   : > { %v8176_v26 = vadd.f32 %v20899_v58, %v8108_v49 }
 0xbc4   : > { %v8244_v53 = vadd.f32 %v8243_v11, %v8176_v26  ;;  %8565 = vmatmul.bf16.gmra.mxu3 %v8277_v16  ;;  %v21002_v12 = vpop.f32.mrf.mxu1 }
 0xbc6   : > { %v8280_v38 = vpack.c.bf16 %v8244_v53, %v8242_v28 }
 0xbc7   : > { %v8110_v19 = vpop.f32.mrf.mxu3 }
 0xbc8   : > { %v8251_v31 = vpop.f32.mrf.mxu0  ;;  %8512 = vmatmul.bf16.gmra.mxu2 %v8280_v38  ;;  %8648 = vmatmul.bf16.gmra.mxu1 %v8280_v38  ;;  %v8111_v36 = vadd.f32 %v8110_v19, %v20875_v52 }
 0xbca   : > { %v8179_v58 = vadd.f32 %v20916_v5, %v8111_v36 }
 0xbcb   : > { %8706 = vmatmul.bf16.gmra.mxu0 %v8278_v15 }
 0xbcc   : > { %v8205_v62 = vpop.f32.mrf.mxu1  ;;  %v8247_v51 = vadd.f32 %v8246_v56, %v8179_v58 }
 0xbcf   : > { %v8112_v30 = vpop.f32.mrf.mxu3 }
 0xbd0   : > { %v8113_v3 = vadd.f32 %v8112_v30, %v8045_v14  ;;  %v8253_v57 = vpop.f32.mrf.mxu0 }
 0xbd2   : > { %v8181_v16 = vadd.f32 %v20932_v54, %v8113_v3 }
 0xbd4   : > { %v8249_v42 = vadd.f32 %v8248_v23, %v8181_v16  ;;  %8570 = vmatmul.bf16.gmra.mxu3 %v8278_v15 }
 0xbd6   : > { %v8281_v1 = vpack.c.bf16 %v8249_v42, %v8247_v51 }
 0xbd7   : > { %v8115_v37 = vpop.f32.mrf.mxu3 }
 0xbd8   : > { %v8256_v47 = vpop.f32.mrf.mxu0  ;;  %8517 = vmatmul.bf16.gmra.mxu2 %v8281_v1  ;;  %8653 = vmatmul.bf16.gmra.mxu1 %v8281_v1  ;;  %v8116_v52 = vadd.f32 %v8115_v37, %v20904_v55 }
 0xbda   : > { %v8184_v5 = vadd.f32 %v20943_v22, %v8116_v52 }
 0xbdb   : > { %8711 = vmatmul.bf16.gmra.mxu0 %v8279_v46 }
 0xbdc   : > { %v8252_v40 = vadd.f32 %v8251_v31, %v8184_v5 }
 0xbdf   : > { %v8117_v21 = vpop.f32.mrf.mxu3 }
 0xbe0   : > { %v8118_v2 = vadd.f32 %v8117_v21, %v8050_v61  ;;  %v8258_v17 = vpop.f32.mrf.mxu0 }
 0xbe2   : > { %v8186_v54 = vadd.f32 %v20954_v41, %v8118_v2 }
 0xbe4   : > { %v8254_v15 = vadd.f32 %v8253_v57, %v8186_v54  ;;  %8575 = vmatmul.bf16.gmra.mxu3 %v8279_v46 }
 0xbe6   : > { %v8282_v4 = vpack.c.bf16 %v8254_v15, %v8252_v40 }
 0xbe7   : > { %v8120_v11 = vpop.f32.mrf.mxu3 }
 0xbe8   : > { %v8261_v18 = vpop.f32.mrf.mxu0  ;;  %8522 = vmatmul.bf16.gmra.mxu2 %v8282_v4  ;;  %8658 = vmatmul.bf16.gmra.mxu1 %v8282_v4  ;;  %v8121_v55 = vadd.f32 %v8120_v11, %v20938_v9 }
 0xbea   : > { %v8189_v22 = vadd.f32 %v20961_v45, %v8121_v55  ;;  %v8060_v45 = vadd.f32 %v20963_v44, %v23265_v63 }
 0xbeb   : > { %8716 = vmatmul.bf16.gmra.mxu0 %v8280_v38 }
 0xbec   : > { %v8257_v8 = vadd.f32 %v8256_v47, %v8189_v22 }
 0xbef   : > { %v8122_v25 = vpop.f32.mrf.mxu3 }
 0xbf0   : > { %v8123_v10 = vadd.f32 %v8122_v25, %v8055_v0  ;;  %v8263_v27 = vpop.f32.mrf.mxu0 }
 0xbf2   : > { %v8191_v41 = vadd.f32 %v20969_v13, %v8123_v10 }
 0xbf4   : > { %v8259_v46 = vadd.f32 %v8258_v17, %v8191_v41  ;;  %8580 = vmatmul.bf16.gmra.mxu3 %v8280_v38 }
 0xbf5   : > { %v8624_v39 = vpop.f32.mrf.mxu1 }
 0xbf6   : > { %v8283_v56 = vpack.c.bf16 %v8259_v46, %v8257_v8 }
 0xbf7   : > { %v8125_v24 = vpop.f32.mrf.mxu3 }
 0xbf8   : > { %v8266_v43 = vpop.f32.mrf.mxu0  ;;  %8527 = vmatmul.bf16.gmra.mxu2 %v8283_v56  ;;  %8663 = vmatmul.bf16.gmra.mxu1 %v8283_v56  ;;  %v8126_v29 = vadd.f32 %v8125_v24, %v20959_v7 }
 0xbfa   : > { %v8194_v13 = vadd.f32 %v20977_v20, %v8126_v29 }
 0xbfb   : > { %v8488_v9 = vpop.f32.mrf.mxu2  ;;  %8721 = vmatmul.bf16.gmra.mxu0 %v8281_v1 }
 0xbfc   : > { %v8262_v28 = vadd.f32 %v8261_v18, %v8194_v13 }
 0xbfd   : > { %v8626_v50 = vpop.f32.mrf.mxu1 }
 0xbff   : > { %v8127_v48 = vpop.f32.mrf.mxu3 }
 0xc00   : > { %v8128_v60 = vadd.f32 %v8127_v48, %v8060_v45  ;;  %v8268_v49 = vpop.f32.mrf.mxu0 }
 0xc02   : > { %v8196_v23 = vadd.f32 %v20985_v33, %v8128_v60  ;;  %v23266_v33 = vld [vmem:[#allocation19_spill] sm:$0xff] }
 0xc03   : > { %v8490_v26 = vpop.f32.mrf.mxu2  ;;  %v8065_v14 = vadd.f32 %v20979_v34, %v23266_v33 }
 0xc04   : > { %v8264_v53 = vadd.f32 %v8263_v27, %v8196_v23  ;;  %8585 = vmatmul.bf16.gmra.mxu3 %v8281_v1 }
 0xc05   : > { %v8629_v38 = vpop.f32.mrf.mxu1 }
 0xc06   : > { %v21024_v19 = vpack.c.bf16 %v8264_v53, %v8262_v28 }
 0xc07   : > { %v8130_v31 = vpop.f32.mrf.mxu3 }
 0xc08   : > { %v8271_v7 = vpop.f32.mrf.mxu0  ;;  %8532 = vmatmul.bf16.gmra.mxu2 %v21024_v19  ;;  %8668 = vmatmul.bf16.gmra.mxu1 %v21024_v19  ;;  %v8131_v20 = vadd.f32 %v8130_v31, %v20974_v35 }
 0xc0a   : > { %v8199_v30 = vadd.f32 %v20993_v59, %v8131_v20 }
 0xc0b   : > { %v21028_v44 = vpop.f32.mrf.mxu2  ;;  %8726 = vmatmul.bf16.gmra.mxu0 %v8282_v4 }
 0xc0c   : > { %v8267_v51 = vadd.f32 %v8266_v43, %v8199_v30 }
 0xc0d   : > { %v8631_v36 = vpop.f32.mrf.mxu1 }
 0xc0f   : > { %v8132_v62 = vpop.f32.mrf.mxu3 }
 0xc10   : > { %v8133_v58 = vadd.f32 %v8132_v62, %v8065_v14  ;;  %v8273_v3 = vpop.f32.mrf.mxu0 }
 0xc12   : > { %v8201_v57 = vadd.f32 %v20998_v6, %v8133_v58 }
 0xc13   : > { %v21035_v16 = vpop.f32.mrf.mxu2 }
 0xc14   : > { %v8269_v42 = vadd.f32 %v8268_v49, %v8201_v57  ;;  %8590 = vmatmul.bf16.gmra.mxu3 %v8282_v4 }
 0xc15   : > { %v21037_v1 = vpop.f32.mrf.mxu1 }
 0xc16   : > { %v21039_v37 = vpack.c.bf16 %v8269_v42, %v8267_v51 }
 0xc17   : > { %v8135_v35 = vpop.f32.mrf.mxu3 }
 0xc18   : > { %8537 = vmatmul.bf16.gmra.mxu2 %v21039_v37  ;;  %8673 = vmatmul.bf16.gmra.mxu1 %v21039_v37  ;;  %v8692_v34 = vpop.f32.mrf.mxu0  ;;  %v8136_v59 = vadd.f32 %v8135_v35, %v20990_v32 }
 0xc19   : > { %v8752_v61 = vpack.c.bf16 %v8692_v34, %v8624_v39 }
 0xc1a   : > { %v8204_v52 = vadd.f32 %v21002_v12, %v8136_v59 }
 0xc1b   : > { %v21044_v47 = vpop.f32.mrf.mxu2  ;;  %8731 = vmatmul.bf16.gmra.mxu0 %v8283_v56  ;;  %v9115_v54 = vunpack.c.h.b16 %v8752_v61  ;;  %v9044_v10 = vunpack.c.l.b16 %v8752_v61 }
 0xc1c   : > { %v8272_v17 = vadd.f32 %v8271_v7, %v8204_v52 }
 0xc1d   : > { %v21046_v6 = vpop.f32.mrf.mxu1 }
 0xc1e   : > { %v21053_v32 = vpack.c.bf16 %v8272_v17, %v8272_v17 }
 0xc1f   : > { %v8137_v21 = vpop.f32.mrf.mxu3 }
 0xc20   : > { %v8694_v5 = vpop.f32.mrf.mxu0 }
 0xc21   : > { %v8754_v2 = vpack.c.bf16 %v8694_v5, %v8626_v50 }
 0xc23   : > { %v9116_v40 = vunpack.c.h.b16 %v8754_v2  ;;  %v21049_v15 = vpop.f32.mrf.mxu2  ;;  %v9045_v25 = vunpack.c.l.b16 %v8754_v2 }
 0xc24   : > { %8595 = vmatmul.bf16.gmra.mxu3 %v8283_v56 }
 0xc25   : > { %v9138_v4 = vpack.c.b16 %v9116_v40, %v9115_v54  ;;  %v21051_v11 = vpop.f32.mrf.mxu1  ;;  %v21066_v39 = vpack.c.b16 %v9045_v25, %v9044_v10 }
 0xc27   : > { %v8556_v18 = vpop.f32.mrf.mxu3  ;;  %v9152_v24 = vshrl.u32 %v9138_v4, 16  ;;  %v9155_v43 = vshll.u32 %v9138_v4, 16  ;;  %v23197_v28 = vrot.slane %v21066_v39, 1 }
 0xc28   : > { %v21055_v55 = vpack.c.bf16 %v8556_v18, %v8488_v9  ;;  %8542 = vmatmul.bf16.gmra.mxu2 %v21053_v32  ;;  %8678 = vmatmul.bf16.gmra.mxu1 %v21053_v32  ;;  %v8697_v12 = vpop.f32.mrf.mxu0 }
 0xc29   : > { %v8756_v27 = vpack.c.bf16 %v8697_v12, %v8629_v38  ;;  %v9154_v53 = vrot.slane %v9152_v24, 5 }
 0xc2a   : > { %v8820_v9 = vunpack.c.l.b16 %v21055_v55 }
 0xc2b   : > { %v21059_v0 = vpop.f32.mrf.mxu2  ;;  %8736 = vmatmul.bf16.gmra.mxu0 %v21024_v19  ;;  %v9046_v50 = vunpack.c.l.b16 %v8756_v27  ;;  %v9117_v63 = vunpack.c.h.b16 %v8756_v27 }
 0xc2d   : > { %v21062_v22 = vpop.f32.mrf.mxu1 }
 0xc2f   : > { %v8558_v41 = vpop.f32.mrf.mxu3 }
 0xc30   : > { %v21064_v8 = vpack.c.bf16 %v8558_v41, %v8490_v26  ;;  %v8699_v46 = vpop.f32.mrf.mxu0 }
 0xc31   : > { %v8758_v56 = vpack.c.bf16 %v8699_v46, %v8631_v36  ;;  %v9157_v36 = vrot.slane %v9155_v43, 6 }
 0xc32   : > { %v8821_v29 = vunpack.c.l.b16 %v21064_v8 }
 0xc33   : > { %v9047_v45 = vunpack.c.l.b16 %v8758_v56  ;;  %v9118_v48 = vunpack.c.h.b16 %v8758_v56  ;;  %v21070_v13 = vpop.f32.mrf.mxu2  ;;  %v21086_v51 = vor.u32 %v9157_v36, %v9154_v53 }
 0xc34   : > { %8600 = vmatmul.bf16.gmra.mxu3 %v21024_v19  ;;  %v21073_v60 = vpack.c.b16 %v8821_v29, %v8820_v9 }
 0xc35   : > { %v9068_v49 = vpack.c.b16 %v9047_v45, %v9046_v50  ;;  %v9139_v23 = vpack.c.b16 %v9118_v48, %v9117_v63  ;;  %v21075_v26 = vpop.f32.mrf.mxu1 }
 0xc37   : > { %v9081_v38 = vrot.slane %v9068_v49, 1  ;;  %v9160_v31 = vshrl.u32 %v9139_v23, 16  ;;  %v9163_v7 = vshll.u32 %v9139_v23, 16  ;;  %v8561_v20 = vpop.f32.mrf.mxu3 }
 0xc38   : > { %v8755_v33 = vpack.c.bf16 %v8561_v20, %v21028_v44  ;;  %v8702_v14 = vpop.f32.mrf.mxu0 }
 0xc39   : > { %v8760_v19 = vpack.c.bf16 %v8702_v14, %v21037_v1  ;;  %v9082_v62 = vsel %vm9079_vm3, %v23197_v28, %v9081_v38  ;;  %v9162_v30 = vrot.slane %v9160_v31, 5  ;;  %v9165_v58 = vrot.slane %v9163_v7, 6 }
 0xc3a   : > { %10723 = vmatpush.bf16.msra.mxu1 %v9082_v62  ;;  %v8822_v52 = vunpack.c.l.b16 %v8755_v33 }
 0xc3b   : > { %v21083_v3 = vpop.f32.mrf.mxu2  ;;  %8741 = vmatmul.bf16.gmra.mxu0 %v21039_v37  ;;  %v9166_v57 = vor.u32 %v9165_v58, %v9162_v30  ;;  %v9048_v21 = vunpack.c.l.b16 %v8760_v19  ;;  %v9119_v5 = vunpack.c.h.b16 %v8760_v19 }
 0xc3d   : > { %v21088_v42 = vpop.f32.mrf.mxu1  ;;  %v21092_v44 = vsel %vm9150_vm4, %v21086_v51, %v9166_v57 }
 0xc3f   : > { %v8563_v1 = vpop.f32.mrf.mxu3 }
 0xc40   : > { %v8757_v35 = vpack.c.bf16 %v8563_v1, %v21035_v16  ;;  %v8704_v34 = vpop.f32.mrf.mxu0 }
 0xc41   : > { %v8762_v59 = vpack.c.bf16 %v8704_v34, %v21046_v6 }
 0xc42   : > { %v8823_v61 = vunpack.c.l.b16 %v8757_v35  ;;  %v8870_v27 = vunpack.c.h.b16 %v8757_v35 }
 0xc43   : > { %v9049_v2 = vunpack.c.l.b16 %v8762_v59  ;;  %v9120_v17 = vunpack.c.h.b16 %v8762_v59  ;;  %v21096_v54 = vpop.f32.mrf.mxu2 }
 0xc44   : > { %8605 = vmatmul.bf16.gmra.mxu3 %v21039_v37  ;;  %v21099_v40 = vpack.c.b16 %v8823_v61, %v8822_v52  ;;  %v8869_v37 = vunpack.c.h.b16 %v8755_v33 }
 0xc45   : > { %v9069_v4 = vpack.c.b16 %v9049_v2, %v9048_v21  ;;  %v9140_v18 = vpack.c.b16 %v9120_v17, %v9119_v5  ;;  %v21101_v12 = vpop.f32.mrf.mxu1 }
 0xc46   : > { %v8891_v50 = vpack.c.b16 %v8870_v27, %v8869_v37 }
 0xc47   : > { %v9169_v16 = vshrl.u32 %v9140_v18, 16  ;;  %v9172_v25 = vshll.u32 %v9140_v18, 16  ;;  %v8566_v10 = vpop.f32.mrf.mxu3  ;;  %v9083_v6 = vrot.slane %v9069_v4, 1 }
 0xc48   : > { %v8707_v41 = vpop.f32.mrf.mxu0  ;;  %v8759_v48 = vpack.c.bf16 %v8566_v10, %v21044_v47  ;;  %v8912_v53 = vshrl.u32 %v8891_v50, 16 }
 0xc49   : > { %v8764_v46 = vpack.c.bf16 %v8707_v41, %v21051_v11  ;;  %v9171_v56 = vrot.slane %v9169_v16, 5  ;;  %v9174_v24 = vrot.slane %v9172_v25, 6  ;;  %v21105_v43 = vsel %vm9079_vm3, %v9081_v38, %v9083_v6 }
 0xc4a   : > { %v8915_v38 = vshll.u32 %v8891_v50, 16  ;;  %v8824_v7 = vunpack.c.l.b16 %v8759_v48  ;;  %v8871_v20 = vunpack.c.h.b16 %v8759_v48  ;;  %v8914_v59 = vrot.slane %v8912_v53, 4 }
 0xc4b   : > { %v21107_v9 = vpop.f32.mrf.mxu2  ;;  %8746 = vmatmul.bf16.gmra.mxu0 %v21053_v32  ;;  %v9175_v29 = vor.u32 %v9174_v24, %v9171_v56  ;;  %v9050_v14 = vunpack.c.l.b16 %v8764_v46  ;;  %v9121_v19 = vunpack.c.h.b16 %v8764_v46 }
 0xc4c   : > { %v8917_v52 = vrot.slane %v8915_v38, 5 }
 0xc4d   : > { %v21110_v63 = vpop.f32.mrf.mxu1  ;;  %v21113_v45 = vsel %vm9150_vm4, %v9166_v57, %v9175_v29 }
 0xc4e   : > { %v21129_v41 = vor.u32 %v8917_v52, %v8914_v59 }
 0xc4f   : > { %v8568_v11 = vpop.f32.mrf.mxu3 }
 0xc50   : > { %v8761_v49 = vpack.c.bf16 %v8568_v11, %v21049_v15  ;;  %v8709_v23 = vpop.f32.mrf.mxu0 }
 0xc51   : > { %v8766_v31 = vpack.c.bf16 %v8709_v23, %v21062_v22 }
 0xc52   : > { %v8825_v36 = vunpack.c.l.b16 %v8761_v49  ;;  %v8872_v33 = vunpack.c.h.b16 %v8761_v49 }
 0xc53   : > { %v9051_v62 = vunpack.c.l.b16 %v8766_v31  ;;  %v9122_v30 = vunpack.c.h.b16 %v8766_v31  ;;  %v21118_v58 = vpop.f32.mrf.mxu2 }
 0xc54   : > { %v8892_v57 = vpack.c.b16 %v8872_v33, %v8871_v20  ;;  %8610 = vmatmul.bf16.gmra.mxu3 %v21053_v32  ;;  %v21121_v47 = vpack.c.b16 %v8825_v36, %v8824_v7 }
 0xc55   : > { %v9070_v15 = vpack.c.b16 %v9051_v62, %v9050_v14  ;;  %v9141_v1 = vpack.c.b16 %v9122_v30, %v9121_v19  ;;  %v21123_v35 = vpop.f32.mrf.mxu1 }
 0xc56   : > { %v8921_v22 = vshrl.u32 %v8892_v57, 16  ;;  %v8924_v34 = vshll.u32 %v8892_v57, 16 }
 0xc57   : > { %v9178_v61 = vshrl.u32 %v9141_v1, 16  ;;  %v9181_v21 = vshll.u32 %v9141_v1, 16  ;;  %v8571_v5 = vpop.f32.mrf.mxu3  ;;  %v9085_v2 = vrot.slane %v9070_v15, 1 }
 0xc58   : > { %v8712_v17 = vpop.f32.mrf.mxu0  ;;  %v8923_v4 = vrot.slane %v8921_v22, 4  ;;  %v8926_v18 = vrot.slane %v8924_v34, 5  ;;  %v8763_v50 = vpack.c.bf16 %v8571_v5, %v21059_v0 }
 0xc59   : > { %v8768_v16 = vpack.c.bf16 %v8712_v17, %v21075_v26  ;;  %v9180_v32 = vrot.slane %v9178_v61, 5  ;;  %v9183_v25 = vrot.slane %v9181_v21, 6  ;;  %v21127_v10 = vsel %vm9079_vm3, %v9083_v6, %v9085_v2 }
 0xc5a   : > { %v8927_v27 = vor.u32 %v8926_v18, %v8923_v4  ;;  %v8826_v23 = vunpack.c.l.b16 %v8763_v50  ;;  %v8873_v53 = vunpack.c.h.b16 %v8763_v50 }
 0xc5b   : > { %v21131_v46 = vpop.f32.mrf.mxu2  ;;  %v9184_v56 = vor.u32 %v9183_v25, %v9180_v32  ;;  %v9052_v7 = vunpack.c.l.b16 %v8768_v16  ;;  %v9123_v20 = vunpack.c.h.b16 %v8768_v16 }
 0xc5c   : > { %v21135_v24 = vsel %vm8902_vm5, %v21129_v41, %v8927_v27 }
 0xc5d   : > { %v21137_v37 = vpop.f32.mrf.mxu1  ;;  %v21140_v26 = vsel %vm9150_vm4, %v9175_v29, %v9184_v56 }
 0xc5f   : > { %v8573_v6 = vpop.f32.mrf.mxu3 }
 0xc60   : > { %v8765_v48 = vpack.c.bf16 %v8573_v6, %v21070_v13  ;;  %v8714_v11 = vpop.f32.mrf.mxu0 }
 0xc61   : > { %v8770_v49 = vpack.c.bf16 %v8714_v11, %v21088_v42 }
 0xc62   : > { %v8827_v38 = vunpack.c.l.b16 %v8765_v48  ;;  %v8874_v31 = vunpack.c.h.b16 %v8765_v48 }
 0xc63   : > { %v9053_v36 = vunpack.c.l.b16 %v8770_v49  ;;  %v9124_v33 = vunpack.c.h.b16 %v8770_v49  ;;  %v21145_v14 = vpop.f32.mrf.mxu2 }
 0xc64   : > { %v8893_v29 = vpack.c.b16 %v8874_v31, %v8873_v53  ;;  %v21147_v19 = vpack.c.b16 %v8827_v38, %v8826_v23 }
 0xc65   : > { %v9071_v0 = vpack.c.b16 %v9053_v36, %v9052_v7  ;;  %v9142_v62 = vpack.c.b16 %v9124_v33, %v9123_v20  ;;  %v21149_v30 = vpop.f32.mrf.mxu1 }
 0xc66   : > { %v8930_v13 = vshrl.u32 %v8893_v29, 16  ;;  %v8933_v57 = vshll.u32 %v8893_v29, 16 }
 0xc67   : > { %v9187_v42 = vshrl.u32 %v9142_v62, 16  ;;  %v9190_v15 = vshll.u32 %v9142_v62, 16  ;;  %v8576_v1 = vpop.f32.mrf.mxu3  ;;  %v9087_v22 = vrot.slane %v9071_v0, 1 }
 0xc68   : > { %v8932_v34 = vrot.slane %v8930_v13, 4  ;;  %v8935_v59 = vrot.slane %v8933_v57, 5  ;;  %v8717_v52 = vpop.f32.mrf.mxu0  ;;  %v21164_v6 = vpack.c.bf16 %v8576_v1, %v21083_v3  ;;  %v8867_v57 = vunpack.c.h.b16 %v21055_v55 }
 0xc69   : > { %v9189_v61 = vrot.slane %v9187_v42, 5  ;;  %v9192_v21 = vrot.slane %v9190_v15, 6  ;;  %v8772_v5 = vpack.c.bf16 %v8717_v52, %v21101_v12  ;;  %v21153_v17 = vsel %vm9079_vm3, %v9085_v2, %v9087_v22 }
 0xc6a   : > { %v8936_v4 = vor.u32 %v8935_v59, %v8932_v34  ;;  %v8875_v49 = vunpack.c.h.b16 %v21164_v6 }
 0xc6b   : > { %v21155_v18 = vpop.f32.mrf.mxu2  ;;  %v9193_v16 = vor.u32 %v9192_v21, %v9189_v61  ;;  %v9125_v53 = vunpack.c.h.b16 %v8772_v5 }
 0xc6c   : > { %v8937_v32 = vsel %vm8902_vm5, %v8927_v27, %v8936_v4  ;;  %v9054_v27 = vunpack.c.l.b16 %v8772_v5 }
 0xc6d   : > { %v21158_v25 = vpop.f32.mrf.mxu1  ;;  %v21161_v50 = vsel %vm9150_vm4, %v9184_v56, %v9193_v16 }
 0xc6f   : > { %v8578_v48 = vpop.f32.mrf.mxu3 }
 0xc70   : > { %v21167_v12 = vpack.c.bf16 %v8578_v48, %v21096_v54  ;;  %v8719_v2 = vpop.f32.mrf.mxu0  ;;  %v8868_v54 = vunpack.c.h.b16 %v21064_v8 }
 0xc71   : > { %v8774_v11 = vpack.c.bf16 %v8719_v2, %v21110_v63 }
 0xc72   : > { %v8876_v23 = vunpack.c.h.b16 %v21167_v12  ;;  %v8890_v21 = vpack.c.b16 %v8868_v54, %v8867_v57 }
 0xc73   : > { %v9055_v38 = vunpack.c.l.b16 %v8774_v11  ;;  %v9126_v31 = vunpack.c.h.b16 %v8774_v11  ;;  %v21172_v56 = vpop.f32.mrf.mxu2 }
 0xc74   : > { %v8894_v7 = vpack.c.b16 %v8876_v23, %v8875_v49  ;;  %v8904_v49 = vshrl.u32 %v8890_v21, 16  ;;  %v8907_v23 = vshll.u32 %v8890_v21, 16 }
 0xc75   : > { %v9072_v3 = vpack.c.b16 %v9055_v38, %v9054_v27  ;;  %v9143_v20 = vpack.c.b16 %v9126_v31, %v9125_v53  ;;  %v21174_v36 = vpop.f32.mrf.mxu1 }
 0xc76   : > { %v8939_v33 = vshrl.u32 %v8894_v7, 16  ;;  %v8942_v29 = vshll.u32 %v8894_v7, 16  ;;  %v8906_v7 = vrot.slane %v8904_v49, 4 }
 0xc77   : > { %v9196_v63 = vshrl.u32 %v9143_v20, 16  ;;  %v9199_v0 = vshll.u32 %v9143_v20, 16  ;;  %v8581_v62 = vpop.f32.mrf.mxu3  ;;  %v9089_v13 = vrot.slane %v9072_v3, 1 }
 0xc78   : > { %v8941_v42 = vrot.slane %v8939_v33, 4  ;;  %v8944_v15 = vrot.slane %v8942_v29, 5  ;;  %v8722_v1 = vpop.f32.mrf.mxu0 }
 0xc79   : > { %v9198_v34 = vrot.slane %v9196_v63, 5  ;;  %v9201_v59 = vrot.slane %v9199_v0, 6  ;;  %v8776_v52 = vpack.c.bf16 %v8722_v1, %v21123_v35  ;;  %v21180_v61 = vsel %vm9079_vm3, %v9087_v22, %v9089_v13 }
 0xc7a   : > { %v8945_v8 = vor.u32 %v8944_v15, %v8941_v42  ;;  %v21191_v35 = vpack.c.bf16 %v8581_v62, %v21107_v9 }
 0xc7b   : > { %v21182_v5 = vpop.f32.mrf.mxu2  ;;  %v9202_v48 = vor.u32 %v9201_v59, %v9198_v34  ;;  %v9056_v3 = vunpack.c.l.b16 %v8776_v52  ;;  %v9127_v20 = vunpack.c.h.b16 %v8776_v52 }
 0xc7c   : > { %v8946_v2 = vsel %vm8902_vm5, %v8936_v4, %v8945_v8  ;;  %v8877_v4 = vunpack.c.h.b16 %v21191_v35 }
 0xc7d   : > { %v21185_v11 = vpop.f32.mrf.mxu1  ;;  %10595 = vmatpush.bf16.msra.mxu3 %v8946_v2  ;;  %v21188_v55 = vsel %vm9150_vm4, %v9193_v16, %v9202_v48  ;;  %v8909_v16 = vrot.slane %v8907_v23, 5 }
 0xc7f   : > { %v8583_v22 = vpop.f32.mrf.mxu3  ;;  %v21204_v62 = vor.u32 %v8909_v16, %v8906_v7 }
 0xc80   : > { %v21194_v27 = vpack.c.bf16 %v8583_v22, %v21118_v58  ;;  %v8724_v53 = vpop.f32.mrf.mxu0 }
 0xc81   : > { %v8778_v38 = vpack.c.bf16 %v8724_v53, %v21137_v37  ;;  %10596 = vmatpush.bf16.msra.mxu3 %v8937_v32  ;;  %v8919_v59 = vsel %vm8902_vm5, %v21204_v62, %v21129_v41 }
 0xc82   : > { %v8878_v31 = vunpack.c.h.b16 %v21194_v27 }
 0xc83   : > { %v9057_v54 = vunpack.c.l.b16 %v8778_v38  ;;  %v9128_v33 = vunpack.c.h.b16 %v8778_v38  ;;  %v21199_v9 = vpop.f32.mrf.mxu2 }
 0xc84   : > { %v8895_v29 = vpack.c.b16 %v8878_v31, %v8877_v4 }
 0xc85   : > { %v9073_v63 = vpack.c.b16 %v9057_v54, %v9056_v3  ;;  %v9144_v58 = vpack.c.b16 %v9128_v33, %v9127_v20  ;;  %v21201_v0 = vpop.f32.mrf.mxu1  ;;  %10597 = vmatpush.bf16.msra.mxu3 %v21135_v24 }
 0xc86   : > { %v8948_v37 = vshrl.u32 %v8895_v29, 16  ;;  %v8951_v32 = vshll.u32 %v8895_v29, 16 }
 0xc87   : > { %v9205_v57 = vshrl.u32 %v9144_v58, 16  ;;  %v9208_v42 = vshll.u32 %v9144_v58, 16  ;;  %v8586_v15 = vpop.f32.mrf.mxu3  ;;  %v9091_v1 = vrot.slane %v9073_v63, 1 }
 0xc88   : > { %v8727_v34 = vpop.f32.mrf.mxu0  ;;  %v8950_v52 = vrot.slane %v8948_v37, 4  ;;  %v8953_v21 = vrot.slane %v8951_v32, 5  ;;  %v8775_v41 = vpack.c.bf16 %v8586_v15, %v21131_v46 }
 0xc89   : > { %10598 = vmatpush.bf16.msra.mxu3 %v8919_v59  ;;  %v21210_v2 = vsel %vm9079_vm3, %v9089_v13, %v9091_v1  ;;  %v9207_v24 = vrot.slane %v9205_v57, 5  ;;  %v9210_v49 = vrot.slane %v9208_v42, 6  ;;  %v8780_v7 = vpack.c.bf16 %v8727_v34, %v21149_v30 }
 0xc8a   : > { %v8954_v23 = vor.u32 %v8953_v21, %v8950_v52  ;;  %v8879_v54 = vunpack.c.h.b16 %v8775_v41 }
 0xc8b   : > { %v21212_v22 = vpop.f32.mrf.mxu2  ;;  %v9211_v53 = vor.u32 %v9210_v49, %v9207_v24  ;;  %v9058_v29 = vunpack.c.l.b16 %v8780_v7 }
 0xc8c   : > { %v21215_v38 = vsel %vm8902_vm5, %v8945_v8, %v8954_v23  ;;  %v9129_v8 = vunpack.c.h.b16 %v8780_v7 }
 0xc8d   : > { %v21217_v4 = vpop.f32.mrf.mxu1  ;;  %v21220_v31 = vsel %vm9150_vm4, %v9202_v48, %v9211_v53 }
 0xc8f   : > { %v8588_v13 = vpop.f32.mrf.mxu3 }
 0xc90   : > { %v8777_v16 = vpack.c.bf16 %v8588_v13, %v21145_v14  ;;  %v8729_v3 = vpop.f32.mrf.mxu0 }
 0xc91   : > { %v8782_v20 = vpack.c.bf16 %v8729_v3, %v21158_v25 }
 0xc92   : > { %v8880_v33 = vunpack.c.h.b16 %v8777_v16 }
 0xc93   : > { %v9059_v63 = vunpack.c.l.b16 %v8782_v20  ;;  %v9130_v58 = vunpack.c.h.b16 %v8782_v20  ;;  %v21226_v37 = vpop.f32.mrf.mxu2 }
 0xc94   : > { %v8896_v48 = vpack.c.b16 %v8880_v33, %v8879_v54 }
 0xc95   : > { %v21228_v32 = vpack.c.b16 %v9059_v63, %v9058_v29  ;;  %v9145_v46 = vpack.c.b16 %v9130_v58, %v9129_v8  ;;  %v21230_v57 = vpop.f32.mrf.mxu1 }
 0xc96   : > { %v8957_v30 = vshrl.u32 %v8896_v48, 16  ;;  %v8960_v42 = vshll.u32 %v8896_v48, 16 }
 0xc97   : > { %v9214_v14 = vshrl.u32 %v9145_v46, 16  ;;  %v9217_v15 = vshll.u32 %v9145_v46, 16  ;;  %v8591_v34 = vpop.f32.mrf.mxu3  ;;  %v23198_v25 = vrot.slane %v21228_v32, 1 }
 0xc98   : > { %v8732_v59 = vpop.f32.mrf.mxu0  ;;  %v8959_v52 = vrot.slane %v8957_v30, 4  ;;  %v8962_v21 = vrot.slane %v8960_v42, 5  ;;  %v8779_v8 = vpack.c.bf16 %v8591_v34, %v21155_v18  ;;  %v8831_v34 = vunpack.c.l.b16 %v21194_v27 }
 0xc99   : > { %v21236_v24 = vsel %vm9079_vm3, %v9091_v1, %v23198_v25  ;;  %v9216_v49 = vrot.slane %v9214_v14, 5  ;;  %v9219_v7 = vrot.slane %v9217_v15, 6  ;;  %v21269_v27 = vpack.c.bf16 %v8732_v59, %v21174_v36 }
 0xc9a   : > { %v8963_v13 = vor.u32 %v8962_v21, %v8959_v52  ;;  %v8834_v48 = vunpack.c.l.b16 %v8779_v8  ;;  %v8881_v46 = vunpack.c.h.b16 %v8779_v8 }
 0xc9b   : > { %v21238_v3 = vpop.f32.mrf.mxu2  ;;  %v21240_v20 = vor.u32 %v9219_v7, %v9216_v49  ;;  %v8832_v49 = vunpack.c.l.b16 %v8775_v41  ;;  %v8829_v41 = vunpack.c.l.b16 %v21167_v12  ;;  %v9060_v36 = vunpack.c.l.b16 %v21269_v27 }
 0xc9c   : > { %v21243_v54 = vsel %vm8902_vm5, %v8954_v23, %v8963_v13  ;;  %v8833_v23 = vunpack.c.l.b16 %v8777_v16 }
 0xc9d   : > { %v21245_v33 = vpop.f32.mrf.mxu1  ;;  %v21249_v29 = vsel %vm9150_vm4, %v9211_v53, %v21240_v20 }
 0xc9f   : > { %v8593_v1 = vpop.f32.mrf.mxu3 }
 0xca0   : > { %v8781_v63 = vpack.c.bf16 %v8593_v1, %v21172_v56  ;;  %v8734_v58 = vpop.f32.mrf.mxu0  ;;  %v8849_v1 = vpack.c.b16 %v8833_v23, %v8832_v49  ;;  %v8828_v23 = vunpack.c.l.b16 %v21164_v6 }
 0xca1   : > { %v21260_v16 = vpack.c.bf16 %v8734_v58, %v21185_v11 }
 0xca2   : > { %v8835_v30 = vunpack.c.l.b16 %v8781_v63  ;;  %v8882_v42 = vunpack.c.h.b16 %v8781_v63  ;;  %v8830_v63 = vunpack.c.l.b16 %v21191_v35 }
 0xca3   : > { %v21253_v14 = vpop.f32.mrf.mxu2 }
 0xca4   : > { %v8850_v15 = vpack.c.b16 %v8835_v30, %v8834_v48  ;;  %v8897_v52 = vpack.c.b16 %v8882_v42, %v8881_v46  ;;  %v8848_v46 = vpack.c.b16 %v8831_v34, %v8830_v63 }
 0xca5   : > { %v21255_v21 = vpop.f32.mrf.mxu1 }
 0xca6   : > { %v8966_v53 = vshrl.u32 %v8897_v52, 16  ;;  %v8969_v7 = vshll.u32 %v8897_v52, 16  ;;  %10467 = vmatpush.bf16.msrb.mxu2 %v8850_v15  ;;  %v8847_v15 = vpack.c.b16 %v8829_v41, %v8828_v23 }
 0xca7   : > { %v8596_v18 = vpop.f32.mrf.mxu3 }
 0xca8   : > { %v8737_v56 = vpop.f32.mrf.mxu0  ;;  %v8968_v28 = vrot.slane %v8966_v53, 4  ;;  %v8971_v8 = vrot.slane %v8969_v7, 5  ;;  %v21273_v35 = vpack.c.bf16 %v8596_v18, %v21182_v5 }
 0xca9   : > { %v21277_v11 = vpack.c.bf16 %v8737_v56, %v21201_v0 }
 0xcaa   : > { %10468 = vmatpush.bf16.msrb.mxu2 %v8849_v1  ;;  %v8972_v25 = vor.u32 %v8971_v8, %v8968_v28  ;;  %v9061_v28 = vunpack.c.l.b16 %v21260_v16  ;;  %v8883_v6 = vunpack.c.h.b16 %v21273_v35 }
 0xcab   : > { %v21262_v48 = vpop.f32.mrf.mxu2  ;;  %v9062_v0 = vunpack.c.l.b16 %v21277_v11 }
 0xcac   : > { %v21266_v30 = vsel %vm8902_vm5, %v8963_v13, %v8972_v25  ;;  %v9075_v52 = vpack.c.b16 %v9061_v28, %v9060_v36 }
 0xcad   : > { %v8681_v42 = vpop.f32.mrf.mxu1 }
 0xcae   : > { %10469 = vmatpush.bf16.msrb.mxu2 %v8848_v46 }
 0xcaf   : > { %v8598_v12 = vpop.f32.mrf.mxu3 }
 0xcb0   : > { %v21280_v58 = vpack.c.bf16 %v8598_v12, %v21199_v9  ;;  %v8739_v13 = vpop.f32.mrf.mxu0 }
 0xcb1   : > { %v21284_v59 = vpack.c.bf16 %v8739_v13, %v21217_v4  ;;  %v9095_v4 = vrot.slane %v9075_v52, 1  ;;  %v14027_v13 = vld [vmem:[%s23179_s16] sm:$0xf] }
 0xcb2   : > { %v8884_v5 = vunpack.c.h.b16 %v21280_v58  ;;  %10470 = vmatpush.bf16.msrb.mxu2 %v8847_v15 }
 0xcb3   : > { %v9063_v49 = vunpack.c.l.b16 %v21284_v59  ;;  %v8545_v53 = vpop.f32.mrf.mxu2 }
 0xcb4   : > { %v8898_v9 = vpack.c.b16 %v8884_v5, %v8883_v6 }
 0xcb5   : > { %v21290_v7 = vpack.c.b16 %v9063_v49, %v9062_v0 }
 0xcb6   : > { %v8975_v18 = vshrl.u32 %v8898_v9, 16  ;;  %v8978_v34 = vshll.u32 %v8898_v9, 16  ;;  %10471 = vmatpush.bf16.msrb.mxu2 %v21147_v19  ;;  %v23267_v19 = vrot.slane %v21228_v32, 1 }
 0xcb7   : > { %v9097_v56 = vrot.slane %v21290_v7, 1  ;;  %v8601_v1 = vpop.f32.mrf.mxu3  ;;  %v9132_v7 = vunpack.c.h.b16 %v21260_v16  ;;  %v14037_v16 = vld [vmem:[%s23179_s16 + $0x20] sm:$0xf0] }
 0xcb8   : > { %v8742_v8 = vpop.f32.mrf.mxu0  ;;  %v8977_v63 = vrot.slane %v8975_v18, 4  ;;  %v8980_v41 = vrot.slane %v8978_v34, 5  ;;  %v9096_v28 = vsel %vm9079_vm3, %v23267_v19, %v9095_v4  ;;  %v21305_v12 = vpack.c.bf16 %v8601_v1, %v21212_v22 }
 0xcb9   : > { %v9098_v46 = vsel %vm9079_vm3, %v9095_v4, %v9097_v56 }
 0xcba   : > { %10472 = vmatpush.bf16.msrb.mxu2 %v21121_v47  ;;  %10851 = vmatpush.bf16.msra.mxu0 %v9098_v46  ;;  %v8981_v42 = vor.u32 %v8980_v41, %v8977_v63  ;;  %v15274_v47 = vld [vmem:[%s23179_s16 + $0x14] sm:$0xf0]  ;;  %v8885_v22 = vunpack.c.h.b16 %v21305_v12 }
 0xcbb   : > { %v14028_v36 = vor.u32 %v15274_v47, %v14027_v13 }
 0xcbc   : > { %v21299_v23 = vsel %vm8902_vm5, %v8972_v25, %v8981_v42 }
 0xcbe   : > { %10473 = vmatpush.bf16.msrb.mxu2 %v21099_v40  ;;  %10852 = vmatpush.bf16.msra.mxu0 %v9096_v28 }
 0xcbf   : > { %v8603_v25 = vpop.f32.mrf.mxu3 }
 0xcc0   : > { %v21315_v15 = vpack.c.bf16 %v8603_v25, %v21226_v37  ;;  %v8744_v32 = vpop.f32.mrf.mxu0 }
 0xcc2   : > { %v8886_v6 = vunpack.c.h.b16 %v21315_v15  ;;  %10474 = vmatpush.bf16.msrb.mxu2 %v21073_v60  ;;  %10853 = vmatpush.bf16.msra.mxu0 %v21236_v24 }
 0xcc4   : > { %v8899_v40 = vpack.c.b16 %v8886_v6, %v8885_v22 }
 0xcc5   : > { %10475 = vmatmul.bf16.vlgmr.msrb.gmra.mxu2 %v14028_v36 }
 0xcc6   : > { %10979 = vmatpush.bf16.msra.mxu2 %v21188_v55  ;;  %v8984_v5 = vshrl.u32 %v8899_v40, 16  ;;  %v8987_v52 = vshll.u32 %v8899_v40, 16  ;;  %10854 = vmatpush.bf16.msra.mxu0 %v21210_v2  ;;  %v8794_v55 = vpack.c.bf16 %v8744_v32, %v21245_v33  ;;  %v9133_v40 = vunpack.c.h.b16 %v21277_v11 }
 0xcc7   : > { %v8606_v37 = vpop.f32.mrf.mxu3 }
 0xcc8   : > { %v8747_v0 = vpop.f32.mrf.mxu0  ;;  %v8986_v49 = vrot.slane %v8984_v5, 4  ;;  %v8989_v53 = vrot.slane %v8987_v52, 5  ;;  %v9065_v34 = vunpack.c.l.b16 %v8794_v55  ;;  %v9136_v41 = vunpack.c.h.b16 %v8794_v55 }
 0xcc9   : > { %v8796_v9 = vpack.c.bf16 %v8747_v0, %v21255_v21  ;;  %v15280_v21 = vld [vmem:[%s23179_s16 + $0x44] sm:$0xf0]  ;;  %v9134_v5 = vunpack.c.h.b16 %v21284_v59  ;;  %v14075_v59 = vld [vmem:[%s23179_s16 + $0x60] sm:$0xf] }
 0xcca   : > { %10980 = vmatpush.bf16.msra.mxu2 %v21161_v50  ;;  %10855 = vmatpush.bf16.msra.mxu0 %v21180_v61  ;;  %v21326_v60 = vor.u32 %v8989_v53, %v8986_v49  ;;  %v8792_v50 = vpack.c.bf16 %v8742_v8, %v21230_v57  ;;  %v14051_v61 = vld [vmem:[%s23179_s16 + $0x30] sm:$0xf] }
 0xccb   : > { %v9066_v24 = vunpack.c.l.b16 %v8796_v9 }
 0xccc   : > { %v21332_v2 = vsel %vm8902_vm5, %v8981_v42, %v21326_v60  ;;  %v9064_v1 = vunpack.c.l.b16 %v8792_v50  ;;  %v9135_v46 = vunpack.c.h.b16 %v8792_v50 }
 0xccd   : > { %v9078_v18 = vpack.c.b16 %v9066_v24, %v9066_v24 }
 0xcce   : > { %10981 = vmatpush.bf16.msra.mxu2 %v21140_v26  ;;  %10856 = vmatpush.bf16.msra.mxu0 %v21153_v17  ;;  %v21343_v26 = vpack.c.bf16 %v8606_v37, %v21238_v3  ;;  %v14052_v17 = vor.u32 %v15280_v21, %v14051_v61  ;;  %v9148_v28 = vpack.c.b16 %v9136_v41, %v9135_v46  ;;  %v15286_v61 = vld [vmem:[%s23179_s16 + $0x74] sm:$0xf0]  ;;  %v9131_v21 = vunpack.c.h.b16 %v21269_v27  ;;  %v15272_v27 = vld [vmem:[%s23179_s16 + $0xc] sm:$0xf] }
 0xccf   : > { %v8608_v33 = vpop.f32.mrf.mxu3  ;;  %v9101_v8 = vrot.slane %v9078_v18, 1  ;;  %v14076_v41 = vor.u32 %v15286_v61, %v14075_v59  ;;  %v8838_v46 = vunpack.c.l.b16 %v21305_v12  ;;  %v8836_v12 = vunpack.c.l.b16 %v21273_v35  ;;  %v15278_v59 = vld [vmem:[%s23179_s16 + $0x3c] sm:$0xf]  ;;  %v14053_v61 = vld [vmem:[%s23179_s16 + $0x48] sm:$0xf0] }
 0xcd0   : > { %v21347_v57 = vpack.c.bf16 %v8608_v33, %v21253_v14  ;;  %v8749_v4 = vpop.f32.mrf.mxu0  ;;  %v8887_v3 = vunpack.c.h.b16 %v21343_v26  ;;  %v9137_v14 = vunpack.c.h.b16 %v8796_v9  ;;  %v9244_v49 = vshll.u32 %v9148_v28, 16 }
 0xcd1   : > { %v9279_v19 = vsel %vm9278_vm7, %v9101_v8, %v21086_v51  ;;  %v8840_v33 = vunpack.c.l.b16 %v21343_v26 }
 0xcd2   : > { %10982 = vmatpush.bf16.msra.mxu2 %v21113_v45  ;;  %v8888_v63 = vunpack.c.h.b16 %v21347_v57  ;;  %10857 = vmatpush.bf16.msra.mxu0 %v21127_v10  ;;  %v9077_v45 = vpack.c.b16 %v9065_v34, %v9064_v1  ;;  %v9149_v10 = vpack.c.b16 %v9137_v14, %v9137_v14  ;;  %v8841_v53 = vunpack.c.l.b16 %v21347_v57 }
 0xcd3   : > { %v9246_v26 = vrot.slane %v9244_v49, 6  ;;  %v14040_v14 = vor.u32 %v15272_v27, %v14037_v16  ;;  %v14099_v49 = vld [vmem:[%s23179_s16 + $0x90] sm:$0xf]  ;;  %v14109_v27 = vld [vmem:[%s23179_s16 + $0xb0] sm:$0xf0] }
 0xcd4   : > { %v8900_v42 = vpack.c.b16 %v8888_v63, %v8887_v3  ;;  %v9099_v25 = vrot.slane %v9077_v45, 1  ;;  %v9253_v52 = vshll.u32 %v9149_v10, 16  ;;  %v8853_v63 = vpack.c.b16 %v8841_v53, %v8840_v33 }
 0xcd5   : > { %10480 = vmatmul.bf16.gmra.mxu2 %v14052_v17 }
 0xcd6   : > { %10983 = vmatpush.bf16.msra.mxu2 %v21092_v44  ;;  %10858 = vmatpush.bf16.msra.mxu0 %v21105_v43  ;;  %v8993_v44 = vshrl.u32 %v8900_v42, 16  ;;  %v8996_v32 = vshll.u32 %v8900_v42, 16  ;;  %v9102_v6 = vsel %vm9079_vm3, %v9099_v25, %v9101_v8  ;;  %v9241_v43 = vshrl.u32 %v9148_v28, 16 }
 0xcd7   : > { %v8611_v13 = vpop.f32.mrf.mxu3  ;;  %v9100_v11 = vsel %vm9079_vm3, %v9097_v56, %v9099_v25  ;;  %v9147_v56 = vpack.c.b16 %v9134_v5, %v9133_v40  ;;  %v9255_v4 = vrot.slane %v9253_v52, 6  ;;  %v9146_v42 = vpack.c.b16 %v9132_v7, %v9131_v21  ;;  %v14035_v21 = vld [vmem:[%s23179_s16 + $0x8] sm:$0xf]  ;;  %v14123_v7 = vld [vmem:[%s23179_s16 + $0xc0] sm:$0xf] }
 0xcd8   : > { %v8795_v47 = vpack.c.bf16 %v8611_v13, %v21262_v48  ;;  %v9250_v48 = vshrl.u32 %v9149_v10, 16  ;;  %v8995_v9 = vrot.slane %v8993_v44, 4  ;;  %v8998_v24 = vrot.slane %v8996_v32, 5 }
 0xcd9   : > { %v9243_v8 = vrot.slane %v9241_v43, 5  ;;  %10859 = vmatmul.bf16.vlgmr.msra.gmra.mxu0 %v14040_v14  ;;  %v9232_v13 = vshrl.u32 %v9147_v56, 16  ;;  %v9235_v10 = vshll.u32 %v9147_v56, 16  ;;  %v14083_v14 = vld [vmem:[%s23179_s16 + $0x68] sm:$0xf] }
 0xcda   : > { %10984 = vmatpush.bf16.msra.mxu2 %v9279_v19  ;;  %v8842_v36 = vunpack.c.l.b16 %v8795_v47  ;;  %v8889_v22 = vunpack.c.h.b16 %v8795_v47  ;;  %v9252_v57 = vrot.slane %v9250_v48, 5  ;;  %v8999_v45 = vor.u32 %v8998_v24, %v8995_v9 }
 0xcdb   : > { %v23270_v47 = vrot.slane %v21066_v39, 1  ;;  %v9247_v32 = vor.u32 %v9246_v26, %v9243_v8  ;;  %v9234_v43 = vrot.slane %v9232_v13, 5  ;;  %v9237_v35 = vrot.slane %v9235_v10, 6  ;;  %v15304_v8 = vld [vmem:[%s23179_s16 + $0x104] sm:$0xf0] }
 0xcdc   : > { %v8854_v37 = vpack.c.b16 %v8842_v36, %v8842_v36  ;;  %v8901_v0 = vpack.c.b16 %v8889_v22, %v8889_v22  ;;  %v9256_v19 = vor.u32 %v9255_v4, %v9252_v57  ;;  %v14029_v36 = vld [vmem:[%s23179_s16 + $0x18] sm:$0xf0]  ;;  %v9223_v22 = vshrl.u32 %v9146_v42, 16  ;;  %v14059_v4 = vld [vmem:[%s23179_s16 + $0x38] sm:$0xf] }
 0xcdd   : > { %v9000_v40 = vsel %vm8902_vm5, %v21326_v60, %v8999_v45  ;;  %v9238_v52 = vor.u32 %v9237_v35, %v9234_v43  ;;  %v15292_v60 = vld [vmem:[%s23179_s16 + $0xa4] sm:$0xf0]  ;;  %v15289_v26 = vld [vmem:[%s23179_s16 + $0x94] sm:$0xf]  ;;  %v15296_v13 = vld [vmem:[%s23179_s16 + $0xcc] sm:$0xf] }
 0xcde   : > { %10985 = vmatpush.bf16.msra.mxu2 %v9102_v6  ;;  %v9002_v55 = vshrl.u32 %v8901_v0, 16  ;;  %v9005_v50 = vshll.u32 %v8901_v0, 16  ;;  %v9271_v18 = vsel %vm21363_vm8, %v8854_v37, %v21204_v62  ;;  %v8839_v62 = vunpack.c.l.b16 %v21315_v15  ;;  %v14133_v10 = vld [vmem:[%s23179_s16 + $0xe0] sm:$0xf0]  ;;  %v15301_v35 = vld [vmem:[%s23179_s16 + $0xf4] sm:$0xf] }
 0xcdf   : > { %v8613_v34 = vpop.f32.mrf.mxu3  ;;  %10599 = vmatpush.bf16.msra.mxu3 %v9271_v18  ;;  %v8837_v15 = vunpack.c.l.b16 %v21280_v58  ;;  %v15271_v58 = vld [vmem:[%s23179_s16 + $0x4] sm:$0xf]  ;;  %v9226_v6 = vshll.u32 %v9146_v42, 16  ;;  %v9257_v39 = vsel %vm9150_vm4, %v9247_v32, %v9256_v19  ;;  %v9225_v37 = vrot.slane %v9223_v22, 5  ;;  %v15277_v18 = vld [vmem:[%s23179_s16 + $0x34] sm:$0xf] }
 0xce0   : > { %v9004_v17 = vrot.slane %v9002_v55, 4  ;;  %v9007_v1 = vrot.slane %v9005_v50, 5  ;;  %v8852_v44 = vpack.c.b16 %v8839_v62, %v8838_v46  ;;  %v14032_v51 = vor.u32 %v15271_v58, %v14029_v36  ;;  %v15283_v34 = vld [vmem:[%s23179_s16 + $0x64] sm:$0xf]  ;;  %v14147_v62 = vld [vmem:[%s23179_s16 + $0xf0] sm:$0xf] }
 0xce1   : > { %v8851_v5 = vpack.c.b16 %v8837_v15, %v8836_v12  ;;  %v10465_v48 = vsel %vm10463_vm9, %v9257_v39, 0  ;;  %v9228_v0 = vrot.slane %v9226_v6, 6  ;;  %v9248_v53 = vsel %vm9150_vm4, %v9238_v52, %v9247_v32  ;;  %v15287_v46 = vld [vmem:[%s23179_s16 + $0x7c] sm:$0xf0]  ;;  %v15310_v19 = vld [vmem:[%s23179_s16 + $0x134] sm:$0xf0] }
 0xce2   : > { %10986 = vmatpush.bf16.msra.mxu2 %v9100_v11  ;;  %v9008_v3 = vor.u32 %v9007_v1, %v9004_v17  ;;  %v14100_v11 = vor.u32 %v15292_v60, %v14099_v49  ;;  %v15281_v17 = vld [vmem:[%s23179_s16 + $0x4c] sm:$0xf0]  ;;  %v14084_v42 = vor.u32 %v15287_v46, %v14083_v14  ;;  %v14171_v15 = vld [vmem:[%s23179_s16 + $0x120] sm:$0xf]  ;;  %v14107_v12 = vld [vmem:[%s23179_s16 + $0x98] sm:$0xf] }
 0xce3   : > { %10600 = vmatpush.bf16.msra.mxu3 %v8853_v63  ;;  %v9229_v9 = vor.u32 %v9228_v0, %v9225_v37  ;;  %v14060_v1 = vor.u32 %v15281_v17, %v14059_v4  ;;  %v14148_v63 = vor.u32 %v15304_v8, %v14147_v62  ;;  %v15293_v58 = vld [vmem:[%s23179_s16 + $0xac] sm:$0xf0]  ;;  %v15316_v6 = vld [vmem:[%s23179_s16 + $0x164] sm:$0xf0]  ;;  %v15299_v37 = vld [vmem:[%s23179_s16 + $0xdc] sm:$0xf0] }
 0xce4   : > { %v9009_v28 = vsel %vm8902_vm5, %v8999_v45, %v9008_v3  ;;  %v14101_v3 = vld [vmem:[%s23179_s16 + $0xa8] sm:$0xf0]  ;;  %v14108_v36 = vor.u32 %v15293_v58, %v14107_v12  ;;  %v14195_v22 = vld [vmem:[%s23179_s16 + $0x150] sm:$0xf]  ;;  %v14219_v49 = vld [vmem:[%s23179_s16 + $0x180] sm:$0xf] }
 0xce5   : > { %10485 = vmatmul.bf16.gmra.mxu2 %v14076_v41  ;;  %v9275_v25 = vsel %vm9079_vm3, %v9009_v28, %v23270_v47  ;;  %v9239_v55 = vsel %vm9150_vm4, %v9229_v9, %v9238_v52  ;;  %v9230_v50 = vsel %vm9150_vm4, %v21240_v20, %v9229_v9  ;;  %v15275_v20 = vld [vmem:[%s23179_s16 + $0x1c] sm:$0xf0]  ;;  %v15290_v41 = vld [vmem:[%s23179_s16 + $0x9c] sm:$0xf]  ;;  %v14104_v45 = vor.u32 %v15289_v26, %v14101_v3  ;;  %v14131_v52 = vld [vmem:[%s23179_s16 + $0xc8] sm:$0xf] }
 0xce6   : > { %10724 = vmatpush.bf16.msra.mxu1 %v9275_v25  ;;  %v14112_v16 = vor.u32 %v15290_v41, %v14109_v27  ;;  %v14172_v28 = vor.u32 %v15310_v19, %v14171_v15  ;;  %v14136_v47 = vor.u32 %v15296_v13, %v14133_v10  ;;  %v15295_v25 = vld [vmem:[%s23179_s16 + $0xc4] sm:$0xf]  ;;  %v14196_v39 = vor.u32 %v15316_v6, %v14195_v22  ;;  %v15322_v60 = vld [vmem:[%s23179_s16 + $0x194] sm:$0xf0]  ;;  %v15308_v9 = vld [vmem:[%s23179_s16 + $0x12c] sm:$0xf] }
 0xce7   : > { %10601 = vmatpush.bf16.msra.mxu3 %v8852_v44  ;;  %v14125_v44 = vld [vmem:[%s23179_s16 + $0xd8] sm:$0xf0]  ;;  %v14132_v0 = vor.u32 %v15299_v37, %v14131_v52  ;;  %v15311_v4 = vld [vmem:[%s23179_s16 + $0x13c] sm:$0xf0]  ;;  %v15334_v62 = vld [vmem:[%s23179_s16 + $0x1f4] sm:$0xf0] }
 0xce8   : > { %v14128_v32 = vor.u32 %v15295_v25, %v14125_v44  ;;  %v15320_v27 = vld [vmem:[%s23179_s16 + $0x18c] sm:$0xf]  ;;  %v15319_v3 = vld [vmem:[%s23179_s16 + $0x184] sm:$0xf]  ;;  %v14203_v15 = vld [vmem:[%s23179_s16 + $0x158] sm:$0xf] }
 0xce9   : > { %v15317_v19 = vld [vmem:[%s23179_s16 + $0x16c] sm:$0xf0]  ;;  %v15340_v10 = vld [vmem:[%s23179_s16 + $0x224] sm:$0xf0]  ;;  %v14253_v22 = vld [vmem:[%s23179_s16 + $0x1d0] sm:$0xf0] }
 0xcea   : > { %10725 = vmatpush.bf16.msra.mxu1 %v9000_v40  ;;  %v15302_v40 = vld [vmem:[%s23179_s16 + $0xfc] sm:$0xf]  ;;  %v14291_v13 = vld [vmem:[%s23179_s16 + $0x210] sm:$0xf] }
 0xceb   : > { %10602 = vmatpush.bf16.msra.mxu3 %v8851_v5  ;;  %v14157_v5 = vld [vmem:[%s23179_s16 + $0x110] sm:$0xf0]  ;;  %v14292_v12 = vor.u32 %v15340_v10, %v14291_v13 }
 0xcec   : > { %v14160_v43 = vor.u32 %v15302_v40, %v14157_v5  ;;  %v9476_v40 = vpop.permute.xlu1 %9475  ;;  %v15325_v5 = vld [vmem:[%s23179_s16 + $0x1b4] sm:$0xf] }
 0xcee   : > { %10603 = vmatmul.bf16.vlgmr.msra.gmra.mxu3 %v14032_v51  ;;  %10726 = vmatpush.bf16.msra.mxu1 %v21332_v2  ;;  %v14061_v2 = vld [vmem:[%s23179_s16 + $0x50] sm:$0xf0]  ;;  %v14149_v51 = vld [vmem:[%s23179_s16 + $0x108] sm:$0xf0] }
 0xcef   : > { %11109 = vmatpush.bf16.msrb.mxu3 %v10465_v48  ;;  %v14064_v24 = vor.u32 %v15278_v59, %v14061_v2  ;;  %v14152_v48 = vor.u32 %v15301_v35, %v14149_v51  ;;  %v15307_v2 = vld [vmem:[%s23179_s16 + $0x124] sm:$0xf] }
 0xcf1   : > { %10864 = vmatmul.bf16.gmra.mxu0 %v14064_v24  ;;  %v14173_v24 = vld [vmem:[%s23179_s16 + $0x138] sm:$0xf0] }
 0xcf2   : > { %10727 = vmatpush.bf16.msra.mxu1 %v21299_v23  ;;  %v14056_v23 = vor.u32 %v15277_v18, %v14053_v61  ;;  %v14155_v18 = vld [vmem:[%s23179_s16 + $0xf8] sm:$0xf]  ;;  %v15305_v61 = vld [vmem:[%s23179_s16 + $0x10c] sm:$0xf0] }
 0xcf3   : > { %11110 = vmatpush.bf16.msrb.mxu3 %v9248_v53  ;;  %v14220_v53 = vor.u32 %v15322_v60, %v14219_v49  ;;  %v14227_v49 = vld [vmem:[%s23179_s16 + $0x188] sm:$0xf]  ;;  %v15323_v60 = vld [vmem:[%s23179_s16 + $0x19c] sm:$0xf0] }
 0xcf5   : > { %10490 = vmatmul.bf16.gmra.mxu2 %v14100_v11  ;;  %v14181_v11 = vld [vmem:[%s23179_s16 + $0x140] sm:$0xf0] }
 0xcf6   : > { %10728 = vmatpush.bf16.msra.mxu1 %v21266_v30  ;;  %v14036_v30 = vor.u32 %v15275_v20, %v14035_v21  ;;  %v14184_v59 = vor.u32 %v15308_v9, %v14181_v11  ;;  %v14243_v21 = vld [vmem:[%s23179_s16 + $0x1b0] sm:$0xf]  ;;  %v15328_v20 = vld [vmem:[%s23179_s16 + $0x1c4] sm:$0xf0]  ;;  %v14315_v11 = vld [vmem:[%s23179_s16 + $0x240] sm:$0xf] }
 0xcf7   : > { %11111 = vmatpush.bf16.msrb.mxu3 %v9239_v55 }
 0xcfa   : > { %10729 = vmatpush.bf16.msra.mxu1 %v21243_v54  ;;  %v15298_v54 = vld [vmem:[%s23179_s16 + $0xd4] sm:$0xf0] }
 0xcfb   : > { %11112 = vmatpush.bf16.msrb.mxu3 %v9230_v50  ;;  %v14124_v56 = vor.u32 %v15298_v54, %v14123_v7  ;;  %v14176_v50 = vor.u32 %v15307_v2, %v14173_v24  ;;  %v14244_v7 = vor.u32 %v15328_v20, %v14243_v21  ;;  %v15314_v54 = vld [vmem:[%s23179_s16 + $0x15c] sm:$0xf]  ;;  %v9481_v2 = vpop.permute.xlu2 %9480  ;;  %v15332_v20 = vld [vmem:[%s23179_s16 + $0x1ec] sm:$0xf] }
 0xcfe   : > { %10608 = vmatmul.bf16.gmra.mxu3 %v14056_v23  ;;  %10730 = vmatpush.bf16.msra.mxu1 %v21215_v38  ;;  %v14085_v38 = vld [vmem:[%s23179_s16 + $0x80] sm:$0xf0]  ;;  %v14156_v23 = vor.u32 %v15305_v61, %v14155_v18 }
 0xcff   : > { %11113 = vmatpush.bf16.msrb.mxu3 %v21249_v29  ;;  %v15284_v29 = vld [vmem:[%s23179_s16 + $0x6c] sm:$0xf] }
 0xd00   : > { %v14088_v33 = vor.u32 %v15284_v29, %v14085_v38  ;;  %v15313_v38 = vld [vmem:[%s23179_s16 + $0x154] sm:$0xf] }
 0xd01   : > { %10731 = vmatmul.bf16.vlgmr.msra.gmra.mxu1 %v14036_v30 }
 0xd02   : > { %10869 = vmatmul.bf16.gmra.mxu0 %v14088_v33  ;;  %v14197_v33 = vld [vmem:[%s23179_s16 + $0x168] sm:$0xf0] }
 0xd03   : > { %11114 = vmatpush.bf16.msrb.mxu3 %v21220_v31  ;;  %v14077_v31 = vld [vmem:[%s23179_s16 + $0x78] sm:$0xf0] }
 0xd04   : > { %v14080_v57 = vor.u32 %v15283_v34, %v14077_v31  ;;  %v14200_v31 = vor.u32 %v15313_v38, %v14197_v33  ;;  %v15331_v33 = vld [vmem:[%s23179_s16 + $0x1e4] sm:$0xf] }
 0xd05   : > { %10495 = vmatmul.bf16.gmra.mxu2 %v14124_v56  ;;  %v14205_v56 = vld [vmem:[%s23179_s16 + $0x170] sm:$0xf0] }
 0xd06   : > { %v14208_v29 = vor.u32 %v15314_v54, %v14205_v56 }
 0xd0e   : > { %10613 = vmatmul.bf16.gmra.mxu3 %v14080_v57  ;;  %v14179_v57 = vld [vmem:[%s23179_s16 + $0x128] sm:$0xf] }
 0xd0f   : > { %v14180_v17 = vor.u32 %v15311_v4, %v14179_v57 }
 0xd11   : > { %10736 = vmatmul.bf16.gmra.mxu1 %v14060_v1  ;;  %v14267_v1 = vld [vmem:[%s23179_s16 + $0x1e0] sm:$0xf] }
 0xd12   : > { %10874 = vmatmul.bf16.gmra.mxu0 %v14112_v16  ;;  %v14229_v16 = vld [vmem:[%s23179_s16 + $0x1a0] sm:$0xf0] }
 0xd13   : > { %v14232_v26 = vor.u32 %v15320_v27, %v14229_v16  ;;  %v15329_v27 = vld [vmem:[%s23179_s16 + $0x1cc] sm:$0xf0] }
 0xd15   : > { %10500 = vmatmul.bf16.gmra.mxu2 %v14148_v63  ;;  %v14268_v63 = vor.u32 %v15334_v62, %v14267_v1 }
 0xd1e   : > { %10618 = vmatmul.bf16.gmra.mxu3 %v14104_v45  ;;  %v14221_v45 = vld [vmem:[%s23179_s16 + $0x198] sm:$0xf0] }
 0xd21   : > { %10741 = vmatmul.bf16.gmra.mxu1 %v14084_v42  ;;  %v14224_v42 = vor.u32 %v15319_v3, %v14221_v45  ;;  %v15352_v3 = vld [vmem:[%s23179_s16 + $0x284] sm:$0xf0]  ;;  %v9491_v45 = vpop.permute.xlu1 %9490 }
 0xd22   : > { %10879 = vmatmul.bf16.gmra.mxu0 %v14136_v47  ;;  %v9471_v47 = vpop.permute.xlu0 %9470 }
 0xd25   : > { %10505 = vmatmul.bf16.gmra.mxu2 %v14172_v28  ;;  %v14204_v28 = vor.u32 %v15317_v19, %v14203_v15 }
 0xd2e   : > { %10623 = vmatmul.bf16.gmra.mxu3 %v14128_v32 }
 0xd31   : > { %10746 = vmatmul.bf16.gmra.mxu1 %v14108_v36  ;;  %v15326_v36 = vld [vmem:[%s23179_s16 + $0x1bc] sm:$0xf] }
 0xd32   : > { %10884 = vmatmul.bf16.gmra.mxu0 %v14160_v43  ;;  %v14245_v43 = vld [vmem:[%s23179_s16 + $0x1c8] sm:$0xf0] }
 0xd35   : > { %10510 = vmatmul.bf16.gmra.mxu2 %v14196_v39  ;;  %v14256_v39 = vor.u32 %v15326_v36, %v14253_v22  ;;  %v15337_v22 = vld [vmem:[%s23179_s16 + $0x214] sm:$0xf] }
 0xd3e   : > { %10628 = vmatmul.bf16.gmra.mxu3 %v14152_v48 }
 0xd41   : > { %10751 = vmatmul.bf16.gmra.mxu1 %v14132_v0  ;;  %v14248_v0 = vor.u32 %v15325_v5, %v14245_v43 }
 0xd42   : > { %10889 = vmatmul.bf16.gmra.mxu0 %v14184_v59  ;;  %v15346_v59 = vld [vmem:[%s23179_s16 + $0x254] sm:$0xf0] }
 0xd45   : > { %10515 = vmatmul.bf16.gmra.mxu2 %v14220_v53  ;;  %v14228_v53 = vor.u32 %v15323_v60, %v14227_v49  ;;  %v15335_v49 = vld [vmem:[%s23179_s16 + $0x1fc] sm:$0xf0] }
 0xd48   : > { %v10476_v55 = vpop.f32.mrf.mxu2 }
 0xd49   : > { %v10477_v25 = vadd.f32 %v10476_v55, %v9471_v47  ;;  %v15338_v47 = vld [vmem:[%s23179_s16 + $0x21c] sm:$0xf] }
 0xd4e   : > { %10633 = vmatmul.bf16.gmra.mxu3 %v14176_v50 }
 0xd50   : > { %v10478_v30 = vpop.f32.mrf.mxu2 }
 0xd51   : > { %10756 = vmatmul.bf16.gmra.mxu1 %v14156_v23  ;;  %v10479_v35 = vadd.f32 %v10478_v30, %v9476_v40  ;;  %v14316_v23 = vor.u32 %v15346_v59, %v14315_v11  ;;  %v14277_v30 = vld [vmem:[%s23179_s16 + $0x200] sm:$0xf0] }
 0xd52   : > { %10894 = vmatmul.bf16.gmra.mxu0 %v14208_v29  ;;  %v14280_v54 = vor.u32 %v15332_v20, %v14277_v30  ;;  %v9486_v29 = vpop.permute.xlu0 %9485  ;;  %v15344_v20 = vld [vmem:[%s23179_s16 + $0x24c] sm:$0xf]  ;;  %v14325_v30 = vld [vmem:[%s23179_s16 + $0x260] sm:$0xf0] }
 0xd55   : > { %10520 = vmatmul.bf16.gmra.mxu2 %v14244_v7 }
 0xd56   : > { %v10860_v41 = vpop.f32.mrf.mxu0 }
 0xd58   : > { %v10481_v34 = vpop.f32.mrf.mxu2 }
 0xd59   : > { %v10482_v55 = vadd.f32 %v10481_v34, %v9481_v2  ;;  %v14269_v34 = vld [vmem:[%s23179_s16 + $0x1f8] sm:$0xf0] }
 0xd5e   : > { %10638 = vmatmul.bf16.gmra.mxu3 %v14200_v31  ;;  %v10862_v46 = vpop.f32.mrf.mxu0 }
 0xd60   : > { %v21591_v8 = vpop.f32.mrf.mxu2 }
 0xd61   : > { %10761 = vmatmul.bf16.gmra.mxu1 %v14180_v17  ;;  %v10484_v31 = vadd.f32 %v21591_v8, %v9486_v29  ;;  %v15343_v29 = vld [vmem:[%s23179_s16 + $0x244] sm:$0xf] }
 0xd62   : > { %10899 = vmatmul.bf16.gmra.mxu0 %v14232_v26  ;;  %v14339_v26 = vld [vmem:[%s23179_s16 + $0x270] sm:$0xf] }
 0xd63   : > { %v14340_v13 = vor.u32 %v15352_v3, %v14339_v26  ;;  %v15364_v26 = vld [vmem:[%s23179_s16 + $0x2e4] sm:$0xf0] }
 0xd65   : > { %10525 = vmatmul.bf16.gmra.mxu2 %v14268_v63  ;;  %v14272_v63 = vor.u32 %v15331_v33, %v14269_v34 }
 0xd68   : > { %v21605_v14 = vpop.f32.mrf.mxu2 }
 0xd6e   : > { %10643 = vmatmul.bf16.gmra.mxu3 %v14224_v42  ;;  %v10865_v58 = vpop.f32.mrf.mxu0  ;;  %v10487_v42 = vadd.f32 %v21605_v14, %v9491_v45 }
 0xd70   : > { %v21619_v44 = vpop.f32.mrf.mxu2 }
 0xd71   : > { %v10604_v32 = vpop.f32.mrf.mxu3  ;;  %10766 = vmatmul.bf16.gmra.mxu1 %v14204_v28 }
 0xd72   : > { %v10605_v6 = vadd.f32 %v10604_v32, %v10477_v25  ;;  %10904 = vmatmul.bf16.gmra.mxu0 %v14256_v39  ;;  %v14301_v25 = vld [vmem:[%s23179_s16 + $0x230] sm:$0xf0] }
 0xd75   : > { %10530 = vmatmul.bf16.gmra.mxu2 %v14292_v12  ;;  %v14304_v12 = vor.u32 %v15338_v47, %v14301_v25 }
 0xd76   : > { %v21635_v52 = vpop.f32.mrf.mxu0 }
 0xd78   : > { %v21633_v51 = vpop.f32.mrf.mxu2 }
 0xd79   : > { %v10606_v48 = vpop.f32.mrf.mxu3 }
 0xd7a   : > { %v10607_v37 = vadd.f32 %v10606_v48, %v10479_v35 }
 0xd7e   : > { %10648 = vmatmul.bf16.gmra.mxu3 %v14248_v0  ;;  %v10732_v9 = vpop.f32.mrf.mxu1  ;;  %v14275_v0 = vld [vmem:[%s23179_s16 + $0x1e8] sm:$0xf] }
 0xd7f   : > { %v10733_v24 = vadd.f32 %v10732_v9, %v10605_v6  ;;  %v21653_v21 = vpop.f32.mrf.mxu0  ;;  %v14293_v6 = vld [vmem:[%s23179_s16 + $0x228] sm:$0xf0]  ;;  %v14276_v60 = vor.u32 %v15335_v49, %v14275_v0  ;;  %v9501_v9 = vpop.permute.xlu0 %9500 }
 0xd80   : > { %v21649_v50 = vpop.f32.mrf.mxu2  ;;  %v10492_v59 = vadd.f32 %v21633_v51, %v9501_v9  ;;  %v14328_v51 = vor.u32 %v15344_v20, %v14325_v30  ;;  %v15370_v9 = vld [vmem:[%s23179_s16 + $0x314] sm:$0xf0] }
 0xd81   : > { %v21651_v18 = vadd.f32 %v10860_v41, %v10733_v24  ;;  %v10609_v61 = vpop.f32.mrf.mxu3  ;;  %10771 = vmatmul.bf16.gmra.mxu1 %v14228_v53  ;;  %v14251_v41 = vld [vmem:[%s23179_s16 + $0x1b8] sm:$0xf] }
 0xd82   : > { %v10610_v7 = vadd.f32 %v10609_v61, %v10482_v55  ;;  %10909 = vmatmul.bf16.gmra.mxu0 %v14280_v54  ;;  %v14252_v16 = vor.u32 %v15329_v27, %v14251_v41  ;;  %v15358_v53 = vld [vmem:[%s23179_s16 + $0x2b4] sm:$0xf0] }
 0xd83   : > { %v14299_v27 = vld [vmem:[%s23179_s16 + $0x218] sm:$0xf] }
 0xd85   : > { %10535 = vmatmul.bf16.gmra.mxu2 %v14316_v23 }
 0xd86   : > { %v10734_v56 = vpop.f32.mrf.mxu1 }
 0xd87   : > { %v10735_v38 = vadd.f32 %v10734_v56, %v10607_v37  ;;  %v21672_v1 = vpop.f32.mrf.mxu0  ;;  %v14296_v37 = vor.u32 %v15337_v22, %v14293_v6  ;;  %v15349_v22 = vld [vmem:[%s23179_s16 + $0x274] sm:$0xf]  ;;  %v14341_v6 = vld [vmem:[%s23179_s16 + $0x288] sm:$0xf0] }
 0xd88   : > { %v21668_v57 = vpop.f32.mrf.mxu2 }
 0xd89   : > { %v21670_v4 = vadd.f32 %v10862_v46, %v10735_v38  ;;  %v10611_v17 = vpop.f32.mrf.mxu3  ;;  %v14317_v38 = vld [vmem:[%s23179_s16 + $0x258] sm:$0xf0] }
 0xd8a   : > { %v10612_v62 = vadd.f32 %v10611_v17, %v10484_v31  ;;  %v14320_v41 = vor.u32 %v15343_v29, %v14317_v38 }
 0xd8e   : > { %10653 = vmatmul.bf16.gmra.mxu3 %v14272_v63  ;;  %v10737_v8 = vpop.f32.mrf.mxu1 }
 0xd8f   : > { %v10738_v46 = vadd.f32 %v10737_v8, %v10610_v7  ;;  %v21691_v10 = vpop.f32.mrf.mxu0 }
 0xd90   : > { %v21687_v15 = vpop.f32.mrf.mxu2 }
 0xd91   : > { %v21689_v19 = vadd.f32 %v10865_v58, %v10738_v46  ;;  %v10614_v28 = vpop.f32.mrf.mxu3  ;;  %10776 = vmatmul.bf16.gmra.mxu1 %v14252_v16  ;;  %v9496_v58 = vpop.permute.xlu2 %9495  ;;  %v15341_v16 = vld [vmem:[%s23179_s16 + $0x22c] sm:$0xf0] }
 0xd92   : > { %v10615_v32 = vadd.f32 %v10614_v28, %v10487_v42  ;;  %10914 = vmatmul.bf16.gmra.mxu0 %v14304_v12  ;;  %v10489_v39 = vadd.f32 %v21619_v44, %v9496_v58  ;;  %v14300_v8 = vor.u32 %v15341_v16, %v14299_v27  ;;  %v14349_v12 = vld [vmem:[%s23179_s16 + $0x290] sm:$0xf0] }
 0xd95   : > { %10540 = vmatmul.bf16.gmra.mxu2 %v14340_v13 }
 0xd96   : > { %v10739_v14 = vpop.f32.mrf.mxu1 }
 0xd97   : > { %v10740_v36 = vadd.f32 %v10739_v14, %v10612_v62  ;;  %v21711_v35 = vpop.f32.mrf.mxu0 }
 0xd98   : > { %v21706_v40 = vpop.f32.mrf.mxu2 }
 0xd99   : > { %v21709_v5 = vadd.f32 %v21635_v52, %v10740_v36  ;;  %v10616_v43 = vpop.f32.mrf.mxu3  ;;  %v14363_v52 = vld [vmem:[%s23179_s16 + $0x2a0] sm:$0xf]  ;;  %v9511_v3 = vpop.permute.xlu2 %9510 }
 0xd9a   : > { %v10617_v48 = vadd.f32 %v10616_v43, %v10489_v39  ;;  %v14364_v61 = vor.u32 %v15358_v53, %v14363_v52  ;;  %v10497_v46 = vadd.f32 %v21668_v57, %v9511_v3  ;;  %v15347_v52 = vld [vmem:[%s23179_s16 + $0x25c] sm:$0xf0]  ;;  %v15353_v3 = vld [vmem:[%s23179_s16 + $0x28c] sm:$0xf0] }
 0xd9e   : > { %10658 = vmatmul.bf16.gmra.mxu3 %v14296_v37  ;;  %v10742_v44 = vpop.f32.mrf.mxu1 }
 0xd9f   : > { %v10743_v11 = vadd.f32 %v10742_v44, %v10615_v32  ;;  %v21731_v23 = vpop.f32.mrf.mxu0  ;;  %v15350_v32 = vld [vmem:[%s23179_s16 + $0x27c] sm:$0xf]  ;;  %v14323_v44 = vld [vmem:[%s23179_s16 + $0x248] sm:$0xf] }
 0xda0   : > { %v21726_v2 = vpop.f32.mrf.mxu2  ;;  %v14352_v57 = vor.u32 %v15350_v32, %v14349_v12  ;;  %v14324_v53 = vor.u32 %v15347_v52, %v14323_v44 }
 0xda1   : > { %v21729_v24 = vadd.f32 %v21653_v21, %v10743_v11  ;;  %v10619_v55 = vpop.f32.mrf.mxu3  ;;  %10781 = vmatmul.bf16.gmra.mxu1 %v14276_v60  ;;  %v9506_v21 = vpop.permute.xlu1 %9505  ;;  %v14344_v60 = vor.u32 %v15349_v22, %v14341_v6  ;;  %v14397_v22 = vld [vmem:[%s23179_s16 + $0x2f0] sm:$0xf0] }
 0xda2   : > { %v10620_v7 = vadd.f32 %v10619_v55, %v10492_v59  ;;  %10919 = vmatmul.bf16.gmra.mxu0 %v14328_v51  ;;  %v10494_v33 = vadd.f32 %v21649_v50, %v9506_v21  ;;  %v14373_v21 = vld [vmem:[%s23179_s16 + $0x2c0] sm:$0xf0] }
 0xda5   : > { %10545 = vmatmul.bf16.gmra.mxu2 %v14364_v61 }
 0xda6   : > { %v10744_v54 = vpop.f32.mrf.mxu1 }
 0xda7   : > { %v10745_v56 = vadd.f32 %v10744_v54, %v10617_v48  ;;  %v21751_v62 = vpop.f32.mrf.mxu0  ;;  %v15356_v54 = vld [vmem:[%s23179_s16 + $0x2ac] sm:$0xf] }
 0xda8   : > { %v21746_v34 = vpop.f32.mrf.mxu2 }
 0xda9   : > { %v21749_v31 = vadd.f32 %v21672_v1, %v10745_v56  ;;  %v10621_v17 = vpop.f32.mrf.mxu3  ;;  %v14387_v1 = vld [vmem:[%s23179_s16 + $0x2d0] sm:$0xf]  ;;  %v9521_v11 = vpop.permute.xlu1 %9520 }
 0xdaa   : > { %v10622_v63 = vadd.f32 %v10621_v17, %v10494_v33  ;;  %v14388_v47 = vor.u32 %v15364_v26, %v14387_v1  ;;  %v10502_v55 = vadd.f32 %v21706_v40, %v9521_v11  ;;  %v14376_v40 = vor.u32 %v15356_v54, %v14373_v21  ;;  %v15355_v33 = vld [vmem:[%s23179_s16 + $0x2a4] sm:$0xf]  ;;  %v14365_v17 = vld [vmem:[%s23179_s16 + $0x2b8] sm:$0xf0]  ;;  %v14347_v26 = vld [vmem:[%s23179_s16 + $0x278] sm:$0xf] }
 0xdab   : > { %v14368_v1 = vor.u32 %v15355_v33, %v14365_v17  ;;  %v15368_v17 = vld [vmem:[%s23179_s16 + $0x30c] sm:$0xf] }
 0xdae   : > { %10663 = vmatmul.bf16.gmra.mxu3 %v14320_v41  ;;  %v10747_v50 = vpop.f32.mrf.mxu1 }
 0xdaf   : > { %v10748_v45 = vadd.f32 %v10747_v50, %v10620_v7  ;;  %v21771_v25 = vpop.f32.mrf.mxu0 }
 0xdb0   : > { %v21766_v42 = vpop.f32.mrf.mxu2 }
 0xdb1   : > { %v21769_v28 = vadd.f32 %v21691_v10, %v10748_v45  ;;  %v10624_v13 = vpop.f32.mrf.mxu3  ;;  %10786 = vmatmul.bf16.gmra.mxu1 %v14300_v8  ;;  %v9516_v10 = vpop.permute.xlu0 %9515  ;;  %v14348_v45 = vor.u32 %v15353_v3, %v14347_v26  ;;  %v15367_v26 = vld [vmem:[%s23179_s16 + $0x304] sm:$0xf]  ;;  %v14413_v3 = vld [vmem:[%s23179_s16 + $0x318] sm:$0xf0] }
 0xdb2   : > { %v10625_v14 = vadd.f32 %v10624_v13, %v10497_v46  ;;  %10924 = vmatmul.bf16.gmra.mxu0 %v14352_v57  ;;  %v10499_v39 = vadd.f32 %v21687_v15, %v9516_v10  ;;  %v15376_v46 = vld [vmem:[%s23179_s16 + $0x344] sm:$0xf0] }
 0xdb5   : > { %10550 = vmatmul.bf16.gmra.mxu2 %v14388_v47 }
 0xdb6   : > { %v10749_v58 = vpop.f32.mrf.mxu1 }
 0xdb7   : > { %v10750_v36 = vadd.f32 %v10749_v58, %v10622_v63  ;;  %v21791_v0 = vpop.f32.mrf.mxu0 }
 0xdb8   : > { %v21786_v43 = vpop.f32.mrf.mxu2 }
 0xdb9   : > { %v21789_v48 = vadd.f32 %v21711_v35, %v10750_v36  ;;  %v10626_v37 = vpop.f32.mrf.mxu3  ;;  %v14411_v35 = vld [vmem:[%s23179_s16 + $0x300] sm:$0xf]  ;;  %v9531_v13 = vpop.permute.xlu0 %9530  ;;  %v15362_v36 = vld [vmem:[%s23179_s16 + $0x2dc] sm:$0xf] }
 0xdba   : > { %v10627_v49 = vadd.f32 %v10626_v37, %v10499_v39  ;;  %v14412_v7 = vor.u32 %v15370_v9, %v14411_v35  ;;  %v10507_v32 = vadd.f32 %v21746_v34, %v9531_v13  ;;  %v14400_v34 = vor.u32 %v15362_v36, %v14397_v22  ;;  %v15388_v22 = vld [vmem:[%s23179_s16 + $0x3a4] sm:$0xf0] }
 0xdbe   : > { %10668 = vmatmul.bf16.gmra.mxu3 %v14344_v60  ;;  %v10752_v15 = vpop.f32.mrf.mxu1  ;;  %v14389_v60 = vld [vmem:[%s23179_s16 + $0x2e8] sm:$0xf0] }
 0xdbf   : > { %v10753_v59 = vadd.f32 %v10752_v15, %v10625_v14  ;;  %v21811_v51 = vpop.f32.mrf.mxu0 }
 0xdc0   : > { %v21806_v61 = vpop.f32.mrf.mxu2 }
 0xdc1   : > { %v21809_v20 = vadd.f32 %v21731_v23, %v10753_v59  ;;  %v10629_v30 = vpop.f32.mrf.mxu3  ;;  %10791 = vmatmul.bf16.gmra.mxu1 %v14324_v53  ;;  %v9526_v23 = vpop.permute.xlu2 %9525  ;;  %v14371_v59 = vld [vmem:[%s23179_s16 + $0x2a8] sm:$0xf] }
 0xdc2   : > { %v10630_v56 = vadd.f32 %v10629_v30, %v10502_v55  ;;  %10929 = vmatmul.bf16.gmra.mxu0 %v14376_v40  ;;  %v10504_v63 = vadd.f32 %v21726_v2, %v9526_v23  ;;  %v15359_v55 = vld [vmem:[%s23179_s16 + $0x2bc] sm:$0xf0] }
 0xdc3   : > { %v14372_v30 = vor.u32 %v15359_v55, %v14371_v59 }
 0xdc5   : > { %10555 = vmatmul.bf16.gmra.mxu2 %v14412_v7  ;;  %v15382_v7 = vld [vmem:[%s23179_s16 + $0x374] sm:$0xf0] }
 0xdc6   : > { %v10754_v29 = vpop.f32.mrf.mxu1 }
 0xdc7   : > { %v10755_v38 = vadd.f32 %v10754_v29, %v10627_v49  ;;  %v21831_v8 = vpop.f32.mrf.mxu0  ;;  %v15361_v49 = vld [vmem:[%s23179_s16 + $0x2d4] sm:$0xf] }
 0xdc8   : > { %v21826_v41 = vpop.f32.mrf.mxu2  ;;  %v14392_v11 = vor.u32 %v15361_v49, %v14389_v60 }
 0xdc9   : > { %v21829_v27 = vadd.f32 %v21751_v62, %v10755_v38  ;;  %v10631_v16 = vpop.f32.mrf.mxu3  ;;  %v14435_v62 = vld [vmem:[%s23179_s16 + $0x330] sm:$0xf]  ;;  %v9541_v54 = vpop.permute.xlu2 %9540 }
 0xdca   : > { %v10632_v50 = vadd.f32 %v10631_v16, %v10504_v63  ;;  %v14436_v58 = vor.u32 %v15376_v46, %v14435_v62  ;;  %v14421_v63 = vld [vmem:[%s23179_s16 + $0x320] sm:$0xf0] }
 0xdce   : > { %10673 = vmatmul.bf16.gmra.mxu3 %v14368_v1  ;;  %v10757_v2 = vpop.f32.mrf.mxu1 }
 0xdcf   : > { %v10758_v47 = vadd.f32 %v10757_v2, %v10630_v56  ;;  %v21851_v10 = vpop.f32.mrf.mxu0  ;;  %v10512_v56 = vadd.f32 %v21786_v43, %v9541_v54  ;;  %v14424_v43 = vor.u32 %v15368_v17, %v14421_v63  ;;  %v14419_v17 = vld [vmem:[%s23179_s16 + $0x308] sm:$0xf]  ;;  %v15371_v63 = vld [vmem:[%s23179_s16 + $0x31c] sm:$0xf0] }
 0xdd0   : > { %v21846_v12 = vpop.f32.mrf.mxu2 }
 0xdd1   : > { %v21849_v14 = vadd.f32 %v21771_v25, %v10758_v47  ;;  %v10634_v57 = vpop.f32.mrf.mxu3  ;;  %10796 = vmatmul.bf16.gmra.mxu1 %v14348_v45  ;;  %v9536_v25 = vpop.permute.xlu1 %9535 }
 0xdd2   : > { %v10635_v6 = vadd.f32 %v10634_v57, %v10507_v32  ;;  %10934 = vmatmul.bf16.gmra.mxu0 %v14400_v34  ;;  %v10509_v44 = vadd.f32 %v21766_v42, %v9536_v25  ;;  %v14416_v32 = vor.u32 %v15367_v26, %v14413_v3  ;;  %v14395_v57 = vld [vmem:[%s23179_s16 + $0x2d8] sm:$0xf] }
 0xdd5   : > { %10560 = vmatmul.bf16.gmra.mxu2 %v14436_v58  ;;  %v15365_v58 = vld [vmem:[%s23179_s16 + $0x2ec] sm:$0xf0] }
 0xdd6   : > { %v10759_v39 = vpop.f32.mrf.mxu1  ;;  %v14396_v36 = vor.u32 %v15365_v58, %v14395_v57  ;;  %v14469_v57 = vld [vmem:[%s23179_s16 + $0x380] sm:$0xf0] }
 0xdd7   : > { %v10760_v37 = vadd.f32 %v10759_v39, %v10632_v50  ;;  %v21871_v35 = vpop.f32.mrf.mxu0 }
 0xdd8   : > { %v21866_v52 = vpop.f32.mrf.mxu2 }
 0xdd9   : > { %v21869_v53 = vadd.f32 %v21791_v0, %v10760_v37  ;;  %v10636_v15 = vpop.f32.mrf.mxu3  ;;  %v14459_v0 = vld [vmem:[%s23179_s16 + $0x360] sm:$0xf] }
 0xdda   : > { %v10637_v9 = vadd.f32 %v10636_v15, %v10509_v44  ;;  %v14460_v38 = vor.u32 %v15382_v7, %v14459_v0  ;;  %v15374_v15 = vld [vmem:[%s23179_s16 + $0x33c] sm:$0xf] }
 0xdde   : > { %10678 = vmatmul.bf16.gmra.mxu3 %v14392_v11  ;;  %v10762_v42 = vpop.f32.mrf.mxu1 }
 0xddf   : > { %v10763_v21 = vadd.f32 %v10762_v42, %v10635_v6  ;;  %v21891_v33 = vpop.f32.mrf.mxu0  ;;  %v9551_v6 = vpop.permute.xlu1 %9550  ;;  %v14437_v42 = vld [vmem:[%s23179_s16 + $0x348] sm:$0xf0] }
 0xde0   : > { %v21886_v40 = vpop.f32.mrf.mxu2  ;;  %v10517_v39 = vadd.f32 %v21826_v41, %v9551_v6 }
 0xde1   : > { %v21889_v29 = vadd.f32 %v21811_v51, %v10763_v21  ;;  %v10639_v23 = vpop.f32.mrf.mxu3  ;;  %10801 = vmatmul.bf16.gmra.mxu1 %v14372_v30  ;;  %v9546_v51 = vpop.permute.xlu0 %9545  ;;  %v15373_v30 = vld [vmem:[%s23179_s16 + $0x334] sm:$0xf] }
 0xde2   : > { %v10640_v16 = vadd.f32 %v10639_v23, %v10512_v56  ;;  %10939 = vmatmul.bf16.gmra.mxu0 %v14424_v43  ;;  %v10514_v45 = vadd.f32 %v21806_v61, %v9546_v51  ;;  %v15394_v43 = vld [vmem:[%s23179_s16 + $0x3d4] sm:$0xf0] }
 0xde5   : > { %10565 = vmatmul.bf16.gmra.mxu2 %v14460_v38  ;;  %v14440_v38 = vor.u32 %v15373_v30, %v14437_v42 }
 0xde6   : > { %v10764_v50 = vpop.f32.mrf.mxu1 }
 0xde7   : > { %v10765_v1 = vadd.f32 %v10764_v50, %v10637_v9  ;;  %v21911_v13 = vpop.f32.mrf.mxu0  ;;  %v14445_v9 = vld [vmem:[%s23179_s16 + $0x350] sm:$0xf0] }
 0xde8   : > { %v21906_v2 = vpop.f32.mrf.mxu2  ;;  %v14448_v41 = vor.u32 %v15374_v15, %v14445_v9 }
 0xde9   : > { %v21909_v62 = vadd.f32 %v21831_v8, %v10765_v1  ;;  %v10641_v46 = vpop.f32.mrf.mxu3  ;;  %v14483_v8 = vld [vmem:[%s23179_s16 + $0x390] sm:$0xf]  ;;  %v9561_v50 = vpop.permute.xlu0 %9560 }
 0xdea   : > { %v10642_v47 = vadd.f32 %v10641_v46, %v10514_v45  ;;  %v14484_v60 = vor.u32 %v15388_v22, %v14483_v8  ;;  %v10522_v1 = vadd.f32 %v21866_v52, %v9561_v50  ;;  %v15379_v8 = vld [vmem:[%s23179_s16 + $0x364] sm:$0xf]  ;;  %v14461_v22 = vld [vmem:[%s23179_s16 + $0x378] sm:$0xf0]  ;;  %v15385_v50 = vld [vmem:[%s23179_s16 + $0x394] sm:$0xf] }
 0xdeb   : > { %v14464_v9 = vor.u32 %v15379_v8, %v14461_v22  ;;  %v15406_v8 = vld [vmem:[%s23179_s16 + $0x434] sm:$0xf0] }
 0xdee   : > { %10683 = vmatmul.bf16.gmra.mxu3 %v14416_v32  ;;  %v10767_v61 = vpop.f32.mrf.mxu1  ;;  %v15380_v32 = vld [vmem:[%s23179_s16 + $0x36c] sm:$0xf] }
 0xdef   : > { %v10768_v34 = vadd.f32 %v10767_v61, %v10640_v16  ;;  %v21931_v44 = vpop.f32.mrf.mxu0  ;;  %v14420_v16 = vor.u32 %v15371_v63, %v14419_v17  ;;  %v14472_v52 = vor.u32 %v15380_v32, %v14469_v57  ;;  %v15386_v63 = vld [vmem:[%s23179_s16 + $0x39c] sm:$0xf] }
 0xdf0   : > { %v21926_v25 = vpop.f32.mrf.mxu2 }
 0xdf1   : > { %v21929_v37 = vadd.f32 %v21851_v10, %v10768_v34  ;;  %v10644_v49 = vpop.f32.mrf.mxu3  ;;  %10806 = vmatmul.bf16.gmra.mxu1 %v14396_v36  ;;  %v9556_v10 = vpop.permute.xlu2 %9555 }
 0xdf2   : > { %v10645_v11 = vadd.f32 %v10644_v49, %v10517_v39  ;;  %10944 = vmatmul.bf16.gmra.mxu0 %v14448_v41  ;;  %v10519_v0 = vadd.f32 %v21846_v12, %v9556_v10  ;;  %v15377_v41 = vld [vmem:[%s23179_s16 + $0x34c] sm:$0xf0]  ;;  %v15400_v10 = vld [vmem:[%s23179_s16 + $0x404] sm:$0xf0] }
 0xdf5   : > { %10570 = vmatmul.bf16.gmra.mxu2 %v14484_v60 }
 0xdf6   : > { %v10769_v59 = vpop.f32.mrf.mxu1 }
 0xdf7   : > { %v10770_v55 = vadd.f32 %v10769_v59, %v10642_v47  ;;  %v21951_v56 = vpop.f32.mrf.mxu0 }
 0xdf8   : > { %v21946_v7 = vpop.f32.mrf.mxu2 }
 0xdf9   : > { %v21949_v54 = vadd.f32 %v21871_v35, %v10770_v55  ;;  %v10646_v21 = vpop.f32.mrf.mxu3  ;;  %v14507_v35 = vld [vmem:[%s23179_s16 + $0x3c0] sm:$0xf]  ;;  %v9571_v55 = vpop.permute.xlu2 %9570 }
 0xdfa   : > { %v10647_v23 = vadd.f32 %v10646_v21, %v10519_v0  ;;  %v14508_v46 = vor.u32 %v15394_v43, %v14507_v35  ;;  %v10527_v42 = vadd.f32 %v21906_v2, %v9571_v55 }
 0xdfe   : > { %10688 = vmatmul.bf16.gmra.mxu3 %v14440_v38  ;;  %v10772_v12 = vpop.f32.mrf.mxu1 }
 0xdff   : > { %v10773_v51 = vadd.f32 %v10772_v12, %v10645_v11  ;;  %v21971_v47 = vpop.f32.mrf.mxu0  ;;  %v14443_v11 = vld [vmem:[%s23179_s16 + $0x338] sm:$0xf] }
 0xe00   : > { %v21966_v26 = vpop.f32.mrf.mxu2  ;;  %v14444_v59 = vor.u32 %v15377_v41, %v14443_v11 }
 0xe01   : > { %v21969_v3 = vadd.f32 %v21891_v33, %v10773_v51  ;;  %v10649_v45 = vpop.f32.mrf.mxu3  ;;  %10811 = vmatmul.bf16.gmra.mxu1 %v14420_v16  ;;  %v9566_v33 = vpop.permute.xlu1 %9565  ;;  %v14493_v16 = vld [vmem:[%s23179_s16 + $0x3b0] sm:$0xf0]  ;;  %v14485_v51 = vld [vmem:[%s23179_s16 + $0x3a8] sm:$0xf0] }
 0xe02   : > { %v10650_v58 = vadd.f32 %v10649_v45, %v10522_v1  ;;  %10949 = vmatmul.bf16.gmra.mxu0 %v14472_v52  ;;  %v10524_v6 = vadd.f32 %v21886_v40, %v9566_v33  ;;  %v14496_v2 = vor.u32 %v15386_v63, %v14493_v16  ;;  %v14488_v52 = vor.u32 %v15385_v50, %v14485_v51  ;;  %v15383_v33 = vld [vmem:[%s23179_s16 + $0x37c] sm:$0xf0]  ;;  %v15389_v50 = vld [vmem:[%s23179_s16 + $0x3ac] sm:$0xf0] }
 0xe05   : > { %10575 = vmatmul.bf16.gmra.mxu2 %v14508_v46 }
 0xe06   : > { %v10774_v36 = vpop.f32.mrf.mxu1 }
 0xe07   : > { %v10775_v61 = vadd.f32 %v10774_v36, %v10647_v23  ;;  %v21991_v60 = vpop.f32.mrf.mxu0  ;;  %v14467_v36 = vld [vmem:[%s23179_s16 + $0x368] sm:$0xf] }
 0xe08   : > { %v21986_v34 = vpop.f32.mrf.mxu2 }
 0xe09   : > { %v21989_v39 = vadd.f32 %v21911_v13, %v10775_v61  ;;  %v10651_v49 = vpop.f32.mrf.mxu3  ;;  %v14531_v13 = vld [vmem:[%s23179_s16 + $0x3f0] sm:$0xf]  ;;  %v14468_v61 = vor.u32 %v15383_v33, %v14467_v36  ;;  %v9581_v22 = vpop.permute.xlu1 %9580 }
 0xe0a   : > { %v10652_v15 = vadd.f32 %v10651_v49, %v10524_v6  ;;  %v14532_v38 = vor.u32 %v15400_v10, %v14531_v13  ;;  %v10532_v49 = vadd.f32 %v21946_v7, %v9581_v22  ;;  %v14517_v13 = vld [vmem:[%s23179_s16 + $0x3e0] sm:$0xf0]  ;;  %v14541_v22 = vld [vmem:[%s23179_s16 + $0x410] sm:$0xf0] }
 0xe0e   : > { %10693 = vmatmul.bf16.gmra.mxu3 %v14464_v9  ;;  %v10777_v40 = vpop.f32.mrf.mxu1 }
 0xe0f   : > { %v10778_v30 = vadd.f32 %v10777_v40, %v10650_v58  ;;  %v22011_v17 = vpop.f32.mrf.mxu0  ;;  %v15392_v40 = vld [vmem:[%s23179_s16 + $0x3cc] sm:$0xf] }
 0xe10   : > { %v22006_v0 = vpop.f32.mrf.mxu2  ;;  %v14520_v7 = vor.u32 %v15392_v40, %v14517_v13  ;;  %v14533_v40 = vld [vmem:[%s23179_s16 + $0x408] sm:$0xf0] }
 0xe11   : > { %v22009_v21 = vadd.f32 %v21931_v44, %v10778_v30  ;;  %v10654_v23 = vpop.f32.mrf.mxu3  ;;  %10816 = vmatmul.bf16.gmra.mxu1 %v14444_v59  ;;  %v9576_v44 = vpop.permute.xlu0 %9575 }
 0xe12   : > { %v10655_v12 = vadd.f32 %v10654_v23, %v10527_v42  ;;  %10954 = vmatmul.bf16.gmra.mxu0 %v14496_v2  ;;  %v10529_v1 = vadd.f32 %v21926_v25, %v9576_v44  ;;  %v15391_v42 = vld [vmem:[%s23179_s16 + $0x3c4] sm:$0xf]  ;;  %v14509_v23 = vld [vmem:[%s23179_s16 + $0x3d8] sm:$0xf0] }
 0xe13   : > { %v14512_v44 = vor.u32 %v15391_v42, %v14509_v23  ;;  %v14515_v23 = vld [vmem:[%s23179_s16 + $0x3c8] sm:$0xf] }
 0xe15   : > { %10580 = vmatmul.bf16.gmra.mxu2 %v14532_v38 }
 0xe16   : > { %v10779_v35 = vpop.f32.mrf.mxu1 }
 0xe17   : > { %v10780_v43 = vadd.f32 %v10779_v35, %v10652_v15  ;;  %v22031_v57 = vpop.f32.mrf.mxu0 }
 0xe18   : > { %v22026_v45 = vpop.f32.mrf.mxu2 }
 0xe19   : > { %v22029_v46 = vadd.f32 %v21951_v56, %v10780_v43  ;;  %v10656_v32 = vpop.f32.mrf.mxu3  ;;  %v14555_v56 = vld [vmem:[%s23179_s16 + $0x420] sm:$0xf]  ;;  %v14491_v43 = vld [vmem:[%s23179_s16 + $0x398] sm:$0xf] }
 0xe1a   : > { %v10657_v58 = vadd.f32 %v10656_v32, %v10529_v1  ;;  %v14556_v41 = vor.u32 %v15406_v8, %v14555_v56  ;;  %v9591_v32 = vpop.permute.xlu0 %9590  ;;  %v15398_v8 = vld [vmem:[%s23179_s16 + $0x3fc] sm:$0xf] }
 0xe1e   : > { %10698 = vmatmul.bf16.gmra.mxu3 %v14488_v52  ;;  %v10782_v25 = vpop.f32.mrf.mxu1  ;;  %v10537_v52 = vadd.f32 %v21986_v34, %v9591_v32  ;;  %v14544_v34 = vor.u32 %v15398_v8, %v14541_v22  ;;  %v15403_v22 = vld [vmem:[%s23179_s16 + $0x424] sm:$0xf] }
 0xe1f   : > { %v10783_v6 = vadd.f32 %v10782_v25, %v10655_v12  ;;  %v22051_v59 = vpop.f32.mrf.mxu0 }
 0xe20   : > { %v22046_v15 = vpop.f32.mrf.mxu2 }
 0xe21   : > { %v22049_v9 = vadd.f32 %v21971_v47, %v10783_v6  ;;  %v10659_v11 = vpop.f32.mrf.mxu3  ;;  %10821 = vmatmul.bf16.gmra.mxu1 %v14468_v61  ;;  %v9586_v47 = vpop.permute.xlu2 %9585 }
 0xe22   : > { %v10660_v10 = vadd.f32 %v10659_v11, %v10532_v49  ;;  %10959 = vmatmul.bf16.gmra.mxu0 %v14520_v7  ;;  %v10534_v38 = vadd.f32 %v21966_v26, %v9586_v47  ;;  %v22082_v26 = vld [vmem:[%s23179_s16 + $0x450] sm:$0xff] }
 0xe23   : > { %v10120_v51 = vunpack.c.l.b16 %v22082_v26 }
 0xe25   : > { %10585 = vmatmul.bf16.gmra.mxu2 %v14556_v41  ;;  %v10264_v25 = vpack.c.b16 %v10120_v51, %v10120_v51  ;;  %v15397_v41 = vld [vmem:[%s23179_s16 + $0x3f4] sm:$0xf] }
 0xe26   : > { %v10784_v55 = vpop.f32.mrf.mxu1  ;;  %v14536_v42 = vor.u32 %v15397_v41, %v14533_v40 }
 0xe27   : > { %v10785_v30 = vadd.f32 %v10784_v55, %v10657_v58  ;;  %v22071_v2 = vpop.f32.mrf.mxu0 }
 0xe28   : > { %v22066_v63 = vpop.f32.mrf.mxu2 }
 0xe29   : > { %v22069_v16 = vadd.f32 %v21991_v60, %v10785_v30  ;;  %v10661_v12 = vpop.f32.mrf.mxu3  ;;  %v14492_v60 = vor.u32 %v15389_v50, %v14491_v43 }
 0xe2a   : > { %v10662_v35 = vadd.f32 %v10661_v12, %v10534_v38  ;;  %v15395_v38 = vld [vmem:[%s23179_s16 + $0x3dc] sm:$0xf0] }
 0xe2e   : > { %10703 = vmatmul.bf16.gmra.mxu3 %v14512_v44  ;;  %v10787_v1 = vpop.f32.mrf.mxu1  ;;  %v9601_v44 = vpop.permute.xlu2 %9600 }
 0xe2f   : > { %v10788_v58 = vadd.f32 %v10787_v1, %v10660_v10  ;;  %v22091_v56 = vpop.f32.mrf.mxu0  ;;  %v10542_v50 = vadd.f32 %v22026_v45, %v9601_v44 }
 0xe30   : > { %v22086_v36 = vpop.f32.mrf.mxu2 }
 0xe31   : > { %v22089_v33 = vadd.f32 %v22011_v17, %v10788_v58  ;;  %v10664_v61 = vpop.f32.mrf.mxu3  ;;  %10826 = vmatmul.bf16.gmra.mxu1 %v14492_v60  ;;  %v9596_v17 = vpop.permute.xlu1 %9595 }
 0xe32   : > { %v10665_v6 = vadd.f32 %v10664_v61, %v10537_v52  ;;  %10964 = vmatmul.bf16.gmra.mxu0 %v14544_v34  ;;  %v10539_v13 = vadd.f32 %v22006_v0, %v9596_v17  ;;  %v14516_v0 = vor.u32 %v15395_v38, %v14515_v23  ;;  %v15404_v52 = vld [vmem:[%s23179_s16 + $0x42c] sm:$0xf]  ;;  %v14565_v61 = vld [vmem:[%s23179_s16 + $0x440] sm:$0xf0]  ;;  %v15282_v38 = vld [vmem:[%s23179_s16 + $0x54] sm:$0xf0] }
 0xe33   : > { %v14568_v8 = vor.u32 %v15404_v52, %v14565_v61 }
 0xe35   : > { %10590 = vmatmul.bf16.gmra.mxu2 %v10264_v25 }
 0xe36   : > { %v10789_v49 = vpop.f32.mrf.mxu1 }
 0xe37   : > { %v10790_v11 = vadd.f32 %v10789_v49, %v10662_v35  ;;  %v22111_v47 = vpop.f32.mrf.mxu0  ;;  %v15276_v35 = vld [vmem:[%s23179_s16 + $0x24] sm:$0xf0] }
 0xe38   : > { %v22106_v10 = vpop.f32.mrf.mxu2 }
 0xe39   : > { %v22109_v7 = vadd.f32 %v22031_v57, %v10790_v11  ;;  %v10666_v55 = vpop.f32.mrf.mxu3  ;;  %v14043_v57 = vld [vmem:[%s23179_s16 + $0x10] sm:$0xf] }
 0xe3a   : > { %v22113_v30 = vadd.f32 %v10666_v55, %v10539_v13  ;;  %v14044_v32 = vor.u32 %v15276_v35, %v14043_v57  ;;  %v14539_v13 = vld [vmem:[%s23179_s16 + $0x3f8] sm:$0xf]  ;;  %v15401_v55 = vld [vmem:[%s23179_s16 + $0x40c] sm:$0xf0] }
 0xe3b   : > { %v9419_v57 = vld [vmem:[%s23179_s16 + $0x458] sm:$0xff] }
 0xe3e   : > { %10708 = vmatmul.bf16.gmra.mxu3 %v14536_v42  ;;  %v10792_v12 = vpop.f32.mrf.mxu1  ;;  %v14540_v42 = vor.u32 %v15401_v55, %v14539_v13  ;;  %v14563_v13 = vld [vmem:[%s23179_s16 + $0x428] sm:$0xf]  ;;  %v15407_v55 = vld [vmem:[%s23179_s16 + $0x43c] sm:$0xf0] }
 0xe3f   : > { %v10793_v43 = vadd.f32 %v10792_v12, %v10665_v6  ;;  %v10930_v58 = vpop.f32.mrf.mxu0  ;;  %v14557_v6 = vld [vmem:[%s23179_s16 + $0x438] sm:$0xf0] }
 0xe40   : > { %v22128_v60 = vpop.f32.mrf.mxu2  ;;  %v14560_v40 = vor.u32 %v15403_v22, %v14557_v6  ;;  %v9616_v22 = vpop.permute.xlu2 %9615 }
 0xe41   : > { %v22131_v51 = vadd.f32 %v22051_v59, %v10793_v43  ;;  %v10669_v1 = vpop.f32.mrf.mxu3  ;;  %10831 = vmatmul.bf16.gmra.mxu1 %v14516_v0  ;;  %v9606_v59 = vpop.permute.xlu0 %9605  ;;  %v10123_v43 = vunpack.c.h.b16 %v9419_v57 }
 0xe42   : > { %v10670_v25 = vadd.f32 %v10669_v1, %v10542_v50  ;;  %10969 = vmatmul.bf16.gmra.mxu0 %v14568_v8  ;;  %v10544_v34 = vadd.f32 %v22046_v15, %v9606_v59  ;;  %v14067_v15 = vld [vmem:[%s23179_s16 + $0x40] sm:$0xf]  ;;  %v9611_v0 = vpop.permute.xlu1 %9610  ;;  %v10121_v59 = vunpack.c.h.b16 %v22082_v26  ;;  %v14564_v26 = vor.u32 %v15407_v55, %v14563_v13 }
 0xe43   : > { %v10547_v35 = vadd.f32 %v22066_v63, %v9611_v0  ;;  %v10267_v8 = vpack.c.b16 %v10123_v43, %v10123_v43  ;;  %v10549_v63 = vadd.f32 %v22086_v36, %v9616_v22  ;;  %v14091_v36 = vld [vmem:[%s23179_s16 + $0x70] sm:$0xf] }
 0xe45   : > { %10987 = vmatmul.bf16.vlgmr.msra.gmra.mxu2 %v14044_v32  ;;  %v14068_v32 = vor.u32 %v15282_v38, %v14067_v15 }
 0xe46   : > { %v22139_v45 = vpop.f32.mrf.mxu1 }
 0xe47   : > { %v22150_v11 = vpop.f32.mrf.mxu0 }
 0xe48   : > { %v22148_v49 = vpop.f32.mrf.mxu2 }
 0xe49   : > { %v10671_v17 = vpop.f32.mrf.mxu3  ;;  %v9621_v15 = vpop.permute.xlu0 %9620 }
 0xe4a   : > { %v22152_v41 = vadd.f32 %v10671_v17, %v10544_v34  ;;  %v10552_v0 = vadd.f32 %v22106_v10, %v9621_v15  ;;  %v9626_v22 = vpop.permute.xlu1 %9625  ;;  %v14045_v10 = vld [vmem:[%s23179_s16 + $0x28] sm:$0xf0]  ;;  %v9631_v15 = vpop.permute.xlu2 %9630 }
 0xe4e   : > { %10713 = vmatmul.bf16.gmra.mxu3 %v14560_v40  ;;  %v10797_v23 = vpop.f32.mrf.mxu1  ;;  %v10265_v40 = vpack.c.b16 %v10121_v59, %v10121_v59 }
 0xe4f   : > { %v10798_v12 = vadd.f32 %v10797_v23, %v10670_v25  ;;  %v10935_v52 = vpop.f32.mrf.mxu0  ;;  %v15288_v23 = vld [vmem:[%s23179_s16 + $0x84] sm:$0xf0] }
 0xe50   : > { %v22170_v44 = vpop.f32.mrf.mxu2 }
 0xe51   : > { %v22173_v50 = vadd.f32 %v22091_v56, %v10798_v12  ;;  %v10674_v1 = vpop.f32.mrf.mxu3  ;;  %10836 = vmatmul.bf16.gmra.mxu1 %v14540_v42 }
 0xe52   : > { %v10675_v61 = vadd.f32 %v10674_v1, %v10547_v35  ;;  %10974 = vmatmul.bf16.gmra.mxu0 %v10267_v8  ;;  %v14092_v1 = vor.u32 %v15288_v23, %v14091_v36  ;;  %v14115_v23 = vld [vmem:[%s23179_s16 + $0xa0] sm:$0xf] }
 0xe55   : > { %10992 = vmatmul.bf16.gmra.mxu2 %v14068_v32 }
 0xe56   : > { %v22175_v25 = vpop.f32.mrf.mxu1 }
 0xe57   : > { %v22181_v56 = vpop.f32.mrf.mxu0 }
 0xe58   : > { %v22179_v6 = vpop.f32.mrf.mxu2 }
 0xe59   : > { %v10676_v34 = vpop.f32.mrf.mxu3 }
 0xe5a   : > { %v22183_v17 = vadd.f32 %v10676_v34, %v10549_v63  ;;  %v15273_v63 = vld [vmem:[%s23179_s16 + $0x14] sm:$0xf] }
 0xe5e   : > { %10718 = vmatmul.bf16.gmra.mxu3 %v10265_v40  ;;  %v10802_v42 = vpop.f32.mrf.mxu1  ;;  %v10122_v40 = vunpack.c.l.b16 %v9419_v57 }
 0xe5f   : > { %v10803_v38 = vadd.f32 %v10802_v42, %v10675_v61  ;;  %v10940_v32 = vpop.f32.mrf.mxu0 }
 0xe60   : > { %v22198_v12 = vpop.f32.mrf.mxu2  ;;  %v10266_v42 = vpack.c.b16 %v10122_v40, %v10122_v40  ;;  %v15279_v40 = vld [vmem:[%s23179_s16 + $0x44] sm:$0xf] }
 0xe61   : > { %v22200_v35 = vadd.f32 %v10930_v58, %v10803_v38  ;;  %v10679_v43 = vpop.f32.mrf.mxu3  ;;  %10841 = vmatmul.bf16.gmra.mxu1 %v14564_v26  ;;  %v10554_v58 = vadd.f32 %v22128_v60, %v9626_v22  ;;  %v14048_v26 = vor.u32 %v15273_v63, %v14045_v10  ;;  %v15294_v60 = vld [vmem:[%s23179_s16 + $0xb4] sm:$0xf0]  ;;  %v10557_v38 = vadd.f32 %v22148_v49, %v9631_v15  ;;  %v14069_v49 = vld [vmem:[%s23179_s16 + $0x58] sm:$0xf0]  ;;  %v14139_v15 = vld [vmem:[%s23179_s16 + $0xd0] sm:$0xf] }
 0xe62   : > { %v10680_v8 = vadd.f32 %v10679_v43, %v10552_v0  ;;  %v14116_v22 = vor.u32 %v15294_v60, %v14115_v23  ;;  %v14072_v23 = vor.u32 %v15279_v40, %v14069_v49 }
 0xe65   : > { %10997 = vmatmul.bf16.gmra.mxu2 %v14092_v1 }
 0xe66   : > { %v22202_v59 = vpop.f32.mrf.mxu1 }
 0xe67   : > { %v22213_v13 = vpop.f32.mrf.mxu0 }
 0xe68   : > { %v22211_v61 = vpop.f32.mrf.mxu2  ;;  %23271 = vst [vmem:[#allocation17_spill] sm:$0xff] %v22213_v13  ;;  %v15285_v13 = vld [vmem:[%s23179_s16 + $0x74] sm:$0xf] }
 0xe69   : > { %v10681_v34 = vpop.f32.mrf.mxu3 }
 0xe6a   : > { %v22215_v55 = vadd.f32 %v10681_v34, %v10554_v58  ;;  %v9636_v34 = vpop.permute.xlu0 %9635 }
 0xe6e   : > { %v10807_v36 = vpop.f32.mrf.mxu1  ;;  %14577 = vmatmul.msk.bf16.vlgmr.msrb.gmra.mxu3 %vm10390_vm10, %v14048_v26 }
 0xe6f   : > { %v10808_v57 = vadd.f32 %v10807_v36, %v10680_v8  ;;  %v10945_v63 = vpop.f32.mrf.mxu0 }
 0xe70   : > { %v10568_v0 = vpop.f32.mrf.mxu2 }
 0xe71   : > { %v22225_v43 = vadd.f32 %v10935_v52, %v10808_v57  ;;  %v10684_v1 = vpop.f32.mrf.mxu3  ;;  %10846 = vmatmul.bf16.gmra.mxu1 %v10266_v42  ;;  %v10559_v52 = vadd.f32 %v22170_v44, %v9636_v34  ;;  %v15300_v57 = vld [vmem:[%s23179_s16 + $0xe4] sm:$0xf0] }
 0xe72   : > { %v10685_v10 = vadd.f32 %v10684_v1, %v10557_v38  ;;  %v9641_v38 = vpop.permute.xlu1 %9640  ;;  %v14140_v40 = vor.u32 %v15300_v57, %v14139_v15 }
 0xe73   : > { %v10562_v1 = vadd.f32 %v22179_v6, %v9641_v38 }
 0xe75   : > { %11002 = vmatmul.bf16.gmra.mxu2 %v14116_v22 }
 0xe76   : > { %v22227_v58 = vpop.f32.mrf.mxu1 }
 0xe77   : > { %v22236_v42 = vpop.f32.mrf.mxu0 }
 0xe78   : > { %v10571_v8 = vpop.f32.mrf.mxu2  ;;  %23272 = vst [vmem:[#allocation20_spill] sm:$0xff] %v22236_v42  ;;  %v9646_v42 = vpop.permute.xlu2 %9645 }
 0xe79   : > { %v10686_v26 = vpop.f32.mrf.mxu3  ;;  %v10564_v6 = vadd.f32 %v22198_v12, %v9646_v42 }
 0xe7a   : > { %v22238_v36 = vadd.f32 %v10686_v26, %v10559_v52 }
 0xe7e   : > { %v10812_v60 = vpop.f32.mrf.mxu1  ;;  %14578 = vmatmul.msk.bf16.gmra.mxu3 %vm10390_vm10, %v14072_v23 }
 0xe7f   : > { %v10813_v44 = vadd.f32 %v10812_v60, %v10685_v10  ;;  %v10950_v49 = vpop.f32.mrf.mxu0  ;;  %v14093_v10 = vld [vmem:[%s23179_s16 + $0x88] sm:$0xf0] }
 0xe80   : > { %v10573_v22 = vpop.f32.mrf.mxu2  ;;  %v14096_v57 = vor.u32 %v15285_v13, %v14093_v10 }
 0xe81   : > { %v22248_v34 = vadd.f32 %v10940_v32, %v10813_v44  ;;  %v10689_v52 = vpop.f32.mrf.mxu3 }
 0xe82   : > { %v10690_v26 = vadd.f32 %v10689_v52, %v10562_v1  ;;  %v14163_v1 = vld [vmem:[%s23179_s16 + $0x100] sm:$0xf]  ;;  %v15306_v52 = vld [vmem:[%s23179_s16 + $0x114] sm:$0xf0] }
 0xe83   : > { %23273 = vst [vmem:[#allocation23_spill] sm:$0xff] %v22248_v34  ;;  %v14164_v13 = vor.u32 %v15306_v52, %v14163_v1 }
 0xe85   : > { %11007 = vmatmul.bf16.gmra.mxu2 %v14140_v40  ;;  %v9651_v40 = vpop.permute.xlu0 %9650 }
 0xe86   : > { %v22250_v23 = vpop.f32.mrf.mxu1  ;;  %v10567_v42 = vadd.f32 %v22211_v61, %v9651_v40 }
 0xe87   : > { %23274 = vst [vmem:[#allocation24_spill] sm:$0xff] %v22250_v23  ;;  %v22259_v38 = vpop.f32.mrf.mxu0  ;;  %v15291_v23 = vld [vmem:[%s23179_s16 + $0xa4] sm:$0xf] }
 0xe88   : > { %v10576_v32 = vpop.f32.mrf.mxu2  ;;  %23275 = vst [vmem:[#allocation21_spill] sm:$0xff] %v22259_v38 }
 0xe89   : > { %v10691_v60 = vpop.f32.mrf.mxu3 }
 0xe8a   : > { %v22261_v15 = vadd.f32 %v10691_v60, %v10564_v6 }
 0xe8c   : > { %23276 = vst [vmem:[#allocation25_spill] sm:$0xff] %v22261_v15  ;;  %v9656_v15 = vpop.permute.xlu1 %9655 }
 0xe8d   : > { %v10569_v61 = vadd.f32 %v10568_v0, %v9656_v15 }
 0xe8e   : > { %v10817_v44 = vpop.f32.mrf.mxu1  ;;  %14579 = vmatmul.msk.bf16.gmra.mxu3 %vm10390_vm10, %v14096_v57 }
 0xe8f   : > { %v10818_v12 = vadd.f32 %v10817_v44, %v10690_v26  ;;  %v10955_v10 = vpop.f32.mrf.mxu0  ;;  %v14117_v26 = vld [vmem:[%s23179_s16 + $0xb8] sm:$0xf0] }
 0xe90   : > { %v10578_v34 = vpop.f32.mrf.mxu2  ;;  %v14120_v52 = vor.u32 %v15291_v23, %v14117_v26 }
 0xe91   : > { %v22271_v38 = vadd.f32 %v10945_v63, %v10818_v12  ;;  %v10694_v6 = vpop.f32.mrf.mxu3 }
 0xe92   : > { %v10695_v60 = vadd.f32 %v10694_v6, %v10567_v42  ;;  %v14187_v42 = vld [vmem:[%s23179_s16 + $0x130] sm:$0xf]  ;;  %v15312_v6 = vld [vmem:[%s23179_s16 + $0x144] sm:$0xf0] }
 0xe93   : > { %23277 = vst [vmem:[#allocation27_spill] sm:$0xff] %v22271_v38  ;;  %v14188_v23 = vor.u32 %v15312_v6, %v14187_v42 }
 0xe95   : > { %11012 = vmatmul.bf16.gmra.mxu2 %v14164_v13  ;;  %v9661_v13 = vpop.permute.xlu2 %9660 }
 0xe96   : > { %v22273_v57 = vpop.f32.mrf.mxu1  ;;  %v10572_v15 = vadd.f32 %v10571_v8, %v9661_v13  ;;  %v14141_v8 = vld [vmem:[%s23179_s16 + $0xe8] sm:$0xf0] }
 0xe97   : > { %23278 = vst [vmem:[#allocation26_spill] sm:$0xff] %v22273_v57  ;;  %v22281_v40 = vpop.f32.mrf.mxu0  ;;  %v15297_v57 = vld [vmem:[%s23179_s16 + $0xd4] sm:$0xf] }
 0xe98   : > { %v10581_v44 = vpop.f32.mrf.mxu2  ;;  %23279 = vst [vmem:[#allocation28_spill] sm:$0xff] %v22281_v40  ;;  %v14144_v6 = vor.u32 %v15297_v57, %v14141_v8 }
 0xe99   : > { %v10696_v63 = vpop.f32.mrf.mxu3 }
 0xe9a   : > { %v22283_v1 = vadd.f32 %v10696_v63, %v10569_v61 }
 0xe9c   : > { %23280 = vst [vmem:[#allocation16_spill] sm:$0xff] %v22283_v1  ;;  %v9666_v1 = vpop.permute.xlu0 %9665 }
 0xe9e   : > { %v10822_v12 = vpop.f32.mrf.mxu1  ;;  %14580 = vmatmul.msk.bf16.gmra.mxu3 %vm10390_vm10, %v14120_v52 }
 0xe9f   : > { %v10823_v0 = vadd.f32 %v10822_v12, %v10695_v60  ;;  %v10960_v26 = vpop.f32.mrf.mxu0  ;;  %v10574_v60 = vadd.f32 %v10573_v22, %v9666_v1  ;;  %v9671_v22 = vpop.permute.xlu1 %9670 }
 0xea0   : > { %v22292_v38 = vpop.f32.mrf.mxu2 }
 0xea1   : > { %v22294_v40 = vadd.f32 %v10950_v49, %v10823_v0  ;;  %v10699_v61 = vpop.f32.mrf.mxu3 }
 0xea2   : > { %v10700_v63 = vadd.f32 %v10699_v61, %v10572_v15  ;;  %v14211_v15 = vld [vmem:[%s23179_s16 + $0x160] sm:$0xf]  ;;  %v15318_v61 = vld [vmem:[%s23179_s16 + $0x174] sm:$0xf0] }
 0xea3   : > { %23281 = vst [vmem:[#allocation14_spill] sm:$0xff] %v22294_v40  ;;  %v14212_v57 = vor.u32 %v15318_v61, %v14211_v15 }
 0xea5   : > { %11017 = vmatmul.bf16.gmra.mxu2 %v14188_v23  ;;  %v10577_v23 = vadd.f32 %v10576_v32, %v9671_v22  ;;  %v14165_v32 = vld [vmem:[%s23179_s16 + $0x118] sm:$0xf0] }
 0xea6   : > { %v22296_v52 = vpop.f32.mrf.mxu1 }
 0xea7   : > { %23282 = vst [vmem:[#allocation15_spill] sm:$0xff] %v22296_v52  ;;  %v22306_v13 = vpop.f32.mrf.mxu0  ;;  %v15303_v52 = vld [vmem:[%s23179_s16 + $0x104] sm:$0xf] }
 0xea8   : > { %v22304_v12 = vpop.f32.mrf.mxu2  ;;  %23283 = vst [vmem:[#allocation22_spill] sm:$0xff] %v22306_v13  ;;  %v14168_v61 = vor.u32 %v15303_v52, %v14165_v32 }
 0xea9   : > { %v10701_v49 = vpop.f32.mrf.mxu3 }
 0xeaa   : > { %v22308_v42 = vadd.f32 %v10701_v49, %v10574_v60 }
 0xeac   : > { %23284 = vst [vmem:[#allocation18_spill] sm:$0xff] %v22308_v42  ;;  %v9676_v42 = vpop.permute.xlu2 %9675 }
 0xeae   : > { %v10827_v0 = vpop.f32.mrf.mxu1  ;;  %14581 = vmatmul.msk.bf16.gmra.mxu3 %vm10390_vm10, %v14144_v6 }
 0xeaf   : > { %v10828_v1 = vadd.f32 %v10827_v0, %v10700_v63  ;;  %v10965_v8 = vpop.f32.mrf.mxu0  ;;  %v10579_v63 = vadd.f32 %v10578_v34, %v9676_v42  ;;  %v15416_v34 = vld [vmem:[%s23181_s18 + $0x38] sm:$0xff]  ;;  %v9681_v42 = vpop.permute.xlu0 %9680 }
 0xeb0   : > { %v22317_v40 = vpop.f32.mrf.mxu2  ;;  %11323 = vmatpush.bf16.msrb.mxu1 %v15416_v34 }
 0xeb1   : > { %v22319_v13 = vadd.f32 %v10955_v10, %v10828_v1  ;;  %v10704_v60 = vpop.f32.mrf.mxu3 }
 0xeb2   : > { %v10705_v49 = vadd.f32 %v10704_v60, %v10577_v23  ;;  %v14235_v23 = vld [vmem:[%s23179_s16 + $0x190] sm:$0xf]  ;;  %v15324_v60 = vld [vmem:[%s23179_s16 + $0x1a4] sm:$0xf0] }
 0xeb3   : > { %23285 = vst [vmem:[#allocation19_spill] sm:$0xff] %v22319_v13  ;;  %v15415_v13 = vld [vmem:[%s23181_s18 + $0x30] sm:$0xff] }
 0xeb4   : > { %11324 = vmatpush.bf16.msrb.mxu1 %v15415_v13 }
 0xeb5   : > { %11022 = vmatmul.bf16.gmra.mxu2 %v14212_v57 }
 0xeb6   : > { %v22321_v6 = vpop.f32.mrf.mxu1 }
 0xeb7   : > { %23286 = vst [vmem:[#allocation29_spill] sm:$0xff] %v22321_v6  ;;  %v22331_v22 = vpop.f32.mrf.mxu0 }
 0xeb8   : > { %v22329_v0 = vpop.f32.mrf.mxu2  ;;  %23287 = vst [vmem:[#allocation30_spill] sm:$0xff] %v22331_v22 }
 0xeb9   : > { %v10706_v10 = vpop.f32.mrf.mxu3 }
 0xeba   : > { %v22333_v15 = vadd.f32 %v10706_v10, %v10579_v63  ;;  %v10582_v63 = vadd.f32 %v10581_v44, %v9681_v42  ;;  %v15414_v44 = vld [vmem:[%s23181_s18 + $0x28] sm:$0xff]  ;;  %v15413_v42 = vld [vmem:[%s23181_s18 + $0x20] sm:$0xff] }
 0xebb   : > { %11325 = vmatpush.bf16.msrb.mxu1 %v15414_v44  ;;  %v9691_v44 = vpop.permute.xlu2 %9690 }
 0xebc   : > { %23288 = vst [vmem:[#allocation31_spill] sm:$0xff] %v22333_v15 }
 0xebe   : > { %v10832_v1 = vpop.f32.mrf.mxu1  ;;  %14582 = vmatmul.msk.bf16.gmra.mxu3 %vm10390_vm10, %v14168_v61  ;;  %v14236_v61 = vor.u32 %v15324_v60, %v14235_v23 }
 0xebf   : > { %v10833_v57 = vadd.f32 %v10832_v1, %v10705_v49  ;;  %v10970_v22 = vpop.f32.mrf.mxu0  ;;  %v9686_v49 = vpop.permute.xlu1 %9685  ;;  %v14189_v1 = vld [vmem:[%s23179_s16 + $0x148] sm:$0xf0]  ;;  %11326 = vmatpush.bf16.msrb.mxu1 %v15413_v42 }
 0xec0   : > { %v10593_v10 = vpop.f32.mrf.mxu2  ;;  %v10584_v23 = vadd.f32 %v22292_v38, %v9686_v49  ;;  %v14259_v38 = vld [vmem:[%s23179_s16 + $0x1c0] sm:$0xf] }
 0xec1   : > { %v22345_v52 = vadd.f32 %v10960_v26, %v10833_v57  ;;  %v10709_v32 = vpop.f32.mrf.mxu3  ;;  %v15309_v26 = vld [vmem:[%s23179_s16 + $0x134] sm:$0xf] }
 0xec2   : > { %v10710_v15 = vadd.f32 %v10709_v32, %v10582_v63  ;;  %v14192_v63 = vor.u32 %v15309_v26, %v14189_v1  ;;  %v15330_v32 = vld [vmem:[%s23179_s16 + $0x1d4] sm:$0xf0]  ;;  %v10587_v26 = vadd.f32 %v22304_v12, %v9691_v44  ;;  %v9696_v12 = vpop.permute.xlu0 %9695 }
 0xec3   : > { %v14260_v42 = vor.u32 %v15330_v32, %v14259_v38  ;;  %v14213_v38 = vld [vmem:[%s23179_s16 + $0x178] sm:$0xf0]  ;;  %v10589_v32 = vadd.f32 %v22317_v40, %v9696_v12  ;;  %v15336_v40 = vld [vmem:[%s23179_s16 + $0x204] sm:$0xf0] }
 0xec5   : > { %11027 = vmatmul.bf16.gmra.mxu2 %v14236_v61  ;;  %v15412_v61 = vld [vmem:[%s23181_s18 + $0x18] sm:$0xff] }
 0xec6   : > { %v22350_v6 = vpop.f32.mrf.mxu1  ;;  %11327 = vmatpush.bf16.msrb.mxu1 %v15412_v61 }
 0xec7   : > { %v22364_v34 = vpop.f32.mrf.mxu0 }
 0xec8   : > { %v22362_v60 = vpop.f32.mrf.mxu2  ;;  %23289 = vst [vmem:[#allocation32_spill] sm:$0xff] %v22364_v34 }
 0xec9   : > { %v10711_v13 = vpop.f32.mrf.mxu3 }
 0xeca   : > { %v22369_v57 = vadd.f32 %v10711_v13, %v10584_v23 }
 0xecc   : > { %23290 = vst [vmem:[#allocation33_spill] sm:$0xff] %v22369_v57  ;;  %v15411_v57 = vld [vmem:[%s23181_s18 + $0x10] sm:$0xff] }
 0xecd   : > { %11328 = vmatpush.bf16.msrb.mxu1 %v15411_v57 }
 0xece   : > { %v10837_v10 = vpop.f32.mrf.mxu1  ;;  %14583 = vmatmul.msk.bf16.gmra.mxu3 %vm10390_vm10, %v14192_v63 }
 0xecf   : > { %v10838_v49 = vadd.f32 %v10837_v10, %v10710_v15  ;;  %v10975_v63 = vpop.f32.mrf.mxu0  ;;  %v15410_v15 = vld [vmem:[%s23181_s18 + $0x8] sm:$0xff] }
 0xed0   : > { %v10990_v1 = vpop.f32.mrf.mxu2 }
 0xed1   : > { %v22382_v23 = vadd.f32 %v10965_v8, %v10838_v49  ;;  %v10714_v13 = vpop.f32.mrf.mxu3  ;;  %v15315_v8 = vld [vmem:[%s23179_s16 + $0x164] sm:$0xf]  ;;  %11329 = vmatpush.bf16.msrb.mxu1 %v15410_v15  ;;  %v9701_v15 = vpop.permute.xlu1 %9700 }
 0xed2   : > { %v10715_v34 = vadd.f32 %v10714_v13, %v10587_v26  ;;  %v14216_v26 = vor.u32 %v15315_v8, %v14213_v38  ;;  %v15409_v13 = vld [vmem:[%s23181_s18] sm:$0xff]  ;;  %v10592_v8 = vadd.f32 %v22329_v0, %v9701_v15 }
 0xed3   : > { %23291 = vst [vmem:[#allocation34_spill] sm:$0xff] %v22382_v23  ;;  %v14283_v23 = vld [vmem:[%s23179_s16 + $0x1f0] sm:$0xf] }
 0xed5   : > { %11032 = vmatmul.bf16.gmra.mxu2 %v14260_v42  ;;  %11330 = vmatpush.bf16.msrb.mxu1 %v15409_v13 }
 0xed6   : > { %v22390_v10 = vpop.f32.mrf.mxu1 }
 0xed7   : > { %23292 = vst [vmem:[#allocation35_spill] sm:$0xff] %v22390_v10  ;;  %v10977_v44 = vpop.f32.mrf.mxu0  ;;  %v14237_v10 = vld [vmem:[%s23179_s16 + $0x1a8] sm:$0xf0] }
 0xed8   : > { %v10993_v61 = vpop.f32.mrf.mxu2  ;;  %v14284_v44 = vor.u32 %v15336_v40, %v14283_v23  ;;  %v15342_v23 = vld [vmem:[%s23179_s16 + $0x234] sm:$0xf0] }
 0xed9   : > { %v10716_v57 = vpop.f32.mrf.mxu3 }
 0xeda   : > { %v22399_v49 = vadd.f32 %v10716_v57, %v10589_v32 }
 0xedc   : > { %23293 = vst [vmem:[#allocation36_spill] sm:$0xff] %v22399_v49  ;;  %v15321_v49 = vld [vmem:[%s23179_s16 + $0x194] sm:$0xf] }
 0xedd   : > { %v14240_v0 = vor.u32 %v15321_v49, %v14237_v10  ;;  %v15327_v10 = vld [vmem:[%s23179_s16 + $0x1c4] sm:$0xf]  ;;  %v14261_v49 = vld [vmem:[%s23179_s16 + $0x1d8] sm:$0xf0] }
 0xede   : > { %v10842_v42 = vpop.f32.mrf.mxu1  ;;  %14584 = vmatmul.msk.bf16.gmra.mxu3 %vm10390_vm10, %v14216_v26 }
 0xedf   : > { %v10843_v12 = vadd.f32 %v10842_v42, %v10715_v34 }
 0xee0   : > { %v10995_v38 = vpop.f32.mrf.mxu2 }
 0xee1   : > { %v22412_v32 = vadd.f32 %v10970_v22, %v10843_v12  ;;  %v10719_v57 = vpop.f32.mrf.mxu3  ;;  %v14307_v22 = vld [vmem:[%s23179_s16 + $0x220] sm:$0xf] }
 0xee2   : > { %v10720_v13 = vadd.f32 %v10719_v57, %v10592_v8 }
 0xee5   : > { %11037 = vmatmul.bf16.gmra.mxu2 %v14284_v44  ;;  %v14308_v44 = vor.u32 %v15342_v23, %v14307_v22  ;;  %v14264_v22 = vor.u32 %v15327_v10, %v14261_v49  ;;  %v10996_v10 = vadd.f32 %v10995_v38, %v21709_v5  ;;  %v15339_v38 = vld [vmem:[%s23179_s16 + $0x224] sm:$0xf] }
 0xee6   : > { %v22414_v26 = vpop.f32.mrf.mxu1 }
 0xee8   : > { %v10998_v34 = vpop.f32.mrf.mxu2 }
 0xee9   : > { %v10721_v42 = vpop.f32.mrf.mxu3 }
 0xeee   : > { %v10847_v15 = vpop.f32.mrf.mxu1  ;;  %14585 = vmatmul.msk.bf16.gmra.mxu3 %vm10390_vm10, %v14240_v0  ;;  %v10989_v0 = vadd.f32 %v22362_v60, %v21651_v18 }
 0xeef   : > { %v10848_v40 = vadd.f32 %v10847_v15, %v10720_v13  ;;  %v10991_v13 = vadd.f32 %v10990_v1, %v21670_v4  ;;  %v15333_v1 = vld [vmem:[%s23179_s16 + $0x1f4] sm:$0xf] }
 0xef0   : > { %v11000_v12 = vpop.f32.mrf.mxu2 }
 0xef1   : > { %v22429_v8 = vadd.f32 %v10975_v63, %v10848_v40  ;;  %v11116_v57 = vpop.f32.mrf.mxu3 }
 0xef2   : > { %v11117_v40 = vadd.f32 %v11116_v57, %v10989_v0  ;;  %v10994_v57 = vadd.f32 %v10993_v61, %v21689_v19 }
 0xef3   : > { %23294 = vst [vmem:[#allocation37_spill] sm:$0xff] %v22429_v8 }
 0xef5   : > { %11042 = vmatmul.bf16.gmra.mxu2 %v14308_v44  ;;  %v14331_v44 = vld [vmem:[%s23179_s16 + $0x250] sm:$0xf] }
 0xef6   : > { %v10849_v42 = vpop.f32.mrf.mxu1 }
 0xef7   : > { %v15348_v42 = vld [vmem:[%s23179_s16 + $0x264] sm:$0xf0] }
 0xef8   : > { %v11003_v15 = vpop.f32.mrf.mxu2  ;;  %v14332_v4 = vor.u32 %v15348_v42, %v14331_v44  ;;  %v15354_v44 = vld [vmem:[%s23179_s16 + $0x294] sm:$0xf0]  ;;  %v14309_v42 = vld [vmem:[%s23179_s16 + $0x238] sm:$0xf0] }
 0xef9   : > { %v11118_v63 = vpop.f32.mrf.mxu3 }
 0xefa   : > { %v11119_v8 = vadd.f32 %v11118_v63, %v10991_v13 }
 0xefc   : > { %v11235_v23 = vpack.c.bf16 %v11119_v8, %v11117_v40  ;;  %v14285_v8 = vld [vmem:[%s23179_s16 + $0x208] sm:$0xf0] }
 0xefd   : > { %v14288_v40 = vor.u32 %v15333_v1, %v14285_v8 }
 0xefe   : > { %14586 = vmatmul.msk.bf16.gmra.mxu3 %vm10390_vm10, %v14264_v22  ;;  %11331 = vmatmul.bf16.vlgmr.msrb.gmra.mxu1 %v11235_v23  ;;  %v14355_v23 = vld [vmem:[%s23179_s16 + $0x280] sm:$0xf] }
 0xeff   : > { %v14356_v5 = vor.u32 %v15354_v44, %v14355_v23  ;;  %v11004_v23 = vadd.f32 %v11003_v15, %v21769_v28 }
 0xf00   : > { %v11005_v18 = vpop.f32.mrf.mxu2 }
 0xf01   : > { %v11121_v60 = vpop.f32.mrf.mxu3  ;;  %v11006_v44 = vadd.f32 %v11005_v18, %v21789_v48  ;;  %v15351_v18 = vld [vmem:[%s23179_s16 + $0x284] sm:$0xf] }
 0xf02   : > { %v11122_v13 = vadd.f32 %v11121_v60, %v10994_v57  ;;  %v10999_v60 = vadd.f32 %v10998_v34, %v21729_v24 }
 0xf05   : > { %11047 = vmatmul.bf16.gmra.mxu2 %v14332_v4  ;;  %v11001_v4 = vadd.f32 %v11000_v12, %v21749_v31  ;;  %v15345_v12 = vld [vmem:[%s23179_s16 + $0x254] sm:$0xf] }
 0xf08   : > { %v11008_v49 = vpop.f32.mrf.mxu2 }
 0xf09   : > { %v11123_v0 = vpop.f32.mrf.mxu3 }
 0xf0a   : > { %v11124_v63 = vadd.f32 %v11123_v0, %v10996_v10  ;;  %v14312_v0 = vor.u32 %v15339_v38, %v14309_v42 }
 0xf0c   : > { %v11236_v22 = vpack.c.bf16 %v11124_v63, %v11122_v13  ;;  %v14379_v63 = vld [vmem:[%s23179_s16 + $0x2b0] sm:$0xf] }
 0xf0e   : > { %14587 = vmatmul.msk.bf16.gmra.mxu3 %vm10390_vm10, %v14288_v40  ;;  %11336 = vmatmul.bf16.gmra.mxu1 %v11236_v22  ;;  %v15360_v40 = vld [vmem:[%s23179_s16 + $0x2c4] sm:$0xf0]  ;;  %v14333_v22 = vld [vmem:[%s23179_s16 + $0x268] sm:$0xf0] }
 0xf0f   : > { %v14380_v31 = vor.u32 %v15360_v40, %v14379_v63 }
 0xf10   : > { %v11010_v19 = vpop.f32.mrf.mxu2 }
 0xf11   : > { %v11126_v61 = vpop.f32.mrf.mxu3 }
 0xf12   : > { %v11127_v57 = vadd.f32 %v11126_v61, %v10999_v60  ;;  %v14336_v60 = vor.u32 %v15345_v12, %v14333_v22 }
 0xf15   : > { %11052 = vmatmul.bf16.gmra.mxu2 %v14356_v5 }
 0xf18   : > { %v11013_v1 = vpop.f32.mrf.mxu2 }
 0xf19   : > { %v11128_v8 = vpop.f32.mrf.mxu3 }
 0xf1a   : > { %v11129_v10 = vadd.f32 %v11128_v8, %v11001_v4  ;;  %v14403_v8 = vld [vmem:[%s23179_s16 + $0x2e0] sm:$0xf] }
 0xf1c   : > { %v11237_v13 = vpack.c.bf16 %v11129_v10, %v11127_v57  ;;  %v15366_v57 = vld [vmem:[%s23179_s16 + $0x2f4] sm:$0xf0]  ;;  %v14357_v10 = vld [vmem:[%s23179_s16 + $0x298] sm:$0xf0] }
 0xf1d   : > { %v14404_v48 = vor.u32 %v15366_v57, %v14403_v8  ;;  %v14360_v12 = vor.u32 %v15351_v18, %v14357_v10  ;;  %v14451_v18 = vld [vmem:[%s23179_s16 + $0x340] sm:$0xf]  ;;  %v15378_v10 = vld [vmem:[%s23179_s16 + $0x354] sm:$0xf0] }
 0xf1e   : > { %14588 = vmatmul.msk.bf16.gmra.mxu3 %vm10390_vm10, %v14312_v0  ;;  %11341 = vmatmul.bf16.gmra.mxu1 %v11237_v13  ;;  %v11009_v0 = vadd.f32 %v11008_v49, %v21809_v20  ;;  %v11011_v13 = vadd.f32 %v11010_v19, %v21829_v27  ;;  %v15357_v19 = vld [vmem:[%s23179_s16 + $0x2b4] sm:$0xf] }
 0xf20   : > { %v11015_v24 = vpop.f32.mrf.mxu2 }
 0xf21   : > { %v11131_v34 = vpop.f32.mrf.mxu3 }
 0xf22   : > { %v11132_v38 = vadd.f32 %v11131_v34, %v11004_v23  ;;  %v14427_v23 = vld [vmem:[%s23179_s16 + $0x310] sm:$0xf] }
 0xf25   : > { %11057 = vmatmul.bf16.gmra.mxu2 %v14380_v31 }
 0xf28   : > { %v11018_v61 = vpop.f32.mrf.mxu2 }
 0xf29   : > { %v11133_v5 = vpop.f32.mrf.mxu3 }
 0xf2a   : > { %v11134_v42 = vadd.f32 %v11133_v5, %v11006_v44  ;;  %v15372_v44 = vld [vmem:[%s23179_s16 + $0x324] sm:$0xf0]  ;;  %v14381_v5 = vld [vmem:[%s23179_s16 + $0x2c8] sm:$0xf0] }
 0xf2b   : > { %v14428_v27 = vor.u32 %v15372_v44, %v14427_v23 }
 0xf2c   : > { %v11238_v4 = vpack.c.bf16 %v11134_v42, %v11132_v38  ;;  %v11014_v38 = vadd.f32 %v11013_v1, %v21849_v14  ;;  %v11016_v42 = vadd.f32 %v11015_v24, %v21869_v53  ;;  %v14452_v53 = vor.u32 %v15378_v10, %v14451_v18  ;;  %v15363_v24 = vld [vmem:[%s23179_s16 + $0x2e4] sm:$0xf]  ;;  %v14499_v18 = vld [vmem:[%s23179_s16 + $0x3a0] sm:$0xf]  ;;  %v15390_v10 = vld [vmem:[%s23179_s16 + $0x3b4] sm:$0xf0] }
 0xf2e   : > { %14589 = vmatmul.msk.bf16.gmra.mxu3 %vm10390_vm10, %v14336_v60  ;;  %11346 = vmatmul.bf16.gmra.mxu1 %v11238_v4 }
 0xf30   : > { %v11020_v28 = vpop.f32.mrf.mxu2 }
 0xf31   : > { %v11136_v15 = vpop.f32.mrf.mxu3 }
 0xf32   : > { %v11137_v34 = vadd.f32 %v11136_v15, %v11009_v0  ;;  %v14384_v15 = vor.u32 %v15357_v19, %v14381_v5  ;;  %v14405_v0 = vld [vmem:[%s23179_s16 + $0x2f8] sm:$0xf0]  ;;  %v14429_v19 = vld [vmem:[%s23179_s16 + $0x328] sm:$0xf0] }
 0xf33   : > { %v14408_v23 = vor.u32 %v15363_v24, %v14405_v0 }
 0xf35   : > { %11062 = vmatmul.bf16.gmra.mxu2 %v14404_v48 }
 0xf38   : > { %v11023_v63 = vpop.f32.mrf.mxu2 }
 0xf39   : > { %v11138_v40 = vpop.f32.mrf.mxu3  ;;  %v11024_v5 = vadd.f32 %v11023_v63, %v21929_v37 }
 0xf3a   : > { %v11139_v31 = vadd.f32 %v11138_v40, %v11011_v13  ;;  %v11019_v13 = vadd.f32 %v11018_v61, %v21889_v29  ;;  %v11021_v40 = vadd.f32 %v11020_v28, %v21909_v62  ;;  %v15369_v28 = vld [vmem:[%s23179_s16 + $0x314] sm:$0xf] }
 0xf3c   : > { %v11239_v22 = vpack.c.bf16 %v11139_v31, %v11137_v34 }
 0xf3e   : > { %14590 = vmatmul.msk.bf16.gmra.mxu3 %vm10390_vm10, %v14360_v12  ;;  %11351 = vmatmul.bf16.gmra.mxu1 %v11239_v22 }
 0xf40   : > { %v11025_v20 = vpop.f32.mrf.mxu2 }
 0xf41   : > { %v11141_v49 = vpop.f32.mrf.mxu3 }
 0xf42   : > { %v11142_v8 = vadd.f32 %v11141_v49, %v11014_v38  ;;  %v14475_v49 = vld [vmem:[%s23179_s16 + $0x370] sm:$0xf]  ;;  %v11026_v38 = vadd.f32 %v11025_v20, %v21949_v54  ;;  %v14500_v54 = vor.u32 %v15390_v10, %v14499_v18  ;;  %v15375_v20 = vld [vmem:[%s23179_s16 + $0x344] sm:$0xf]  ;;  %v14547_v18 = vld [vmem:[%s23179_s16 + $0x400] sm:$0xf] }
 0xf45   : > { %11067 = vmatmul.bf16.gmra.mxu2 %v14428_v27  ;;  %v15384_v27 = vld [vmem:[%s23179_s16 + $0x384] sm:$0xf0] }
 0xf46   : > { %v14476_v62 = vor.u32 %v15384_v27, %v14475_v49 }
 0xf48   : > { %v11028_v60 = vpop.f32.mrf.mxu2 }
 0xf49   : > { %v11143_v4 = vpop.f32.mrf.mxu3 }
 0xf4a   : > { %v11144_v57 = vadd.f32 %v11143_v4, %v11016_v42 }
 0xf4c   : > { %v11240_v48 = vpack.c.bf16 %v11144_v57, %v11142_v8 }
 0xf4e   : > { %14591 = vmatmul.msk.bf16.gmra.mxu3 %vm10390_vm10, %v14384_v15  ;;  %11356 = vmatmul.bf16.gmra.mxu1 %v11240_v48  ;;  %v14432_v15 = vor.u32 %v15369_v28, %v14429_v19 }
 0xf50   : > { %v11030_v14 = vpop.f32.mrf.mxu2 }
 0xf51   : > { %v11146_v1 = vpop.f32.mrf.mxu3  ;;  %v11031_v24 = vadd.f32 %v11030_v14, %v21989_v39 }
 0xf52   : > { %v11147_v12 = vadd.f32 %v11146_v1, %v11019_v13  ;;  %v14453_v1 = vld [vmem:[%s23179_s16 + $0x358] sm:$0xf0] }
 0xf55   : > { %11072 = vmatmul.bf16.gmra.mxu2 %v14452_v53  ;;  %v11029_v53 = vadd.f32 %v11028_v60, %v21969_v3  ;;  %v15396_v3 = vld [vmem:[%s23179_s16 + $0x3e4] sm:$0xf0] }
 0xf58   : > { %v11033_v34 = vpop.f32.mrf.mxu2 }
 0xf59   : > { %v11148_v31 = vpop.f32.mrf.mxu3  ;;  %v11034_v28 = vadd.f32 %v11033_v34, %v22009_v21  ;;  %v15402_v21 = vld [vmem:[%s23179_s16 + $0x414] sm:$0xf0] }
 0xf5a   : > { %v11149_v22 = vadd.f32 %v11148_v31, %v11021_v40 }
 0xf5c   : > { %v11241_v44 = vpack.c.bf16 %v11149_v22, %v11147_v12  ;;  %v14456_v12 = vor.u32 %v15375_v20, %v14453_v1  ;;  %v14501_v20 = vld [vmem:[%s23179_s16 + $0x3b8] sm:$0xf0] }
 0xf5e   : > { %14592 = vmatmul.msk.bf16.gmra.mxu3 %vm10390_vm10, %v14408_v23  ;;  %11361 = vmatmul.bf16.gmra.mxu1 %v11241_v44  ;;  %v14523_v44 = vld [vmem:[%s23179_s16 + $0x3d0] sm:$0xf] }
 0xf5f   : > { %v14524_v14 = vor.u32 %v15396_v3, %v14523_v44  ;;  %v14571_v3 = vld [vmem:[%s23179_s16 + $0x430] sm:$0xf] }
 0xf60   : > { %v11035_v29 = vpop.f32.mrf.mxu2 }
 0xf61   : > { %v11151_v61 = vpop.f32.mrf.mxu3  ;;  %v11036_v19 = vadd.f32 %v11035_v29, %v22029_v46  ;;  %v14548_v29 = vor.u32 %v15402_v21, %v14547_v18  ;;  %v9420_v18 = vld [vmem:[%s23179_s16 + $0x460] sm:$0xff] }
 0xf62   : > { %v11152_v8 = vadd.f32 %v11151_v61, %v11024_v5  ;;  %v15381_v61 = vld [vmem:[%s23179_s16 + $0x374] sm:$0xf] }
 0xf65   : > { %11077 = vmatmul.bf16.gmra.mxu2 %v14476_v62  ;;  %v14477_v62 = vld [vmem:[%s23179_s16 + $0x388] sm:$0xf0] }
 0xf68   : > { %v11038_v42 = vpop.f32.mrf.mxu2 }
 0xf69   : > { %v11153_v4 = vpop.f32.mrf.mxu3  ;;  %v11039_v1 = vadd.f32 %v11038_v42, %v22049_v9  ;;  %v15408_v9 = vld [vmem:[%s23179_s16 + $0x444] sm:$0xf0] }
 0xf6a   : > { %v11154_v57 = vadd.f32 %v11153_v4, %v11026_v38 }
 0xf6c   : > { %v11242_v48 = vpack.c.bf16 %v11154_v57, %v11152_v8  ;;  %v14480_v57 = vor.u32 %v15381_v61, %v14477_v62  ;;  %v15393_v61 = vld [vmem:[%s23179_s16 + $0x3d4] sm:$0xf]  ;;  %v14525_v62 = vld [vmem:[%s23179_s16 + $0x3e8] sm:$0xf0] }
 0xf6e   : > { %14593 = vmatmul.msk.bf16.gmra.mxu3 %vm10390_vm10, %v14432_v15  ;;  %11366 = vmatmul.bf16.gmra.mxu1 %v11242_v48 }
 0xf70   : > { %v11040_v37 = vpop.f32.mrf.mxu2 }
 0xf71   : > { %v11156_v63 = vpop.f32.mrf.mxu3 }
 0xf72   : > { %v11157_v40 = vadd.f32 %v11156_v63, %v11029_v53  ;;  %v11041_v53 = vadd.f32 %v11040_v37, %v22069_v16  ;;  %v14572_v37 = vor.u32 %v15408_v9, %v14571_v3 }
 0xf75   : > { %11082 = vmatmul.bf16.gmra.mxu2 %v14500_v54  ;;  %v15387_v54 = vld [vmem:[%s23179_s16 + $0x3a4] sm:$0xf] }
 0xf78   : > { %v11043_v0 = vpop.f32.mrf.mxu2 }
 0xf79   : > { %v11158_v13 = vpop.f32.mrf.mxu3 }
 0xf7a   : > { %v11159_v31 = vadd.f32 %v11158_v13, %v11031_v24 }
 0xf7b   : > { %v22560_v22 = vpop.f32.mrf.mxu1 }
 0xf7c   : > { %v11243_v23 = vpack.c.bf16 %v11159_v31, %v11157_v40 }
 0xf7e   : > { %14594 = vmatmul.msk.bf16.gmra.mxu3 %vm10390_vm10, %v14456_v12  ;;  %11371 = vmatmul.bf16.gmra.mxu1 %v11243_v23  ;;  %v14504_v12 = vor.u32 %v15387_v54, %v14501_v20 }
 0xf80   : > { %v11045_v39 = vpop.f32.mrf.mxu2 }
 0xf81   : > { %v11161_v60 = vpop.f32.mrf.mxu3 }
 0xf82   : > { %v11162_v4 = vadd.f32 %v11161_v60, %v11034_v28  ;;  %v11044_v28 = vadd.f32 %v11043_v0, %v22089_v33 }
 0xf83   : > { %v22569_v49 = vpop.f32.mrf.mxu1 }
 0xf84   : > { %v11451_v27 = vpack.c.bf16 %v22569_v49, %v22560_v22  ;;  %v14647_v22 = vld [vmem:[%s23182_s19 + $0x18] sm:$0xf]  ;;  %v15421_v49 = vld [vmem:[%s23182_s19 + $0x20] sm:$0xf0] }
 0xf85   : > { %11087 = vmatmul.bf16.gmra.mxu2 %v14524_v14 }
 0xf88   : > { %v22581_v5 = vpop.f32.mrf.mxu2 }
 0xf89   : > { %v11163_v38 = vpop.f32.mrf.mxu3 }
 0xf8a   : > { %v11164_v8 = vadd.f32 %v11163_v38, %v11036_v19  ;;  %v11046_v19 = vadd.f32 %v11045_v39, %v22109_v7  ;;  %v10795_v7 = vadd.f32 %v22139_v45, %v22113_v30 }
 0xf8b   : > { %v22583_v15 = vpop.f32.mrf.mxu1 }
 0xf8c   : > { %v11244_v48 = vpack.c.bf16 %v11164_v8, %v11162_v4 }
 0xf8e   : > { %14595 = vmatmul.msk.bf16.gmra.mxu3 %vm10390_vm10, %v14480_v57  ;;  %11376 = vmatmul.bf16.gmra.mxu1 %v11244_v48  ;;  %v14528_v48 = vor.u32 %v15393_v61, %v14525_v62  ;;  %v10800_v61 = vadd.f32 %v22175_v25, %v22152_v41 }
 0xf90   : > { %v11050_v46 = vpop.f32.mrf.mxu2 }
 0xf91   : > { %v11166_v34 = vpop.f32.mrf.mxu3 }
 0xf92   : > { %v11167_v40 = vadd.f32 %v11166_v34, %v11039_v1  ;;  %v10923_v1 = vadd.f32 %v22071_v2, %v10795_v7 }
 0xf93   : > { %v22592_v10 = vpop.f32.mrf.mxu1 }
 0xf94   : > { %v11452_v63 = vpack.c.bf16 %v22592_v10, %v22583_v15  ;;  %v11051_v30 = vadd.f32 %v11050_v46, %v10923_v1  ;;  %v14573_v46 = vld [vmem:[%s23179_s16 + $0x448] sm:$0xf0] }
 0xf95   : > { %11092 = vmatmul.bf16.gmra.mxu2 %v14548_v29  ;;  %v10124_v29 = vunpack.c.l.b16 %v9420_v18 }
 0xf97   : > { %v10268_v0 = vpack.c.b16 %v10124_v29, %v10124_v29 }
 0xf98   : > { %v11053_v24 = vpop.f32.mrf.mxu2 }
 0xf99   : > { %v11168_v13 = vpop.f32.mrf.mxu3 }
 0xf9a   : > { %v11169_v31 = vadd.f32 %v11168_v13, %v11041_v53  ;;  %v15399_v53 = vld [vmem:[%s23179_s16 + $0x404] sm:$0xf]  ;;  %v14549_v13 = vld [vmem:[%s23179_s16 + $0x418] sm:$0xf0] }
 0xf9b   : > { %v22604_v23 = vpop.f32.mrf.mxu1  ;;  %v14552_v3 = vor.u32 %v15399_v53, %v14549_v13 }
 0xf9c   : > { %v11245_v44 = vpack.c.bf16 %v11169_v31, %v11167_v40  ;;  %v11049_v40 = vadd.f32 %v22581_v5, %v22131_v51  ;;  %v10928_v51 = vadd.f32 %v22111_v47, %v10800_v61  ;;  %v15405_v5 = vld [vmem:[%s23179_s16 + $0x434] sm:$0xf] }
 0xf9d   : > { %v14576_v41 = vor.u32 %v15405_v5, %v14573_v46 }
 0xf9e   : > { %14596 = vmatmul.msk.bf16.gmra.mxu3 %vm10390_vm10, %v14504_v12  ;;  %11381 = vmatmul.bf16.gmra.mxu1 %v11245_v44 }
 0xfa0   : > { %v11055_v16 = vpop.f32.mrf.mxu2 }
 0xfa1   : > { %v11171_v42 = vpop.f32.mrf.mxu3 }
 0xfa2   : > { %v11172_v8 = vadd.f32 %v11171_v42, %v11044_v28  ;;  %v11054_v28 = vadd.f32 %v11053_v24, %v22173_v50  ;;  %v10125_v50 = vunpack.c.h.b16 %v9420_v18 }
 0xfa3   : > { %v22613_v60 = vpop.f32.mrf.mxu1 }
 0xfa4   : > { %v11453_v14 = vpack.c.bf16 %v22613_v60, %v22604_v23  ;;  %v10269_v13 = vpack.c.b16 %v10125_v50, %v10125_v50  ;;  %v23302_v60 = vld [vmem:[#allocation16_spill] sm:$0xff] }
 0xfa5   : > { %11097 = vmatmul.bf16.gmra.mxu2 %v14572_v37 }
 0xfa8   : > { %v11058_v38 = vpop.f32.mrf.mxu2 }
 0xfa9   : > { %v11173_v4 = vpop.f32.mrf.mxu3  ;;  %v11059_v24 = vadd.f32 %v11058_v38, %v22200_v35 }
 0xfaa   : > { %v11174_v57 = vadd.f32 %v11173_v4, %v11046_v19  ;;  %v11056_v19 = vadd.f32 %v11055_v16, %v10928_v51 }
 0xfab   : > { %v22628_v21 = vpop.f32.mrf.mxu1 }
 0xfac   : > { %v11246_v34 = vpack.c.bf16 %v11174_v57, %v11172_v8 }
 0xfae   : > { %14597 = vmatmul.msk.bf16.gmra.mxu3 %vm10390_vm10, %v14528_v48  ;;  %11386 = vmatmul.bf16.gmra.mxu1 %v11246_v34 }
 0xfb0   : > { %v11060_v54 = vpop.f32.mrf.mxu2 }
 0xfb1   : > { %v11176_v33 = vpop.f32.mrf.mxu3 }
 0xfb2   : > { %v11177_v12 = vadd.f32 %v11176_v33, %v11049_v40  ;;  %v10805_v33 = vadd.f32 %v22202_v59, %v22183_v17  ;;  %v10810_v17 = vadd.f32 %v22227_v58, %v22215_v55  ;;  %v23296_v58 = vld [vmem:[#allocation17_spill] sm:$0xff] }
 0xfb3   : > { %v22633_v39 = vpop.f32.mrf.mxu1 }
 0xfb4   : > { %v11454_v20 = vpack.c.bf16 %v22633_v39, %v22628_v21  ;;  %v10933_v7 = vadd.f32 %v22150_v11, %v10805_v33  ;;  %v10938_v59 = vadd.f32 %v22181_v56, %v10810_v17  ;;  %v23297_v56 = vld [vmem:[#allocation23_spill] sm:$0xff]  ;;  %v14635_v21 = vld [vmem:[%s23182_s19] sm:$0xf] }
 0xfb5   : > { %11102 = vmatmul.bf16.gmra.mxu2 %v10268_v0  ;;  %v15418_v39 = vld [vmem:[%s23182_s19 + $0x8] sm:$0xf0] }
 0xfb6   : > { %v11061_v16 = vadd.f32 %v11060_v54, %v10933_v7  ;;  %v14636_v23 = vor.u32 %v15418_v39, %v14635_v21 }
 0xfb8   : > { %v11063_v45 = vpop.f32.mrf.mxu2 }
 0xfb9   : > { %v11178_v31 = vpop.f32.mrf.mxu3  ;;  %v11064_v35 = vadd.f32 %v11063_v45, %v22225_v43 }
 0xfba   : > { %v11179_v44 = vadd.f32 %v11178_v31, %v11051_v30 }
 0xfbb   : > { %v22646_v9 = vpop.f32.mrf.mxu1 }
 0xfbc   : > { %v11247_v2 = vpack.c.bf16 %v11179_v44, %v11177_v12 }
 0xfbe   : > { %14598 = vmatmul.msk.bf16.gmra.mxu3 %vm10390_vm10, %v14552_v3  ;;  %11391 = vmatmul.bf16.gmra.mxu1 %v11247_v2 }
 0xfc0   : > { %v11065_v42 = vpop.f32.mrf.mxu2 }
 0xfc1   : > { %v11181_v37 = vpop.f32.mrf.mxu3  ;;  %v11066_v38 = vadd.f32 %v11065_v42, %v10938_v59 }
 0xfc2   : > { %v11182_v57 = vadd.f32 %v11181_v37, %v11054_v28  ;;  %v23295_v28 = vld [vmem:[#allocation24_spill] sm:$0xff] }
 0xfc3   : > { %v22651_v62 = vpop.f32.mrf.mxu1 }
 0xfc8   : > { %v11068_v4 = vpop.f32.mrf.mxu2 }
 0xfc9   : > { %v11183_v8 = vpop.f32.mrf.mxu3  ;;  %v11069_v43 = vadd.f32 %v11068_v4, %v23297_v56  ;;  %v23299_v4 = vld [vmem:[#allocation26_spill] sm:$0xff] }
 0xfca   : > { %v11184_v48 = vadd.f32 %v11183_v8, %v11056_v19  ;;  %v10815_v19 = vadd.f32 %v23295_v28, %v22238_v36  ;;  %v11455_v36 = vpack.c.bf16 %v22651_v62, %v22646_v9 }
 0xfcb   : > { %v11357_v25 = vpop.f32.mrf.mxu1 }
 0xfcc   : > { %v11248_v34 = vpack.c.bf16 %v11184_v48, %v11182_v57  ;;  %v10943_v57 = vadd.f32 %v23296_v58, %v10815_v19 }
 0xfce   : > { %14599 = vmatmul.msk.bf16.gmra.mxu3 %vm10390_vm10, %v14576_v41  ;;  %11396 = vmatmul.bf16.gmra.mxu1 %v11248_v34 }
 0xfd0   : > { %v11070_v47 = vpop.f32.mrf.mxu2 }
 0xfd1   : > { %v11186_v29 = vpop.f32.mrf.mxu3  ;;  %v11071_v45 = vadd.f32 %v11070_v47, %v10943_v57 }
 0xfd2   : > { %v11187_v40 = vadd.f32 %v11186_v29, %v11059_v24 }
 0xfd3   : > { %v11359_v0 = vpop.f32.mrf.mxu1 }
 0xfd4   : > { %v11456_v7 = vpack.c.bf16 %v11359_v0, %v11357_v25  ;;  %v23301_v25 = vld [vmem:[#allocation27_spill] sm:$0xff] }
 0xfd8   : > { %v11073_v1 = vpop.f32.mrf.mxu2 }
 0xfd9   : > { %v11188_v53 = vpop.f32.mrf.mxu3  ;;  %v11074_v0 = vadd.f32 %v11073_v1, %v23301_v25 }
 0xfda   : > { %v11189_v30 = vadd.f32 %v11188_v53, %v11061_v16  ;;  %v23298_v53 = vld [vmem:[#allocation25_spill] sm:$0xff] }
 0xfdb   : > { %v11362_v31 = vpop.f32.mrf.mxu1  ;;  %v10820_v47 = vadd.f32 %v23299_v4, %v23298_v53  ;;  %v14659_v4 = vld [vmem:[%s23182_s19 + $0x30] sm:$0xf] }
 0xfdc   : > { %v11249_v12 = vpack.c.bf16 %v11189_v30, %v11187_v40  ;;  %v23300_v30 = vld [vmem:[#allocation20_spill] sm:$0xff] }
 0xfde   : > { %14600 = vmatmul.msk.bf16.gmra.mxu3 %vm10390_vm10, %v10269_v13  ;;  %11401 = vmatmul.bf16.gmra.mxu1 %v11249_v12 }
 0xfe0   : > { %v11075_v44 = vpop.f32.mrf.mxu2 }
 0xfe1   : > { %v11191_v3 = vpop.f32.mrf.mxu3 }
 0xfe2   : > { %v11192_v2 = vadd.f32 %v11191_v3, %v11064_v35 }
 0xfe3   : > { %v11364_v11 = vpop.f32.mrf.mxu1 }
 0xfe4   : > { %v11457_v42 = vpack.c.bf16 %v11364_v11, %v11362_v31  ;;  %v10948_v31 = vadd.f32 %v23300_v30, %v10820_v47  ;;  %v15424_v47 = vld [vmem:[%s23182_s19 + $0x38] sm:$0xf0] }
 0xfe6   : > { %v11076_v9 = vadd.f32 %v11075_v44, %v10948_v31 }
 0xfe8   : > { %v11078_v18 = vpop.f32.mrf.mxu2 }
 0xfe9   : > { %v11193_v54 = vpop.f32.mrf.mxu3 }
 0xfea   : > { %v11194_v37 = vadd.f32 %v11193_v54, %v11066_v38  ;;  %v23305_v38 = vld [vmem:[#allocation14_spill] sm:$0xff] }
 0xfeb   : > { %v11367_v61 = vpop.f32.mrf.mxu1  ;;  %v11079_v54 = vadd.f32 %v11078_v18, %v23305_v38  ;;  %v14648_v18 = vor.u32 %v15421_v49, %v14647_v22 }
 0xfec   : > { %v11250_v51 = vpack.c.bf16 %v11194_v37, %v11192_v2 }
 0xfee   : > { %11406 = vmatmul.bf16.gmra.mxu1 %v11250_v51 }
 0xff0   : > { %v11080_v5 = vpop.f32.mrf.mxu2 }
 0xff1   : > { %v11196_v46 = vpop.f32.mrf.mxu3 }
 0xff2   : > { %v11197_v34 = vadd.f32 %v11196_v46, %v11069_v43  ;;  %v23308_v43 = vld [vmem:[#allocation28_spill] sm:$0xff] }
 0xff3   : > { %v11369_v8 = vpop.f32.mrf.mxu1 }
 0xff4   : > { %v11458_v55 = vpack.c.bf16 %v11369_v8, %v11367_v61 }
 0xff6   : > { %11746 = vmatpush.bf16.msrb.mxu0 %v11458_v55  ;;  %v23307_v55 = vld [vmem:[#allocation29_spill] sm:$0xff] }
 0xff8   : > { %v11083_v48 = vpop.f32.mrf.mxu2 }
 0xff9   : > { %v11198_v41 = vpop.f32.mrf.mxu3 }
 0xffa   : > { %v11199_v29 = vadd.f32 %v11198_v41, %v11071_v45  ;;  %11747 = vmatpush.bf16.msrb.mxu0 %v11457_v42  ;;  %v23309_v42 = vld [vmem:[#allocation19_spill] sm:$0xff] }
 0xffb   : > { %v22675_v33 = vpop.f32.mrf.mxu1  ;;  %v11084_v41 = vadd.f32 %v11083_v48, %v23309_v42  ;;  %v14660_v48 = vor.u32 %v15424_v47, %v14659_v4  ;;  %v23316_v42 = vld [vmem:[#allocation36_spill] sm:$0xff] }
 0xffc   : > { %v11251_v50 = vpack.c.bf16 %v11199_v29, %v11197_v34 }
 0xffe   : > { %11411 = vmatmul.bf16.gmra.mxu1 %v11251_v50  ;;  %11748 = vmatpush.bf16.msrb.mxu0 %v11456_v7 }
0x1000   : > { %v11085_v24 = vpop.f32.mrf.mxu2 }
0x1001   : > { %v11201_v16 = vpop.f32.mrf.mxu3 }
0x1002   : > { %11749 = vmatpush.bf16.msrb.mxu0 %v11455_v36  ;;  %v11202_v3 = vadd.f32 %v11201_v16, %v11074_v0 }
0x1003   : > { %v22681_v13 = vpop.f32.mrf.mxu1 }
0x1004   : > { %v11459_v40 = vpack.c.bf16 %v22681_v13, %v22675_v33  ;;  %v15445_v33 = vld [vmem:[%s23182_s19 + $0xe0] sm:$0xf0] }
0x1006   : > { %11750 = vmatpush.bf16.msrb.mxu0 %v11454_v20 }
0x1008   : > { %v11088_v62 = vpop.f32.mrf.mxu2 }
0x1009   : > { %v11203_v12 = vpop.f32.mrf.mxu3 }
0x100a   : > { %v11204_v17 = vadd.f32 %v11203_v12, %v11076_v9  ;;  %11751 = vmatpush.bf16.msrb.mxu0 %v11453_v14  ;;  %v23303_v14 = vld [vmem:[#allocation15_spill] sm:$0xff]  ;;  %v23311_v12 = vld [vmem:[#allocation22_spill] sm:$0xff] }
0x100b   : > { %v22693_v11 = vpop.f32.mrf.mxu1  ;;  %v10825_v44 = vadd.f32 %v23303_v14, %v23302_v60 }
0x100c   : > { %v11252_v59 = vpack.c.bf16 %v11204_v17, %v11202_v3  ;;  %v11089_v17 = vadd.f32 %v11088_v62, %v22345_v52  ;;  %v23312_v62 = vld [vmem:[#allocation33_spill] sm:$0xff] }
0x100e   : > { %11416 = vmatmul.bf16.gmra.mxu1 %v11252_v59  ;;  %11752 = vmatpush.bf16.msrb.mxu0 %v11452_v63  ;;  %v23304_v63 = vld [vmem:[#allocation21_spill] sm:$0xff] }
0x100f   : > { %v10953_v35 = vadd.f32 %v23304_v63, %v10825_v44  ;;  %v15427_v44 = vld [vmem:[%s23182_s19 + $0x50] sm:$0xf0] }
0x1010   : > { %v11090_v20 = vpop.f32.mrf.mxu2 }
0x1011   : > { %v11206_v1 = vpop.f32.mrf.mxu3  ;;  %v11081_v2 = vadd.f32 %v11080_v5, %v10953_v35  ;;  %v23306_v5 = vld [vmem:[#allocation18_spill] sm:$0xff] }
0x1012   : > { %11753 = vmatpush.bf16.msrb.mxu0 %v11451_v27  ;;  %v11207_v51 = vadd.f32 %v11206_v1, %v11079_v54  ;;  %v10830_v58 = vadd.f32 %v23307_v55, %v23306_v5  ;;  %v14683_v55 = vld [vmem:[%s23182_s19 + $0x60] sm:$0xf] }
0x1013   : > { %v22709_v15 = vpop.f32.mrf.mxu1 }
0x1014   : > { %v11460_v10 = vpack.c.bf16 %v22709_v15, %v22693_v11  ;;  %v10958_v45 = vadd.f32 %v23308_v43, %v10830_v58  ;;  %v15430_v58 = vld [vmem:[%s23182_s19 + $0x68] sm:$0xf0] }
0x1015   : > { %11754 = vmatmul.bf16.vlgmr.msrb.gmra.mxu0 %v14636_v23 }
0x1016   : > { %v11086_v34 = vadd.f32 %v11085_v24, %v10958_v45  ;;  %v23310_v24 = vld [vmem:[#allocation31_spill] sm:$0xff]  ;;  %v14684_v45 = vor.u32 %v15430_v58, %v14683_v55 }
0x1017   : > { %v10835_v25 = vadd.f32 %v22350_v6, %v23310_v24  ;;  %v14671_v6 = vld [vmem:[%s23182_s19 + $0x48] sm:$0xf] }
0x1018   : > { %v11093_v37 = vpop.f32.mrf.mxu2  ;;  %v14672_v52 = vor.u32 %v15427_v44, %v14671_v6 }
0x1019   : > { %v11208_v61 = vpop.f32.mrf.mxu3  ;;  %v10963_v3 = vadd.f32 %v23311_v12, %v10835_v25 }
0x101a   : > { %v11209_v46 = vadd.f32 %v11208_v61, %v11081_v2  ;;  %v23314_v2 = vld [vmem:[#allocation30_spill] sm:$0xff] }
0x101b   : > { %v22715_v28 = vpop.f32.mrf.mxu1  ;;  %v11091_v59 = vadd.f32 %v11090_v20, %v10963_v3  ;;  %v23313_v20 = vld [vmem:[#allocation35_spill] sm:$0xff] }
0x101c   : > { %v11253_v19 = vpack.c.bf16 %v11209_v46, %v11207_v51  ;;  %v10840_v38 = vadd.f32 %v23313_v20, %v23312_v62  ;;  %v23315_v51 = vld [vmem:[#allocation34_spill] sm:$0xff] }
0x101d   : > { %v11094_v46 = vadd.f32 %v11093_v37, %v23315_v51  ;;  %v10845_v37 = vadd.f32 %v22414_v26, %v23316_v42  ;;  %v15433_v26 = vld [vmem:[%s23182_s19 + $0x80] sm:$0xf0] }
0x101e   : > { %11421 = vmatmul.bf16.gmra.mxu1 %v11253_v19  ;;  %v10968_v61 = vadd.f32 %v23314_v2, %v10840_v38 }
0x1020   : > { %v11095_v27 = vpop.f32.mrf.mxu2 }
0x1021   : > { %v11211_v8 = vpop.f32.mrf.mxu3  ;;  %v11096_v19 = vadd.f32 %v11095_v27, %v10968_v61 }
0x1022   : > { %v11212_v50 = vadd.f32 %v11211_v8, %v11084_v41  ;;  %v23317_v41 = vld [vmem:[#allocation32_spill] sm:$0xff] }
0x1023   : > { %v22725_v57 = vpop.f32.mrf.mxu1 }
0x1024   : > { %v11461_v56 = vpack.c.bf16 %v22725_v57, %v22715_v28 }
0x1025   : > { %11759 = vmatmul.bf16.gmra.mxu0 %v14648_v18 }
0x1028   : > { %v11098_v29 = vpop.f32.mrf.mxu2 }
0x1029   : > { %v11213_v7 = vpop.f32.mrf.mxu3 }
0x102a   : > { %v11214_v36 = vadd.f32 %v11213_v7, %v11086_v34  ;;  %v10973_v34 = vadd.f32 %v23317_v41, %v10845_v37  ;;  %v11099_v7 = vadd.f32 %v11098_v29, %v22412_v32  ;;  %v23318_v32 = vld [vmem:[#allocation37_spill] sm:$0xff] }
0x102b   : > { %v22731_v16 = vpop.f32.mrf.mxu1 }
0x102c   : > { %v11254_v53 = vpack.c.bf16 %v11214_v36, %v11212_v50 }
0x102e   : > { %11426 = vmatmul.bf16.gmra.mxu1 %v11254_v53 }
0x1030   : > { %v11100_v30 = vpop.f32.mrf.mxu2 }
0x1031   : > { %v11216_v31 = vpop.f32.mrf.mxu3  ;;  %v11101_v50 = vadd.f32 %v11100_v30, %v10973_v34 }
0x1032   : > { %v11217_v1 = vadd.f32 %v11216_v31, %v11089_v17 }
0x1033   : > { %v22741_v0 = vpop.f32.mrf.mxu1 }
0x1034   : > { %v11462_v9 = vpack.c.bf16 %v22741_v0, %v22731_v16 }
0x1035   : > { %11764 = vmatmul.bf16.gmra.mxu0 %v14660_v48  ;;  %v14695_v48 = vld [vmem:[%s23182_s19 + $0x78] sm:$0xf] }
0x1036   : > { %v14696_v25 = vor.u32 %v15433_v26, %v14695_v48  ;;  %v15420_v48 = vld [vmem:[%s23182_s19 + $0x1c] sm:$0xf]  ;;  %v14649_v26 = vld [vmem:[%s23182_s19 + $0x24] sm:$0xf0] }
0x1038   : > { %v11103_v21 = vpop.f32.mrf.mxu2 }
0x1039   : > { %v11218_v39 = vpop.f32.mrf.mxu3  ;;  %v11104_v29 = vadd.f32 %v11103_v21, %v23318_v32  ;;  %v15625_v32 = vmov 65535  }
0x103a   : > { %v11219_v23 = vadd.f32 %v11218_v39, %v11091_v59  ;;  %v14707_v39 = vld [vmem:[%s23182_s19 + $0x90] sm:$0xf] }
0x103b   : > { %v22747_v60 = vpop.f32.mrf.mxu1 }
0x103c   : > { %v11255_v14 = vpack.c.bf16 %v11219_v23, %v11217_v1  ;;  %v15436_v1 = vld [vmem:[%s23182_s19 + $0x98] sm:$0xf0] }
0x103d   : > { %v14708_v23 = vor.u32 %v15436_v1, %v14707_v39  ;;  %v15423_v1 = vld [vmem:[%s23182_s19 + $0x34] sm:$0xf] }
0x103e   : > { %11431 = vmatmul.bf16.gmra.mxu1 %v11255_v14 }
0x1040   : > { %v11105_v63 = vpop.f32.mrf.mxu2 }
0x1041   : > { %v11221_v35 = vpop.f32.mrf.mxu3 }
0x1042   : > { %v11222_v49 = vadd.f32 %v11221_v35, %v11094_v46  ;;  %v14719_v35 = vld [vmem:[%s23182_s19 + $0xa8] sm:$0xf] }
0x1043   : > { %v11394_v54 = vpop.f32.mrf.mxu1 }
0x1044   : > { %v11463_v62 = vpack.c.bf16 %v11394_v54, %v22747_v60  ;;  %v14731_v60 = vld [vmem:[%s23182_s19 + $0xc0] sm:$0xf]  ;;  %v15442_v54 = vld [vmem:[%s23182_s19 + $0xc8] sm:$0xf0] }
0x1045   : > { %11769 = vmatmul.bf16.gmra.mxu0 %v14672_v52  ;;  %v15439_v52 = vld [vmem:[%s23182_s19 + $0xb0] sm:$0xf0]  ;;  %v14732_v16 = vor.u32 %v15442_v54, %v14731_v60  ;;  %v14673_v60 = vld [vmem:[%s23182_s19 + $0x54] sm:$0xf0] }
0x1046   : > { %v14720_v20 = vor.u32 %v15439_v52, %v14719_v35 }
0x1049   : > { %v11223_v22 = vpop.f32.mrf.mxu3 }
0x104a   : > { %v11224_v8 = vadd.f32 %v11223_v22, %v11096_v19  ;;  %v14755_v19 = vld [vmem:[%s23182_s19 + $0xf0] sm:$0xf]  ;;  %v15448_v22 = vld [vmem:[%s23182_s19 + $0xf8] sm:$0xf0] }
0x104b   : > { %v11397_v18 = vpop.f32.mrf.mxu1 }
0x104c   : > { %v11256_v5 = vpack.c.bf16 %v11224_v8, %v11222_v49  ;;  %v14756_v49 = vor.u32 %v15448_v22, %v14755_v19  ;;  %v14697_v19 = vld [vmem:[%s23182_s19 + $0x84] sm:$0xf0] }
0x104e   : > { %11436 = vmatmul.bf16.gmra.mxu1 %v11256_v5 }
0x1051   : > { %v11226_v43 = vpop.f32.mrf.mxu3 }
0x1052   : > { %v11227_v53 = vadd.f32 %v11226_v43, %v11099_v7  ;;  %v14767_v43 = vld [vmem:[%s23182_s19 + $0x108] sm:$0xf]  ;;  %v15417_v7 = vld [vmem:[%s23182_s19 + $0x4] sm:$0xf] }
0x1053   : > { %v11399_v27 = vpop.f32.mrf.mxu1 }
0x1054   : > { %v11464_v63 = vpack.c.bf16 %v11399_v27, %v11397_v18 }
0x1055   : > { %11774 = vmatmul.bf16.gmra.mxu0 %v14684_v45  ;;  %v15451_v45 = vld [vmem:[%s23182_s19 + $0x110] sm:$0xf0] }
0x1056   : > { %v14768_v42 = vor.u32 %v15451_v45, %v14767_v43  ;;  %v15435_v45 = vld [vmem:[%s23182_s19 + $0x94] sm:$0xf] }
0x1059   : > { %v11228_v36 = vpop.f32.mrf.mxu3 }
0x105a   : > { %v11229_v4 = vadd.f32 %v11228_v36, %v11101_v50  ;;  %v14637_v50 = vld [vmem:[%s23182_s19 + $0xc] sm:$0xf0] }
0x105b   : > { %v11402_v47 = vpop.f32.mrf.mxu1  ;;  %v14640_v36 = vor.u32 %v15417_v7, %v14637_v50  ;;  %v15428_v7 = vld [vmem:[%s23182_s19 + $0x58] sm:$0xf0] }
0x105c   : > { %v11257_v31 = vpack.c.bf16 %v11229_v4, %v11227_v53 }
0x105e   : > { %11441 = vmatmul.bf16.gmra.mxu1 %v11257_v31 }
0x1061   : > { %v11231_v24 = vpop.f32.mrf.mxu3 }
0x1062   : > { %v11232_v30 = vadd.f32 %v11231_v24, %v11104_v29  ;;  %v14652_v24 = vor.u32 %v15420_v48, %v14649_v26  ;;  %v11741_v29 = vsel %vm9277_vm6, 4294967295, %v15625_v32 }
0x1063   : > { %v11404_v12 = vpop.f32.mrf.mxu1 }
0x1064   : > { %v11258_v59 = vpack.c.bf16 %v11232_v30, %v11232_v30  ;;  %v11465_v44 = vpack.c.bf16 %v11404_v12, %v11402_v47 }
0x1065   : > { %11779 = vmatmul.bf16.gmra.mxu0 %v14696_v25 }
0x1069   : > { %v11233_v3 = vpop.f32.mrf.mxu3 }
0x106b   : > { %v11407_v17 = vpop.f32.mrf.mxu1 }
0x106e   : > { %11446 = vmatmul.bf16.gmra.mxu1 %v11258_v59 }
0x1073   : > { %v11409_v14 = vpop.f32.mrf.mxu1 }
0x1074   : > { %v11466_v6 = vpack.c.bf16 %v11409_v14, %v11407_v17  ;;  %v11742_v17 = vsel %vm6999_vm1, %v11741_v29, 0 }
0x1075   : > { %11784 = vmatmul.bf16.gmra.mxu0 %v14708_v23  ;;  %v14661_v23 = vld [vmem:[%s23182_s19 + $0x3c] sm:$0xf0] }
0x1076   : > { %11815 = vmatpush.bf16.msra.mxu0 %v11466_v6  ;;  %v14664_v14 = vor.u32 %v15423_v1, %v14661_v23  ;;  %v14703_v1 = vld [vmem:[%s23182_s19 + $0x80] sm:$0xf]  ;;  %v15434_v23 = vld [vmem:[%s23182_s19 + $0x88] sm:$0xf0] }
0x107a   : > { %11816 = vmatpush.bf16.msra.mxu0 %v11465_v44 }
0x107b   : > { %v22782_v21 = vpop.f32.mrf.mxu1 }
0x107e   : > { %11817 = vmatpush.bf16.msra.mxu0 %v11464_v63 }
0x1082   : > { %11818 = vmatpush.bf16.msra.mxu0 %v11463_v62 }
0x1083   : > { %v22791_v38 = vpop.f32.mrf.mxu1 }
0x1084   : > { %v11467_v2 = vpack.c.bf16 %v22791_v38, %v22782_v21  ;;  %v14655_v21 = vld [vmem:[%s23182_s19 + $0x20] sm:$0xf]  ;;  %v15422_v38 = vld [vmem:[%s23182_s19 + $0x28] sm:$0xf0] }
0x1085   : > { %11789 = vmatmul.bf16.gmra.mxu0 %v14720_v20  ;;  %v15426_v20 = vld [vmem:[%s23182_s19 + $0x4c] sm:$0xf] }
0x1086   : > { %11819 = vmatpush.bf16.msra.mxu0 %v11462_v9  ;;  %v14676_v54 = vor.u32 %v15426_v20, %v14673_v60  ;;  %v14715_v20 = vld [vmem:[%s23182_s19 + $0x98] sm:$0xf]  ;;  %v15437_v60 = vld [vmem:[%s23182_s19 + $0xa0] sm:$0xf0] }
0x108a   : > { %11820 = vmatpush.bf16.msra.mxu0 %v11461_v56  ;;  %v14743_v56 = vld [vmem:[%s23182_s19 + $0xd8] sm:$0xf] }
0x108b   : > { %v22801_v61 = vpop.f32.mrf.mxu1  ;;  %v14744_v13 = vor.u32 %v15445_v33, %v14743_v56  ;;  %v15419_v56 = vld [vmem:[%s23182_s19 + $0x10] sm:$0xf0] }
0x108e   : > { %11821 = vmatpush.bf16.msra.mxu0 %v11460_v10 }
0x1092   : > { %11822 = vmatpush.bf16.msra.mxu0 %v11459_v40  ;;  %v22815_v28 = vpop.f32.mrf.mxu0 }
0x1093   : > { %v22817_v57 = vpop.f32.mrf.mxu1 }
0x1094   : > { %v11468_v11 = vpack.c.bf16 %v22817_v57, %v22801_v61  ;;  %v15429_v61 = vld [vmem:[%s23182_s19 + $0x64] sm:$0xf]  ;;  %v14685_v57 = vld [vmem:[%s23182_s19 + $0x6c] sm:$0xf0] }
0x1095   : > { %11794 = vmatmul.bf16.gmra.mxu0 %v14732_v16 }
0x109a   : > { %v22821_v15 = vpop.f32.mrf.mxu0 }
0x109b   : > { %v22823_v10 = vpop.f32.mrf.mxu1 }
0x10a2   : > { %v22831_v40 = vpop.f32.mrf.mxu0 }
0x10a3   : > { %v11424_v0 = vpop.f32.mrf.mxu1 }
0x10a4   : > { %v11469_v9 = vpack.c.bf16 %v11424_v0, %v22823_v10  ;;  %v14643_v10 = vld [vmem:[%s23182_s19 + $0x8] sm:$0xf] }
0x10a5   : > { %11799 = vmatmul.bf16.gmra.mxu0 %v14744_v13  ;;  %v14644_v13 = vor.u32 %v15419_v56, %v14643_v10  ;;  %v14716_v10 = vor.u32 %v15437_v60, %v14715_v20  ;;  %v15447_v56 = vld [vmem:[%s23182_s19 + $0xf4] sm:$0xf]  ;;  %v15452_v60 = vld [vmem:[%s23182_s19 + $0x118] sm:$0xf0] }
0x10aa   : > { %v22834_v51 = vpop.f32.mrf.mxu0 }
0x10ab   : > { %v11427_v46 = vpop.f32.mrf.mxu1 }
0x10b2   : > { %v22842_v8 = vpop.f32.mrf.mxu0 }
0x10b3   : > { %v11429_v18 = vpop.f32.mrf.mxu1 }
0x10b4   : > { %v11470_v5 = vpack.c.bf16 %v11429_v18, %v11427_v46  ;;  %v15432_v46 = vld [vmem:[%s23182_s19 + $0x7c] sm:$0xf]  ;;  %v14667_v18 = vld [vmem:[%s23182_s19 + $0x38] sm:$0xf] }
0x10b5   : > { %11804 = vmatmul.bf16.gmra.mxu0 %v14756_v49  ;;  %v14700_v22 = vor.u32 %v15432_v46, %v14697_v19  ;;  %v15450_v46 = vld [vmem:[%s23182_s19 + $0x10c] sm:$0xf]  ;;  %v14769_v19 = vld [vmem:[%s23182_s19 + $0x114] sm:$0xf0] }
0x10ba   : > { %v22844_v55 = vpop.f32.mrf.mxu0 }
0x10bb   : > { %v11432_v58 = vpop.f32.mrf.mxu1 }
0x10c2   : > { %v22852_v37 = vpop.f32.mrf.mxu0 }
0x10c3   : > { %v11434_v27 = vpop.f32.mrf.mxu1 }
0x10c4   : > { %v11471_v52 = vpack.c.bf16 %v11434_v27, %v11432_v58 }
0x10c5   : > { %11809 = vmatmul.bf16.gmra.mxu0 %v14768_v42  ;;  %v14709_v42 = vld [vmem:[%s23182_s19 + $0x9c] sm:$0xf0] }
0x10c6   : > { %v14712_v27 = vor.u32 %v15435_v45, %v14709_v42 }
0x10ca   : > { %v22854_v41 = vpop.f32.mrf.mxu0 }
0x10cb   : > { %v11437_v34 = vpop.f32.mrf.mxu1 }
0x10d2   : > { %v22862_v53 = vpop.f32.mrf.mxu0 }
0x10d3   : > { %v11439_v4 = vpop.f32.mrf.mxu1 }
0x10d4   : > { %v11472_v35 = vpack.c.bf16 %v11439_v4, %v11437_v34  ;;  %v14679_v34 = vld [vmem:[%s23182_s19 + $0x50] sm:$0xf]  ;;  %v15438_v4 = vld [vmem:[%s23182_s19 + $0xac] sm:$0xf] }
0x10d5   : > { %11823 = vmatmul.bf16.vlgmr.msra.gmra.mxu0 %v14640_v36  ;;  %v14680_v36 = vor.u32 %v15428_v7, %v14679_v34 }
0x10da   : > { %v22864_v47 = vpop.f32.mrf.mxu0 }
0x10db   : > { %v11442_v31 = vpop.f32.mrf.mxu1 }
0x10e2   : > { %v22872_v25 = vpop.f32.mrf.mxu0 }
0x10e3   : > { %v11444_v12 = vpop.f32.mrf.mxu1 }
0x10e4   : > { %v11473_v6 = vpack.c.bf16 %v11444_v12, %v11442_v31  ;;  %v14721_v31 = vld [vmem:[%s23182_s19 + $0xb4] sm:$0xf0]  ;;  %v15431_v12 = vld [vmem:[%s23182_s19 + $0x70] sm:$0xf0] }
0x10e5   : > { %11828 = vmatmul.bf16.gmra.mxu0 %v14652_v24  ;;  %v14724_v48 = vor.u32 %v15438_v4, %v14721_v31  ;;  %v14691_v24 = vld [vmem:[%s23182_s19 + $0x68] sm:$0xf]  ;;  %v15446_v4 = vld [vmem:[%s23182_s19 + $0xe8] sm:$0xf0] }
0x10e6   : > { %v14692_v32 = vor.u32 %v15431_v12, %v14691_v24 }
0x10ea   : > { %v22875_v30 = vpop.f32.mrf.mxu0 }
0x10eb   : > { %v11447_v3 = vpop.f32.mrf.mxu1 }
0x10ec   : > { %v11474_v59 = vpack.c.bf16 %v11447_v3, %v11447_v3  ;;  %v15441_v3 = vld [vmem:[%s23182_s19 + $0xc4] sm:$0xf] }
0x10ee   : > { %v11744_v39 = vand.u32 %v11742_v17, %v11474_v59  ;;  %v14733_v17 = vld [vmem:[%s23182_s19 + $0xcc] sm:$0xf0] }
0x10ef   : > { %v14736_v59 = vor.u32 %v15441_v3, %v14733_v17 }
0x10f0   : > { %11884 = vmatpush.bf16.msrb.mxu2 %v11744_v39 }
0x10f2   : > { %v22884_v44 = vpop.f32.mrf.mxu0 }
0x10f3   : > { %v11449_v63 = vpop.f32.mrf.mxu1 }
0x10f4   : > { %11885 = vmatpush.bf16.msrb.mxu2 %v11473_v6  ;;  %v15444_v6 = vld [vmem:[%s23182_s19 + $0xdc] sm:$0xf]  ;;  %v14745_v63 = vld [vmem:[%s23182_s19 + $0xe4] sm:$0xf0] }
0x10f5   : > { %11833 = vmatmul.bf16.gmra.mxu0 %v14664_v14  ;;  %v14704_v14 = vor.u32 %v15434_v23, %v14703_v1  ;;  %v15449_v1 = vld [vmem:[%s23182_s19 + $0x100] sm:$0xf0] }
0x10f8   : > { %11886 = vmatpush.bf16.msrb.mxu2 %v11472_v35 }
0x10fa   : > { %v22886_v62 = vpop.f32.mrf.mxu0 }
0x10fc   : > { %11887 = vmatpush.bf16.msrb.mxu2 %v11471_v52  ;;  %v14748_v52 = vor.u32 %v15444_v6, %v14745_v63 }
0x1100   : > { %11888 = vmatpush.bf16.msrb.mxu2 %v11470_v5  ;;  %v15425_v5 = vld [vmem:[%s23182_s19 + $0x40] sm:$0xf0] }
0x1101   : > { %v14668_v58 = vor.u32 %v15425_v5, %v14667_v18  ;;  %v14739_v18 = vld [vmem:[%s23182_s19 + $0xc8] sm:$0xf]  ;;  %v15443_v5 = vld [vmem:[%s23182_s19 + $0xd0] sm:$0xf0] }
0x1102   : > { %v22894_v16 = vpop.f32.mrf.mxu0  ;;  %v14740_v45 = vor.u32 %v15443_v5, %v14739_v18 }
0x1104   : > { %11889 = vmatpush.bf16.msrb.mxu2 %v11469_v9  ;;  %v14656_v9 = vor.u32 %v15422_v38, %v14655_v21  ;;  %v15440_v21 = vld [vmem:[%s23182_s19 + $0xb8] sm:$0xf0] }
0x1105   : > { %11838 = vmatmul.bf16.gmra.mxu0 %v14676_v54 }
0x1108   : > { %11890 = vmatpush.bf16.msrb.mxu2 %v11468_v11  ;;  %v14688_v11 = vor.u32 %v15429_v61, %v14685_v57 }
0x110a   : > { %v22905_v33 = vpop.f32.mrf.mxu0 }
0x110c   : > { %11891 = vmatpush.bf16.msrb.mxu2 %v11467_v2 }
0x110f   : > { %14777 = vmatmul.msk.bf16.vlgmr.msrb.gmra.mxu2 %vm11703_vm11, %v14644_v13  ;;  %v14757_v13 = vld [vmem:[%s23182_s19 + $0xfc] sm:$0xf0] }
0x1110   : > { %v14760_v61 = vor.u32 %v15447_v56, %v14757_v13 }
0x1112   : > { %v22917_v0 = vpop.f32.mrf.mxu0 }
0x1115   : > { %11843 = vmatmul.bf16.gmra.mxu0 %v14688_v11  ;;  %v14727_v11 = vld [vmem:[%s23182_s19 + $0xb0] sm:$0xf] }
0x1116   : > { %v14728_v38 = vor.u32 %v15440_v21, %v14727_v11 }
0x111a   : > { %v22925_v2 = vpop.f32.mrf.mxu0 }
0x111f   : > { %14778 = vmatmul.msk.bf16.gmra.mxu2 %vm11703_vm11, %v14656_v9 }
0x1122   : > { %v22934_v49 = vpop.f32.mrf.mxu0 }
0x1125   : > { %11848 = vmatmul.bf16.gmra.mxu0 %v14700_v22  ;;  %v14772_v22 = vor.u32 %v15450_v46, %v14769_v19 }
0x112a   : > { %v22942_v43 = vpop.f32.mrf.mxu0 }
0x112f   : > { %14779 = vmatmul.msk.bf16.gmra.mxu2 %vm11703_vm11, %v14668_v58 }
0x1132   : > { %v22957_v50 = vpop.f32.mrf.mxu0 }
0x1135   : > { %11853 = vmatmul.bf16.gmra.mxu0 %v14712_v27 }
0x113a   : > { %v22966_v26 = vpop.f32.mrf.mxu0 }
0x113f   : > { %14780 = vmatmul.msk.bf16.gmra.mxu2 %vm11703_vm11, %v14680_v36  ;;  %v14751_v36 = vld [vmem:[%s23182_s19 + $0xe0] sm:$0xf] }
0x1140   : > { %v14752_v24 = vor.u32 %v15446_v4, %v14751_v36 }
0x1142   : > { %v22974_v29 = vpop.f32.mrf.mxu0 }
0x1145   : > { %11858 = vmatmul.bf16.gmra.mxu0 %v14724_v48 }
0x114a   : > { %v22983_v39 = vpop.f32.mrf.mxu0 }
0x114f   : > { %14781 = vmatmul.msk.bf16.gmra.mxu2 %vm11703_vm11, %v14692_v32 }
0x1152   : > { %v11824_v35 = vpop.f32.mrf.mxu0 }
0x1153   : > { %v11825_v42 = vadd.f32 %v11824_v35, %v22815_v28 }
0x1155   : > { %11863 = vmatmul.bf16.gmra.mxu0 %v14736_v59 }
0x115a   : > { %v11826_v54 = vpop.f32.mrf.mxu0 }
0x115b   : > { %v11827_v28 = vadd.f32 %v11826_v54, %v22821_v15  ;;  %v14763_v15 = vld [vmem:[%s23182_s19 + $0xf8] sm:$0xf] }
0x115f   : > { %14782 = vmatmul.msk.bf16.gmra.mxu2 %vm11703_vm11, %v14704_v14 }
0x1162   : > { %v11829_v57 = vpop.f32.mrf.mxu0 }
0x1163   : > { %v11830_v32 = vadd.f32 %v11829_v57, %v22831_v40  ;;  %v14764_v40 = vor.u32 %v15449_v1, %v14763_v15 }
0x1165   : > { %11868 = vmatmul.bf16.gmra.mxu0 %v14748_v52 }
0x116a   : > { %v11831_v9 = vpop.f32.mrf.mxu0 }
0x116b   : > { %v11832_v23 = vadd.f32 %v11831_v9, %v22834_v51  ;;  %v14775_v51 = vld [vmem:[%s23182_s19 + $0x110] sm:$0xf] }
0x116f   : > { %14783 = vmatmul.msk.bf16.gmra.mxu2 %vm11703_vm11, %v14716_v10 }
0x1172   : > { %v11834_v58 = vpop.f32.mrf.mxu0 }
0x1173   : > { %v11835_v35 = vadd.f32 %v11834_v58, %v22842_v8  ;;  %v14776_v8 = vor.u32 %v15452_v60, %v14775_v51 }
0x1175   : > { %11873 = vmatmul.bf16.gmra.mxu0 %v14760_v61 }
0x117a   : > { %v11836_v34 = vpop.f32.mrf.mxu0 }
0x117b   : > { %v11837_v54 = vadd.f32 %v11836_v34, %v22844_v55 }
0x117f   : > { %14784 = vmatmul.msk.bf16.gmra.mxu2 %vm11703_vm11, %v14728_v38 }
0x1182   : > { %v11839_v12 = vpop.f32.mrf.mxu0 }
0x1183   : > { %v11840_v61 = vadd.f32 %v11839_v12, %v22852_v37 }
0x1185   : > { %11878 = vmatmul.bf16.gmra.mxu0 %v14772_v22 }
0x118a   : > { %v11841_v59 = vpop.f32.mrf.mxu0 }
0x118b   : > { %v11842_v38 = vadd.f32 %v11841_v59, %v22854_v41 }
0x118f   : > { %14785 = vmatmul.msk.bf16.gmra.mxu2 %vm11703_vm11, %v14740_v45 }
0x1192   : > { %v11893_v27 = vpop.f32.mrf.mxu2  ;;  %v11844_v63 = vpop.f32.mrf.mxu0 }
0x1193   : > { %v11894_v7 = vadd.f32 %v11893_v27, %v11825_v42  ;;  %v11845_v19 = vadd.f32 %v11844_v63, %v22862_v53 }
0x1195   : > { %11953 = vst.msk [vmem:[%s23035_s26] sm:$0xff] %vm926_vm0, %v11894_v7 }
0x119a   : > { %v11895_v31 = vpop.f32.mrf.mxu2  ;;  %v11846_v56 = vpop.f32.mrf.mxu0 }
0x119b   : > { %v11896_v48 = vadd.f32 %v11895_v31, %v11827_v28  ;;  %v11847_v5 = vadd.f32 %v11846_v56, %v22864_v47 }
0x119d   : > { %11954 = vst.msk [vmem:[%s23035_s26 + $0x8] sm:$0xff] %vm926_vm0, %v11896_v48 }
0x119f   : > { %14786 = vmatmul.msk.bf16.gmra.mxu2 %vm11703_vm11, %v14752_v24 }
0x11a2   : > { %v11898_v3 = vpop.f32.mrf.mxu2  ;;  %v11849_v21 = vpop.f32.mrf.mxu0 }
0x11a3   : > { %v11899_v17 = vadd.f32 %v11898_v3, %v11830_v32  ;;  %v11850_v41 = vadd.f32 %v11849_v21, %v22872_v25 }
0x11a5   : > { %11955 = vst.msk [vmem:[%s23035_s26 + $0x10] sm:$0xff] %vm926_vm0, %v11899_v17 }
0x11aa   : > { %v11900_v14 = vpop.f32.mrf.mxu2  ;;  %v11851_v46 = vpop.f32.mrf.mxu0 }
0x11ab   : > { %v11901_v6 = vadd.f32 %v11900_v14, %v11832_v23  ;;  %v11852_v53 = vadd.f32 %v11851_v46, %v22875_v30 }
0x11ad   : > { %11956 = vst.msk [vmem:[%s23035_s26 + $0x18] sm:$0xff] %vm926_vm0, %v11901_v6 }
0x11af   : > { %14787 = vmatmul.msk.bf16.gmra.mxu2 %vm11703_vm11, %v14764_v40 }
0x11b2   : > { %v11903_v52 = vpop.f32.mrf.mxu2  ;;  %v11854_v37 = vpop.f32.mrf.mxu0 }
0x11b3   : > { %v11904_v20 = vadd.f32 %v11903_v52, %v11835_v35  ;;  %v11855_v47 = vadd.f32 %v11854_v37, %v22884_v44 }
0x11b5   : > { %11957 = vst.msk [vmem:[%s23035_s26 + $0x20] sm:$0xff] %vm926_vm0, %v11904_v20 }
0x11ba   : > { %v11905_v10 = vpop.f32.mrf.mxu2  ;;  %v11856_v27 = vpop.f32.mrf.mxu0 }
0x11bb   : > { %v11906_v13 = vadd.f32 %v11905_v10, %v11837_v54  ;;  %v11857_v48 = vadd.f32 %v11856_v27, %v22886_v62 }
0x11bd   : > { %11958 = vst.msk [vmem:[%s23035_s26 + $0x28] sm:$0xff] %vm926_vm0, %v11906_v13 }
0x11bf   : > { %14788 = vmatmul.msk.bf16.gmra.mxu2 %vm11703_vm11, %v14776_v8 }
0x11c2   : > { %v11908_v57 = vpop.f32.mrf.mxu2  ;;  %v11859_v4 = vpop.f32.mrf.mxu0 }
0x11c3   : > { %v11909_v11 = vadd.f32 %v11908_v57, %v11840_v61  ;;  %v11860_v32 = vadd.f32 %v11859_v4, %v22894_v16 }
0x11c5   : > { %11959 = vst.msk [vmem:[%s23035_s26 + $0x30] sm:$0xff] %vm926_vm0, %v11909_v11 }
0x11ca   : > { %v11910_v55 = vpop.f32.mrf.mxu2  ;;  %v11861_v25 = vpop.f32.mrf.mxu0 }
0x11cb   : > { %v11911_v9 = vadd.f32 %v11910_v55, %v11842_v38  ;;  %v11862_v44 = vadd.f32 %v11861_v25, %v22905_v33 }
0x11cd   : > { %11960 = vst.msk [vmem:[%s23035_s26 + $0x38] sm:$0xff] %vm926_vm0, %v11911_v9 }
0x11d2   : > { %v11913_v22 = vpop.f32.mrf.mxu2  ;;  %v11864_v30 = vpop.f32.mrf.mxu0 }
0x11d3   : > { %v11914_v18 = vadd.f32 %v11913_v22, %v11845_v19  ;;  %v11865_v62 = vadd.f32 %v11864_v30, %v22917_v0 }
0x11d5   : > { %11961 = vst.msk [vmem:[%s23035_s26 + $0x40] sm:$0xff] %vm926_vm0, %v11914_v18 }
0x11da   : > { %v11915_v58 = vpop.f32.mrf.mxu2  ;;  %v11866_v15 = vpop.f32.mrf.mxu0 }
0x11db   : > { %v11916_v45 = vadd.f32 %v11915_v58, %v11847_v5  ;;  %v11867_v16 = vadd.f32 %v11866_v15, %v22925_v2 }
0x11dd   : > { %11962 = vst.msk [vmem:[%s23035_s26 + $0x48] sm:$0xff] %vm926_vm0, %v11916_v45 }
0x11e2   : > { %v11918_v42 = vpop.f32.mrf.mxu2  ;;  %v11869_v6 = vpop.f32.mrf.mxu0 }
0x11e3   : > { %v11919_v34 = vadd.f32 %v11918_v42, %v11850_v41  ;;  %v11870_v35 = vadd.f32 %v11869_v6, %v22934_v49 }
0x11e5   : > { %11963 = vst.msk [vmem:[%s23035_s26 + $0x50] sm:$0xff] %vm926_vm0, %v11919_v34 }
0x11ea   : > { %v11920_v7 = vpop.f32.mrf.mxu2  ;;  %v11871_v33 = vpop.f32.mrf.mxu0 }
0x11eb   : > { %v11921_v36 = vadd.f32 %v11920_v7, %v11852_v53  ;;  %v11872_v51 = vadd.f32 %v11871_v33, %v22942_v43 }
0x11ed   : > { %11964 = vst.msk [vmem:[%s23035_s26 + $0x58] sm:$0xff] %vm926_vm0, %v11921_v36 }
0x11f2   : > { %v11923_v28 = vpop.f32.mrf.mxu2  ;;  %v11874_v0 = vpop.f32.mrf.mxu0 }
0x11f3   : > { %v11924_v31 = vadd.f32 %v11923_v28, %v11855_v47  ;;  %v11875_v2 = vadd.f32 %v11874_v0, %v22957_v50 }
0x11f5   : > { %11965 = vst.msk [vmem:[%s23035_s26 + $0x60] sm:$0xff] %vm926_vm0, %v11924_v31 }
0x11fa   : > { %v11925_v24 = vpop.f32.mrf.mxu2  ;;  %v11876_v56 = vpop.f32.mrf.mxu0 }
0x11fb   : > { %v11926_v12 = vadd.f32 %v11925_v24, %v11857_v48  ;;  %v11877_v13 = vadd.f32 %v11876_v56, %v22966_v26 }
0x11fd   : > { %11966 = vst.msk [vmem:[%s23035_s26 + $0x68] sm:$0xff] %vm926_vm0, %v11926_v12 }
0x1202   : > { %v11928_v3 = vpop.f32.mrf.mxu2  ;;  %v11879_v57 = vpop.f32.mrf.mxu0 }
0x1203   : > { %v11929_v17 = vadd.f32 %v11928_v3, %v11860_v32  ;;  %v11880_v43 = vadd.f32 %v11879_v57, %v22974_v29 }
0x1205   : > { %11967 = vst.msk [vmem:[%s23035_s26 + $0x70] sm:$0xff] %vm926_vm0, %v11929_v17 }
0x120a   : > { %v11930_v59 = vpop.f32.mrf.mxu2  ;;  %v11881_v26 = vpop.f32.mrf.mxu0 }
0x120b   : > { %v11931_v1 = vadd.f32 %v11930_v59, %v11862_v44  ;;  %v11882_v21 = vadd.f32 %v11881_v26, %v22983_v39 }
0x120d   : > { %11968 = vst.msk [vmem:[%s23035_s26 + $0x78] sm:$0xff] %vm926_vm0, %v11931_v1 }
0x1212   : > { %v11933_v23 = vpop.f32.mrf.mxu2 }
0x1213   : > { %v11934_v14 = vadd.f32 %v11933_v23, %v11865_v62 }
0x1215   : > { %11969 = vst.msk [vmem:[%s23035_s26 + $0x80] sm:$0xff] %vm926_vm0, %v11934_v14 }
0x121a   : > { %v11935_v40 = vpop.f32.mrf.mxu2 }
0x121b   : > { %v11936_v63 = vadd.f32 %v11935_v40, %v11867_v16 }
0x121d   : > { %11970 = vst.msk [vmem:[%s23035_s26 + $0x88] sm:$0xff] %vm926_vm0, %v11936_v63 }
0x1222   : > { %v11938_v52 = vpop.f32.mrf.mxu2 }
0x1223   : > { %v11939_v20 = vadd.f32 %v11938_v52, %v11870_v35 }
0x1225   : > { %11971 = vst.msk [vmem:[%s23035_s26 + $0x90] sm:$0xff] %vm926_vm0, %v11939_v20 }
0x122a   : > { %v11940_v60 = vpop.f32.mrf.mxu2 }
0x122b   : > { %v11941_v54 = vadd.f32 %v11940_v60, %v11872_v51 }
0x122d   : > { %11972 = vst.msk [vmem:[%s23035_s26 + $0x98] sm:$0xff] %vm926_vm0, %v11941_v54 }
0x1232   : > { %v11943_v10 = vpop.f32.mrf.mxu2 }
0x1233   : > { %v11944_v49 = vadd.f32 %v11943_v10, %v11875_v2 }
0x1235   : > { %11973 = vst.msk [vmem:[%s23035_s26 + $0xa0] sm:$0xff] %vm926_vm0, %v11944_v49 }
0x123a   : > { %v11945_v8 = vpop.f32.mrf.mxu2 }
0x123b   : > { %v11946_v61 = vadd.f32 %v11945_v8, %v11877_v13 }
0x123d   : > { %11974 = vst.msk [vmem:[%s23035_s26 + $0xa8] sm:$0xff] %vm926_vm0, %v11946_v61 }
0x1242   : > { %v11948_v11 = vpop.f32.mrf.mxu2 }
0x1243   : > { %v11949_v50 = vadd.f32 %v11948_v11, %v11880_v43 }
0x1245   : > { %11975 = vst.msk [vmem:[%s23035_s26 + $0xb0] sm:$0xff] %vm926_vm0, %v11949_v50 }
0x124a   : > { %v11950_v38 = vpop.f32.mrf.mxu2 }
0x124b   : > { %v11951_v55 = vadd.f32 %v11950_v38, %v11882_v21 }
0x124d   : > { %11976 = vst.msk [vmem:[%s23035_s26 + $0xb8] sm:$0xff] %vm926_vm0, %v11951_v55 }
0x124e   : > { %15580 = shalt.err (!%p15577_p8)
}
0x124f   : > { %s15626_s0 = smov 128   ;;  %s15627_s26 = smov 8  }
0x1250   : > { %15468 = dma.vmem_to_hbm [thread:$0]  (%p15771_p5), %s11991_s29, 3072, %s11993_s3, %s11978_s2, %s15626_s0, %s15626_s0, %s15627_s26  }
0x1251 PF: > { %s23319_s23 = sld [smem:[#allocation10_spill]] }
0x1252   : > { %s23320_s6 = sld [smem:[#allocation8_spill]] }
0x1257   : > { %p15480_p9 = scmp.ge.s32.totalorder %s23319_s23, 2 }
0x1258   : > { %s12007_s24 = sand.u32 1, %s23320_s6  }
0x1259   : > { %p15475_p10 = pnand %p15480_p9, %p15775_p6  ;;  %s12008_s30 = scalar_lea.sflag [#allocation4], %s12007_s24 }
0x125b   : > { %p15476_p11 = pneg %p15475_p10 }
0x125d   : > { %15602 = dma.done.wait (%p15476_p11), %s12008_s30, 3072  }
0x125e   : > { %15604 = vsyncadd (%p15476_p11), %s12008_s30, 4294964224  ;;  %s23322_s24 = sld [smem:[#allocation11_spill]]  ;;  %s23325_s1 = smov %s15611_s22 }
0x125f   : > { %s23323_s25 = sld [smem:[#allocation9_spill]] }
0x1260   : > { %s23324_s23 = sld [smem:[#allocation12_spill]] }
0x1264   : > { %p31_p12 = scmp.ge.s32.totalorder %s23322_s24, 4  }
0x1265   : > { %s23326_s22 = smov %s23323_s25 }
0x1266   :  { %33 = sbr.rel (!%p31_p12) target bundleno = 14 (0xe), region = 140 }
0x126b   :  { %12014 = vsyncpa [#allocation3], 1 }
0x126c   :  { %12016 = vsyncpa [#allocation3 + $0x1], 1 }
0x126d   :  { %12017 = vsyncpa [#allocation4], 1 }
0x126e   :  { %12019 = vsyncpa [#allocation4 + $0x1], 1 }

</bundles_post_ra>
